<compile_context>
chip_gen: v5e
topology: v5e:2x2
jax: 0.10.0
libtpu: 0.0.40
codegen_flags: <defaults>
</compile_context>

<pallas_src>
import jax
import jax.numpy as jnp
from jax.experimental import pallas as pl
from jax.experimental.pallas import tpu as pltpu

EPS = 1e-5
LANES = 128
# jnp.float32 keeps bit-faithful semantics vs. the f32 PyTorch module.  Flip to
# jnp.bfloat16 for higher MXU throughput (accumulation stays f32), at the cost
# of ~1e-3 deviations after BatchNorm normalization.
MXU_IN_DTYPE = jnp.float32
# 32 MiB: ample for these tiles, leaves headroom under v7x's 64 MiB physical
# VMEM; v5e/v6e (128 MiB) could raise it for larger H/W/C.
VMEM_LIMIT_BYTES = 32 * 1024 * 1024


def _round_up(x, m):
    return (x + m - 1) // m * m


# ----------------------------------------------------------------------------
# Kernel 1: 3x3x3 conv (shifted matmuls) + bias + per-plane BatchNorm partials
# ----------------------------------------------------------------------------
def _make_conv_kernel(H, W, Cin, Cp, D, group_kd):
    HW = H * W

    def kernel(x0_ref, x1_ref, x2_ref, w_ref, b_ref, y_ref, st_ref):
        d = pl.program_id(1)
        dt = x1_ref.dtype
        # Depth-border masks: view0/view2 load a clamped neighbour plane which
        # must contribute zero at d == 0 / d == D-1.
        v0 = (d > 0).astype(dt)
        v2 = (d < D - 1).astype(dt)
        planes = (x0_ref[0, 0] * v0, x1_ref[0, 0], x2_ref[0, 0] * v2)

        acc = jnp.zeros((HW, Cp), jnp.float32)
        if group_kd:
            # 9 matmuls, K = 3*Cin (kd folded into K; lane concat is free when
            # Cin is a multiple of 128).
            for kh in range(3):
                for kw in range(3):
                    g = kh * 3 + kw
                    patch = jnp.concatenate(
                        [planes[kd][kh:kh + H, kw:kw + W, :].reshape(HW, Cin)
                         for kd in range(3)], axis=-1)
                    w_g = w_ref[g * 3 * Cin:(g + 1) * 3 * Cin, :]
                    acc = acc + jnp.dot(patch, w_g,
                                        preferred_element_type=jnp.float32)
        else:
            # Small-Cin path (conv1): 27 thin matmuls, negligible FLOPs.
            for kh in range(3):
                for kw in range(3):
                    for kd in range(3):
                        t = (kh * 3 + kw) * 3 + kd
                        patch = planes[kd][kh:kh + H, kw:kw + W, :].reshape(
                            HW, Cin)
                        w_t = w_ref[t * Cin:(t + 1) * Cin, :]
                        acc = acc + jnp.dot(patch, w_t,
                                            preferred_element_type=jnp.float32)

        out = acc + b_ref[...]                       # (HW, Cp) + (1, Cp)
        y_ref[0, 0] = out

        # Per-(n, d) BN partials: sum and *centered* sum-of-squares (combined
        # on the host with the parallel-variance formula -> no cancellation).
        s = jnp.sum(out, axis=0, keepdims=True)
        m = s * (1.0 / HW)
        c = out - m
        st_ref[0, 0, 0:1, :] = s
        st_ref[0, 0, 1:2, :] = jnp.sum(c * c, axis=0, keepdims=True)

    return kernel


def _conv3d_pass(xp, w_flat, b_p, *, N, D, H, W, Cin, Cp):
    """3x3x3 'same' conv over an H/W-padded channels-last input.

    xp:     (N, D, H+2, W+2, Cin)  H/W zero-padded; depth halo handled in-kernel
    w_flat: (27*Cin, Cp)           rows ordered (kh, kw, kd, ci); VMEM-resident
    b_p:    (1, Cp)                bias (f32)
    ->  y     (N, D, H*W, Cp) f32  conv + bias
        stats (N, D, 2,   Cp) f32  per-plane [sum, centered sum-of-squares]
    """
    HW = H * W
    group_kd = (Cin % LANES == 0)
    flops = 2 * N * D * HW * 27 * Cin * Cp
    bytes_accessed = (3 * xp.size * xp.dtype.itemsize   # 3 clamped depth views
                      + w_flat.size * w_flat.dtype.itemsize
                      + N * D * HW * Cp * 4 + N * D * 2 * Cp * 4)
    y, stats = pl.pallas_call(
        _make_conv_kernel(H, W, Cin, Cp, D, group_kd),
        out_shape=[jax.ShapeDtypeStruct((N, D, HW, Cp), jnp.float32),
                   jax.ShapeDtypeStruct((N, D, 2, Cp), jnp.float32)],
        grid=(N, D),
        in_specs=[
            # Three clamped depth views of the same tensor (d-1, d, d+1).
            pl.BlockSpec((1, 1, H + 2, W + 2, Cin),
                         lambda n, d: (n, jnp.maximum(d - 1, 0), 0, 0, 0)),
            pl.BlockSpec((1, 1, H + 2, W + 2, Cin),
                         lambda n, d: (n, d, 0, 0, 0)),
            pl.BlockSpec((1, 1, H + 2, W + 2, Cin),
                         lambda n, d: (n, jnp.minimum(d + 1, D - 1), 0, 0, 0)),
            # Whole weight slab, constant block index -> single DMA, resident.
            pl.BlockSpec((27 * Cin, Cp), lambda n, d: (0, 0)),
            pl.BlockSpec((1, Cp), lambda n, d: (0, 0)),
        ],
        out_specs=[
            pl.BlockSpec((1, 1, HW, Cp), lambda n, d: (n, d, 0, 0)),
            pl.BlockSpec((1, 1, 2, Cp), lambda n, d: (n, d, 0, 0)),
        ],
        compiler_params=pltpu.CompilerParams(
            dimension_semantics=("parallel", "parallel"),
            vmem_limit_bytes=VMEM_LIMIT_BYTES),
        cost_estimate=pl.CostEstimate(flops=flops, transcendentals=0,
                                      bytes_accessed=bytes_accessed),
    )(xp, xp, xp, w_flat, b_p)
    return y, stats


# ----------------------------------------------------------------------------
# Kernel 2: BatchNorm(folded) + ReLU, written into conv2's H/W-padded layout.
# Grid is (N, D) only (no border depth planes); only the rim is zeroed.
# ----------------------------------------------------------------------------
def _make_bn_relu_pad_kernel(H, W, Cp):
    def kernel(y_ref, sc_ref, sh_ref, o_ref):
        z = jnp.maximum(y_ref[0, 0] * sc_ref[...] + sh_ref[...], 0.0)
        zi = z.reshape(H, W, Cp).astype(o_ref.dtype)
        zrow = jnp.zeros((1, W + 2, Cp), o_ref.dtype)
        zcol = jnp.zeros((H, 1, Cp), o_ref.dtype)
        o_ref[0, 0, 0:1, :, :] = zrow
        o_ref[0, 0, H + 1:H + 2, :, :] = zrow
        o_ref[0, 0, 1:H + 1, 0:1, :] = zcol
        o_ref[0, 0, 1:H + 1, W + 1:W + 2, :] = zcol
        o_ref[0, 0, 1:H + 1, 1:W + 1, :] = zi       # interior written once

    return kernel


def _bn_relu_pad_pass(y, scale, shift, *, N, D, H, W, Cp):
    HW = H * W
    out_bytes = N * D * (H + 2) * (W + 2) * Cp * jnp.dtype(MXU_IN_DTYPE).itemsize
    return pl.pallas_call(
        _make_bn_relu_pad_kernel(H, W, Cp),
        out_shape=jax.ShapeDtypeStruct((N, D, H + 2, W + 2, Cp), MXU_IN_DTYPE),
        grid=(N, D),
        in_specs=[
            pl.BlockSpec((1, 1, HW, Cp), lambda n, d: (n, d, 0, 0)),
            pl.BlockSpec((1, Cp), lambda n, d: (0, 0)),
            pl.BlockSpec((1, Cp), lambda n, d: (0, 0)),
        ],
        out_specs=pl.BlockSpec((1, 1, H + 2, W + 2, Cp),
                               lambda n, d: (n, d, 0, 0, 0)),
        compiler_params=pltpu.CompilerParams(
            dimension_semantics=("parallel", "parallel"),
            vmem_limit_bytes=VMEM_LIMIT_BYTES),
        cost_estimate=pl.CostEstimate(flops=3 * N * D * HW * Cp,
                                      transcendentals=0,
                                      bytes_accessed=y.size * 4 + out_bytes),
    )(y, scale, shift)


# ----------------------------------------------------------------------------
# Kernel 3: BatchNorm + ReLU fused with the 2x2x2 max-pool epilogue.
# Dense (2, HW, Cp) blocks, pool window fully inside one program, all parallel.
# ----------------------------------------------------------------------------
def _make_bn_relu_pool_kernel(H, W, Cp):
    H2, W2 = H // 2, W // 2

    def kernel(y_ref, sc_ref, sh_ref, enc_ref, pool_ref):
        z = jnp.maximum(y_ref[0] * sc_ref[...] + sh_ref[...], 0.0)  # (2,HW,Cp)
        enc_ref[0] = z
        zd = jnp.maximum(z[0], z[1])                 # depth pair   (HW, Cp)
        z4 = zd.reshape(H2, 2, W2, 2, Cp)
        zh = jnp.maximum(z4[:, 0], z4[:, 1])         # H pair       (H2,W2,2,Cp)
        zw = jnp.maximum(zh[:, :, 0], zh[:, :, 1])   # W pair       (H2,W2,Cp)
        pool_ref[0, 0] = zw.reshape(H2 * W2, Cp)

    return kernel


def _bn_relu_pool_pass(y, scale, shift, *, N, D, H, W, Cp):
    HW = H * W
    H2, W2, D2 = H // 2, W // 2, D // 2
    enc, pool = pl.pallas_call(
        _make_bn_relu_pool_kernel(H, W, Cp),
        out_shape=[jax.ShapeDtypeStruct((N, D, HW, Cp), jnp.float32),
                   jax.ShapeDtypeStruct((N, D2, H2 * W2, Cp), jnp.float32)],
        grid=(N, D2),
        in_specs=[
            pl.BlockSpec((1, 2, HW, Cp), lambda n, dp: (n, dp, 0, 0)),
            pl.BlockSpec((1, Cp), lambda n, dp: (0, 0)),
            pl.BlockSpec((1, Cp), lambda n, dp: (0, 0)),
        ],
        out_specs=[
            pl.BlockSpec((1, 2, HW, Cp), lambda n, dp: (n, dp, 0, 0)),
            pl.BlockSpec((1, 1, H2 * W2, Cp), lambda n, dp: (n, dp, 0, 0)),
        ],
        compiler_params=pltpu.CompilerParams(
            dimension_semantics=("parallel", "parallel"),
            vmem_limit_bytes=VMEM_LIMIT_BYTES),
        cost_estimate=pl.CostEstimate(
            flops=5 * N * D * HW * Cp, transcendentals=0,
            bytes_accessed=(2 * N * D * HW * Cp + N * D2 * H2 * W2 * Cp) * 4),
    )(y, scale, shift)
    return enc, pool


# ----------------------------------------------------------------------------
# Host-side parameter plumbing
# ----------------------------------------------------------------------------
def _prep_weight(w, cin_p, cout_p):
    """Torch (Cout, Cin, kd, kh, kw) -> (27*cin_p, cout_p), rows (kh,kw,kd,ci)."""
    cout, cin = w.shape[0], w.shape[1]
    w = jnp.transpose(w, (3, 4, 2, 1, 0))            # (kh, kw, kd, ci, co)
    w = jnp.pad(w, ((0, 0), (0, 0), (0, 0),
                    (0, cin_p - cin), (0, cout_p - cout)))
    return w.reshape(27 * cin_p, cout_p).astype(MXU_IN_DTYPE)


def _pad_vec(v, cp):
    return jnp.pad(v, (0, cp - v.shape[0])).reshape(1, cp).astype(jnp.float32)


def _bn_scale_shift(stats, gamma_p, beta_p, hw, count):
    """Fold training-mode BatchNorm (batch stats, biased var) into scale/shift.

    Uses the parallel-variance combination of per-plane centered partials.
    """
    s = stats[:, :, 0, :]                            # (N, D, Cp) plane sums
    q = stats[:, :, 1, :]                            # (N, D, Cp) centered SSQ
    m = s / hw                                       # plane means
    mu = jnp.sum(s, axis=(0, 1)) / count             # grand mean
    var = (jnp.sum(q, axis=(0, 1))
           + hw * jnp.sum((m - mu) ** 2, axis=(0, 1))) / count
    var = jnp.maximum(var, 0.0)
    scale = gamma_p[0] * jax.lax.rsqrt(var + EPS)
    shift = beta_p[0] - mu * scale
    return scale.reshape(1, -1), shift.reshape(1, -1)


def encoder_block(x, params):
    """x: (N, Cin, D, H, W) f32 -> (enc, enc_pool) in NCDHW, like PyTorch."""
    N, Cin, D, H, W = x.shape
    Cout = params["w1"].shape[0]
    assert D % 2 == 0 and H % 2 == 0 and W % 2 == 0, "MaxPool3d(2) needs even dims"
    Cp = _round_up(Cout, LANES)
    HW = H * W
    count = N * D * HW

    # NCDHW -> channels-last, zero-padded in H/W only (depth halo in-kernel).
    # TODO(synk): drop these transposes if the surrounding model consumes
    # channels-last directly.
    x_cl = jnp.transpose(x, (0, 2, 3, 4, 1))
    xp1 = jnp.pad(x_cl, ((0, 0), (0, 0), (1, 1), (1, 1), (0, 0))
                  ).astype(MXU_IN_DTYPE)

    w1r = _prep_weight(params["w1"], Cin, Cp)
    w2r = _prep_weight(params["w2"], Cp, Cp)
    b1p, b2p = _pad_vec(params["b1"], Cp), _pad_vec(params["b2"], Cp)
    g1p, g2p = _pad_vec(params["g1"], Cp), _pad_vec(params["g2"], Cp)
    be1p, be2p = _pad_vec(params["be1"], Cp), _pad_vec(params["be2"], Cp)

    # conv1 (+ BN partials), then BN+ReLU written into conv2's padded input.
    y1, s1 = _conv3d_pass(xp1, w1r, b1p, N=N, D=D, H=H, W=W, Cin=Cin, Cp=Cp)
    sc1, sh1 = _bn_scale_shift(s1, g1p, be1p, HW, count)
    xp2 = _bn_relu_pad_pass(y1, sc1, sh1, N=N, D=D, H=H, W=W, Cp=Cp)

    # conv2 (+ BN partials), then BN+ReLU fused with the 2x2x2 max-pool.
    y2, s2 = _conv3d_pass(xp2, w2r, b2p, N=N, D=D, H=H, W=W, Cin=Cp, Cp=Cp)
    sc2, sh2 = _bn_scale_shift(s2, g2p, be2p, HW, count)
    enc_cl, pool_cl = _bn_relu_pool_pass(y2, sc2, sh2, N=N, D=D, H=H, W=W,
                                         Cp=Cp)

    # Channels-last -> NCDHW, dropping the lane padding.
    enc = jnp.transpose(enc_cl.reshape(N, D, H, W, Cp)[..., :Cout],
                        (0, 4, 1, 2, 3))
    enc_pool = jnp.transpose(
        pool_cl.reshape(N, D // 2, H // 2, W // 2, Cp)[..., :Cout],
        (0, 4, 1, 2, 3))
    return enc, enc_pool


# ----------------------------------------------------------------------------
# Pure-JAX reference (for correctness check)
# ----------------------------------------------------------------------------
def _ref_conv_bn_relu(x, w, b, g, be):
    y = jax.lax.conv_general_dilated(
        x, w, window_strides=(1, 1, 1),
        padding=((1, 1), (1, 1), (1, 1)),
        dimension_numbers=("NCDHW", "OIDHW", "NCDHW"))
    y = y + b[None, :, None, None, None]
    mean = jnp.mean(y, axis=(0, 2, 3, 4), keepdims=True)
    var = jnp.mean((y - mean) ** 2, axis=(0, 2, 3, 4), keepdims=True)
    y = (y - mean) * jax.lax.rsqrt(var + EPS)
    y = y * g[None, :, None, None, None] + be[None, :, None, None, None]
    return jnp.maximum(y, 0.0)


def _ref_encoder_block(x, p):
    h = _ref_conv_bn_relu(x, p["w1"], p["b1"], p["g1"], p["be1"])
    h = _ref_conv_bn_relu(h, p["w2"], p["b2"], p["g2"], p["be2"])
    n, c, d, hh, w = h.shape
    pool = h.reshape(n, c, d // 2, 2, hh // 2, 2, w // 2, 2).max(axis=(3, 5, 7))
    return h, pool


# ----------------------------------------------------------------------------
if __name__ == "__main__":
    key = jax.random.PRNGKey(0)
    N, Cin, Cout, D, H, W = 2, 2, 4, 8, 8, 8

    ks = jax.random.split(key, 9)
    params = {
        "w1": 0.1 * jax.random.normal(ks[0], (Cout, Cin, 3, 3, 3), jnp.float32),
        "b1": 0.1 * jax.random.normal(ks[1], (Cout,), jnp.float32),
        "g1": 1.0 + 0.1 * jax.random.normal(ks[2], (Cout,), jnp.float32),
        "be1": 0.1 * jax.random.normal(ks[3], (Cout,), jnp.float32),
        "w2": 0.1 * jax.random.normal(ks[4], (Cout, Cout, 3, 3, 3), jnp.float32),
        "b2": 0.1 * jax.random.normal(ks[5], (Cout,), jnp.float32),
        "g2": 1.0 + 0.1 * jax.random.normal(ks[6], (Cout,), jnp.float32),
        "be2": 0.1 * jax.random.normal(ks[7], (Cout,), jnp.float32),
    }
    x = jax.random.normal(ks[8], (N, Cin, D, H, W), jnp.float32)

    enc, enc_pool = jax.jit(encoder_block)(x, params)
    jax.block_until_ready((enc, enc_pool))

    ref_enc, ref_pool = _ref_encoder_block(x, params)
    assert enc.shape == (N, Cout, D, H, W)
    assert enc_pool.shape == (N, Cout, D // 2, H // 2, W // 2)
    assert jnp.allclose(enc, ref_enc, rtol=1e-4, atol=1e-4), float(
        jnp.max(jnp.abs(enc - ref_enc)))
    assert jnp.allclose(enc_pool, ref_pool, rtol=1e-4, atol=1e-4), float(
        jnp.max(jnp.abs(enc_pool - ref_pool)))

    print("KERNEL_OK")
</pallas_src>

<mosaic_0001>
module attributes {stable_mosaic.version = 11 : i64} {
  func.func @kernel(%arg0: i32, %arg1: i32, %arg2: memref<1x1x10x10x2xf32, #tpu.memory_space<vmem>>, %arg3: memref<1x1x10x10x2xf32, #tpu.memory_space<vmem>>, %arg4: memref<1x1x10x10x2xf32, #tpu.memory_space<vmem>>, %arg5: memref<54x128xf32, #tpu.memory_space<vmem>>, %arg6: memref<1x128xf32, #tpu.memory_space<vmem>>, %arg7: memref<1x1x64x128xf32, #tpu.memory_space<vmem>>, %arg8: memref<1x1x2x128xf32, #tpu.memory_space<vmem>>) attributes {dimension_semantics = [#tpu.dimension_semantics<parallel>, #tpu.dimension_semantics<parallel>], iteration_bounds = array<i64: 2, 8>, scalar_prefetch = 0 : i64, scratch_operands = 0 : i64, tpu.core_type = #tpu.core_type<tc>, window_params = [{transform_indices = @transform_0, window_bounds = array<i64: 1, 1, 10, 10, 2>}, {transform_indices = @transform_1, window_bounds = array<i64: 1, 1, 10, 10, 2>}, {transform_indices = @transform_2, window_bounds = array<i64: 1, 1, 10, 10, 2>}, {pipeline_mode = #tpu.pipeline_mode<synchronous>, transform_indices = @transform_3, window_bounds = array<i64: 54, 128>}, {pipeline_mode = #tpu.pipeline_mode<synchronous>, transform_indices = @transform_4, window_bounds = array<i64: 1, 128>}, {transform_indices = @transform_5, window_bounds = array<i64: 1, 1, 64, 128>}, {transform_indices = @transform_6, window_bounds = array<i64: 1, 1, 2, 128>}]} {
    %c0_i32 = arith.constant 0 : i32
    %0 = arith.cmpi sgt, %arg1, %c0_i32 : i32
    %1 = arith.extui %0 : i1 to i32
    %2 = arith.sitofp %1 : i32 to f32
    %c7_i32 = arith.constant 7 : i32
    %3 = arith.cmpi slt, %arg1, %c7_i32 : i32
    %4 = arith.extui %3 : i1 to i32
    %5 = arith.sitofp %4 : i32 to f32
    %c0 = arith.constant 0 : index
    %c0_0 = arith.constant 0 : index
    %c0_1 = arith.constant 0 : index
    %c0_2 = arith.constant 0 : index
    %c0_3 = arith.constant 0 : index
    %6 = vector.load %arg2[%c0, %c0_0, %c0_1, %c0_2, %c0_3] : memref<1x1x10x10x2xf32, #tpu.memory_space<vmem>>, vector<1x1x10x10x2xf32>
    %7 = vector.shape_cast %6 : vector<1x1x10x10x2xf32> to vector<10x10x2xf32>
    %8 = vector.broadcast %2 : f32 to vector<10x10x2xf32>
    %9 = arith.mulf %7, %8 : vector<10x10x2xf32>
    %c0_4 = arith.constant 0 : index
    %c0_5 = arith.constant 0 : index
    %c0_6 = arith.constant 0 : index
    %c0_7 = arith.constant 0 : index
    %c0_8 = arith.constant 0 : index
    %10 = vector.load %arg3[%c0_4, %c0_5, %c0_6, %c0_7, %c0_8] : memref<1x1x10x10x2xf32, #tpu.memory_space<vmem>>, vector<1x1x10x10x2xf32>
    %11 = vector.shape_cast %10 : vector<1x1x10x10x2xf32> to vector<10x10x2xf32>
    %c0_9 = arith.constant 0 : index
    %c0_10 = arith.constant 0 : index
    %c0_11 = arith.constant 0 : index
    %c0_12 = arith.constant 0 : index
    %c0_13 = arith.constant 0 : index
    %12 = vector.load %arg4[%c0_9, %c0_10, %c0_11, %c0_12, %c0_13] : memref<1x1x10x10x2xf32, #tpu.memory_space<vmem>>, vector<1x1x10x10x2xf32>
    %13 = vector.shape_cast %12 : vector<1x1x10x10x2xf32> to vector<10x10x2xf32>
    %14 = vector.broadcast %5 : f32 to vector<10x10x2xf32>
    %15 = arith.mulf %13, %14 : vector<10x10x2xf32>
    %cst = arith.constant 0.000000e+00 : f32
    %16 = vector.broadcast %cst : f32 to vector<64x128xf32>
    %17 = vector.extract_strided_slice %9 {offsets = [0, 0, 0], sizes = [8, 8, 2], strides = [1, 1, 1]} : vector<10x10x2xf32> to vector<8x8x2xf32>
    %18 = vector.shape_cast %17 : vector<8x8x2xf32> to vector<64x2xf32>
    %c0_14 = arith.constant 0 : index
    %c0_15 = arith.constant 0 : index
    %19 = vector.load %arg5[%c0_14, %c0_15] : memref<54x128xf32, #tpu.memory_space<vmem>>, vector<2x128xf32>
    %cst_16 = arith.constant dense<0.000000e+00> : vector<64x128xf32>
    %20 = tpu.matmul %18, %19, %cst_16 {dimension_numbers = #tpu.dot_dimension_numbers<[1], [0], [0], [1], [0, 0, 1, 1], [], []>} : vector<64x2xf32>, vector<2x128xf32>, vector<64x128xf32> -> vector<64x128xf32>
    %21 = arith.addf %16, %20 : vector<64x128xf32>
    %22 = vector.extract_strided_slice %11 {offsets = [0, 0, 0], sizes = [8, 8, 2], strides = [1, 1, 1]} : vector<10x10x2xf32> to vector<8x8x2xf32>
    %23 = vector.shape_cast %22 : vector<8x8x2xf32> to vector<64x2xf32>
    %c2 = arith.constant 2 : index
    %c0_17 = arith.constant 0 : index
    %24 = vector.load %arg5[%c2, %c0_17] : memref<54x128xf32, #tpu.memory_space<vmem>>, vector<2x128xf32>
    %cst_18 = arith.constant dense<0.000000e+00> : vector<64x128xf32>
    %25 = tpu.matmul %23, %24, %cst_18 {dimension_numbers = #tpu.dot_dimension_numbers<[1], [0], [0], [1], [0, 0, 1, 1], [], []>} : vector<64x2xf32>, vector<2x128xf32>, vector<64x128xf32> -> vector<64x128xf32>
    %26 = arith.addf %21, %25 : vector<64x128xf32>
    %27 = vector.extract_strided_slice %15 {offsets = [0, 0, 0], sizes = [8, 8, 2], strides = [1, 1, 1]} : vector<10x10x2xf32> to vector<8x8x2xf32>
    %28 = vector.shape_cast %27 : vector<8x8x2xf32> to vector<64x2xf32>
    %c4 = arith.constant 4 : index
    %c0_19 = arith.constant 0 : index
    %29 = vector.load %arg5[%c4, %c0_19] : memref<54x128xf32, #tpu.memory_space<vmem>>, vector<2x128xf32>
    %cst_20 = arith.constant dense<0.000000e+00> : vector<64x128xf32>
    %30 = tpu.matmul %28, %29, %cst_20 {dimension_numbers = #tpu.dot_dimension_numbers<[1], [0], [0], [1], [0, 0, 1, 1], [], []>} : vector<64x2xf32>, vector<2x128xf32>, vector<64x128xf32> -> vector<64x128xf32>
    %31 = arith.addf %26, %30 : vector<64x128xf32>
    %32 = vector.extract_strided_slice %9 {offsets = [0, 1, 0], sizes = [8, 8, 2], strides = [1, 1, 1]} : vector<10x10x2xf32> to vector<8x8x2xf32>
    %33 = vector.shape_cast %32 : vector<8x8x2xf32> to vector<64x2xf32>
    %c6 = arith.constant 6 : index
    %c0_21 = arith.constant 0 : index
    %34 = vector.load %arg5[%c6, %c0_21] : memref<54x128xf32, #tpu.memory_space<vmem>>, vector<2x128xf32>
    %cst_22 = arith.constant dense<0.000000e+00> : vector<64x128xf32>
    %35 = tpu.matmul %33, %34, %cst_22 {dimension_numbers = #tpu.dot_dimension_numbers<[1], [0], [0], [1], [0, 0, 1, 1], [], []>} : vector<64x2xf32>, vector<2x128xf32>, vector<64x128xf32> -> vector<64x128xf32>
    %36 = arith.addf %31, %35 : vector<64x128xf32>
    %37 = vector.extract_strided_slice %11 {offsets = [0, 1, 0], sizes = [8, 8, 2], strides = [1, 1, 1]} : vector<10x10x2xf32> to vector<8x8x2xf32>
    %38 = vector.shape_cast %37 : vector<8x8x2xf32> to vector<64x2xf32>
    %c8 = arith.constant 8 : index
    %c0_23 = arith.constant 0 : index
    %39 = vector.load %arg5[%c8, %c0_23] : memref<54x128xf32, #tpu.memory_space<vmem>>, vector<2x128xf32>
    %cst_24 = arith.constant dense<0.000000e+00> : vector<64x128xf32>
    %40 = tpu.matmul %38, %39, %cst_24 {dimension_numbers = #tpu.dot_dimension_numbers<[1], [0], [0], [1], [0, 0, 1, 1], [], []>} : vector<64x2xf32>, vector<2x128xf32>, vector<64x128xf32> -> vector<64x128xf32>
    %41 = arith.addf %36, %40 : vector<64x128xf32>
    %42 = vector.extract_strided_slice %15 {offsets = [0, 1, 0], sizes = [8, 8, 2], strides = [1, 1, 1]} : vector<10x10x2xf32> to vector<8x8x2xf32>
    %43 = vector.shape_cast %42 : vector<8x8x2xf32> to vector<64x2xf32>
    %c10 = arith.constant 10 : index
    %c0_25 = arith.constant 0 : index
    %44 = vector.load %arg5[%c10, %c0_25] : memref<54x128xf32, #tpu.memory_space<vmem>>, vector<2x128xf32>
    %cst_26 = arith.constant dense<0.000000e+00> : vector<64x128xf32>
    %45 = tpu.matmul %43, %44, %cst_26 {dimension_numbers = #tpu.dot_dimension_numbers<[1], [0], [0], [1], [0, 0, 1, 1], [], []>} : vector<64x2xf32>, vector<2x128xf32>, vector<64x128xf32> -> vector<64x128xf32>
    %46 = arith.addf %41, %45 : vector<64x128xf32>
    %47 = vector.extract_strided_slice %9 {offsets = [0, 2, 0], sizes = [8, 8, 2], strides = [1, 1, 1]} : vector<10x10x2xf32> to vector<8x8x2xf32>
    %48 = vector.shape_cast %47 : vector<8x8x2xf32> to vector<64x2xf32>
    %c12 = arith.constant 12 : index
    %c0_27 = arith.constant 0 : index
    %49 = vector.load %arg5[%c12, %c0_27] : memref<54x128xf32, #tpu.memory_space<vmem>>, vector<2x128xf32>
    %cst_28 = arith.constant dense<0.000000e+00> : vector<64x128xf32>
    %50 = tpu.matmul %48, %49, %cst_28 {dimension_numbers = #tpu.dot_dimension_numbers<[1], [0], [0], [1], [0, 0, 1, 1], [], []>} : vector<64x2xf32>, vector<2x128xf32>, vector<64x128xf32> -> vector<64x128xf32>
    %51 = arith.addf %46, %50 : vector<64x128xf32>
    %52 = vector.extract_strided_slice %11 {offsets = [0, 2, 0], sizes = [8, 8, 2], strides = [1, 1, 1]} : vector<10x10x2xf32> to vector<8x8x2xf32>
    %53 = vector.shape_cast %52 : vector<8x8x2xf32> to vector<64x2xf32>
    %c14 = arith.constant 14 : index
    %c0_29 = arith.constant 0 : index
    %54 = vector.load %arg5[%c14, %c0_29] : memref<54x128xf32, #tpu.memory_space<vmem>>, vector<2x128xf32>
    %cst_30 = arith.constant dense<0.000000e+00> : vector<64x128xf32>
    %55 = tpu.matmul %53, %54, %cst_30 {dimension_numbers = #tpu.dot_dimension_numbers<[1], [0], [0], [1], [0, 0, 1, 1], [], []>} : vector<64x2xf32>, vector<2x128xf32>, vector<64x128xf32> -> vector<64x128xf32>
    %56 = arith.addf %51, %55 : vector<64x128xf32>
    %57 = vector.extract_strided_slice %15 {offsets = [0, 2, 0], sizes = [8, 8, 2], strides = [1, 1, 1]} : vector<10x10x2xf32> to vector<8x8x2xf32>
    %58 = vector.shape_cast %57 : vector<8x8x2xf32> to vector<64x2xf32>
    %c16 = arith.constant 16 : index
    %c0_31 = arith.constant 0 : index
    %59 = vector.load %arg5[%c16, %c0_31] : memref<54x128xf32, #tpu.memory_space<vmem>>, vector<2x128xf32>
    %cst_32 = arith.constant dense<0.000000e+00> : vector<64x128xf32>
    %60 = tpu.matmul %58, %59, %cst_32 {dimension_numbers = #tpu.dot_dimension_numbers<[1], [0], [0], [1], [0, 0, 1, 1], [], []>} : vector<64x2xf32>, vector<2x128xf32>, vector<64x128xf32> -> vector<64x128xf32>
    %61 = arith.addf %56, %60 : vector<64x128xf32>
    %62 = vector.extract_strided_slice %9 {offsets = [1, 0, 0], sizes = [8, 8, 2], strides = [1, 1, 1]} : vector<10x10x2xf32> to vector<8x8x2xf32>
    %63 = vector.shape_cast %62 : vector<8x8x2xf32> to vector<64x2xf32>
    %c18 = arith.constant 18 : index
    %c0_33 = arith.constant 0 : index
    %64 = vector.load %arg5[%c18, %c0_33] : memref<54x128xf32, #tpu.memory_space<vmem>>, vector<2x128xf32>
    %cst_34 = arith.constant dense<0.000000e+00> : vector<64x128xf32>
    %65 = tpu.matmul %63, %64, %cst_34 {dimension_numbers = #tpu.dot_dimension_numbers<[1], [0], [0], [1], [0, 0, 1, 1], [], []>} : vector<64x2xf32>, vector<2x128xf32>, vector<64x128xf32> -> vector<64x128xf32>
    %66 = arith.addf %61, %65 : vector<64x128xf32>
    %67 = vector.extract_strided_slice %11 {offsets = [1, 0, 0], sizes = [8, 8, 2], strides = [1, 1, 1]} : vector<10x10x2xf32> to vector<8x8x2xf32>
    %68 = vector.shape_cast %67 : vector<8x8x2xf32> to vector<64x2xf32>
    %c20 = arith.constant 20 : index
    %c0_35 = arith.constant 0 : index
    %69 = vector.load %arg5[%c20, %c0_35] : memref<54x128xf32, #tpu.memory_space<vmem>>, vector<2x128xf32>
    %cst_36 = arith.constant dense<0.000000e+00> : vector<64x128xf32>
    %70 = tpu.matmul %68, %69, %cst_36 {dimension_numbers = #tpu.dot_dimension_numbers<[1], [0], [0], [1], [0, 0, 1, 1], [], []>} : vector<64x2xf32>, vector<2x128xf32>, vector<64x128xf32> -> vector<64x128xf32>
    %71 = arith.addf %66, %70 : vector<64x128xf32>
    %72 = vector.extract_strided_slice %15 {offsets = [1, 0, 0], sizes = [8, 8, 2], strides = [1, 1, 1]} : vector<10x10x2xf32> to vector<8x8x2xf32>
    %73 = vector.shape_cast %72 : vector<8x8x2xf32> to vector<64x2xf32>
    %c22 = arith.constant 22 : index
    %c0_37 = arith.constant 0 : index
    %74 = vector.load %arg5[%c22, %c0_37] : memref<54x128xf32, #tpu.memory_space<vmem>>, vector<2x128xf32>
    %cst_38 = arith.constant dense<0.000000e+00> : vector<64x128xf32>
    %75 = tpu.matmul %73, %74, %cst_38 {dimension_numbers = #tpu.dot_dimension_numbers<[1], [0], [0], [1], [0, 0, 1, 1], [], []>} : vector<64x2xf32>, vector<2x128xf32>, vector<64x128xf32> -> vector<64x128xf32>
    %76 = arith.addf %71, %75 : vector<64x128xf32>
    %77 = vector.extract_strided_slice %9 {offsets = [1, 1, 0], sizes = [8, 8, 2], strides = [1, 1, 1]} : vector<10x10x2xf32> to vector<8x8x2xf32>
    %78 = vector.shape_cast %77 : vector<8x8x2xf32> to vector<64x2xf32>
    %c24 = arith.constant 24 : index
    %c0_39 = arith.constant 0 : index
    %79 = vector.load %arg5[%c24, %c0_39] : memref<54x128xf32, #tpu.memory_space<vmem>>, vector<2x128xf32>
    %cst_40 = arith.constant dense<0.000000e+00> : vector<64x128xf32>
    %80 = tpu.matmul %78, %79, %cst_40 {dimension_numbers = #tpu.dot_dimension_numbers<[1], [0], [0], [1], [0, 0, 1, 1], [], []>} : vector<64x2xf32>, vector<2x128xf32>, vector<64x128xf32> -> vector<64x128xf32>
    %81 = arith.addf %76, %80 : vector<64x128xf32>
    %82 = vector.extract_strided_slice %11 {offsets = [1, 1, 0], sizes = [8, 8, 2], strides = [1, 1, 1]} : vector<10x10x2xf32> to vector<8x8x2xf32>
    %83 = vector.shape_cast %82 : vector<8x8x2xf32> to vector<64x2xf32>
    %c26 = arith.constant 26 : index
    %c0_41 = arith.constant 0 : index
    %84 = vector.load %arg5[%c26, %c0_41] : memref<54x128xf32, #tpu.memory_space<vmem>>, vector<2x128xf32>
    %cst_42 = arith.constant dense<0.000000e+00> : vector<64x128xf32>
    %85 = tpu.matmul %83, %84, %cst_42 {dimension_numbers = #tpu.dot_dimension_numbers<[1], [0], [0], [1], [0, 0, 1, 1], [], []>} : vector<64x2xf32>, vector<2x128xf32>, vector<64x128xf32> -> vector<64x128xf32>
    %86 = arith.addf %81, %85 : vector<64x128xf32>
    %87 = vector.extract_strided_slice %15 {offsets = [1, 1, 0], sizes = [8, 8, 2], strides = [1, 1, 1]} : vector<10x10x2xf32> to vector<8x8x2xf32>
    %88 = vector.shape_cast %87 : vector<8x8x2xf32> to vector<64x2xf32>
    %c28 = arith.constant 28 : index
    %c0_43 = arith.constant 0 : index
    %89 = vector.load %arg5[%c28, %c0_43] : memref<54x128xf32, #tpu.memory_space<vmem>>, vector<2x128xf32>
    %cst_44 = arith.constant dense<0.000000e+00> : vector<64x128xf32>
    %90 = tpu.matmul %88, %89, %cst_44 {dimension_numbers = #tpu.dot_dimension_numbers<[1], [0], [0], [1], [0, 0, 1, 1], [], []>} : vector<64x2xf32>, vector<2x128xf32>, vector<64x128xf32> -> vector<64x128xf32>
    %91 = arith.addf %86, %90 : vector<64x128xf32>
    %92 = vector.extract_strided_slice %9 {offsets = [1, 2, 0], sizes = [8, 8, 2], strides = [1, 1, 1]} : vector<10x10x2xf32> to vector<8x8x2xf32>
    %93 = vector.shape_cast %92 : vector<8x8x2xf32> to vector<64x2xf32>
    %c30 = arith.constant 30 : index
    %c0_45 = arith.constant 0 : index
    %94 = vector.load %arg5[%c30, %c0_45] : memref<54x128xf32, #tpu.memory_space<vmem>>, vector<2x128xf32>
    %cst_46 = arith.constant dense<0.000000e+00> : vector<64x128xf32>
    %95 = tpu.matmul %93, %94, %cst_46 {dimension_numbers = #tpu.dot_dimension_numbers<[1], [0], [0], [1], [0, 0, 1, 1], [], []>} : vector<64x2xf32>, vector<2x128xf32>, vector<64x128xf32> -> vector<64x128xf32>
    %96 = arith.addf %91, %95 : vector<64x128xf32>
    %97 = vector.extract_strided_slice %11 {offsets = [1, 2, 0], sizes = [8, 8, 2], strides = [1, 1, 1]} : vector<10x10x2xf32> to vector<8x8x2xf32>
    %98 = vector.shape_cast %97 : vector<8x8x2xf32> to vector<64x2xf32>
    %c32 = arith.constant 32 : index
    %c0_47 = arith.constant 0 : index
    %99 = vector.load %arg5[%c32, %c0_47] : memref<54x128xf32, #tpu.memory_space<vmem>>, vector<2x128xf32>
    %cst_48 = arith.constant dense<0.000000e+00> : vector<64x128xf32>
    %100 = tpu.matmul %98, %99, %cst_48 {dimension_numbers = #tpu.dot_dimension_numbers<[1], [0], [0], [1], [0, 0, 1, 1], [], []>} : vector<64x2xf32>, vector<2x128xf32>, vector<64x128xf32> -> vector<64x128xf32>
    %101 = arith.addf %96, %100 : vector<64x128xf32>
    %102 = vector.extract_strided_slice %15 {offsets = [1, 2, 0], sizes = [8, 8, 2], strides = [1, 1, 1]} : vector<10x10x2xf32> to vector<8x8x2xf32>
    %103 = vector.shape_cast %102 : vector<8x8x2xf32> to vector<64x2xf32>
    %c34 = arith.constant 34 : index
    %c0_49 = arith.constant 0 : index
    %104 = vector.load %arg5[%c34, %c0_49] : memref<54x128xf32, #tpu.memory_space<vmem>>, vector<2x128xf32>
    %cst_50 = arith.constant dense<0.000000e+00> : vector<64x128xf32>
    %105 = tpu.matmul %103, %104, %cst_50 {dimension_numbers = #tpu.dot_dimension_numbers<[1], [0], [0], [1], [0, 0, 1, 1], [], []>} : vector<64x2xf32>, vector<2x128xf32>, vector<64x128xf32> -> vector<64x128xf32>
    %106 = arith.addf %101, %105 : vector<64x128xf32>
    %107 = vector.extract_strided_slice %9 {offsets = [2, 0, 0], sizes = [8, 8, 2], strides = [1, 1, 1]} : vector<10x10x2xf32> to vector<8x8x2xf32>
    %108 = vector.shape_cast %107 : vector<8x8x2xf32> to vector<64x2xf32>
    %c36 = arith.constant 36 : index
    %c0_51 = arith.constant 0 : index
    %109 = vector.load %arg5[%c36, %c0_51] : memref<54x128xf32, #tpu.memory_space<vmem>>, vector<2x128xf32>
    %cst_52 = arith.constant dense<0.000000e+00> : vector<64x128xf32>
    %110 = tpu.matmul %108, %109, %cst_52 {dimension_numbers = #tpu.dot_dimension_numbers<[1], [0], [0], [1], [0, 0, 1, 1], [], []>} : vector<64x2xf32>, vector<2x128xf32>, vector<64x128xf32> -> vector<64x128xf32>
    %111 = arith.addf %106, %110 : vector<64x128xf32>
    %112 = vector.extract_strided_slice %11 {offsets = [2, 0, 0], sizes = [8, 8, 2], strides = [1, 1, 1]} : vector<10x10x2xf32> to vector<8x8x2xf32>
    %113 = vector.shape_cast %112 : vector<8x8x2xf32> to vector<64x2xf32>
    %c38 = arith.constant 38 : index
    %c0_53 = arith.constant 0 : index
    %114 = vector.load %arg5[%c38, %c0_53] : memref<54x128xf32, #tpu.memory_space<vmem>>, vector<2x128xf32>
    %cst_54 = arith.constant dense<0.000000e+00> : vector<64x128xf32>
    %115 = tpu.matmul %113, %114, %cst_54 {dimension_numbers = #tpu.dot_dimension_numbers<[1], [0], [0], [1], [0, 0, 1, 1], [], []>} : vector<64x2xf32>, vector<2x128xf32>, vector<64x128xf32> -> vector<64x128xf32>
    %116 = arith.addf %111, %115 : vector<64x128xf32>
    %117 = vector.extract_strided_slice %15 {offsets = [2, 0, 0], sizes = [8, 8, 2], strides = [1, 1, 1]} : vector<10x10x2xf32> to vector<8x8x2xf32>
    %118 = vector.shape_cast %117 : vector<8x8x2xf32> to vector<64x2xf32>
    %c40 = arith.constant 40 : index
    %c0_55 = arith.constant 0 : index
    %119 = vector.load %arg5[%c40, %c0_55] : memref<54x128xf32, #tpu.memory_space<vmem>>, vector<2x128xf32>
    %cst_56 = arith.constant dense<0.000000e+00> : vector<64x128xf32>
    %120 = tpu.matmul %118, %119, %cst_56 {dimension_numbers = #tpu.dot_dimension_numbers<[1], [0], [0], [1], [0, 0, 1, 1], [], []>} : vector<64x2xf32>, vector<2x128xf32>, vector<64x128xf32> -> vector<64x128xf32>
    %121 = arith.addf %116, %120 : vector<64x128xf32>
    %122 = vector.extract_strided_slice %9 {offsets = [2, 1, 0], sizes = [8, 8, 2], strides = [1, 1, 1]} : vector<10x10x2xf32> to vector<8x8x2xf32>
    %123 = vector.shape_cast %122 : vector<8x8x2xf32> to vector<64x2xf32>
    %c42 = arith.constant 42 : index
    %c0_57 = arith.constant 0 : index
    %124 = vector.load %arg5[%c42, %c0_57] : memref<54x128xf32, #tpu.memory_space<vmem>>, vector<2x128xf32>
    %cst_58 = arith.constant dense<0.000000e+00> : vector<64x128xf32>
    %125 = tpu.matmul %123, %124, %cst_58 {dimension_numbers = #tpu.dot_dimension_numbers<[1], [0], [0], [1], [0, 0, 1, 1], [], []>} : vector<64x2xf32>, vector<2x128xf32>, vector<64x128xf32> -> vector<64x128xf32>
    %126 = arith.addf %121, %125 : vector<64x128xf32>
    %127 = vector.extract_strided_slice %11 {offsets = [2, 1, 0], sizes = [8, 8, 2], strides = [1, 1, 1]} : vector<10x10x2xf32> to vector<8x8x2xf32>
    %128 = vector.shape_cast %127 : vector<8x8x2xf32> to vector<64x2xf32>
    %c44 = arith.constant 44 : index
    %c0_59 = arith.constant 0 : index
    %129 = vector.load %arg5[%c44, %c0_59] : memref<54x128xf32, #tpu.memory_space<vmem>>, vector<2x128xf32>
    %cst_60 = arith.constant dense<0.000000e+00> : vector<64x128xf32>
    %130 = tpu.matmul %128, %129, %cst_60 {dimension_numbers = #tpu.dot_dimension_numbers<[1], [0], [0], [1], [0, 0, 1, 1], [], []>} : vector<64x2xf32>, vector<2x128xf32>, vector<64x128xf32> -> vector<64x128xf32>
    %131 = arith.addf %126, %130 : vector<64x128xf32>
    %132 = vector.extract_strided_slice %15 {offsets = [2, 1, 0], sizes = [8, 8, 2], strides = [1, 1, 1]} : vector<10x10x2xf32> to vector<8x8x2xf32>
    %133 = vector.shape_cast %132 : vector<8x8x2xf32> to vector<64x2xf32>
    %c46 = arith.constant 46 : index
    %c0_61 = arith.constant 0 : index
    %134 = vector.load %arg5[%c46, %c0_61] : memref<54x128xf32, #tpu.memory_space<vmem>>, vector<2x128xf32>
    %cst_62 = arith.constant dense<0.000000e+00> : vector<64x128xf32>
    %135 = tpu.matmul %133, %134, %cst_62 {dimension_numbers = #tpu.dot_dimension_numbers<[1], [0], [0], [1], [0, 0, 1, 1], [], []>} : vector<64x2xf32>, vector<2x128xf32>, vector<64x128xf32> -> vector<64x128xf32>
    %136 = arith.addf %131, %135 : vector<64x128xf32>
    %137 = vector.extract_strided_slice %9 {offsets = [2, 2, 0], sizes = [8, 8, 2], strides = [1, 1, 1]} : vector<10x10x2xf32> to vector<8x8x2xf32>
    %138 = vector.shape_cast %137 : vector<8x8x2xf32> to vector<64x2xf32>
    %c48 = arith.constant 48 : index
    %c0_63 = arith.constant 0 : index
    %139 = vector.load %arg5[%c48, %c0_63] : memref<54x128xf32, #tpu.memory_space<vmem>>, vector<2x128xf32>
    %cst_64 = arith.constant dense<0.000000e+00> : vector<64x128xf32>
    %140 = tpu.matmul %138, %139, %cst_64 {dimension_numbers = #tpu.dot_dimension_numbers<[1], [0], [0], [1], [0, 0, 1, 1], [], []>} : vector<64x2xf32>, vector<2x128xf32>, vector<64x128xf32> -> vector<64x128xf32>
    %141 = arith.addf %136, %140 : vector<64x128xf32>
    %142 = vector.extract_strided_slice %11 {offsets = [2, 2, 0], sizes = [8, 8, 2], strides = [1, 1, 1]} : vector<10x10x2xf32> to vector<8x8x2xf32>
    %143 = vector.shape_cast %142 : vector<8x8x2xf32> to vector<64x2xf32>
    %c50 = arith.constant 50 : index
    %c0_65 = arith.constant 0 : index
    %144 = vector.load %arg5[%c50, %c0_65] : memref<54x128xf32, #tpu.memory_space<vmem>>, vector<2x128xf32>
    %cst_66 = arith.constant dense<0.000000e+00> : vector<64x128xf32>
    %145 = tpu.matmul %143, %144, %cst_66 {dimension_numbers = #tpu.dot_dimension_numbers<[1], [0], [0], [1], [0, 0, 1, 1], [], []>} : vector<64x2xf32>, vector<2x128xf32>, vector<64x128xf32> -> vector<64x128xf32>
    %146 = arith.addf %141, %145 : vector<64x128xf32>
    %147 = vector.extract_strided_slice %15 {offsets = [2, 2, 0], sizes = [8, 8, 2], strides = [1, 1, 1]} : vector<10x10x2xf32> to vector<8x8x2xf32>
    %148 = vector.shape_cast %147 : vector<8x8x2xf32> to vector<64x2xf32>
    %c52 = arith.constant 52 : index
    %c0_67 = arith.constant 0 : index
    %149 = vector.load %arg5[%c52, %c0_67] : memref<54x128xf32, #tpu.memory_space<vmem>>, vector<2x128xf32>
    %cst_68 = arith.constant dense<0.000000e+00> : vector<64x128xf32>
    %150 = tpu.matmul %148, %149, %cst_68 {dimension_numbers = #tpu.dot_dimension_numbers<[1], [0], [0], [1], [0, 0, 1, 1], [], []>} : vector<64x2xf32>, vector<2x128xf32>, vector<64x128xf32> -> vector<64x128xf32>
    %151 = arith.addf %146, %150 : vector<64x128xf32>
    %c0_69 = arith.constant 0 : index
    %c0_70 = arith.constant 0 : index
    %152 = vector.load %arg6[%c0_69, %c0_70] : memref<1x128xf32, #tpu.memory_space<vmem>>, vector<1x128xf32>
    %153 = vector.broadcast %152 : vector<1x128xf32> to vector<64x128xf32>
    %154 = arith.addf %151, %153 : vector<64x128xf32>
    %c0_71 = arith.constant 0 : index
    %c0_72 = arith.constant 0 : index
    %c0_73 = arith.constant 0 : index
    %c0_74 = arith.constant 0 : index
    %155 = vector.load %arg7[%c0_71, %c0_72, %c0_73, %c0_74] : memref<1x1x64x128xf32, #tpu.memory_space<vmem>>, vector<1x1x64x128xf32>
    %156 = vector.shape_cast %155 : vector<1x1x64x128xf32> to vector<64x128xf32>
    %157 = vector.shape_cast %154 : vector<64x128xf32> to vector<1x1x64x128xf32>
    tpu.vector_store %arg7[%c0_71, %c0_72, %c0_73, %c0_74], %157 {strides = array<i32>} : memref<1x1x64x128xf32, #tpu.memory_space<vmem>>, vector<1x1x64x128xf32>,
    %cst_75 = arith.constant dense<0.000000e+00> : vector<128xf32>
    %158 = vector.multi_reduction <add>, %154, %cst_75 [0] : vector<64x128xf32> to vector<128xf32>
    %159 = vector.shape_cast %158 : vector<128xf32> to vector<1x128xf32>
    %cst_76 = arith.constant 1.562500e-02 : f32
    %160 = vector.broadcast %cst_76 : f32 to vector<1x128xf32>
    %161 = arith.mulf %159, %160 : vector<1x128xf32>
    %162 = vector.broadcast %161 : vector<1x128xf32> to vector<64x128xf32>
    %163 = arith.subf %154, %162 : vector<64x128xf32>
    %c0_77 = arith.constant 0 : index
    %c0_78 = arith.constant 0 : index
    %c0_79 = arith.constant 0 : index
    %c0_80 = arith.constant 0 : index
    %164 = vector.load %arg8[%c0_77, %c0_78, %c0_79, %c0_80] : memref<1x1x2x128xf32, #tpu.memory_space<vmem>>, vector<1x1x1x128xf32>
    %165 = vector.shape_cast %164 : vector<1x1x1x128xf32> to vector<1x128xf32>
    %166 = vector.shape_cast %159 : vector<1x128xf32> to vector<1x1x1x128xf32>
    tpu.vector_store %arg8[%c0_77, %c0_78, %c0_79, %c0_80], %166 {strides = array<i32>} : memref<1x1x2x128xf32, #tpu.memory_space<vmem>>, vector<1x1x1x128xf32>,
    %167 = arith.mulf %163, %163 : vector<64x128xf32>
    %cst_81 = arith.constant dense<0.000000e+00> : vector<128xf32>
    %168 = vector.multi_reduction <add>, %167, %cst_81 [0] : vector<64x128xf32> to vector<128xf32>
    %169 = vector.shape_cast %168 : vector<128xf32> to vector<1x128xf32>
    %c0_82 = arith.constant 0 : index
    %c0_83 = arith.constant 0 : index
    %c1 = arith.constant 1 : index
    %c0_84 = arith.constant 0 : index
    %170 = vector.load %arg8[%c0_82, %c0_83, %c1, %c0_84] : memref<1x1x2x128xf32, #tpu.memory_space<vmem>>, vector<1x1x1x128xf32>
    %171 = vector.shape_cast %170 : vector<1x1x1x128xf32> to vector<1x128xf32>
    %172 = vector.shape_cast %169 : vector<1x128xf32> to vector<1x1x1x128xf32>
    tpu.vector_store %arg8[%c0_82, %c0_83, %c1, %c0_84], %172 {strides = array<i32>} : memref<1x1x2x128xf32, #tpu.memory_space<vmem>>, vector<1x1x1x128xf32>,
    return
  }
  func.func @transform_0(%arg0: i32, %arg1: i32) -> (i32, i32, i32, i32, i32) {
    %c1_i32 = arith.constant 1 : i32
    %0 = arith.subi %arg1, %c1_i32 : i32
    %c0_i32 = arith.constant 0 : i32
    %1 = arith.maxsi %0, %c0_i32 : i32
    %c0_i32_0 = arith.constant 0 : i32
    %c0_i32_1 = arith.constant 0 : i32
    %c0_i32_2 = arith.constant 0 : i32
    %c0_i32_3 = arith.constant 0 : i32
    return %arg0, %1, %c0_i32_0, %c0_i32_1, %c0_i32_2 : i32, i32, i32, i32, i32
  }
  func.func @transform_1(%arg0: i32, %arg1: i32) -> (i32, i32, i32, i32, i32) {
    %c0_i32 = arith.constant 0 : i32
    %c0_i32_0 = arith.constant 0 : i32
    %c0_i32_1 = arith.constant 0 : i32
    %c0_i32_2 = arith.constant 0 : i32
    return %arg0, %arg1, %c0_i32, %c0_i32_0, %c0_i32_1 : i32, i32, i32, i32, i32
  }
  func.func @transform_2(%arg0: i32, %arg1: i32) -> (i32, i32, i32, i32, i32) {
    %c1_i32 = arith.constant 1 : i32
    %0 = arith.addi %arg1, %c1_i32 : i32
    %c7_i32 = arith.constant 7 : i32
    %1 = arith.minsi %0, %c7_i32 : i32
    %c0_i32 = arith.constant 0 : i32
    %c0_i32_0 = arith.constant 0 : i32
    %c0_i32_1 = arith.constant 0 : i32
    %c0_i32_2 = arith.constant 0 : i32
    return %arg0, %1, %c0_i32, %c0_i32_0, %c0_i32_1 : i32, i32, i32, i32, i32
  }
  func.func @transform_3(%arg0: i32, %arg1: i32) -> (i32, i32) {
    %c0_i32 = arith.constant 0 : i32
    %c0_i32_0 = arith.constant 0 : i32
    %c0_i32_1 = arith.constant 0 : i32
    return %c0_i32, %c0_i32_0 : i32, i32
  }
  func.func @transform_4(%arg0: i32, %arg1: i32) -> (i32, i32) {
    %c0_i32 = arith.constant 0 : i32
    %c0_i32_0 = arith.constant 0 : i32
    %c0_i32_1 = arith.constant 0 : i32
    return %c0_i32, %c0_i32_0 : i32, i32
  }
  func.func @transform_5(%arg0: i32, %arg1: i32) -> (i32, i32, i32, i32) {
    %c0_i32 = arith.constant 0 : i32
    %c0_i32_0 = arith.constant 0 : i32
    %c0_i32_1 = arith.constant 0 : i32
    return %arg0, %arg1, %c0_i32, %c0_i32_0 : i32, i32, i32, i32
  }
  func.func @transform_6(%arg0: i32, %arg1: i32) -> (i32, i32, i32, i32) {
    %c0_i32 = arith.constant 0 : i32
    %c0_i32_0 = arith.constant 0 : i32
    %c0_i32_1 = arith.constant 0 : i32
    return %arg0, %arg1, %c0_i32, %c0_i32_0 : i32, i32, i32, i32
  }
}

module attributes {stable_mosaic.version = 11 : i64} {
  func.func @kernel(%arg0: i32, %arg1: i32, %arg2: memref<1x1x64x128xf32, #tpu.memory_space<vmem>>, %arg3: memref<1x128xf32, #tpu.memory_space<vmem>>, %arg4: memref<1x128xf32, #tpu.memory_space<vmem>>, %arg5: memref<1x1x10x10x128xf32, #tpu.memory_space<vmem>>) attributes {dimension_semantics = [#tpu.dimension_semantics<parallel>, #tpu.dimension_semantics<parallel>], iteration_bounds = array<i64: 2, 8>, scalar_prefetch = 0 : i64, scratch_operands = 0 : i64, tpu.core_type = #tpu.core_type<tc>, window_params = [{transform_indices = @transform_0, window_bounds = array<i64: 1, 1, 64, 128>}, {pipeline_mode = #tpu.pipeline_mode<synchronous>, transform_indices = @transform_1, window_bounds = array<i64: 1, 128>}, {pipeline_mode = #tpu.pipeline_mode<synchronous>, transform_indices = @transform_2, window_bounds = array<i64: 1, 128>}, {transform_indices = @transform_3, window_bounds = array<i64: 1, 1, 10, 10, 128>}]} {
    %c0 = arith.constant 0 : index
    %c0_0 = arith.constant 0 : index
    %c0_1 = arith.constant 0 : index
    %c0_2 = arith.constant 0 : index
    %0 = vector.load %arg2[%c0, %c0_0, %c0_1, %c0_2] : memref<1x1x64x128xf32, #tpu.memory_space<vmem>>, vector<1x1x64x128xf32>
    %1 = vector.shape_cast %0 : vector<1x1x64x128xf32> to vector<64x128xf32>
    %c0_3 = arith.constant 0 : index
    %c0_4 = arith.constant 0 : index
    %2 = vector.load %arg3[%c0_3, %c0_4] : memref<1x128xf32, #tpu.memory_space<vmem>>, vector<1x128xf32>
    %3 = vector.broadcast %2 : vector<1x128xf32> to vector<64x128xf32>
    %4 = arith.mulf %1, %3 : vector<64x128xf32>
    %c0_5 = arith.constant 0 : index
    %c0_6 = arith.constant 0 : index
    %5 = vector.load %arg4[%c0_5, %c0_6] : memref<1x128xf32, #tpu.memory_space<vmem>>, vector<1x128xf32>
    %6 = vector.broadcast %5 : vector<1x128xf32> to vector<64x128xf32>
    %7 = arith.addf %4, %6 : vector<64x128xf32>
    %cst = arith.constant 0.000000e+00 : f32
    %8 = vector.broadcast %cst : f32 to vector<64x128xf32>
    %9 = arith.maximumf %7, %8 : vector<64x128xf32>
    %10 = vector.shape_cast %9 : vector<64x128xf32> to vector<8x8x128xf32>
    %cst_7 = arith.constant 0.000000e+00 : f32
    %11 = vector.broadcast %cst_7 : f32 to vector<1x10x128xf32>
    %cst_8 = arith.constant 0.000000e+00 : f32
    %12 = vector.broadcast %cst_8 : f32 to vector<8x1x128xf32>
    %c0_9 = arith.constant 0 : index
    %c0_10 = arith.constant 0 : index
    %c0_11 = arith.constant 0 : index
    %c0_12 = arith.constant 0 : index
    %c0_13 = arith.constant 0 : index
    %13 = vector.load %arg5[%c0_9, %c0_10, %c0_11, %c0_12, %c0_13] : memref<1x1x10x10x128xf32, #tpu.memory_space<vmem>>, vector<1x1x1x10x128xf32>
    %14 = vector.shape_cast %13 : vector<1x1x1x10x128xf32> to vector<1x10x128xf32>
    %15 = vector.shape_cast %11 : vector<1x10x128xf32> to vector<1x1x1x10x128xf32>
    tpu.vector_store %arg5[%c0_9, %c0_10, %c0_11, %c0_12, %c0_13], %15 {strides = array<i32>} : memref<1x1x10x10x128xf32, #tpu.memory_space<vmem>>, vector<1x1x1x10x128xf32>,
    %c0_14 = arith.constant 0 : index
    %c0_15 = arith.constant 0 : index
    %c9 = arith.constant 9 : index
    %c0_16 = arith.constant 0 : index
    %c0_17 = arith.constant 0 : index
    %16 = vector.load %arg5[%c0_14, %c0_15, %c9, %c0_16, %c0_17] : memref<1x1x10x10x128xf32, #tpu.memory_space<vmem>>, vector<1x1x1x10x128xf32>
    %17 = vector.shape_cast %16 : vector<1x1x1x10x128xf32> to vector<1x10x128xf32>
    %18 = vector.shape_cast %11 : vector<1x10x128xf32> to vector<1x1x1x10x128xf32>
    tpu.vector_store %arg5[%c0_14, %c0_15, %c9, %c0_16, %c0_17], %18 {strides = array<i32>} : memref<1x1x10x10x128xf32, #tpu.memory_space<vmem>>, vector<1x1x1x10x128xf32>,
    %c0_18 = arith.constant 0 : index
    %c0_19 = arith.constant 0 : index
    %c1 = arith.constant 1 : index
    %c0_20 = arith.constant 0 : index
    %c0_21 = arith.constant 0 : index
    %19 = vector.load %arg5[%c0_18, %c0_19, %c1, %c0_20, %c0_21] : memref<1x1x10x10x128xf32, #tpu.memory_space<vmem>>, vector<1x1x8x1x128xf32>
    %20 = vector.shape_cast %19 : vector<1x1x8x1x128xf32> to vector<8x1x128xf32>
    %21 = vector.shape_cast %12 : vector<8x1x128xf32> to vector<1x1x8x1x128xf32>
    tpu.vector_store %arg5[%c0_18, %c0_19, %c1, %c0_20, %c0_21], %21 {strides = array<i32>} : memref<1x1x10x10x128xf32, #tpu.memory_space<vmem>>, vector<1x1x8x1x128xf32>,
    %c0_22 = arith.constant 0 : index
    %c0_23 = arith.constant 0 : index
    %c1_24 = arith.constant 1 : index
    %c9_25 = arith.constant 9 : index
    %c0_26 = arith.constant 0 : index
    %22 = vector.load %arg5[%c0_22, %c0_23, %c1_24, %c9_25, %c0_26] : memref<1x1x10x10x128xf32, #tpu.memory_space<vmem>>, vector<1x1x8x1x128xf32>
    %23 = vector.shape_cast %22 : vector<1x1x8x1x128xf32> to vector<8x1x128xf32>
    %24 = vector.shape_cast %12 : vector<8x1x128xf32> to vector<1x1x8x1x128xf32>
    tpu.vector_store %arg5[%c0_22, %c0_23, %c1_24, %c9_25, %c0_26], %24 {strides = array<i32>} : memref<1x1x10x10x128xf32, #tpu.memory_space<vmem>>, vector<1x1x8x1x128xf32>,
    %c0_27 = arith.constant 0 : index
    %c0_28 = arith.constant 0 : index
    %c1_29 = arith.constant 1 : index
    %c1_30 = arith.constant 1 : index
    %c0_31 = arith.constant 0 : index
    %25 = vector.load %arg5[%c0_27, %c0_28, %c1_29, %c1_30, %c0_31] : memref<1x1x10x10x128xf32, #tpu.memory_space<vmem>>, vector<1x1x8x8x128xf32>
    %26 = vector.shape_cast %25 : vector<1x1x8x8x128xf32> to vector<8x8x128xf32>
    %27 = vector.shape_cast %10 : vector<8x8x128xf32> to vector<1x1x8x8x128xf32>
    tpu.vector_store %arg5[%c0_27, %c0_28, %c1_29, %c1_30, %c0_31], %27 {strides = array<i32>} : memref<1x1x10x10x128xf32, #tpu.memory_space<vmem>>, vector<1x1x8x8x128xf32>,
    return
  }
  func.func @transform_0(%arg0: i32, %arg1: i32) -> (i32, i32, i32, i32) {
    %c0_i32 = arith.constant 0 : i32
    %c0_i32_0 = arith.constant 0 : i32
    %c0_i32_1 = arith.constant 0 : i32
    return %arg0, %arg1, %c0_i32, %c0_i32_0 : i32, i32, i32, i32
  }
  func.func @transform_1(%arg0: i32, %arg1: i32) -> (i32, i32) {
    %c0_i32 = arith.constant 0 : i32
    %c0_i32_0 = arith.constant 0 : i32
    %c0_i32_1 = arith.constant 0 : i32
    return %c0_i32, %c0_i32_0 : i32, i32
  }
  func.func @transform_2(%arg0: i32, %arg1: i32) -> (i32, i32) {
    %c0_i32 = arith.constant 0 : i32
    %c0_i32_0 = arith.constant 0 : i32
    %c0_i32_1 = arith.constant 0 : i32
    return %c0_i32, %c0_i32_0 : i32, i32
  }
  func.func @transform_3(%arg0: i32, %arg1: i32) -> (i32, i32, i32, i32, i32) {
    %c0_i32 = arith.constant 0 : i32
    %c0_i32_0 = arith.constant 0 : i32
    %c0_i32_1 = arith.constant 0 : i32
    %c0_i32_2 = arith.constant 0 : i32
    return %arg0, %arg1, %c0_i32, %c0_i32_0, %c0_i32_1 : i32, i32, i32, i32, i32
  }
}

module attributes {stable_mosaic.version = 11 : i64} {
  func.func @kernel(%arg0: i32, %arg1: i32, %arg2: memref<1x1x10x10x128xf32, #tpu.memory_space<vmem>>, %arg3: memref<1x1x10x10x128xf32, #tpu.memory_space<vmem>>, %arg4: memref<1x1x10x10x128xf32, #tpu.memory_space<vmem>>, %arg5: memref<3456x128xf32, #tpu.memory_space<vmem>>, %arg6: memref<1x128xf32, #tpu.memory_space<vmem>>, %arg7: memref<1x1x64x128xf32, #tpu.memory_space<vmem>>, %arg8: memref<1x1x2x128xf32, #tpu.memory_space<vmem>>) attributes {dimension_semantics = [#tpu.dimension_semantics<parallel>, #tpu.dimension_semantics<parallel>], iteration_bounds = array<i64: 2, 8>, scalar_prefetch = 0 : i64, scratch_operands = 0 : i64, tpu.core_type = #tpu.core_type<tc>, window_params = [{transform_indices = @transform_0, window_bounds = array<i64: 1, 1, 10, 10, 128>}, {transform_indices = @transform_1, window_bounds = array<i64: 1, 1, 10, 10, 128>}, {transform_indices = @transform_2, window_bounds = array<i64: 1, 1, 10, 10, 128>}, {pipeline_mode = #tpu.pipeline_mode<synchronous>, transform_indices = @transform_3, window_bounds = array<i64: 3456, 128>}, {pipeline_mode = #tpu.pipeline_mode<synchronous>, transform_indices = @transform_4, window_bounds = array<i64: 1, 128>}, {transform_indices = @transform_5, window_bounds = array<i64: 1, 1, 64, 128>}, {transform_indices = @transform_6, window_bounds = array<i64: 1, 1, 2, 128>}]} {
    %c0_i32 = arith.constant 0 : i32
    %0 = arith.cmpi sgt, %arg1, %c0_i32 : i32
    %1 = arith.extui %0 : i1 to i32
    %2 = arith.sitofp %1 : i32 to f32
    %c7_i32 = arith.constant 7 : i32
    %3 = arith.cmpi slt, %arg1, %c7_i32 : i32
    %4 = arith.extui %3 : i1 to i32
    %5 = arith.sitofp %4 : i32 to f32
    %c0 = arith.constant 0 : index
    %c0_0 = arith.constant 0 : index
    %c0_1 = arith.constant 0 : index
    %c0_2 = arith.constant 0 : index
    %c0_3 = arith.constant 0 : index
    %6 = vector.load %arg2[%c0, %c0_0, %c0_1, %c0_2, %c0_3] : memref<1x1x10x10x128xf32, #tpu.memory_space<vmem>>, vector<1x1x10x10x128xf32>
    %7 = vector.shape_cast %6 : vector<1x1x10x10x128xf32> to vector<10x10x128xf32>
    %8 = vector.broadcast %2 : f32 to vector<10x10x128xf32>
    %9 = arith.mulf %7, %8 : vector<10x10x128xf32>
    %c0_4 = arith.constant 0 : index
    %c0_5 = arith.constant 0 : index
    %c0_6 = arith.constant 0 : index
    %c0_7 = arith.constant 0 : index
    %c0_8 = arith.constant 0 : index
    %10 = vector.load %arg3[%c0_4, %c0_5, %c0_6, %c0_7, %c0_8] : memref<1x1x10x10x128xf32, #tpu.memory_space<vmem>>, vector<1x1x10x10x128xf32>
    %11 = vector.shape_cast %10 : vector<1x1x10x10x128xf32> to vector<10x10x128xf32>
    %c0_9 = arith.constant 0 : index
    %c0_10 = arith.constant 0 : index
    %c0_11 = arith.constant 0 : index
    %c0_12 = arith.constant 0 : index
    %c0_13 = arith.constant 0 : index
    %12 = vector.load %arg4[%c0_9, %c0_10, %c0_11, %c0_12, %c0_13] : memref<1x1x10x10x128xf32, #tpu.memory_space<vmem>>, vector<1x1x10x10x128xf32>
    %13 = vector.shape_cast %12 : vector<1x1x10x10x128xf32> to vector<10x10x128xf32>
    %14 = vector.broadcast %5 : f32 to vector<10x10x128xf32>
    %15 = arith.mulf %13, %14 : vector<10x10x128xf32>
    %cst = arith.constant 0.000000e+00 : f32
    %16 = vector.broadcast %cst : f32 to vector<64x128xf32>
    %17 = vector.extract_strided_slice %9 {offsets = [0, 0, 0], sizes = [8, 8, 128], strides = [1, 1, 1]} : vector<10x10x128xf32> to vector<8x8x128xf32>
    %18 = vector.shape_cast %17 : vector<8x8x128xf32> to vector<64x128xf32>
    %19 = vector.extract_strided_slice %11 {offsets = [0, 0, 0], sizes = [8, 8, 128], strides = [1, 1, 1]} : vector<10x10x128xf32> to vector<8x8x128xf32>
    %20 = vector.shape_cast %19 : vector<8x8x128xf32> to vector<64x128xf32>
    %21 = vector.extract_strided_slice %15 {offsets = [0, 0, 0], sizes = [8, 8, 128], strides = [1, 1, 1]} : vector<10x10x128xf32> to vector<8x8x128xf32>
    %22 = vector.shape_cast %21 : vector<8x8x128xf32> to vector<64x128xf32>
    %23 = tpu.concatenate %18, %20, %22 in 1 : vector<64x128xf32>, vector<64x128xf32>, vector<64x128xf32> -> vector<64x384xf32>
    %c0_14 = arith.constant 0 : index
    %c0_15 = arith.constant 0 : index
    %24 = vector.load %arg5[%c0_14, %c0_15] : memref<3456x128xf32, #tpu.memory_space<vmem>>, vector<384x128xf32>
    %cst_16 = arith.constant dense<0.000000e+00> : vector<64x128xf32>
    %25 = tpu.matmul %23, %24, %cst_16 {dimension_numbers = #tpu.dot_dimension_numbers<[1], [0], [0], [1], [0, 0, 1, 1], [], []>} : vector<64x384xf32>, vector<384x128xf32>, vector<64x128xf32> -> vector<64x128xf32>
    %26 = arith.addf %16, %25 : vector<64x128xf32>
    %27 = vector.extract_strided_slice %9 {offsets = [0, 1, 0], sizes = [8, 8, 128], strides = [1, 1, 1]} : vector<10x10x128xf32> to vector<8x8x128xf32>
    %28 = vector.shape_cast %27 : vector<8x8x128xf32> to vector<64x128xf32>
    %29 = vector.extract_strided_slice %11 {offsets = [0, 1, 0], sizes = [8, 8, 128], strides = [1, 1, 1]} : vector<10x10x128xf32> to vector<8x8x128xf32>
    %30 = vector.shape_cast %29 : vector<8x8x128xf32> to vector<64x128xf32>
    %31 = vector.extract_strided_slice %15 {offsets = [0, 1, 0], sizes = [8, 8, 128], strides = [1, 1, 1]} : vector<10x10x128xf32> to vector<8x8x128xf32>
    %32 = vector.shape_cast %31 : vector<8x8x128xf32> to vector<64x128xf32>
    %33 = tpu.concatenate %28, %30, %32 in 1 : vector<64x128xf32>, vector<64x128xf32>, vector<64x128xf32> -> vector<64x384xf32>
    %c384 = arith.constant 384 : index
    %c0_17 = arith.constant 0 : index
    %34 = vector.load %arg5[%c384, %c0_17] : memref<3456x128xf32, #tpu.memory_space<vmem>>, vector<384x128xf32>
    %cst_18 = arith.constant dense<0.000000e+00> : vector<64x128xf32>
    %35 = tpu.matmul %33, %34, %cst_18 {dimension_numbers = #tpu.dot_dimension_numbers<[1], [0], [0], [1], [0, 0, 1, 1], [], []>} : vector<64x384xf32>, vector<384x128xf32>, vector<64x128xf32> -> vector<64x128xf32>
    %36 = arith.addf %26, %35 : vector<64x128xf32>
    %37 = vector.extract_strided_slice %9 {offsets = [0, 2, 0], sizes = [8, 8, 128], strides = [1, 1, 1]} : vector<10x10x128xf32> to vector<8x8x128xf32>
    %38 = vector.shape_cast %37 : vector<8x8x128xf32> to vector<64x128xf32>
    %39 = vector.extract_strided_slice %11 {offsets = [0, 2, 0], sizes = [8, 8, 128], strides = [1, 1, 1]} : vector<10x10x128xf32> to vector<8x8x128xf32>
    %40 = vector.shape_cast %39 : vector<8x8x128xf32> to vector<64x128xf32>
    %41 = vector.extract_strided_slice %15 {offsets = [0, 2, 0], sizes = [8, 8, 128], strides = [1, 1, 1]} : vector<10x10x128xf32> to vector<8x8x128xf32>
    %42 = vector.shape_cast %41 : vector<8x8x128xf32> to vector<64x128xf32>
    %43 = tpu.concatenate %38, %40, %42 in 1 : vector<64x128xf32>, vector<64x128xf32>, vector<64x128xf32> -> vector<64x384xf32>
    %c768 = arith.constant 768 : index
    %c0_19 = arith.constant 0 : index
    %44 = vector.load %arg5[%c768, %c0_19] : memref<3456x128xf32, #tpu.memory_space<vmem>>, vector<384x128xf32>
    %cst_20 = arith.constant dense<0.000000e+00> : vector<64x128xf32>
    %45 = tpu.matmul %43, %44, %cst_20 {dimension_numbers = #tpu.dot_dimension_numbers<[1], [0], [0], [1], [0, 0, 1, 1], [], []>} : vector<64x384xf32>, vector<384x128xf32>, vector<64x128xf32> -> vector<64x128xf32>
    %46 = arith.addf %36, %45 : vector<64x128xf32>
    %47 = vector.extract_strided_slice %9 {offsets = [1, 0, 0], sizes = [8, 8, 128], strides = [1, 1, 1]} : vector<10x10x128xf32> to vector<8x8x128xf32>
    %48 = vector.shape_cast %47 : vector<8x8x128xf32> to vector<64x128xf32>
    %49 = vector.extract_strided_slice %11 {offsets = [1, 0, 0], sizes = [8, 8, 128], strides = [1, 1, 1]} : vector<10x10x128xf32> to vector<8x8x128xf32>
    %50 = vector.shape_cast %49 : vector<8x8x128xf32> to vector<64x128xf32>
    %51 = vector.extract_strided_slice %15 {offsets = [1, 0, 0], sizes = [8, 8, 128], strides = [1, 1, 1]} : vector<10x10x128xf32> to vector<8x8x128xf32>
    %52 = vector.shape_cast %51 : vector<8x8x128xf32> to vector<64x128xf32>
    %53 = tpu.concatenate %48, %50, %52 in 1 : vector<64x128xf32>, vector<64x128xf32>, vector<64x128xf32> -> vector<64x384xf32>
    %c1152 = arith.constant 1152 : index
    %c0_21 = arith.constant 0 : index
    %54 = vector.load %arg5[%c1152, %c0_21] : memref<3456x128xf32, #tpu.memory_space<vmem>>, vector<384x128xf32>
    %cst_22 = arith.constant dense<0.000000e+00> : vector<64x128xf32>
    %55 = tpu.matmul %53, %54, %cst_22 {dimension_numbers = #tpu.dot_dimension_numbers<[1], [0], [0], [1], [0, 0, 1, 1], [], []>} : vector<64x384xf32>, vector<384x128xf32>, vector<64x128xf32> -> vector<64x128xf32>
    %56 = arith.addf %46, %55 : vector<64x128xf32>
    %57 = vector.extract_strided_slice %9 {offsets = [1, 1, 0], sizes = [8, 8, 128], strides = [1, 1, 1]} : vector<10x10x128xf32> to vector<8x8x128xf32>
    %58 = vector.shape_cast %57 : vector<8x8x128xf32> to vector<64x128xf32>
    %59 = vector.extract_strided_slice %11 {offsets = [1, 1, 0], sizes = [8, 8, 128], strides = [1, 1, 1]} : vector<10x10x128xf32> to vector<8x8x128xf32>
    %60 = vector.shape_cast %59 : vector<8x8x128xf32> to vector<64x128xf32>
    %61 = vector.extract_strided_slice %15 {offsets = [1, 1, 0], sizes = [8, 8, 128], strides = [1, 1, 1]} : vector<10x10x128xf32> to vector<8x8x128xf32>
    %62 = vector.shape_cast %61 : vector<8x8x128xf32> to vector<64x128xf32>
    %63 = tpu.concatenate %58, %60, %62 in 1 : vector<64x128xf32>, vector<64x128xf32>, vector<64x128xf32> -> vector<64x384xf32>
    %c1536 = arith.constant 1536 : index
    %c0_23 = arith.constant 0 : index
    %64 = vector.load %arg5[%c1536, %c0_23] : memref<3456x128xf32, #tpu.memory_space<vmem>>, vector<384x128xf32>
    %cst_24 = arith.constant dense<0.000000e+00> : vector<64x128xf32>
    %65 = tpu.matmul %63, %64, %cst_24 {dimension_numbers = #tpu.dot_dimension_numbers<[1], [0], [0], [1], [0, 0, 1, 1], [], []>} : vector<64x384xf32>, vector<384x128xf32>, vector<64x128xf32> -> vector<64x128xf32>
    %66 = arith.addf %56, %65 : vector<64x128xf32>
    %67 = vector.extract_strided_slice %9 {offsets = [1, 2, 0], sizes = [8, 8, 128], strides = [1, 1, 1]} : vector<10x10x128xf32> to vector<8x8x128xf32>
    %68 = vector.shape_cast %67 : vector<8x8x128xf32> to vector<64x128xf32>
    %69 = vector.extract_strided_slice %11 {offsets = [1, 2, 0], sizes = [8, 8, 128], strides = [1, 1, 1]} : vector<10x10x128xf32> to vector<8x8x128xf32>
    %70 = vector.shape_cast %69 : vector<8x8x128xf32> to vector<64x128xf32>
    %71 = vector.extract_strided_slice %15 {offsets = [1, 2, 0], sizes = [8, 8, 128], strides = [1, 1, 1]} : vector<10x10x128xf32> to vector<8x8x128xf32>
    %72 = vector.shape_cast %71 : vector<8x8x128xf32> to vector<64x128xf32>
    %73 = tpu.concatenate %68, %70, %72 in 1 : vector<64x128xf32>, vector<64x128xf32>, vector<64x128xf32> -> vector<64x384xf32>
    %c1920 = arith.constant 1920 : index
    %c0_25 = arith.constant 0 : index
    %74 = vector.load %arg5[%c1920, %c0_25] : memref<3456x128xf32, #tpu.memory_space<vmem>>, vector<384x128xf32>
    %cst_26 = arith.constant dense<0.000000e+00> : vector<64x128xf32>
    %75 = tpu.matmul %73, %74, %cst_26 {dimension_numbers = #tpu.dot_dimension_numbers<[1], [0], [0], [1], [0, 0, 1, 1], [], []>} : vector<64x384xf32>, vector<384x128xf32>, vector<64x128xf32> -> vector<64x128xf32>
    %76 = arith.addf %66, %75 : vector<64x128xf32>
    %77 = vector.extract_strided_slice %9 {offsets = [2, 0, 0], sizes = [8, 8, 128], strides = [1, 1, 1]} : vector<10x10x128xf32> to vector<8x8x128xf32>
    %78 = vector.shape_cast %77 : vector<8x8x128xf32> to vector<64x128xf32>
    %79 = vector.extract_strided_slice %11 {offsets = [2, 0, 0], sizes = [8, 8, 128], strides = [1, 1, 1]} : vector<10x10x128xf32> to vector<8x8x128xf32>
    %80 = vector.shape_cast %79 : vector<8x8x128xf32> to vector<64x128xf32>
    %81 = vector.extract_strided_slice %15 {offsets = [2, 0, 0], sizes = [8, 8, 128], strides = [1, 1, 1]} : vector<10x10x128xf32> to vector<8x8x128xf32>
    %82 = vector.shape_cast %81 : vector<8x8x128xf32> to vector<64x128xf32>
    %83 = tpu.concatenate %78, %80, %82 in 1 : vector<64x128xf32>, vector<64x128xf32>, vector<64x128xf32> -> vector<64x384xf32>
    %c2304 = arith.constant 2304 : index
    %c0_27 = arith.constant 0 : index
    %84 = vector.load %arg5[%c2304, %c0_27] : memref<3456x128xf32, #tpu.memory_space<vmem>>, vector<384x128xf32>
    %cst_28 = arith.constant dense<0.000000e+00> : vector<64x128xf32>
    %85 = tpu.matmul %83, %84, %cst_28 {dimension_numbers = #tpu.dot_dimension_numbers<[1], [0], [0], [1], [0, 0, 1, 1], [], []>} : vector<64x384xf32>, vector<384x128xf32>, vector<64x128xf32> -> vector<64x128xf32>
    %86 = arith.addf %76, %85 : vector<64x128xf32>
    %87 = vector.extract_strided_slice %9 {offsets = [2, 1, 0], sizes = [8, 8, 128], strides = [1, 1, 1]} : vector<10x10x128xf32> to vector<8x8x128xf32>
    %88 = vector.shape_cast %87 : vector<8x8x128xf32> to vector<64x128xf32>
    %89 = vector.extract_strided_slice %11 {offsets = [2, 1, 0], sizes = [8, 8, 128], strides = [1, 1, 1]} : vector<10x10x128xf32> to vector<8x8x128xf32>
    %90 = vector.shape_cast %89 : vector<8x8x128xf32> to vector<64x128xf32>
    %91 = vector.extract_strided_slice %15 {offsets = [2, 1, 0], sizes = [8, 8, 128], strides = [1, 1, 1]} : vector<10x10x128xf32> to vector<8x8x128xf32>
    %92 = vector.shape_cast %91 : vector<8x8x128xf32> to vector<64x128xf32>
    %93 = tpu.concatenate %88, %90, %92 in 1 : vector<64x128xf32>, vector<64x128xf32>, vector<64x128xf32> -> vector<64x384xf32>
    %c2688 = arith.constant 2688 : index
    %c0_29 = arith.constant 0 : index
    %94 = vector.load %arg5[%c2688, %c0_29] : memref<3456x128xf32, #tpu.memory_space<vmem>>, vector<384x128xf32>
    %cst_30 = arith.constant dense<0.000000e+00> : vector<64x128xf32>
    %95 = tpu.matmul %93, %94, %cst_30 {dimension_numbers = #tpu.dot_dimension_numbers<[1], [0], [0], [1], [0, 0, 1, 1], [], []>} : vector<64x384xf32>, vector<384x128xf32>, vector<64x128xf32> -> vector<64x128xf32>
    %96 = arith.addf %86, %95 : vector<64x128xf32>
    %97 = vector.extract_strided_slice %9 {offsets = [2, 2, 0], sizes = [8, 8, 128], strides = [1, 1, 1]} : vector<10x10x128xf32> to vector<8x8x128xf32>
    %98 = vector.shape_cast %97 : vector<8x8x128xf32> to vector<64x128xf32>
    %99 = vector.extract_strided_slice %11 {offsets = [2, 2, 0], sizes = [8, 8, 128], strides = [1, 1, 1]} : vector<10x10x128xf32> to vector<8x8x128xf32>
    %100 = vector.shape_cast %99 : vector<8x8x128xf32> to vector<64x128xf32>
    %101 = vector.extract_strided_slice %15 {offsets = [2, 2, 0], sizes = [8, 8, 128], strides = [1, 1, 1]} : vector<10x10x128xf32> to vector<8x8x128xf32>
    %102 = vector.shape_cast %101 : vector<8x8x128xf32> to vector<64x128xf32>
    %103 = tpu.concatenate %98, %100, %102 in 1 : vector<64x128xf32>, vector<64x128xf32>, vector<64x128xf32> -> vector<64x384xf32>
    %c3072 = arith.constant 3072 : index
    %c0_31 = arith.constant 0 : index
    %104 = vector.load %arg5[%c3072, %c0_31] : memref<3456x128xf32, #tpu.memory_space<vmem>>, vector<384x128xf32>
    %cst_32 = arith.constant dense<0.000000e+00> : vector<64x128xf32>
    %105 = tpu.matmul %103, %104, %cst_32 {dimension_numbers = #tpu.dot_dimension_numbers<[1], [0], [0], [1], [0, 0, 1, 1], [], []>} : vector<64x384xf32>, vector<384x128xf32>, vector<64x128xf32> -> vector<64x128xf32>
    %106 = arith.addf %96, %105 : vector<64x128xf32>
    %c0_33 = arith.constant 0 : index
    %c0_34 = arith.constant 0 : index
    %107 = vector.load %arg6[%c0_33, %c0_34] : memref<1x128xf32, #tpu.memory_space<vmem>>, vector<1x128xf32>
    %108 = vector.broadcast %107 : vector<1x128xf32> to vector<64x128xf32>
    %109 = arith.addf %106, %108 : vector<64x128xf32>
    %c0_35 = arith.constant 0 : index
    %c0_36 = arith.constant 0 : index
    %c0_37 = arith.constant 0 : index
    %c0_38 = arith.constant 0 : index
    %110 = vector.load %arg7[%c0_35, %c0_36, %c0_37, %c0_38] : memref<1x1x64x128xf32, #tpu.memory_space<vmem>>, vector<1x1x64x128xf32>
    %111 = vector.shape_cast %110 : vector<1x1x64x128xf32> to vector<64x128xf32>
    %112 = vector.shape_cast %109 : vector<64x128xf32> to vector<1x1x64x128xf32>
    tpu.vector_store %arg7[%c0_35, %c0_36, %c0_37, %c0_38], %112 {strides = array<i32>} : memref<1x1x64x128xf32, #tpu.memory_space<vmem>>, vector<1x1x64x128xf32>,
    %cst_39 = arith.constant dense<0.000000e+00> : vector<128xf32>
    %113 = vector.multi_reduction <add>, %109, %cst_39 [0] : vector<64x128xf32> to vector<128xf32>
    %114 = vector.shape_cast %113 : vector<128xf32> to vector<1x128xf32>
    %cst_40 = arith.constant 1.562500e-02 : f32
    %115 = vector.broadcast %cst_40 : f32 to vector<1x128xf32>
    %116 = arith.mulf %114, %115 : vector<1x128xf32>
    %117 = vector.broadcast %116 : vector<1x128xf32> to vector<64x128xf32>
    %118 = arith.subf %109, %117 : vector<64x128xf32>
    %c0_41 = arith.constant 0 : index
    %c0_42 = arith.constant 0 : index
    %c0_43 = arith.constant 0 : index
    %c0_44 = arith.constant 0 : index
    %119 = vector.load %arg8[%c0_41, %c0_42, %c0_43, %c0_44] : memref<1x1x2x128xf32, #tpu.memory_space<vmem>>, vector<1x1x1x128xf32>
    %120 = vector.shape_cast %119 : vector<1x1x1x128xf32> to vector<1x128xf32>
    %121 = vector.shape_cast %114 : vector<1x128xf32> to vector<1x1x1x128xf32>
    tpu.vector_store %arg8[%c0_41, %c0_42, %c0_43, %c0_44], %121 {strides = array<i32>} : memref<1x1x2x128xf32, #tpu.memory_space<vmem>>, vector<1x1x1x128xf32>,
    %122 = arith.mulf %118, %118 : vector<64x128xf32>
    %cst_45 = arith.constant dense<0.000000e+00> : vector<128xf32>
    %123 = vector.multi_reduction <add>, %122, %cst_45 [0] : vector<64x128xf32> to vector<128xf32>
    %124 = vector.shape_cast %123 : vector<128xf32> to vector<1x128xf32>
    %c0_46 = arith.constant 0 : index
    %c0_47 = arith.constant 0 : index
    %c1 = arith.constant 1 : index
    %c0_48 = arith.constant 0 : index
    %125 = vector.load %arg8[%c0_46, %c0_47, %c1, %c0_48] : memref<1x1x2x128xf32, #tpu.memory_space<vmem>>, vector<1x1x1x128xf32>
    %126 = vector.shape_cast %125 : vector<1x1x1x128xf32> to vector<1x128xf32>
    %127 = vector.shape_cast %124 : vector<1x128xf32> to vector<1x1x1x128xf32>
    tpu.vector_store %arg8[%c0_46, %c0_47, %c1, %c0_48], %127 {strides = array<i32>} : memref<1x1x2x128xf32, #tpu.memory_space<vmem>>, vector<1x1x1x128xf32>,
    return
  }
  func.func @transform_0(%arg0: i32, %arg1: i32) -> (i32, i32, i32, i32, i32) {
    %c1_i32 = arith.constant 1 : i32
    %0 = arith.subi %arg1, %c1_i32 : i32
    %c0_i32 = arith.constant 0 : i32
    %1 = arith.maxsi %0, %c0_i32 : i32
    %c0_i32_0 = arith.constant 0 : i32
    %c0_i32_1 = arith.constant 0 : i32
    %c0_i32_2 = arith.constant 0 : i32
    %c0_i32_3 = arith.constant 0 : i32
    return %arg0, %1, %c0_i32_0, %c0_i32_1, %c0_i32_2 : i32, i32, i32, i32, i32
  }
  func.func @transform_1(%arg0: i32, %arg1: i32) -> (i32, i32, i32, i32, i32) {
    %c0_i32 = arith.constant 0 : i32
    %c0_i32_0 = arith.constant 0 : i32
    %c0_i32_1 = arith.constant 0 : i32
    %c0_i32_2 = arith.constant 0 : i32
    return %arg0, %arg1, %c0_i32, %c0_i32_0, %c0_i32_1 : i32, i32, i32, i32, i32
  }
  func.func @transform_2(%arg0: i32, %arg1: i32) -> (i32, i32, i32, i32, i32) {
    %c1_i32 = arith.constant 1 : i32
    %0 = arith.addi %arg1, %c1_i32 : i32
    %c7_i32 = arith.constant 7 : i32
    %1 = arith.minsi %0, %c7_i32 : i32
    %c0_i32 = arith.constant 0 : i32
    %c0_i32_0 = arith.constant 0 : i32
    %c0_i32_1 = arith.constant 0 : i32
    %c0_i32_2 = arith.constant 0 : i32
    return %arg0, %1, %c0_i32, %c0_i32_0, %c0_i32_1 : i32, i32, i32, i32, i32
  }
  func.func @transform_3(%arg0: i32, %arg1: i32) -> (i32, i32) {
    %c0_i32 = arith.constant 0 : i32
    %c0_i32_0 = arith.constant 0 : i32
    %c0_i32_1 = arith.constant 0 : i32
    return %c0_i32, %c0_i32_0 : i32, i32
  }
  func.func @transform_4(%arg0: i32, %arg1: i32) -> (i32, i32) {
    %c0_i32 = arith.constant 0 : i32
    %c0_i32_0 = arith.constant 0 : i32
    %c0_i32_1 = arith.constant 0 : i32
    return %c0_i32, %c0_i32_0 : i32, i32
  }
  func.func @transform_5(%arg0: i32, %arg1: i32) -> (i32, i32, i32, i32) {
    %c0_i32 = arith.constant 0 : i32
    %c0_i32_0 = arith.constant 0 : i32
    %c0_i32_1 = arith.constant 0 : i32
    return %arg0, %arg1, %c0_i32, %c0_i32_0 : i32, i32, i32, i32
  }
  func.func @transform_6(%arg0: i32, %arg1: i32) -> (i32, i32, i32, i32) {
    %c0_i32 = arith.constant 0 : i32
    %c0_i32_0 = arith.constant 0 : i32
    %c0_i32_1 = arith.constant 0 : i32
    return %arg0, %arg1, %c0_i32, %c0_i32_0 : i32, i32, i32, i32
  }
}

module attributes {stable_mosaic.version = 11 : i64} {
  func.func @kernel(%arg0: i32, %arg1: i32, %arg2: memref<1x2x64x128xf32, #tpu.memory_space<vmem>>, %arg3: memref<1x128xf32, #tpu.memory_space<vmem>>, %arg4: memref<1x128xf32, #tpu.memory_space<vmem>>, %arg5: memref<1x2x64x128xf32, #tpu.memory_space<vmem>>, %arg6: memref<1x1x16x128xf32, #tpu.memory_space<vmem>>) attributes {dimension_semantics = [#tpu.dimension_semantics<parallel>, #tpu.dimension_semantics<parallel>], iteration_bounds = array<i64: 2, 4>, scalar_prefetch = 0 : i64, scratch_operands = 0 : i64, tpu.core_type = #tpu.core_type<tc>, window_params = [{transform_indices = @transform_0, window_bounds = array<i64: 1, 2, 64, 128>}, {pipeline_mode = #tpu.pipeline_mode<synchronous>, transform_indices = @transform_1, window_bounds = array<i64: 1, 128>}, {pipeline_mode = #tpu.pipeline_mode<synchronous>, transform_indices = @transform_2, window_bounds = array<i64: 1, 128>}, {transform_indices = @transform_3, window_bounds = array<i64: 1, 2, 64, 128>}, {transform_indices = @transform_4, window_bounds = array<i64: 1, 1, 16, 128>}]} {
    %c0 = arith.constant 0 : index
    %c0_0 = arith.constant 0 : index
    %c0_1 = arith.constant 0 : index
    %c0_2 = arith.constant 0 : index
    %0 = vector.load %arg2[%c0, %c0_0, %c0_1, %c0_2] : memref<1x2x64x128xf32, #tpu.memory_space<vmem>>, vector<1x2x64x128xf32>
    %1 = vector.shape_cast %0 : vector<1x2x64x128xf32> to vector<2x64x128xf32>
    %c0_3 = arith.constant 0 : index
    %c0_4 = arith.constant 0 : index
    %2 = vector.load %arg3[%c0_3, %c0_4] : memref<1x128xf32, #tpu.memory_space<vmem>>, vector<1x128xf32>
    %3 = vector.shape_cast %2 : vector<1x128xf32> to vector<1x1x128xf32>
    %4 = vector.broadcast %3 : vector<1x1x128xf32> to vector<2x64x128xf32>
    %5 = arith.mulf %1, %4 : vector<2x64x128xf32>
    %c0_5 = arith.constant 0 : index
    %c0_6 = arith.constant 0 : index
    %6 = vector.load %arg4[%c0_5, %c0_6] : memref<1x128xf32, #tpu.memory_space<vmem>>, vector<1x128xf32>
    %7 = vector.shape_cast %6 : vector<1x128xf32> to vector<1x1x128xf32>
    %8 = vector.broadcast %7 : vector<1x1x128xf32> to vector<2x64x128xf32>
    %9 = arith.addf %5, %8 : vector<2x64x128xf32>
    %cst = arith.constant 0.000000e+00 : f32
    %10 = vector.broadcast %cst : f32 to vector<2x64x128xf32>
    %11 = arith.maximumf %9, %10 : vector<2x64x128xf32>
    %c0_7 = arith.constant 0 : index
    %c0_8 = arith.constant 0 : index
    %c0_9 = arith.constant 0 : index
    %c0_10 = arith.constant 0 : index
    %12 = vector.load %arg5[%c0_7, %c0_8, %c0_9, %c0_10] : memref<1x2x64x128xf32, #tpu.memory_space<vmem>>, vector<1x2x64x128xf32>
    %13 = vector.shape_cast %12 : vector<1x2x64x128xf32> to vector<2x64x128xf32>
    %14 = vector.shape_cast %11 : vector<2x64x128xf32> to vector<1x2x64x128xf32>
    tpu.vector_store %arg5[%c0_7, %c0_8, %c0_9, %c0_10], %14 {strides = array<i32>} : memref<1x2x64x128xf32, #tpu.memory_space<vmem>>, vector<1x2x64x128xf32>,
    %15 = vector.extract_strided_slice %11 {offsets = [0, 0, 0], sizes = [1, 64, 128], strides = [1, 1, 1]} : vector<2x64x128xf32> to vector<1x64x128xf32>
    %16 = vector.shape_cast %15 : vector<1x64x128xf32> to vector<64x128xf32>
    %17 = vector.extract_strided_slice %11 {offsets = [1, 0, 0], sizes = [1, 64, 128], strides = [1, 1, 1]} : vector<2x64x128xf32> to vector<1x64x128xf32>
    %18 = vector.shape_cast %17 : vector<1x64x128xf32> to vector<64x128xf32>
    %19 = arith.maximumf %16, %18 : vector<64x128xf32>
    %20 = vector.shape_cast %19 : vector<64x128xf32> to vector<4x2x4x2x128xf32>
    %21 = vector.extract_strided_slice %20 {offsets = [0, 0, 0, 0, 0], sizes = [4, 1, 4, 2, 128], strides = [1, 1, 1, 1, 1]} : vector<4x2x4x2x128xf32> to vector<4x1x4x2x128xf32>
    %22 = vector.shape_cast %21 : vector<4x1x4x2x128xf32> to vector<4x4x2x128xf32>
    %23 = vector.extract_strided_slice %20 {offsets = [0, 1, 0, 0, 0], sizes = [4, 1, 4, 2, 128], strides = [1, 1, 1, 1, 1]} : vector<4x2x4x2x128xf32> to vector<4x1x4x2x128xf32>
    %24 = vector.shape_cast %23 : vector<4x1x4x2x128xf32> to vector<4x4x2x128xf32>
    %25 = arith.maximumf %22, %24 : vector<4x4x2x128xf32>
    %26 = vector.extract_strided_slice %25 {offsets = [0, 0, 0, 0], sizes = [4, 4, 1, 128], strides = [1, 1, 1, 1]} : vector<4x4x2x128xf32> to vector<4x4x1x128xf32>
    %27 = vector.shape_cast %26 : vector<4x4x1x128xf32> to vector<4x4x128xf32>
    %28 = vector.extract_strided_slice %25 {offsets = [0, 0, 1, 0], sizes = [4, 4, 1, 128], strides = [1, 1, 1, 1]} : vector<4x4x2x128xf32> to vector<4x4x1x128xf32>
    %29 = vector.shape_cast %28 : vector<4x4x1x128xf32> to vector<4x4x128xf32>
    %30 = arith.maximumf %27, %29 : vector<4x4x128xf32>
    %31 = vector.shape_cast %30 : vector<4x4x128xf32> to vector<16x128xf32>
    %c0_11 = arith.constant 0 : index
    %c0_12 = arith.constant 0 : index
    %c0_13 = arith.constant 0 : index
    %c0_14 = arith.constant 0 : index
    %32 = vector.load %arg6[%c0_11, %c0_12, %c0_13, %c0_14] : memref<1x1x16x128xf32, #tpu.memory_space<vmem>>, vector<1x1x16x128xf32>
    %33 = vector.shape_cast %32 : vector<1x1x16x128xf32> to vector<16x128xf32>
    %34 = vector.shape_cast %31 : vector<16x128xf32> to vector<1x1x16x128xf32>
    tpu.vector_store %arg6[%c0_11, %c0_12, %c0_13, %c0_14], %34 {strides = array<i32>} : memref<1x1x16x128xf32, #tpu.memory_space<vmem>>, vector<1x1x16x128xf32>,
    return
  }
  func.func @transform_0(%arg0: i32, %arg1: i32) -> (i32, i32, i32, i32) {
    %c0_i32 = arith.constant 0 : i32
    %c0_i32_0 = arith.constant 0 : i32
    %c0_i32_1 = arith.constant 0 : i32
    return %arg0, %arg1, %c0_i32, %c0_i32_0 : i32, i32, i32, i32
  }
  func.func @transform_1(%arg0: i32, %arg1: i32) -> (i32, i32) {
    %c0_i32 = arith.constant 0 : i32
    %c0_i32_0 = arith.constant 0 : i32
    %c0_i32_1 = arith.constant 0 : i32
    return %c0_i32, %c0_i32_0 : i32, i32
  }
  func.func @transform_2(%arg0: i32, %arg1: i32) -> (i32, i32) {
    %c0_i32 = arith.constant 0 : i32
    %c0_i32_0 = arith.constant 0 : i32
    %c0_i32_1 = arith.constant 0 : i32
    return %c0_i32, %c0_i32_0 : i32, i32
  }
  func.func @transform_3(%arg0: i32, %arg1: i32) -> (i32, i32, i32, i32) {
    %c0_i32 = arith.constant 0 : i32
    %c0_i32_0 = arith.constant 0 : i32
    %c0_i32_1 = arith.constant 0 : i32
    return %arg0, %arg1, %c0_i32, %c0_i32_0 : i32, i32, i32, i32
  }
  func.func @transform_4(%arg0: i32, %arg1: i32) -> (i32, i32, i32, i32) {
    %c0_i32 = arith.constant 0 : i32
    %c0_i32_0 = arith.constant 0 : i32
    %c0_i32_1 = arith.constant 0 : i32
    return %arg0, %arg1, %c0_i32, %c0_i32_0 : i32, i32, i32, i32
  }
}

</mosaic_0001>

<bundles_post_ra>
// kernel: encoder_block.5
= control target key start
LH: loop header
LB: loop body
LE: loop exit
PB: predicated region body
PF: predicated region fallthrough
CT: control target
= control target key end

     0   :  { %s515_s12 = smov 0   ;;  %s517_s13 = smov 0   ;;  %s602_s0 = inlined_call_operand.vmem [shape: f32[2,8,64,128], index: 0, kind: input, shape index: {}]   ;;  %s603_s1 = inlined_call_operand.vmem [shape: f32[1,128], index: 1, kind: input, shape index: {}]   ;;  %s604_s2 = inlined_call_operand.vmem [shape: f32[1,128], index: 2, kind: input, shape index: {}]   ;;  %s605_s3 = inlined_call_operand.vmem [shape: f32[2,8,10,10,128], index: 3, kind: output, shape index: {}]  }
   0x1   :  { %s519_s14 = smov 0   ;;  %s521_s15 = smov 0  }
   0x2   :  { %s523_s16 = smov 0  }
   0x3 LB: > { %s22_s17 = sadd.s32 1, %s484_s14  ;;  %s25_s18 = sadd.s32 1, %s488_s15  ;;  %s492_s16 = sphi %s523_s16, %s13_s16   ;;  %s488_s15 = sphi %s521_s15, %s609_s15   ;;  %s484_s14 = sphi %s519_s14, %s608_s14   ;;  %s480_s13 = sphi %s517_s13, %s607_s13   ;;  %s476_s12 = sphi %s515_s12, %s606_s12  }
   0x4   : > { %p23_p0 = scmp.ge.s32.totalorder %s22_s17, 8  ;;  %p376_p1 = scmp.ge.s32.totalorder %s492_s16, 1 }
   0x5   : > { %p157_p2 = scmp.lt.s32.totalorder %s492_s16, 17 }
   0x6   : > { %s611_s17 = smov (%p23_p0, %s22_s17), 0  ;;  %s613_s18 = smov (!%p23_p0, %s25_s18), %s488_s15 }
   0x7   : > { %p158_p3 = pnand %p376_p1, %p157_p2  ;;  %p27_p4 = scmp.ge.s32.totalorder %s613_s18, 2 }
   0x8   : > { %p189_p5 = scmp.lt.s32.totalorder (!%p158_p3), %s480_s13, 1  ;;  %p191_p6 = scmp.lt.s32.totalorder (!%p158_p3), %s476_s12, 7 }
   0x9   : > { %s615_s18 = smov (%p27_p4, %s613_s18), 0  ;;  %161 = sbr.rel (%p158_p3) target bundleno = 49 (0x31), region = 32 }
   0xe   : > { %s617_s13 = smov (!%p189_p5, %s480_s13), 1  ;;  %s619_s12 = smov (!%p191_p6, %s476_s12), 7  ;;  %v494_v0 = vmov 0.0   ;;  %v452_v1 = vld [vmem:[%s603_s1] ss:$0 sm:$0xff] }
   0xf   : > { %s410_s19 = smul.u32 160, %s617_s13  ;;  %s378_s20 = sshll.u32 %s617_s13, 6  ;;  %v453_v6 = vld [vmem:[%s604_s2] ss:$0 sm:$0xff] }
  0x10   : > { %s409_s21 = smul.u32 20, %s619_s12  ;;  %s377_s22 = sshll.u32 %s619_s12, 3 }
  0x11   : > { %s195_s23 = sadd.s32 %s378_s20, %s377_s22 }
  0x12   : > { %s204_s24 = sadd.s32 %s410_s19, %s409_s21  ;;  %s379_s29 = sshll.u32 %s195_s23, 3 }
  0x13   : > { %s380_s25 = sshll.u32 %s204_s24, 3  ;;  %s197_s5 = scalar_lea.vmem %s602_s0, %s379_s29 }
  0x14   : > { %s548_s28 = scalar_lea.vmem %s605_s3, %s380_s25  ;;  %v207_v2 = vld [vmem:[%s197_s5] sm:$0xff]  ;;  %v208_v3 = vld [vmem:[%s197_s5 + $0x8] sm:$0xff]  ;;  %v209_v4 = vld [vmem:[%s197_s5 + $0x10] sm:$0xff] }
  0x15   : > { %247 = vst [vmem:[%s548_s28] sm:$0xff] %v494_v0  ;;  %v219_v5 = vmul.f32 %v452_v1, %v207_v2  ;;  %v210_v7 = vld [vmem:[%s197_s5 + $0x18] sm:$0xff]  ;;  %v220_v8 = vmul.f32 %v452_v1, %v208_v3  ;;  %v211_v9 = vld [vmem:[%s197_s5 + $0x20] sm:$0xff]  ;;  %v221_v10 = vmul.f32 %v452_v1, %v209_v4  ;;  %v212_v11 = vld [vmem:[%s197_s5 + $0x28] sm:$0xff] }
  0x16   : > { %248 = vst [vmem:[%s548_s28 + $0x8] sm:$0x3] %v494_v0  ;;  %v222_v12 = vmul.f32 %v452_v1, %v210_v7  ;;  %v213_v13 = vld [vmem:[%s197_s5 + $0x30] sm:$0xff]  ;;  %v223_v15 = vmul.f32 %v452_v1, %v211_v9  ;;  %v214_v16 = vld [vmem:[%s197_s5 + $0x38] sm:$0xff]  ;;  %v224_v18 = vmul.f32 %v452_v1, %v212_v11 }
  0x17   : > { %381 = vst [vmem:[%s548_s28 + $0x90] sm:$0xff] %v494_v0  ;;  %v231_v14 = vadd.f32 %v453_v6, %v219_v5  ;;  %v232_v17 = vadd.f32 %v453_v6, %v220_v8  ;;  %v233_v19 = vadd.f32 %v453_v6, %v221_v10  ;;  %v225_v20 = vmul.f32 %v452_v1, %v213_v13 }
  0x18   : > { %382 = vst [vmem:[%s548_s28 + $0x98] sm:$0x3] %v494_v0  ;;  %v234_v21 = vadd.f32 %v453_v6, %v222_v12  ;;  %v226_v22 = vmul.f32 %v452_v1, %v214_v16  ;;  %v235_v24 = vadd.f32 %v453_v6, %v223_v15  ;;  %v236_v26 = vadd.f32 %v453_v6, %v224_v18 }
  0x19   : > { %383 = vst [vmem:[%s548_s28 + $0x10] sm:$0x1] %v494_v0  ;;  %v239_v23 = vmax.f32 %v231_v14, 0.0  ;;  %v240_v25 = vmax.f32 %v232_v17, 0.0  ;;  %v241_v27 = vmax.f32 %v233_v19, 0.0  ;;  %v237_v28 = vadd.f32 %v453_v6, %v225_v20 }
  0x1a   : > { %384 = vst [vmem:[%s548_s28 + $0x20] sm:$0x1] %v494_v0  ;;  %v242_v29 = vmax.f32 %v234_v21, 0.0  ;;  %v238_v30 = vadd.f32 %v453_v6, %v226_v22  ;;  %v243_v31 = vmax.f32 %v235_v24, 0.0  ;;  %v244_v32 = vmax.f32 %v236_v26, 0.0 }
  0x1b   : > { %385 = vst [vmem:[%s548_s28 + $0x30] sm:$0x1] %v494_v0  ;;  %v245_v33 = vmax.f32 %v237_v28, 0.0 }
  0x1c   : > { %386 = vst [vmem:[%s548_s28 + $0x40] sm:$0x1] %v494_v0  ;;  %v246_v34 = vmax.f32 %v238_v30, 0.0 }
  0x1d   : > { %387 = vst [vmem:[%s548_s28 + $0x50] sm:$0x1] %v494_v0 }
  0x1e   : > { %388 = vst [vmem:[%s548_s28 + $0x60] sm:$0x1] %v494_v0 }
  0x1f   : > { %389 = vst [vmem:[%s548_s28 + $0x70] sm:$0x1] %v494_v0 }
  0x20   : > { %390 = vst [vmem:[%s548_s28 + $0x80] sm:$0x1] %v494_v0 }
  0x21   : > { %391 = vst [vmem:[%s548_s28 + $0x19] sm:$0x1] %v494_v0 }
  0x22   : > { %392 = vst [vmem:[%s548_s28 + $0x29] sm:$0x1] %v494_v0 }
  0x23   : > { %393 = vst [vmem:[%s548_s28 + $0x39] sm:$0x1] %v494_v0 }
  0x24   : > { %394 = vst [vmem:[%s548_s28 + $0x49] sm:$0x1] %v494_v0 }
  0x25   : > { %395 = vst [vmem:[%s548_s28 + $0x59] sm:$0x1] %v494_v0 }
  0x26   : > { %396 = vst [vmem:[%s548_s28 + $0x69] sm:$0x1] %v494_v0 }
  0x27   : > { %397 = vst [vmem:[%s548_s28 + $0x79] sm:$0x1] %v494_v0 }
  0x28   : > { %398 = vst [vmem:[%s548_s28 + $0x89] sm:$0x1] %v494_v0 }
  0x29   : > { %399 = vst [vmem:[%s548_s28 + $0x11] sm:$0xff] %v239_v23 }
  0x2a   : > { %400 = vst [vmem:[%s548_s28 + $0x21] sm:$0xff] %v240_v25 }
  0x2b   : > { %401 = vst [vmem:[%s548_s28 + $0x31] sm:$0xff] %v241_v27 }
  0x2c   : > { %402 = vst [vmem:[%s548_s28 + $0x41] sm:$0xff] %v242_v29 }
  0x2d   : > { %403 = vst [vmem:[%s548_s28 + $0x51] sm:$0xff] %v243_v31 }
  0x2e   : > { %404 = vst [vmem:[%s548_s28 + $0x61] sm:$0xff] %v244_v32 }
  0x2f   : > { %405 = vst [vmem:[%s548_s28 + $0x71] sm:$0xff] %v245_v33 }
  0x30   : > { %406 = vst [vmem:[%s548_s28 + $0x81] sm:$0xff] %v246_v34 }
  0x31 PF: > { %s13_s16 = sadd.s32 1, %s492_s16   ;;  %s606_s12 = smov %s484_s14 }
  0x32   : > { %p10_p7 = scmp.ge.s32.totalorder %s13_s16, 18   ;;  %s607_s13 = smov %s488_s15 }
  0x33   : > { %s608_s14 = smov %s611_s17  ;;  %s609_s15 = smov %s615_s18 }
  0x34   :  { %12 = sbr.rel (!%p10_p7) target bundleno = 3 (0x3), region = 64 }

// kernel: encoder_block.7
= control target key start
LH: loop header
LB: loop body
LE: loop exit
PB: predicated region body
PF: predicated region fallthrough
CT: control target
= control target key end

     0   :  { %s863_s15 = smov 0   ;;  %s865_s16 = smov 0   ;;  %s1040_s0 = inlined_call_operand.vmem [shape: f32[2,8,64,128], index: 0, kind: input, shape index: {}]   ;;  %s1041_s1 = inlined_call_operand.vmem [shape: f32[1,128], index: 1, kind: input, shape index: {}]   ;;  %s1042_s2 = inlined_call_operand.vmem [shape: f32[1,128], index: 2, kind: input, shape index: {}]   ;;  %s1043_s3 = inlined_call_operand.vmem [shape: f32[2,8,64,128], index: 3, kind: output, shape index: {0}]   ;;  %s1044_s4 = inlined_call_operand.vmem [shape: f32[2,4,16,128], index: 4, kind: output, shape index: {1}]  }
   0x1   :  { %s867_s17 = smov 0   ;;  %s869_s18 = smov 0  }
   0x2   :  { %s871_s19 = smov 0  }
   0x3 LB: > { %s24_s20 = sadd.s32 1, %s828_s17  ;;  %s27_s21 = sadd.s32 1, %s832_s18  ;;  %s836_s19 = sphi %s871_s19, %s15_s19   ;;  %s832_s18 = sphi %s869_s18, %s1048_s18   ;;  %s828_s17 = sphi %s867_s17, %s1047_s17   ;;  %s824_s16 = sphi %s865_s16, %s1046_s16   ;;  %s820_s15 = sphi %s863_s15, %s1045_s15  }
   0x4   : > { %p25_p0 = scmp.ge.s32.totalorder %s24_s20, 4  ;;  %p726_p1 = scmp.ge.s32.totalorder %s836_s19, 1 }
   0x5   : > { %p189_p2 = scmp.lt.s32.totalorder %s836_s19, 9 }
   0x6   : > { %s1050_s20 = smov (%p25_p0, %s24_s20), 0  ;;  %s1052_s21 = smov (!%p25_p0, %s27_s21), %s832_s18 }
   0x7   : > { %p190_p3 = pnand %p726_p1, %p189_p2  ;;  %p29_p4 = scmp.ge.s32.totalorder %s1052_s21, 2 }
   0x8   : > { %s727_s22 = sshll.u32 (!%p190_p3), %s820_s15, 1  ;;  %p235_p5 = scmp.lt.s32.totalorder (!%p190_p3), %s824_s16, 1 }
   0x9   : > { %s1054_s21 = smov (%p29_p4, %s1052_s21), 0  ;;  %193 = sbr.rel (%p190_p3) target bundleno = 65 (0x41), region = 32 }
   0xa   : > { %p237_p6 = scmp.lt.s32.totalorder (!%p190_p3), %s727_s22, 7  ;;  %p258_p7 = scmp.lt.s32.totalorder (!%p190_p3), %s820_s15, 3 }
   0xe   : > { %s1056_s16 = smov (!%p235_p5, %s824_s16), 1  ;;  %s1058_s22 = smov (!%p237_p6, %s727_s22), 7  ;;  %v796_v0 = vld [vmem:[%s1041_s1] ss:$0 sm:$0xff]  ;;  %vm545_vm0 = vcmask 1041409   ;;  %vm547_vm1 = vcmask 1042434  }
   0xf   : > { %s729_s23 = sshll.u32 %s1056_s16, 6  ;;  %s728_s24 = sshll.u32 %s1058_s22, 3  ;;  %v910_v1 = vld [vmem:[%s1042_s2] ss:$0 sm:$0xff]  ;;  %vm549_vm2 = vcmask 1043459   ;;  %vm551_vm3 = vcmask 1044484  }
  0x10   : > { %s241_s25 = sadd.s32 %s729_s23, %s728_s24  ;;  %s1060_s15 = smov (!%p258_p7, %s820_s15), 3  ;;  %vm553_vm4 = vcmask 1045509   ;;  %vm555_vm5 = vcmask 1046534   ;;  %vm557_vm6 = vcmask 1047559  }
  0x11   : > { %s730_s28 = sshll.u32 %s241_s25, 3  ;;  %s735_s11 = sshll.u32 %s1060_s15, 1 }
  0x12   : > { %s905_s5 = scalar_lea.vmem %s1040_s0, %s730_s28  ;;  %s926_s10 = scalar_lea.vmem %s1043_s3, %s730_s28 }
  0x13   : > { %v265_v2 = vld [vmem:[%s905_s5] sm:$0xff]  ;;  %v266_v3 = vld [vmem:[%s905_s5 + $0x8] sm:$0xff]  ;;  %v267_v4 = vld [vmem:[%s905_s5 + $0x10] sm:$0xff]  ;;  %s736_s12 = sshll.u32 %s1056_s16, 3 }
  0x14   : > { %v285_v5 = vmul.f32 %v796_v0, %v265_v2  ;;  %v286_v6 = vmul.f32 %v796_v0, %v266_v3  ;;  %v287_v7 = vmul.f32 %v796_v0, %v267_v4  ;;  %v268_v8 = vld [vmem:[%s905_s5 + $0x18] sm:$0xff]  ;;  %v269_v9 = vld [vmem:[%s905_s5 + $0x20] sm:$0xff]  ;;  %v270_v10 = vld [vmem:[%s905_s5 + $0x28] sm:$0xff]  ;;  %s262_s13 = sadd.s32 %s736_s12, %s735_s11 }
  0x15   : > { %v288_v11 = vmul.f32 %v796_v0, %v268_v8  ;;  %v289_v12 = vmul.f32 %v796_v0, %v269_v9  ;;  %v290_v13 = vmul.f32 %v796_v0, %v270_v10  ;;  %v271_v14 = vld [vmem:[%s905_s5 + $0x30] sm:$0xff]  ;;  %v272_v15 = vld [vmem:[%s905_s5 + $0x38] sm:$0xff]  ;;  %v273_v24 = vld [vmem:[%s905_s5 + $0x40] sm:$0xff]  ;;  %s737_s14 = sshll.u32 %s262_s13, 3 }
  0x16   : > { %v305_v16 = vadd.f32 %v910_v1, %v285_v5  ;;  %v306_v17 = vadd.f32 %v910_v1, %v286_v6  ;;  %v307_v18 = vadd.f32 %v910_v1, %v287_v7  ;;  %v291_v19 = vmul.f32 %v796_v0, %v271_v14  ;;  %v274_v25 = vld [vmem:[%s905_s5 + $0x48] sm:$0xff]  ;;  %v275_v26 = vld [vmem:[%s905_s5 + $0x50] sm:$0xff]  ;;  %v276_v31 = vld [vmem:[%s905_s5 + $0x58] sm:$0xff]  ;;  %s264_s22 = scalar_lea.vmem %s1044_s4, %s737_s14 }
  0x17   : > { %v308_v20 = vadd.f32 %v910_v1, %v288_v11  ;;  %v309_v21 = vadd.f32 %v910_v1, %v289_v12  ;;  %v310_v22 = vadd.f32 %v910_v1, %v290_v13  ;;  %v292_v23 = vmul.f32 %v796_v0, %v272_v15  ;;  %v277_v32 = vld [vmem:[%s905_s5 + $0x60] sm:$0xff]  ;;  %v278_v33 = vld [vmem:[%s905_s5 + $0x68] sm:$0xff]  ;;  %v279_v38 = vld [vmem:[%s905_s5 + $0x70] sm:$0xff] }
  0x18   : > { %v321_v27 = vmax.f32 %v305_v16, 0.0  ;;  %v322_v28 = vmax.f32 %v306_v17, 0.0  ;;  %v323_v29 = vmax.f32 %v307_v18, 0.0  ;;  %v935_v30 = vadd.f32 %v910_v1, %v291_v19  ;;  %v280_v43 = vld [vmem:[%s905_s5 + $0x78] sm:$0xff] }
  0x19   : > { %v324_v34 = vmax.f32 %v308_v20, 0.0  ;;  %v325_v35 = vmax.f32 %v309_v21, 0.0  ;;  %v326_v36 = vmax.f32 %v310_v22, 0.0  ;;  %v941_v37 = vadd.f32 %v910_v1, %v292_v23 }
  0x1a   : > { %337 = vst [vmem:[%s926_s10] sm:$0xff] %v321_v27  ;;  %v327_v39 = vmax.f32 %v935_v30, 0.0  ;;  %v293_v40 = vmul.f32 %v796_v0, %v273_v24  ;;  %v294_v41 = vmul.f32 %v796_v0, %v274_v25  ;;  %v295_v42 = vmul.f32 %v796_v0, %v275_v26 }
  0x1b   : > { %338 = vst [vmem:[%s926_s10 + $0x8] sm:$0xff] %v322_v28  ;;  %v328_v44 = vmax.f32 %v941_v37, 0.0  ;;  %v296_v45 = vmul.f32 %v796_v0, %v276_v31  ;;  %v297_v46 = vmul.f32 %v796_v0, %v277_v32  ;;  %v298_v47 = vmul.f32 %v796_v0, %v278_v33 }
  0x1c   : > { %339 = vst [vmem:[%s926_s10 + $0x10] sm:$0xff] %v323_v29  ;;  %v313_v48 = vadd.f32 %v910_v1, %v293_v40  ;;  %v314_v49 = vadd.f32 %v910_v1, %v294_v41  ;;  %v315_v50 = vadd.f32 %v910_v1, %v295_v42  ;;  %v299_v51 = vmul.f32 %v796_v0, %v279_v38 }
  0x1d   : > { %340 = vst [vmem:[%s926_s10 + $0x18] sm:$0xff] %v324_v34  ;;  %v316_v52 = vadd.f32 %v910_v1, %v296_v45  ;;  %v317_v53 = vadd.f32 %v910_v1, %v297_v46  ;;  %v318_v54 = vadd.f32 %v910_v1, %v298_v47  ;;  %v300_v55 = vmul.f32 %v796_v0, %v280_v43 }
  0x1e   : > { %341 = vst [vmem:[%s926_s10 + $0x20] sm:$0xff] %v325_v35  ;;  %v329_v56 = vmax.f32 %v313_v48, 0.0  ;;  %v330_v57 = vmax.f32 %v314_v49, 0.0  ;;  %v331_v58 = vmax.f32 %v315_v50, 0.0  ;;  %v319_v59 = vadd.f32 %v910_v1, %v299_v51 }
  0x1f   : > { %342 = vst [vmem:[%s926_s10 + $0x28] sm:$0xff] %v326_v36  ;;  %v332_v60 = vmax.f32 %v316_v52, 0.0  ;;  %v333_v61 = vmax.f32 %v317_v53, 0.0  ;;  %v334_v62 = vmax.f32 %v318_v54, 0.0  ;;  %v961_v63 = vadd.f32 %v910_v1, %v300_v55 }
  0x20   : > { %343 = vst [vmem:[%s926_s10 + $0x30] sm:$0xff] %v327_v39  ;;  %v353_v0 = vmax.f32 %v321_v27, %v329_v56  ;;  %v354_v2 = vmax.f32 %v322_v28, %v330_v57  ;;  %v966_v3 = vmax.f32 %v323_v29, %v331_v58  ;;  %v335_v4 = vmax.f32 %v319_v59, 0.0 }
  0x21   : > { %344 = vst [vmem:[%s926_s10 + $0x38] sm:$0xff] %v328_v44  ;;  %v971_v5 = vmax.f32 %v324_v34, %v332_v60  ;;  %v357_v6 = vmax.f32 %v325_v35, %v333_v61  ;;  %v358_v7 = vmax.f32 %v326_v36, %v334_v62  ;;  %v336_v1 = vmax.f32 %v961_v63, 0.0 }
  0x22   : > { %345 = vst [vmem:[%s926_s10 + $0x40] sm:$0xff] %v329_v56  ;;  %v369_v8 = vrot.slane %v353_v0, 2  ;;  %v370_v9 = vrot.slane %v353_v0, 4  ;;  %v371_v10 = vrot.slane %v353_v0, 6  ;;  %v372_v11 = vrot.slane %v354_v2, 2 }
  0x23   : > { %346 = vst [vmem:[%s926_s10 + $0x48] sm:$0xff] %v330_v57  ;;  %v373_v12 = vrot.slane %v354_v2, 4  ;;  %v374_v13 = vrot.slane %v354_v2, 6  ;;  %v417_v14 = vmax.f32 %v353_v0, %v354_v2  ;;  %v375_v15 = vrot.slane %v966_v3, 2 }
  0x24   : > { %v418_v16 = vmax.f32 %v369_v8, %v372_v11  ;;  %347 = vst [vmem:[%s926_s10 + $0x50] sm:$0xff] %v331_v58  ;;  %v376_v17 = vrot.slane %v966_v3, 4  ;;  %v378_v18 = vrot.slane %v971_v5, 2  ;;  %v379_v19 = vrot.slane %v971_v5, 4 }
  0x25   : > { %v419_v20 = vmax.f32 %v370_v9, %v373_v12  ;;  %v420_v21 = vmax.f32 %v371_v10, %v374_v13  ;;  %v738_v22 = vrot.slane %v417_v14, 9  ;;  %348 = vst [vmem:[%s926_s10 + $0x58] sm:$0xff] %v332_v60  ;;  %v421_v23 = vmax.f32 %v966_v3, %v971_v5 }
  0x26   : > { %v739_v24 = vrot.slane %v418_v16, 9  ;;  %349 = vst [vmem:[%s926_s10 + $0x60] sm:$0xff] %v333_v61  ;;  %v381_v25 = vrot.slane %v357_v6, 2  ;;  %v382_v26 = vrot.slane %v357_v6, 4  ;;  %v383_v27 = vrot.slane %v357_v6, 6 }
  0x27   : > { %v740_v28 = vrot.slane %v419_v20, 9  ;;  %v741_v29 = vrot.slane %v420_v21, 9  ;;  %v497_v31 = vmax.f32 %v417_v14, %v738_v22  ;;  %v742_v32 = vrot.slane %v421_v23, 9  ;;  %350 = vst [vmem:[%s926_s10 + $0x68] sm:$0xff] %v334_v62 }
  0x28   : > { %v498_v33 = vmax.f32 %v418_v16, %v739_v24  ;;  %v384_v34 = vrot.slane %v358_v7, 2  ;;  %v385_v35 = vrot.slane %v358_v7, 4  ;;  %v386_v36 = vrot.slane %v358_v7, 6  ;;  %351 = vst [vmem:[%s926_s10 + $0x70] sm:$0xff] %v335_v4 }
  0x29   : > { %v499_v38 = vmax.f32 %v419_v20, %v740_v28  ;;  %v529_v40 = vperm.slane %v497_v31, 0  ;;  %v425_v41 = vmax.f32 %v357_v6, %v358_v7  ;;  %v990_v42 = vmax.f32 %v327_v39, %v335_v4  ;;  %352 = vst [vmem:[%s926_s10 + $0x78] sm:$0xff] %v336_v1 }
  0x2a   : > { %v530_v43 = vperm.slane %v498_v33, 0  ;;  %v426_v45 = vmax.f32 %v381_v25, %v384_v34  ;;  %v427_v46 = vmax.f32 %v382_v26, %v385_v35  ;;  %v428_v47 = vmax.f32 %v383_v27, %v386_v36 }
  0x2b   : > { %v531_v48 = vperm.slane %v499_v38, 0  ;;  %v746_v49 = vrot.slane %v425_v41, 9  ;;  %v387_v50 = vrot.slane %v990_v42, 2  ;;  %v388_v51 = vrot.slane %v990_v42, 4 }
  0x2c   : > { %v747_v30 = vrot.slane %v426_v45, 9  ;;  %v748_v39 = vrot.slane %v427_v46, 9  ;;  %v749_v52 = vrot.slane %v428_v47, 9  ;;  %v360_v53 = vmax.f32 %v328_v44, %v336_v1 }
  0x2d   : > { %v505_v54 = vmax.f32 %v425_v41, %v746_v49  ;;  %v377_v55 = vrot.slane %v966_v3, 6  ;;  %v380_v56 = vrot.slane %v971_v5, 6  ;;  %v422_v57 = vmax.f32 %v375_v15, %v378_v18 }
  0x2e   : > { %v506_v58 = vmax.f32 %v426_v45, %v747_v30  ;;  %v507_v59 = vmax.f32 %v427_v46, %v748_v39  ;;  %v390_v60 = vrot.slane %v360_v53, 2  ;;  %v391_v61 = vrot.slane %v360_v53, 4 }
  0x2f   : > { %v537_v62 = vperm.slane %v505_v54, 0  ;;  %v429_v63 = vmax.f32 %v990_v42, %v360_v53  ;;  %v423_v0 = vmax.f32 %v376_v17, %v379_v19  ;;  %v424_v2 = vmax.f32 %v377_v55, %v380_v56 }
  0x30   : > { %v538_v4 = vperm.slane %v506_v58, 0  ;;  %v539_v37 = vperm.slane %v507_v59, 0  ;;  %v743_v44 = vrot.slane %v422_v57, 9  ;;  %v500_v6 = vmax.f32 %v420_v21, %v741_v29 }
  0x31   : > { %v750_v7 = vrot.slane %v429_v63, 9  ;;  %v744_v1 = vrot.slane %v423_v0, 9  ;;  %v745_v3 = vrot.slane %v424_v2, 9  ;;  %v501_v8 = vmax.f32 %v421_v23, %v742_v32 }
  0x32   : > { %v502_v5 = vmax.f32 %v422_v57, %v743_v44  ;;  %v532_v9 = vperm.slane %v500_v6, 0  ;;  %v546_v10 = vsel %vm545_vm0, %v530_v43, %v529_v40  ;;  %v389_v21 = vrot.slane %v990_v42, 6 }
  0x33   : > { %v503_v11 = vmax.f32 %v423_v0, %v744_v1  ;;  %v504_v12 = vmax.f32 %v424_v2, %v745_v3  ;;  %v533_v13 = vperm.slane %v501_v8, 0  ;;  %v548_v14 = vsel %vm547_vm1, %v531_v48, %v546_v10 }
  0x34   : > { %v534_v15 = vperm.slane %v502_v5, 0  ;;  %v550_v16 = vsel %vm549_vm2, %v532_v9, %v548_v14  ;;  %v392_v22 = vrot.slane %v360_v53, 6  ;;  %v430_v23 = vmax.f32 %v387_v50, %v390_v60 }
  0x35   : > { %v535_v17 = vperm.slane %v503_v11, 0  ;;  %v536_v18 = vperm.slane %v504_v12, 0  ;;  %v552_v19 = vsel %vm551_vm3, %v533_v13, %v550_v16  ;;  %v431_v25 = vmax.f32 %v388_v51, %v391_v61 }
  0x36   : > { %v554_v20 = vsel %vm553_vm4, %v534_v15, %v552_v19  ;;  %v508_v26 = vmax.f32 %v428_v47, %v749_v52  ;;  %v509_v27 = vmax.f32 %v429_v63, %v750_v7  ;;  %v432_v29 = vmax.f32 %v389_v21, %v392_v22 }
  0x37   : > { %v556_v24 = vsel %vm555_vm5, %v535_v17, %v554_v20  ;;  %v751_v31 = vrot.slane %v430_v23, 9  ;;  %v559_v32 = vsel %vm545_vm0, %v538_v4, %v537_v62  ;;  %v752_v33 = vrot.slane %v431_v25, 9 }
  0x38   : > { %v558_v28 = vsel %vm557_vm6, %v536_v18, %v556_v24  ;;  %v540_v34 = vperm.slane %v508_v26, 0  ;;  %v541_v35 = vperm.slane %v509_v27, 0  ;;  %v560_v36 = vsel %vm547_vm1, %v539_v37, %v559_v32 }
  0x39   : > { %568 = vst [vmem:[%s264_s22] sm:$0xff] %v558_v28  ;;  %v753_v38 = vrot.slane %v432_v29, 9  ;;  %v510_v40 = vmax.f32 %v430_v23, %v751_v31  ;;  %v511_v41 = vmax.f32 %v431_v25, %v752_v33 }
  0x3a   : > { %v561_v42 = vsel %vm549_vm2, %v540_v34, %v560_v36 }
  0x3b   : > { %v512_v43 = vmax.f32 %v432_v29, %v753_v38  ;;  %v542_v45 = vperm.slane %v510_v40, 0  ;;  %v562_v46 = vsel %vm551_vm3, %v541_v35, %v561_v42  ;;  %v543_v47 = vperm.slane %v511_v41, 0 }
  0x3d   : > { %v544_v48 = vperm.slane %v512_v43, 0  ;;  %v563_v49 = vsel %vm553_vm4, %v542_v45, %v562_v46 }
  0x3e   : > { %v564_v50 = vsel %vm555_vm5, %v543_v47, %v563_v49 }
  0x3f   : > { %v565_v51 = vsel %vm557_vm6, %v544_v48, %v564_v50 }
  0x40   : > { %569 = vst [vmem:[%s264_s22 + $0x8] sm:$0xff] %v565_v51 }
  0x41 PF: > { %s15_s19 = sadd.s32 1, %s836_s19   ;;  %s1045_s15 = smov %s828_s17 }
  0x42   : > { %p12_p8 = scmp.ge.s32.totalorder %s15_s19, 10   ;;  %s1046_s16 = smov %s832_s18 }
  0x43   : > { %s1047_s17 = smov %s1050_s20  ;;  %s1048_s18 = smov %s1054_s21 }
  0x44   :  { %14 = sbr.rel (!%p12_p8) target bundleno = 3 (0x3), region = 74 }

// kernel: encoder_block.4
= control target key start
LH: loop header
LB: loop body
LE: loop exit
PB: predicated region body
PF: predicated region fallthrough
CT: control target
= control target key end

     0   :  { %s3015_s21 = smov 0   ;;  %s3017_s22 = smov 0   ;;  %s4316_s0 = inlined_call_operand.vmem [shape: f32[2,8,10,10,2], index: 0, kind: input, shape index: {}, may-alias: {0,1,2}]   ;;  %s4317_s1 = inlined_call_operand.vmem [shape: f32[2,8,10,10,2], index: 1, kind: input, shape index: {}, may-alias: {0,1,2}]   ;;  %s4318_s2 = inlined_call_operand.vmem [shape: f32[2,8,10,10,2], index: 2, kind: input, shape index: {}, may-alias: {0,1,2}]   ;;  %s4319_s3 = inlined_call_operand.vmem [shape: f32[54,128], index: 3, kind: input, shape index: {}]   ;;  %s4320_s4 = inlined_call_operand.vmem [shape: f32[1,128], index: 4, kind: input, shape index: {}]   ;;  %s4321_s5 = inlined_call_operand.vmem [shape: f32[2,8,64,128], index: 5, kind: output, shape index: {0}]   ;;  %s4322_s6 = inlined_call_operand.vmem [shape: f32[2,8,2,128], index: 6, kind: output, shape index: {1}]  }
   0x1   :  { %s3019_s23 = smov 0   ;;  %s3021_s24 = smov 0  }
   0x2   :  { %s3023_s25 = smov 0  }
   0x3 LB: > { %s26_s26 = sadd.s32 1, %s2970_s23  ;;  %s29_s27 = sadd.s32 1, %s2974_s24  ;;  %s2978_s25 = sphi %s3023_s25, %s17_s25   ;;  %s2974_s24 = sphi %s3021_s24, %s4411_s24   ;;  %s2970_s23 = sphi %s3019_s23, %s4410_s23   ;;  %s2966_s22 = sphi %s3017_s22, %s4409_s22   ;;  %s2962_s21 = sphi %s3015_s21, %s4408_s21  }
   0x4   : > { %p27_p0 = scmp.ge.s32.totalorder %s26_s26, 8  ;;  %p2621_p1 = scmp.ge.s32.totalorder %s2978_s25, 1 }
   0x5   : > { %p293_p2 = scmp.lt.s32.totalorder %s2978_s25, 17 }
   0x6   : > { %s4413_s26 = smov (%p27_p0, %s26_s26), 0  ;;  %s4415_s27 = smov (!%p27_p0, %s29_s27), %s2974_s24 }
   0x7   : > { %p294_p3 = pnand %p2621_p1, %p293_p2  ;;  %p31_p4 = scmp.ge.s32.totalorder %s4415_s27, 2 }
   0x9   : > { %s4417_s27 = smov (%p31_p4, %s4415_s27), 0  ;;  %297 = sbr.rel (%p294_p3) target bundleno = 640 (0x280), region = 40 }
   0xe   : > { %v528_v0 = vld [vmem:[%s4319_s3 + $0x2] sm:$0x3]  ;;  %vm554_vm0 = vcmask 1041408   ;;  %p366_p5 = scmp.lt.s32.totalorder %s2966_s22, 1  ;;  %p380_p6 = scmp.lt.s32.totalorder %s2962_s21, 7  ;;  %vm529_vm1 = vcmask 15360  }
   0xf   : > { %2886 = vmatpush.msk.msra.mxu3 %vm554_vm0, %v528_v0  ;;  %v527_v1 = vld [vmem:[%s4319_s3] sm:$0x3]  ;;  %v667_v2 = vld [vmem:[%s4319_s3 + $0x4] sm:$0x3]  ;;  %s387_s10 = sadd.s32 1, %s2962_s21  ;;  %2639 = vmatpush.msk.msra.mxu0 %vm554_vm0, %v528_v0  ;;  %s2622_s9 = sadd.s32 4294967295, %s2962_s21 }
  0x10   : > { %s4419_s22 = smov (!%p366_p5, %s2966_s22), 1  ;;  %2657 = vmatpush.msk.msra.mxu2 %vm554_vm0, %v667_v2  ;;  %v1073_v3 = vld [vmem:[%s4319_s3 + $0xc] sm:$0x3]  ;;  %v878_v4 = vld [vmem:[%s4319_s3 + $0x8] sm:$0x3]  ;;  %2648 = vmatpush.msk.msra.mxu1 %vm554_vm0, %v527_v1  ;;  %p3083_p7 = scmp.lt.s32.totalorder %s387_s10, 7 }
  0x11   : > { %2887 = vmatpush.msk.msrb.mxu3 %vm554_vm0, %v527_v1  ;;  %s3073_s15 = scalar_select %p380_p6, %s2962_s21, 7  ;;  %v979_v5 = vld [vmem:[%s4319_s3 + $0xa] sm:$0x3]  ;;  %2675 = vmatpush.msk.msrb.mxu0 %vm554_vm0, %v878_v4  ;;  %v777_v21 = vld [vmem:[%s4319_s3 + $0x6] sm:$0x3]  ;;  %vm752_vm2 = vcmask 1046528  }
  0x12   : > { %2693 = vmatpush.msk.msrb.mxu2 %vm554_vm0, %v1073_v3  ;;  %s3081_s18 = smul.u32 160, %s4419_s22  ;;  %2684 = vmatpush.msk.msrb.mxu1 %vm554_vm0, %v979_v5  ;;  %s4421_s10 = smov (!%p3083_p7, %s387_s10), 7  ;;  %v1384_v32 = vld [vmem:[%s4319_s3 + $0x14] sm:$0x3]  ;;  %v1259_v33 = vld [vmem:[%s4319_s3 + $0x10] sm:$0x3] }
  0x13   : > { %s2891_s20 = smul.u32 20, %s3073_s15  ;;  %s4423_s10 = smov (!%p3083_p7, %s4421_s10), 7  ;;  %v1166_v38 = vld [vmem:[%s4319_s3 + $0xe] sm:$0x3]  ;;  %v1328_v40 = vld [vmem:[%s4319_s3 + $0x12] sm:$0x3] }
  0x14   : > { %s423_s11 = scalar_select %p380_p6, 1, 0  ;;  %vm1048_vm3 = vcmask 1045504  }
  0x15   : > { %s384_s28 = sadd.s32 %s2891_s20, %s3081_s18  ;;  %s2892_s12 = smul.u32 20, %s4423_s10 }
  0x16   : > { %s2629_s29 = sshll.u32 %s384_s28, 3  ;;  %s424_s13 = scvt.s32.f32 %s423_s11 }
  0x17   : > { %s3096_s8 = scalar_lea.vmem %s4317_s1, %s2629_s29  ;;  %p364_p8 = scmp.gt.s32.totalorder %s2622_s9, 0 }
  0x18   : > { %v3100_v6 = vld [vmem:[%s3096_s8 + $0x60] sm:$0xff]  ;;  %s396_s14 = sadd.s32 %s2892_s12, %s3081_s18  ;;  %p419_p9 = scmp.gt.s32.totalorder %s2962_s21, 0  ;;  %v3116_v8 = vstv %s424_s13  ;;  %v3124_v9 = vld [vmem:[%s3096_s8 + $0x70] sm:$0xff]  ;;  %v3253_v48 = vld [vmem:[%s3096_s8 + $0x8] sm:$0x3] }
  0x19   : > { %v3105_v7 = vld [vmem:[%s3096_s8] sm:$0xff]  ;;  %2646 = vmatmul.msk.f32.vlgmr.msra.gmra.mxu3 %vm529_vm1, %v3100_v6  ;;  %s2633_s16 = sshll.u32 %s396_s14, 3  ;;  %p2623_p10 = scmp.lt.s32.totalorder %s2622_s9, 7  ;;  %v3127_v10 = vld [vmem:[%s3096_s8 + $0x10] sm:$0xff]  ;;  %v855_v51 = vrot.slane %v3253_v48, 1 }
  0x1a   : > { %2640 = vmatmul.msk.f32.vlgmr.msra.gmra.mxu0 %vm529_vm1, %v3105_v7  ;;  %2888 = vmatpush.msk.msra.mxu3 %vm554_vm0, %v667_v2  ;;  %s3121_s20 = scalar_lea.vmem %s4318_s2, %s2633_s16  ;;  %s4425_s9 = smov (!%p364_p8, %s2622_s9), 0  ;;  %v3147_v16 = vld [vmem:[%s3096_s8 + $0x20] sm:$0xff]  ;;  %v3181_v26 = vld [vmem:[%s3096_s8 + $0x30] sm:$0xff]  ;;  %v854_v50 = vrot.slane %v3105_v7, 1  ;;  %v3278_v60 = vld [vmem:[%s3096_s8 + $0x18] sm:$0x3] }
  0x1b   : > { %v486_v11 = vld [vmem:[%s3121_s20] sm:$0xff]  ;;  %s420_s21 = scalar_select %p419_p9, 1, 0  ;;  %v488_v13 = vld [vmem:[%s3121_s20 + $0x10] sm:$0xff]  ;;  %2711 = vmatpush.msk.msra.mxu0 %vm554_vm0, %v1259_v33  ;;  %v857_v63 = vrot.slane %v3127_v10, 1  ;;  %v858_v0 = vrot.slane %v3278_v60, 1 }
  0x1c   : > { %v3131_v12 = vmul.f32 %v3116_v8, %v486_v11  ;;  %s4427_s9 = smov (!%p2623_p10, %s4425_s9), 7  ;;  %v3144_v15 = vmul.f32 %v3116_v8, %v488_v13  ;;  %v490_v22 = vld [vmem:[%s3121_s20 + $0x20] sm:$0xff]  ;;  %v492_v29 = vld [vmem:[%s3121_s20 + $0x30] sm:$0xff]  ;;  %v856_v58 = vsel %vm752_vm2, %v854_v50, %v855_v51  ;;  %v487_v11 = vld [vmem:[%s3121_s20 + $0x8] sm:$0x3]  ;;  %s2637_s19 = sshll.u32 %s4419_s22, 3 }
  0x1d   : > { %s421_s10 = scvt.s32.f32 %s420_s21  ;;  %s2889_s28 = smul.u32 20, %s4427_s9  ;;  %v3178_v25 = vmul.f32 %v3116_v8, %v490_v22  ;;  %v498_v31 = vld [vmem:[%s3121_s20 + $0x60] sm:$0xff]  ;;  %v3208_v34 = vmul.f32 %v3116_v8, %v492_v29  ;;  %v500_v42 = vld [vmem:[%s3121_s20 + $0x70] sm:$0xff]  ;;  %v3303_v22 = vld [vmem:[%s3096_s8 + $0x28] sm:$0x3]  ;;  %v860_v29 = vrot.slane %v3147_v16, 1 }
  0x1e   : > { %2658 = vmatmul.msk.f32.vlgmr.msra.gmra.mxu2 %vm529_vm1, %v3131_v12  ;;  %v3211_v35 = vld [vmem:[%s3096_s8 + $0x40] sm:$0xff]  ;;  %v3218_v37 = vmul.f32 %v3116_v8, %v498_v31  ;;  %v3244_v45 = vld [vmem:[%s3096_s8 + $0x50] sm:$0xff]  ;;  %v3250_v47 = vmul.f32 %v3116_v8, %v500_v42  ;;  %v955_v33 = vrot.slane %v3131_v12, 1  ;;  %v3334_v50 = vld [vmem:[%s3096_s8 + $0x38] sm:$0x3]  ;;  %s416_s21 = sadd.s32 %s2637_s19, %s3073_s15 }
  0x1f   : > { %s372_s29 = sadd.s32 %s3081_s18, %s2889_s28  ;;  %v3141_v14 = vstv %s421_s10  ;;  %2729 = vmatpush.msk.msra.mxu2 %vm554_vm0, %v1384_v32  ;;  %v494_v39 = vld [vmem:[%s3121_s20 + $0x40] sm:$0xff]  ;;  %v496_v52 = vld [vmem:[%s3121_s20 + $0x50] sm:$0xff]  ;;  %s2638_s10 = sshll.u32 %s416_s21, 1 }
  0x20   : > { %s2628_s30 = sshll.u32 %s372_s29, 3  ;;  %v3241_v44 = vmul.f32 %v3116_v8, %v494_v39  ;;  %v3271_v57 = vmul.f32 %v3116_v8, %v496_v52 }
  0x21   : > { %2647 = vmatmul.msk.f32.gmra.mxu3 %vm529_vm1, %v3124_v9  ;;  %s3152_s12 = scalar_lea.vmem %s4316_s0, %s2628_s30  ;;  %s4293_s30 = scalar_lea.vmem %s4322_s6, %s2638_s10 }
  0x22   : > { %2641 = vmatmul.msk.f32.gmra.mxu0 %vm529_vm1, %v3127_v10  ;;  %v425_v17 = vld [vmem:[%s3152_s12] sm:$0xff]  ;;  %v427_v23 = vld [vmem:[%s3152_s12 + $0x10] sm:$0xff]  ;;  %v426_v43 = vld [vmem:[%s3152_s12 + $0x8] sm:$0x3] }
  0x23   : > { %v437_v18 = vld [vmem:[%s3152_s12 + $0x60] sm:$0xff]  ;;  %v3157_v19 = vmul.f32 %v3141_v14, %v425_v17  ;;  %v439_v24 = vld [vmem:[%s3152_s12 + $0x70] sm:$0xff]  ;;  %v3184_v27 = vmul.f32 %v3141_v14, %v427_v23  ;;  %v447_v49 = vmul.f32 %v3141_v14, %v426_v43  ;;  %v428_v56 = vld [vmem:[%s3152_s12 + $0x18] sm:$0x3]  ;;  %v3296_v17 = vsel %vm752_vm2, %v857_v63, %v858_v0 }
  0x24   : > { %v3160_v20 = vmul.f32 %v3141_v14, %v437_v18  ;;  %v3187_v28 = vmul.f32 %v3141_v14, %v439_v24  ;;  %v429_v30 = vld [vmem:[%s3152_s12 + $0x20] sm:$0xff]  ;;  %v431_v41 = vld [vmem:[%s3152_s12 + $0x30] sm:$0xff]  ;;  %v449_v62 = vmul.f32 %v3141_v14, %v428_v56  ;;  %v430_v13 = vld [vmem:[%s3152_s12 + $0x28] sm:$0x3]  ;;  %v3309_v23 = vmul.f32 %v3116_v8, %v487_v11 }
  0x25   : > { %2649 = vmatmul.msk.f32.vlgmr.msra.gmra.mxu1 %vm529_vm1, %v3157_v19  ;;  %v3215_v36 = vmul.f32 %v3141_v14, %v429_v30  ;;  %v3247_v46 = vmul.f32 %v3141_v14, %v431_v41  ;;  %v753_v53 = vrot.slane %v3157_v19, 1  ;;  %v433_v54 = vld [vmem:[%s3152_s12 + $0x40] sm:$0xff]  ;;  %v754_v55 = vrot.slane %v447_v49, 1  ;;  %v435_v3 = vld [vmem:[%s3152_s12 + $0x50] sm:$0xff]  ;;  %v489_v41 = vld [vmem:[%s3121_s20 + $0x18] sm:$0x3] }
  0x26   : > { %2659 = vmatmul.msk.f32.gmra.mxu2 %vm529_vm1, %v3144_v15  ;;  %2720 = vmatpush.msk.msra.mxu1 %vm554_vm0, %v1328_v40  ;;  %v3275_v59 = vmul.f32 %v3141_v14, %v433_v54  ;;  %v1049_v1 = vrot.slane %v3157_v19, 2  ;;  %v1050_v2 = vrot.slane %v447_v49, 2  ;;  %v756_v4 = vrot.slane %v3184_v27, 1  ;;  %v432_v42 = vld [vmem:[%s3152_s12 + $0x38] sm:$0x3] }
  0x27   : > { %v755_v61 = vsel %vm752_vm2, %v753_v53, %v754_v55  ;;  %v757_v5 = vrot.slane %v449_v62, 1  ;;  %v3299_v18 = vmul.f32 %v3141_v14, %v435_v3  ;;  %v451_v24 = vmul.f32 %v3141_v14, %v430_v13  ;;  %v434_v3 = vld [vmem:[%s3152_s12 + $0x48] sm:$0x3] }
  0x28   : > { %v861_v30 = vrot.slane %v3303_v22, 1  ;;  %v1052_v31 = vrot.slane %v3184_v27, 2  ;;  %v1053_v32 = vrot.slane %v449_v62, 2  ;;  %v759_v39 = vrot.slane %v3215_v36, 1  ;;  %v3366_v11 = vld [vmem:[%s3096_s8 + $0x48] sm:$0x3] }
  0x29   : > { %2655 = vmatmul.msk.f32.vlgmr.msrb.gmra.mxu3 %vm529_vm1, %v3160_v20  ;;  %v3306_v19 = vsel %vm752_vm2, %v756_v4, %v757_v5  ;;  %v760_v40 = vrot.slane %v451_v24, 1  ;;  %v3341_v53 = vmul.f32 %v3116_v8, %v489_v41  ;;  %v453_v54 = vmul.f32 %v3141_v14, %v432_v42  ;;  %v493_v42 = vld [vmem:[%s3121_s20 + $0x38] sm:$0x3] }
  0x2a   : > { %2642 = vmatmul.msk.f32.gmra.mxu0 %vm529_vm1, %v3147_v16  ;;  %2666 = vmatpush.msk.msrb.mxu3 %vm554_vm0, %v777_v21  ;;  %v1051_v21 = vsel %vm1048_vm3, %v1049_v1, %v1050_v2  ;;  %v3328_v43 = vsel %vm752_vm2, %v860_v29, %v861_v30  ;;  %v3331_v49 = vsel %vm1048_vm3, %v1052_v31, %v1053_v32  ;;  %v863_v55 = vrot.slane %v3181_v26, 1  ;;  %v491_v2 = vld [vmem:[%s3121_s20 + $0x28] sm:$0x3] }
  0x2b   : > { %4360 = vst [vmem:[#allocation2_spill] sm:$0xff] %v3331_v49  ;;  %v3338_v52 = vsel %vm752_vm2, %v759_v39, %v760_v40  ;;  %v864_v56 = vrot.slane %v3334_v50, 1  ;;  %v958_v62 = vrot.slane %v3144_v15, 1  ;;  %v959_v63 = vrot.slane %v3341_v53, 1 }
  0x2c   : > { %v762_v0 = vrot.slane %v3247_v46, 1  ;;  %v763_v1 = vrot.slane %v453_v54, 1  ;;  %v455_v29 = vmul.f32 %v3141_v14, %v434_v3  ;;  %v866_v30 = vrot.slane %v3211_v35, 1 }
  0x2d   : > { %2650 = vmatmul.msk.f32.gmra.mxu1 %vm529_vm1, %v3184_v27  ;;  %v3360_v4 = vsel %vm752_vm2, %v863_v55, %v864_v56  ;;  %v3369_v13 = vsel %vm752_vm2, %v958_v62, %v959_v63  ;;  %v867_v31 = vrot.slane %v3366_v11, 1  ;;  %v1058_v32 = vrot.slane %v3247_v46, 2 }
  0x2e   : > { %2660 = vmatmul.msk.f32.gmra.mxu2 %vm529_vm1, %v3178_v25  ;;  %4361 = vst [vmem:[#allocation3_spill] sm:$0xff] %v3360_v4  ;;  %v765_v40 = vrot.slane %v3275_v59, 1  ;;  %v766_v41 = vrot.slane %v455_v29, 1  ;;  %v1142_v56 = vrot.slane %v3105_v7, 2  ;;  %v869_v7 = vrot.slane %v3244_v45, 1 }
  0x2f   : > { %v3395_v55 = vsel %vm752_vm2, %v866_v30, %v867_v31  ;;  %v1062_v3 = vrot.slane %v455_v29, 2  ;;  %v964_v31 = vrot.slane %v3208_v34, 1 }
  0x30   : > { %4363 = vst [vmem:[#allocation5_spill] sm:$0xff] %v3395_v55  ;;  %v3409_v63 = vsel %vm752_vm2, %v765_v40, %v766_v41  ;;  %v495_v40 = vld [vmem:[%s3121_s20 + $0x48] sm:$0x3] }
  0x31   : > { %2656 = vmatmul.msk.f32.gmra.mxu3 %vm529_vm1, %v3187_v28  ;;  %v438_v41 = vld [vmem:[%s3152_s12 + $0x68] sm:$0x3] }
  0x32   : > { %2643 = vmatmul.msk.f32.gmra.mxu0 %vm529_vm1, %v3181_v26 }
  0x35   : > { %2651 = vmatmul.msk.f32.gmra.mxu1 %vm529_vm1, %v3215_v36 }
  0x36   : > { %2661 = vmatmul.msk.f32.gmra.mxu2 %vm529_vm1, %v3208_v34 }
  0x39   : > { %2664 = vmatmul.msk.f32.vlgmr.msra.gmra.mxu3 %vm529_vm1, %v3218_v37 }
  0x3a   : > { %2644 = vmatmul.msk.f32.gmra.mxu0 %vm529_vm1, %v3211_v35  ;;  %2702 = vmatpush.msk.msra.mxu3 %vm554_vm0, %v1166_v38  ;;  %v956_v38 = vrot.slane %v3309_v23, 1 }
  0x3c   : > { %v957_v51 = vsel %vm752_vm2, %v955_v33, %v956_v38  ;;  %v1059_v33 = vrot.slane %v453_v54, 2  ;;  %v961_v38 = vrot.slane %v3178_v25, 1  ;;  %v3403_v54 = vld [vmem:[%s3096_s8 + $0x58] sm:$0x3] }
  0x3d   : > { %2652 = vmatmul.msk.f32.gmra.mxu1 %vm529_vm1, %v3247_v46 }
  0x3e   : > { %2662 = vmatmul.msk.f32.gmra.mxu2 %vm529_vm1, %v3241_v44 }
  0x41   : > { %2665 = vmatmul.msk.f32.gmra.mxu3 %vm529_vm1, %v3250_v47 }
  0x42   : > { %2645 = vmatmul.msk.f32.gmra.mxu0 %vm529_vm1, %v3244_v45 }
  0x45   : > { %2653 = vmatmul.msk.f32.gmra.mxu1 %vm529_vm1, %v3275_v59 }
  0x46   : > { %2663 = vmatmul.msk.f32.gmra.mxu2 %vm529_vm1, %v3271_v57 }
  0x49   : > { %2667 = vmatmul.msk.f32.vlgmr.msrb.gmra.mxu3 %vm529_vm1, %v755_v61  ;;  %v1056_v61 = vrot.slane %v451_v24, 2  ;;  %v3375_v24 = vmul.f32 %v3116_v8, %v491_v2  ;;  %v1061_v2 = vrot.slane %v3275_v59, 2 }
  0x4a   : > { %2676 = vmatmul.msk.f32.vlgmr.msrb.gmra.mxu0 %vm529_vm1, %v856_v58  ;;  %v1055_v58 = vrot.slane %v3215_v36, 2 }
  0x4b   : > { %v962_v39 = vrot.slane %v3375_v24, 1 }
  0x4c   : > { %v3363_v5 = vsel %vm1048_vm3, %v1055_v58, %v1056_v61  ;;  %v1143_v58 = vrot.slane %v3253_v48, 2  ;;  %v3400_v61 = vsel %vm1048_vm3, %v1058_v32, %v1059_v33  ;;  %v870_v48 = vrot.slane %v3403_v54, 1 }
  0x4d   : > { %2654 = vmatmul.msk.f32.gmra.mxu1 %vm529_vm1, %v3299_v18  ;;  %4362 = vst [vmem:[#allocation4_spill] sm:$0xff] %v3363_v5  ;;  %v3406_v62 = vsel %vm752_vm2, %v961_v38, %v962_v39  ;;  %v768_v33 = vrot.slane %v3299_v18, 1  ;;  %v1440_v39 = vld [vmem:[%s4319_s3 + $0x16] sm:$0x3] }
  0x4e   : > { %2694 = vmatmul.msk.f32.vlgmr.msrb.gmra.mxu2 %vm529_vm1, %v1051_v21  ;;  %v3372_v21 = vsel %vm752_vm2, %v762_v0, %v763_v1  ;;  %4364 = vst [vmem:[#allocation6_spill] sm:$0xff] %v3400_v61  ;;  %v3412_v0 = vmul.f32 %v3116_v8, %v493_v42  ;;  %v3427_v30 = vsel %vm1048_vm3, %v1142_v56, %v1143_v58 }
  0x4f   : > { %4365 = vst [vmem:[#allocation7_spill] sm:$0xff] %v3406_v62  ;;  %2738 = vmatpush.msk.msrb.mxu3 %vm554_vm0, %v1440_v39  ;;  %v3439_v29 = vsel %vm752_vm2, %v869_v7, %v870_v48  ;;  %v3442_v42 = vsel %vm1048_vm3, %v1061_v2, %v1062_v3  ;;  %v872_v7 = vrot.slane %v3100_v6, 1  ;;  %v1064_v2 = vrot.slane %v3299_v18, 2 }
  0x50   : > { %v965_v32 = vrot.slane %v3412_v0, 1  ;;  %4366 = vst [vmem:[#allocation8_spill] sm:$0xff] %v3439_v29 }
  0x51   : > { %2668 = vmatmul.msk.f32.gmra.mxu3 %vm529_vm1, %v3306_v19  ;;  %4367 = vst [vmem:[#allocation9_spill] sm:$0xff] %v3442_v42 }
  0x52   : > { %2677 = vmatmul.msk.f32.gmra.mxu0 %vm529_vm1, %v3296_v17  ;;  %v3448_v56 = vsel %vm752_vm2, %v964_v31, %v965_v32  ;;  %v1618_v31 = vld [vmem:[%s4319_s3 + $0x1c] sm:$0x3]  ;;  %v967_v32 = vrot.slane %v3241_v44, 1 }
  0x53   : > { %4368 = vst [vmem:[#allocation10_spill] sm:$0xff] %v3448_v56  ;;  %2765 = vmatpush.msk.msrb.mxu2 %vm554_vm0, %v1618_v31 }
  0x55   : > { %2685 = vmatmul.msk.f32.vlgmr.msrb.gmra.mxu1 %vm529_vm1, %v957_v51  ;;  %v436_v51 = vld [vmem:[%s3152_s12 + $0x58] sm:$0x3] }
  0x56   : > { %2695 = vmatmul.msk.f32.gmra.mxu2 %vm529_vm1, %v3331_v49  ;;  %v457_v1 = vmul.f32 %v3141_v14, %v436_v51  ;;  %v3445_v51 = vld [vmem:[%s3096_s8 + $0x68] sm:$0x3] }
  0x57   : > { %v873_v48 = vrot.slane %v3445_v51, 1 }
  0x58   : > { %v769_v38 = vrot.slane %v457_v1, 1  ;;  %v1065_v3 = vrot.slane %v457_v1, 2 }
  0x59   : > { %2669 = vmatmul.msk.f32.gmra.mxu3 %vm529_vm1, %v3338_v52  ;;  %v3482_v1 = vsel %vm752_vm2, %v872_v7, %v873_v48  ;;  %v875_v7 = vrot.slane %v3124_v9, 1 }
  0x5a   : > { %2678 = vmatmul.msk.f32.gmra.mxu0 %vm529_vm1, %v3328_v43  ;;  %v3451_v58 = vsel %vm752_vm2, %v768_v33, %v769_v38  ;;  %v771_v38 = vrot.slane %v3160_v20, 1  ;;  %4369 = vst [vmem:[#allocation11_spill] sm:$0xff] %v3482_v1  ;;  %v3485_v49 = vsel %vm1048_vm3, %v1064_v2, %v1065_v3  ;;  %v1067_v2 = vrot.slane %v3160_v20, 2 }
  0x5b   : > { %4370 = vst [vmem:[#allocation12_spill] sm:$0xff] %v3485_v49 }
  0x5d   : > { %2686 = vmatmul.msk.f32.gmra.mxu1 %vm529_vm1, %v3369_v13 }
  0x5e   : > { %2696 = vmatmul.msk.f32.gmra.mxu2 %vm529_vm1, %v3363_v5  ;;  %v459_v5 = vmul.f32 %v3141_v14, %v438_v41  ;;  %v497_v41 = vld [vmem:[%s3121_s20 + $0x58] sm:$0x3] }
  0x60   : > { %v772_v39 = vrot.slane %v459_v5, 1  ;;  %v1068_v3 = vrot.slane %v459_v5, 2 }
  0x61   : > { %2670 = vmatmul.msk.f32.gmra.mxu3 %vm529_vm1, %v3372_v21 }
  0x62   : > { %2679 = vmatmul.msk.f32.gmra.mxu0 %vm529_vm1, %v3360_v4  ;;  %v3494_v31 = vsel %vm752_vm2, %v771_v38, %v772_v39  ;;  %v3497_v4 = vmul.f32 %v3116_v8, %v497_v41  ;;  %v774_v38 = vrot.slane %v3187_v28, 1  ;;  %v499_v41 = vld [vmem:[%s3121_s20 + $0x68] sm:$0x3]  ;;  %v3523_v5 = vsel %vm1048_vm3, %v1067_v2, %v1068_v3 }
  0x63   : > { %4372 = vst [vmem:[#allocation14_spill] sm:$0xff] %v3494_v31  ;;  %v973_v3 = vrot.slane %v3218_v37, 1 }
  0x64   : > { %4373 = vst [vmem:[#allocation15_spill] sm:$0xff] %v3523_v5 }
  0x65   : > { %2687 = vmatmul.msk.f32.gmra.mxu1 %vm529_vm1, %v3406_v62 }
  0x66   : > { %2697 = vmatmul.msk.f32.gmra.mxu2 %vm529_vm1, %v3400_v61  ;;  %v3454_v61 = vmul.f32 %v3116_v8, %v495_v40  ;;  %v1500_v40 = vld [vmem:[%s4319_s3 + $0x18] sm:$0x3] }
  0x67   : > { %2747 = vmatpush.msk.msrb.mxu0 %vm554_vm0, %v1500_v40 }
  0x68   : > { %v968_v33 = vrot.slane %v3454_v61, 1 }
  0x69   : > { %2671 = vmatmul.msk.f32.gmra.mxu3 %vm529_vm1, %v3409_v63 }
  0x6a   : > { %2680 = vmatmul.msk.f32.gmra.mxu0 %vm529_vm1, %v3395_v55  ;;  %v3491_v55 = vsel %vm752_vm2, %v967_v32, %v968_v33  ;;  %v970_v32 = vrot.slane %v3271_v57, 1  ;;  %v971_v33 = vrot.slane %v3497_v4, 1 }
  0x6b   : > { %4371 = vst [vmem:[#allocation13_spill] sm:$0xff] %v3491_v55 }
  0x6d   : > { %2688 = vmatmul.msk.f32.gmra.mxu1 %vm529_vm1, %v3448_v56 }
  0x6e   : > { %2698 = vmatmul.msk.f32.gmra.mxu2 %vm529_vm1, %v3442_v42  ;;  %v440_v42 = vld [vmem:[%s3152_s12 + $0x78] sm:$0x3] }
  0x6f   : > { %v461_v40 = vmul.f32 %v3141_v14, %v440_v42  ;;  %v1559_v42 = vld [vmem:[%s4319_s3 + $0x1a] sm:$0x3] }
  0x70   : > { %2756 = vmatpush.msk.msrb.mxu1 %vm554_vm0, %v1559_v42  ;;  %v1235_v42 = vrot.slane %v3131_v12, 2 }
  0x71   : > { %2672 = vmatmul.msk.f32.gmra.mxu3 %vm529_vm1, %v3451_v58  ;;  %v775_v39 = vrot.slane %v461_v40, 1  ;;  %v1071_v2 = vrot.slane %v461_v40, 2  ;;  %v1238_v40 = vrot.slane %v3144_v15, 2 }
  0x72   : > { %2681 = vmatmul.msk.f32.gmra.mxu0 %vm529_vm1, %v3439_v29  ;;  %v3488_v29 = vld [vmem:[%s3096_s8 + $0x78] sm:$0x3] }
  0x73   : > { %v876_v48 = vrot.slane %v3488_v29, 1 }
  0x75   : > { %2689 = vmatmul.msk.f32.gmra.mxu1 %vm529_vm1, %v3491_v55  ;;  %v3532_v55 = vmul.f32 %v3116_v8, %v499_v41  ;;  %v1239_v41 = vrot.slane %v3341_v53, 2 }
  0x76   : > { %2699 = vmatmul.msk.f32.gmra.mxu2 %vm529_vm1, %v3485_v49  ;;  %v3520_v49 = vsel %vm752_vm2, %v875_v7, %v876_v48  ;;  %v1236_v7 = vrot.slane %v3309_v23, 2  ;;  %v1070_v48 = vrot.slane %v3187_v28, 2 }
  0x78   : > { %v1237_v12 = vsel %vm1048_vm3, %v1235_v42, %v1236_v7  ;;  %v976_v42 = vrot.slane %v3250_v47, 1 }
  0x79   : > { %2673 = vmatmul.msk.f32.gmra.mxu3 %vm529_vm1, %v3494_v31  ;;  %v3529_v31 = vsel %vm752_vm2, %v774_v38, %v775_v39  ;;  %v3550_v38 = vsel %vm1048_vm3, %v1070_v48, %v1071_v2  ;;  %v1145_v48 = vrot.slane %v3127_v10, 2  ;;  %v1146_v2 = vrot.slane %v3278_v60, 2 }
  0x7a   : > { %2682 = vmatmul.msk.f32.gmra.mxu0 %vm529_vm1, %v3482_v1  ;;  %v3526_v1 = vsel %vm752_vm2, %v970_v32, %v971_v33  ;;  %4375 = vst [vmem:[#allocation17_spill] sm:$0xff] %v3529_v31  ;;  %v974_v32 = vrot.slane %v3532_v55, 1  ;;  %v501_v33 = vld [vmem:[%s3121_s20 + $0x78] sm:$0x3]  ;;  %v1148_v60 = vrot.slane %v3147_v16, 2 }
  0x7b   : > { %4374 = vst [vmem:[#allocation16_spill] sm:$0xff] %v3526_v1  ;;  %v3556_v39 = vmul.f32 %v3116_v8, %v501_v33  ;;  %v3578_v53 = vsel %vm1048_vm3, %v1145_v48, %v1146_v2  ;;  %v1242_v33 = vrot.slane %v3375_v24, 2  ;;  %v1244_v24 = vrot.slane %v3208_v34, 2 }
  0x7c   : > { %4376 = vst [vmem:[#allocation18_spill] sm:$0xff] %v3550_v38  ;;  %v3553_v23 = vsel %vm752_vm2, %v973_v3, %v974_v32  ;;  %v3572_v3 = vsel %vm1048_vm3, %v1238_v40, %v1239_v41  ;;  %v1152_v48 = vrot.slane %v3334_v50, 2 }
  0x7d   : > { %2690 = vmatmul.msk.f32.gmra.mxu1 %vm529_vm1, %v3526_v1  ;;  %4377 = vst [vmem:[#allocation19_spill] sm:$0xff] %v3553_v23  ;;  %v977_v7 = vrot.slane %v3556_v39, 1 }
  0x7e   : > { %2700 = vmatmul.msk.f32.gmra.mxu2 %vm529_vm1, %v3523_v5  ;;  %v1254_v5 = vrot.slane %v3532_v55, 2  ;;  %v1161_v55 = vrot.slane %v3445_v51, 2  ;;  %v1734_v51 = vld [vmem:[%s4319_s3 + $0x20] sm:$0x3] }
  0x7f   : > { %v3575_v32 = vsel %vm752_vm2, %v976_v42, %v977_v7  ;;  %v1245_v42 = vrot.slane %v3412_v0, 2  ;;  %v1151_v7 = vrot.slane %v3181_v26, 2  ;;  %v1248_v0 = vrot.slane %v3454_v61, 2 }
  0x80   : > { %4378 = vst [vmem:[#allocation20_spill] sm:$0xff] %v3575_v32 }
  0x81   : > { %2674 = vmatmul.msk.f32.gmra.mxu3 %vm529_vm1, %v3529_v31 }
  0x82   : > { %2683 = vmatmul.msk.f32.gmra.mxu0 %vm529_vm1, %v3520_v49 }
  0x85   : > { %2691 = vmatmul.msk.f32.gmra.mxu1 %vm529_vm1, %v3553_v23 }
  0x86   : > { %2701 = vmatmul.msk.f32.gmra.mxu2 %vm529_vm1, %v3550_v38 }
  0x89   : > { %2703 = vmatmul.msk.f32.vlgmr.msra.gmra.mxu3 %vm529_vm1, %v3427_v30  ;;  %v1241_v30 = vrot.slane %v3178_v25, 2 }
  0x8a   : > { %2712 = vmatmul.msk.f32.vlgmr.msra.gmra.mxu0 %vm529_vm1, %v1237_v12  ;;  %v1149_v12 = vrot.slane %v3303_v22, 2 }
  0x8b   : > { %v3593_v41 = vsel %vm1048_vm3, %v1241_v30, %v1242_v33  ;;  %v3611_v30 = vsel %vm1048_vm3, %v1244_v24, %v1245_v42  ;;  %v1154_v33 = vrot.slane %v3211_v35, 2  ;;  %2783 = vmatpush.msk.msra.mxu0 %vm554_vm0, %v1734_v51 }
  0x8d   : > { %2692 = vmatmul.msk.f32.gmra.mxu1 %vm529_vm1, %v3575_v32 }
  0x8e   : > { %2730 = vmatmul.msk.f32.vlgmr.msra.gmra.mxu2 %vm529_vm1, %v3127_v10  ;;  %v3596_v10 = vsel %vm1048_vm3, %v1148_v60, %v1149_v12  ;;  %v1155_v60 = vrot.slane %v3366_v11, 2  ;;  %v1251_v11 = vrot.slane %v3497_v4, 2 }
  0x91   : > { %2704 = vmatmul.msk.f32.gmra.mxu3 %vm529_vm1, %v3578_v53 }
  0x92   : > { %2713 = vmatmul.msk.f32.gmra.mxu0 %vm529_vm1, %v3572_v3 }
  0x95   : > { %2721 = vmatmul.msk.f32.vlgmr.msra.gmra.mxu1 %vm529_vm1, %v3184_v27  ;;  %v1247_v27 = vrot.slane %v3241_v44, 2 }
  0x96   : > { %2731 = vmatmul.msk.f32.gmra.mxu2 %vm529_vm1, %v3147_v16  ;;  %v3614_v16 = vsel %vm1048_vm3, %v1151_v7, %v1152_v48  ;;  %v3632_v7 = vsel %vm1048_vm3, %v1154_v33, %v1155_v60  ;;  %v1250_v48 = vrot.slane %v3271_v57, 2 }
  0x97   : > { %v575_v40 = vpop.f32.mrf.mxu0  ;;  %v3629_v42 = vsel %vm1048_vm3, %v1247_v27, %v1248_v0  ;;  %v1158_v27 = vrot.slane %v3403_v54, 2  ;;  %v1253_v54 = vrot.slane %v3218_v37, 2 }
  0x98   : > { %4379 = vst [vmem:[#allocation21_spill] sm:$0xff] %v3629_v42 }
  0x99   : > { %2705 = vmatmul.msk.f32.gmra.mxu3 %vm529_vm1, %v3596_v10 }
  0x9a   : > { %2714 = vmatmul.msk.f32.gmra.mxu0 %vm529_vm1, %v3593_v41 }
  0x9c   : > { %v593_v22 = vpop.f32.mrf.mxu3 }
  0x9d   : > { %2722 = vmatmul.msk.f32.gmra.mxu1 %vm529_vm1, %v3215_v36 }
  0x9e   : > { %2732 = vmatmul.msk.f32.gmra.mxu2 %vm529_vm1, %v3181_v26 }
  0x9f   : > { %v578_v2 = vpop.f32.mrf.mxu0 }
  0xa1   : > { %2706 = vmatmul.msk.f32.gmra.mxu3 %vm529_vm1, %v3614_v16  ;;  %v712_v12 = vpop.f32.mrf.mxu2 }
  0xa2   : > { %2715 = vmatmul.msk.f32.gmra.mxu0 %vm529_vm1, %v3611_v30  ;;  %v643_v26 = vpop.f32.mrf.mxu1 }
  0xa3   : > { %v644_v61 = vadd.f32 %v643_v26, %v575_v40  ;;  %v1157_v40 = vrot.slane %v3244_v45, 2 }
  0xa4   : > { %v596_v50 = vpop.f32.mrf.mxu3 }
  0xa5   : > { %v3640_v38 = vadd.f32 %v712_v12, %v644_v61  ;;  %2723 = vmatmul.msk.f32.gmra.mxu1 %vm529_vm1, %v3247_v46  ;;  %v3652_v12 = vsel %vm1048_vm3, %v1157_v40, %v1158_v27  ;;  %v3677_v27 = vsel %vm1048_vm3, %v1253_v54, %v1254_v5  ;;  %v1257_v5 = vrot.slane %v3556_v39, 2 }
  0xa6   : > { %2733 = vmatmul.msk.f32.gmra.mxu2 %vm529_vm1, %v3211_v35  ;;  %v3649_v35 = vsel %vm1048_vm3, %v1250_v48, %v1251_v11  ;;  %v1163_v54 = vrot.slane %v3124_v9, 2 }
  0xa7   : > { %v581_v24 = vpop.f32.mrf.mxu0 }
  0xa9   : > { %2707 = vmatmul.msk.f32.gmra.mxu3 %vm529_vm1, %v3632_v7  ;;  %v715_v0 = vpop.f32.mrf.mxu2 }
  0xaa   : > { %2716 = vmatmul.msk.f32.gmra.mxu0 %vm529_vm1, %v3629_v42  ;;  %v646_v4 = vpop.f32.mrf.mxu1 }
  0xab   : > { %v647_v61 = vadd.f32 %v646_v4, %v578_v2  ;;  %v1160_v2 = vrot.slane %v3100_v6, 2 }
  0xac   : > { %v661_v33 = vpop.f32.mrf.mxu3 }
  0xad   : > { %v662_v26 = vadd.f32 %v661_v33, %v593_v22  ;;  %v3660_v42 = vadd.f32 %v715_v0, %v647_v61  ;;  %2724 = vmatmul.msk.f32.gmra.mxu1 %vm529_vm1, %v3275_v59  ;;  %v1676_v22 = vld [vmem:[%s4319_s3 + $0x1e] sm:$0x3]  ;;  %v3680_v4 = vsel %vm1048_vm3, %v1160_v2, %v1161_v55 }
  0xae   : > { %2734 = vmatmul.msk.f32.gmra.mxu2 %vm529_vm1, %v3244_v45  ;;  %v1847_v45 = vld [vmem:[%s4319_s3 + $0x24] sm:$0x3]  ;;  %2774 = vmatpush.msk.msra.mxu3 %vm554_vm0, %v1676_v22  ;;  %4380 = vst [vmem:[#allocation22_spill] sm:$0xff] %v3680_v4  ;;  %v1256_v22 = vrot.slane %v3250_v47, 2 }
  0xaf   : > { %v584_v60 = vpop.f32.mrf.mxu0  ;;  %2801 = vmatpush.msk.msra.mxu2 %vm554_vm0, %v1847_v45 }
  0xb0   : > { %v3703_v55 = vsel %vm1048_vm3, %v1256_v22, %v1257_v5 }
  0xb1   : > { %2708 = vmatmul.msk.f32.gmra.mxu3 %vm529_vm1, %v3652_v12  ;;  %v718_v48 = vpop.f32.mrf.mxu2 }
  0xb2   : > { %2717 = vmatmul.msk.f32.gmra.mxu0 %vm529_vm1, %v3649_v35  ;;  %v649_v33 = vpop.f32.mrf.mxu1 }
  0xb3   : > { %v650_v61 = vadd.f32 %v649_v33, %v581_v24  ;;  %v1792_v24 = vld [vmem:[%s4319_s3 + $0x22] sm:$0x3] }
  0xb4   : > { %v664_v11 = vpop.f32.mrf.mxu3  ;;  %2792 = vmatpush.msk.msra.mxu1 %vm554_vm0, %v1792_v24 }
  0xb5   : > { %v665_v0 = vadd.f32 %v664_v11, %v596_v50  ;;  %v738_v50 = vadd.f32 %v718_v48, %v650_v61  ;;  %2725 = vmatmul.msk.f32.gmra.mxu1 %vm529_vm1, %v3299_v18 }
  0xb6   : > { %2735 = vmatmul.msk.f32.gmra.mxu2 %vm529_vm1, %v3100_v6  ;;  %v1164_v6 = vrot.slane %v3488_v29, 2 }
  0xb7   : > { %v587_v40 = vpop.f32.mrf.mxu0 }
  0xb8   : > { %v3708_v33 = vsel %vm1048_vm3, %v1163_v54, %v1164_v6  ;;  %v441_v6 = vld [vmem:[%s3152_s12 + $0x80] sm:$0xff] }
  0xb9   : > { %2709 = vmatmul.msk.f32.gmra.mxu3 %vm529_vm1, %v3680_v4  ;;  %v721_v39 = vpop.f32.mrf.mxu2  ;;  %4381 = vst [vmem:[#allocation23_spill] sm:$0xff] %v3708_v33 }
  0xba   : > { %2718 = vmatmul.msk.f32.gmra.mxu0 %vm529_vm1, %v3677_v27  ;;  %v652_v11 = vpop.f32.mrf.mxu1 }
  0xbb   : > { %v653_v61 = vadd.f32 %v652_v11, %v584_v60  ;;  %v3721_v60 = vld [vmem:[%s3096_s8 + $0x80] sm:$0xff]  ;;  %v3733_v11 = vmul.f32 %v3141_v14, %v441_v6 }
  0xbc   : > { %v730_v45 = vpop.f32.mrf.mxu3 }
  0xbd   : > { %v3705_v48 = vadd.f32 %v730_v45, %v662_v26  ;;  %v739_v29 = vadd.f32 %v721_v39, %v653_v61  ;;  %2726 = vmatmul.msk.f32.gmra.mxu1 %vm529_vm1, %v3160_v20 }
  0xbe   : > { %2736 = vmatmul.msk.f32.gmra.mxu2 %vm529_vm1, %v3124_v9 }
  0xbf   : > { %v590_v2 = vpop.f32.mrf.mxu0 }
  0xc1   : > { %2710 = vmatmul.msk.f32.gmra.mxu3 %vm529_vm1, %v3708_v33  ;;  %v724_v26 = vpop.f32.mrf.mxu2 }
  0xc2   : > { %2719 = vmatmul.msk.f32.gmra.mxu0 %vm529_vm1, %v3703_v55  ;;  %v655_v24 = vpop.f32.mrf.mxu1 }
  0xc3   : > { %v656_v54 = vadd.f32 %v655_v24, %v587_v40 }
  0xc4   : > { %v733_v51 = vpop.f32.mrf.mxu3 }
  0xc5   : > { %v3718_v5 = vadd.f32 %v733_v51, %v665_v0  ;;  %v740_v9 = vadd.f32 %v724_v26, %v656_v54  ;;  %2727 = vmatmul.msk.f32.gmra.mxu1 %vm529_vm1, %v3187_v28 }
  0xc6   : > { %2737 = vmatmul.msk.f32.gmra.mxu2 %vm529_vm1, %v3721_v60 }
  0xc7   : > { %v915_v22 = vpop.f32.mrf.mxu0 }
  0xc9   : > { %2739 = vmatmul.msk.f32.vlgmr.msrb.gmra.mxu3 %vm529_vm1, %v3144_v15  ;;  %v727_v0 = vpop.f32.mrf.mxu2 }
  0xca   : > { %2748 = vmatmul.msk.f32.vlgmr.msrb.gmra.mxu0 %vm529_vm1, %v3306_v19  ;;  %v658_v19 = vpop.f32.mrf.mxu1 }
  0xcb   : > { %v659_v61 = vadd.f32 %v658_v19, %v590_v2 }
  0xcc   : > { %v814_v39 = vpop.f32.mrf.mxu3 }
  0xcd   : > { %v838_v40 = vadd.f32 %v814_v39, %v3640_v38  ;;  %v741_v26 = vadd.f32 %v727_v0, %v659_v61  ;;  %2728 = vmatmul.msk.f32.gmra.mxu1 %vm529_vm1, %v3733_v11 }
  0xce   : > { %2766 = vmatmul.msk.f32.vlgmr.msrb.gmra.mxu2 %vm529_vm1, %v3369_v13 }
  0xcf   : > { %v918_v45 = vpop.f32.mrf.mxu0  ;;  %v939_v51 = vadd.f32 %v915_v22, %v838_v40 }
  0xd1   : > { %2740 = vmatmul.msk.f32.gmra.mxu3 %vm529_vm1, %v3178_v25  ;;  %v1110_v15 = vpop.f32.mrf.mxu2 }
  0xd2   : > { %2749 = vmatmul.msk.f32.gmra.mxu0 %vm529_vm1, %v3338_v52  ;;  %v1016_v2 = vpop.f32.mrf.mxu1 }
  0xd3   : > { %v1040_v22 = vadd.f32 %v1016_v2, %v939_v51 }
  0xd4   : > { %v817_v24 = vpop.f32.mrf.mxu3 }
  0xd5   : > { %v839_v38 = vadd.f32 %v817_v24, %v3660_v42  ;;  %v3749_v13 = vadd.f32 %v1110_v15, %v1040_v22  ;;  %2757 = vmatmul.msk.f32.vlgmr.msrb.gmra.mxu1 %vm529_vm1, %v3296_v17  ;;  %v4382_v22 = vld [vmem:[#allocation13_spill] sm:$0xff] }
  0xd6   : > { %2767 = vmatmul.msk.f32.gmra.mxu2 %vm529_vm1, %v3406_v62 }
  0xd7   : > { %v921_v54 = vpop.f32.mrf.mxu0  ;;  %v940_v6 = vadd.f32 %v918_v45, %v839_v38 }
  0xd9   : > { %2741 = vmatmul.msk.f32.gmra.mxu3 %vm529_vm1, %v3208_v34  ;;  %v1113_v0 = vpop.f32.mrf.mxu2 }
  0xda   : > { %2750 = vmatmul.msk.f32.gmra.mxu0 %vm529_vm1, %v3372_v21  ;;  %v1019_v19 = vpop.f32.mrf.mxu1 }
  0xdb   : > { %v1041_v45 = vadd.f32 %v1019_v19, %v940_v6 }
  0xdc   : > { %v820_v39 = vpop.f32.mrf.mxu3 }
  0xdd   : > { %v840_v40 = vadd.f32 %v820_v39, %v738_v50  ;;  %v3759_v51 = vadd.f32 %v1113_v0, %v1041_v45  ;;  %2758 = vmatmul.msk.f32.gmra.mxu1 %vm529_vm1, %v3328_v43  ;;  %v4383_v0 = vld [vmem:[#allocation3_spill] sm:$0xff] }
  0xde   : > { %2768 = vmatmul.msk.f32.gmra.mxu2 %vm529_vm1, %v3448_v56 }
  0xdf   : > { %v924_v42 = vpop.f32.mrf.mxu0  ;;  %v941_v61 = vadd.f32 %v921_v54, %v840_v40 }
  0xe1   : > { %2742 = vmatmul.msk.f32.gmra.mxu3 %vm529_vm1, %v3241_v44  ;;  %v1116_v17 = vpop.f32.mrf.mxu2 }
  0xe2   : > { %2751 = vmatmul.msk.f32.gmra.mxu0 %vm529_vm1, %v3409_v63  ;;  %v1022_v38 = vpop.f32.mrf.mxu1 }
  0xe3   : > { %v1042_v54 = vadd.f32 %v1022_v38, %v941_v61  ;;  %v4385_v38 = vld [vmem:[#allocation5_spill] sm:$0xff] }
  0xe4   : > { %v823_v15 = vpop.f32.mrf.mxu3 }
  0xe5   : > { %v841_v24 = vadd.f32 %v823_v15, %v739_v29  ;;  %v3769_v6 = vadd.f32 %v1116_v17, %v1042_v54  ;;  %2759 = vmatmul.msk.f32.gmra.mxu1 %vm529_vm1, %v4383_v0  ;;  %v4384_v15 = vld [vmem:[#allocation14_spill] sm:$0xff] }
  0xe6   : > { %2769 = vmatmul.msk.f32.gmra.mxu2 %vm529_vm1, %v4382_v22  ;;  %v1903_v17 = vld [vmem:[%s4319_s3 + $0x26] sm:$0x3] }
  0xe7   : > { %v927_v50 = vpop.f32.mrf.mxu0  ;;  %v942_v2 = vadd.f32 %v924_v42, %v841_v24  ;;  %2810 = vmatpush.msk.msrb.mxu3 %vm554_vm0, %v1903_v17 }
  0xe9   : > { %2743 = vmatmul.msk.f32.gmra.mxu3 %vm529_vm1, %v3271_v57  ;;  %v1119_v39 = vpop.f32.mrf.mxu2 }
  0xea   : > { %2752 = vmatmul.msk.f32.gmra.mxu0 %vm529_vm1, %v3451_v58  ;;  %v1025_v42 = vpop.f32.mrf.mxu1 }
  0xeb   : > { %v1043_v45 = vadd.f32 %v1025_v42, %v942_v2 }
  0xec   : > { %v826_v29 = vpop.f32.mrf.mxu3 }
  0xed   : > { %v842_v19 = vadd.f32 %v826_v29, %v740_v9  ;;  %v3783_v24 = vadd.f32 %v1119_v39, %v1043_v45  ;;  %2760 = vmatmul.msk.f32.gmra.mxu1 %vm529_vm1, %v4385_v38  ;;  %v442_v9 = vld [vmem:[%s3152_s12 + $0x88] sm:$0x3] }
  0xee   : > { %2770 = vmatmul.msk.f32.gmra.mxu2 %vm529_vm1, %v3526_v1  ;;  %v3795_v39 = vmul.f32 %v3141_v14, %v442_v9  ;;  %v1959_v1 = vld [vmem:[%s4319_s3 + $0x28] sm:$0x3] }
  0xef   : > { %v930_v40 = vpop.f32.mrf.mxu0  ;;  %v943_v61 = vadd.f32 %v927_v50, %v842_v19  ;;  %v2078_v50 = vld [vmem:[%s4319_s3 + $0x2c] sm:$0x3]  ;;  %2819 = vmatpush.msk.msrb.mxu0 %vm554_vm0, %v1959_v1 }
  0xf0   : > { %2837 = vmatpush.msk.msrb.mxu2 %vm554_vm0, %v2078_v50  ;;  %v1497_v50 = vrot.slane %v3733_v11, 1  ;;  %v1498_v9 = vrot.slane %v3795_v39, 1 }
  0xf1   : > { %2744 = vmatmul.msk.f32.gmra.mxu3 %vm529_vm1, %v3218_v37  ;;  %v1122_v54 = vpop.f32.mrf.mxu2 }
  0xf2   : > { %2753 = vmatmul.msk.f32.gmra.mxu0 %vm529_vm1, %v4384_v15  ;;  %v1028_v42 = vpop.f32.mrf.mxu1  ;;  %v3820_v1 = vsel %vm752_vm2, %v1497_v50, %v1498_v9  ;;  %v4387_v9 = vld [vmem:[#allocation11_spill] sm:$0xff] }
  0xf3   : > { %v1044_v45 = vadd.f32 %v1028_v42, %v943_v61  ;;  %v4386_v61 = vld [vmem:[#allocation8_spill] sm:$0xff] }
  0xf4   : > { %v829_v2 = vpop.f32.mrf.mxu3 }
  0xf5   : > { %v843_v19 = vadd.f32 %v829_v2, %v741_v26  ;;  %v3807_v26 = vadd.f32 %v1122_v54, %v1044_v45  ;;  %2761 = vmatmul.msk.f32.gmra.mxu1 %vm529_vm1, %v4386_v61  ;;  %v502_v2 = vld [vmem:[%s3121_s20 + $0x80] sm:$0xff] }
  0xf6   : > { %2771 = vmatmul.msk.f32.gmra.mxu2 %vm529_vm1, %v3553_v23  ;;  %v3824_v45 = vmul.f32 %v3116_v8, %v502_v2 }
  0xf7   : > { %v933_v29 = vpop.f32.mrf.mxu0  ;;  %v944_v17 = vadd.f32 %v930_v40, %v843_v19  ;;  %v2019_v40 = vld [vmem:[%s4319_s3 + $0x2a] sm:$0x3]  ;;  %v503_v19 = vld [vmem:[%s3121_s20 + $0x88] sm:$0x3] }
  0xf8   : > { %2828 = vmatpush.msk.msrb.mxu1 %vm554_vm0, %v2019_v40  ;;  %v3827_v56 = vmul.f32 %v3116_v8, %v503_v19 }
  0xf9   : > { %2745 = vmatmul.msk.f32.gmra.mxu3 %vm529_vm1, %v3250_v47  ;;  %v1125_v42 = vpop.f32.mrf.mxu2 }
  0xfa   : > { %2754 = vmatmul.msk.f32.gmra.mxu0 %vm529_vm1, %v3529_v31  ;;  %v1031_v62 = vpop.f32.mrf.mxu1 }
  0xfb   : > { %v1045_v31 = vadd.f32 %v1031_v62, %v944_v17  ;;  %v1616_v62 = vrot.slane %v3827_v56, 1 }
  0xfc   : > { %v832_v23 = vpop.f32.mrf.mxu3 }
  0xfd   : > { %v844_v54 = vadd.f32 %v832_v23, %v3705_v48  ;;  %v3833_v50 = vadd.f32 %v1125_v42, %v1045_v31  ;;  %2762 = vmatmul.msk.f32.gmra.mxu1 %vm529_vm1, %v4387_v9  ;;  %v1615_v23 = vrot.slane %v3824_v45, 1 }
  0xfe   : > { %2772 = vmatmul.msk.f32.gmra.mxu2 %vm529_vm1, %v3575_v32 }
  0xff   : > { %v936_v22 = vpop.f32.mrf.mxu0  ;;  %v945_v15 = vadd.f32 %v933_v29, %v844_v54  ;;  %v3843_v2 = vsel %vm752_vm2, %v1615_v23, %v1616_v62  ;;  %v3846_v54 = vld [vmem:[%s3096_s8 + $0x88] sm:$0x3]  ;;  %v1556_v23 = vrot.slane %v3721_v60, 1 }
 0x100   : > { %4388 = vst [vmem:[#allocation3_spill] sm:$0xff] %v3843_v2 }
 0x101   : > { %2746 = vmatmul.msk.f32.gmra.mxu3 %vm529_vm1, %v3824_v45  ;;  %v1128_v48 = vpop.f32.mrf.mxu2 }
 0x102   : > { %2755 = vmatmul.msk.f32.gmra.mxu0 %vm529_vm1, %v3820_v1  ;;  %v1034_v31 = vpop.f32.mrf.mxu1 }
 0x103   : > { %v1046_v19 = vadd.f32 %v1034_v31, %v945_v15 }
 0x104   : > { %v835_v29 = vpop.f32.mrf.mxu3 }
 0x105   : > { %v845_v40 = vadd.f32 %v835_v29, %v3718_v5  ;;  %v3852_v32 = vadd.f32 %v1128_v48, %v1046_v19  ;;  %2763 = vmatmul.msk.f32.gmra.mxu1 %vm529_vm1, %v3520_v49  ;;  %v4389_v5 = vld [vmem:[#allocation2_spill] sm:$0xff] }
 0x106   : > { %2773 = vmatmul.msk.f32.gmra.mxu2 %vm529_vm1, %v3843_v2  ;;  %v4390_v2 = vld [vmem:[#allocation4_spill] sm:$0xff] }
 0x107   : > { %v1296_v17 = vpop.f32.mrf.mxu0  ;;  %v946_v42 = vadd.f32 %v936_v22, %v845_v40  ;;  %v1557_v22 = vrot.slane %v3846_v54, 1 }
 0x109   : > { %2775 = vmatmul.msk.f32.vlgmr.msra.gmra.mxu3 %vm529_vm1, %v4389_v5  ;;  %v1131_v15 = vpop.f32.mrf.mxu2  ;;  %v3862_v31 = vsel %vm752_vm2, %v1556_v23, %v1557_v22 }
 0x10a   : > { %2784 = vmatmul.msk.f32.vlgmr.msra.gmra.mxu0 %vm529_vm1, %v3578_v53  ;;  %v1037_v40 = vpop.f32.mrf.mxu1 }
 0x10b   : > { %v1047_v48 = vadd.f32 %v1037_v40, %v946_v42 }
 0x10c   : > { %v1203_v62 = vpop.f32.mrf.mxu3 }
 0x10d   : > { %v1227_v53 = vadd.f32 %v1203_v62, %v3749_v13  ;;  %v3868_v5 = vadd.f32 %v1131_v15, %v1047_v48  ;;  %2764 = vmatmul.msk.f32.gmra.mxu1 %vm529_vm1, %v3862_v31  ;;  %v4391_v15 = vld [vmem:[#allocation6_spill] sm:$0xff] }
 0x10e   : > { %2802 = vmatmul.msk.f32.vlgmr.msra.gmra.mxu2 %vm529_vm1, %v3215_v36 }
 0x10f   : > { %v1299_v29 = vpop.f32.mrf.mxu0  ;;  %v1320_v19 = vadd.f32 %v1296_v17, %v1227_v53 }
 0x111   : > { %2776 = vmatmul.msk.f32.gmra.mxu3 %vm529_vm1, %v4390_v2  ;;  %v1408_v13 = vpop.f32.mrf.mxu2 }
 0x112   : > { %2785 = vmatmul.msk.f32.gmra.mxu0 %vm529_vm1, %v3596_v10  ;;  %v1352_v17 = vpop.f32.mrf.mxu1 }
 0x113   : > { %v1376_v22 = vadd.f32 %v1352_v17, %v1320_v19 }
 0x114   : > { %v1206_v62 = vpop.f32.mrf.mxu3 }
 0x115   : > { %v1228_v42 = vadd.f32 %v1206_v62, %v3759_v51  ;;  %v3879_v36 = vadd.f32 %v1408_v13, %v1376_v22  ;;  %2793 = vmatmul.msk.f32.vlgmr.msra.gmra.mxu1 %vm529_vm1, %v3572_v3  ;;  %v4392_v3 = vld [vmem:[#allocation9_spill] sm:$0xff] }
 0x116   : > { %2803 = vmatmul.msk.f32.gmra.mxu2 %vm529_vm1, %v3247_v46 }
 0x117   : > { %v1302_v23 = vpop.f32.mrf.mxu0  ;;  %v1321_v53 = vadd.f32 %v1299_v29, %v1228_v42 }
 0x119   : > { %2777 = vmatmul.msk.f32.gmra.mxu3 %vm529_vm1, %v4391_v15  ;;  %v1411_v40 = vpop.f32.mrf.mxu2 }
 0x11a   : > { %2786 = vmatmul.msk.f32.gmra.mxu0 %vm529_vm1, %v3614_v16  ;;  %v1355_v29 = vpop.f32.mrf.mxu1 }
 0x11b   : > { %v1377_v62 = vadd.f32 %v1355_v29, %v1321_v53 }
 0x11c   : > { %v1209_v48 = vpop.f32.mrf.mxu3 }
 0x11d   : > { %v1229_v19 = vadd.f32 %v1209_v48, %v3769_v6  ;;  %v3890_v46 = vadd.f32 %v1411_v40, %v1377_v62  ;;  %2794 = vmatmul.msk.f32.gmra.mxu1 %vm529_vm1, %v3593_v41  ;;  %v4393_v40 = vld [vmem:[#allocation12_spill] sm:$0xff] }
 0x11e   : > { %2804 = vmatmul.msk.f32.gmra.mxu2 %vm529_vm1, %v3275_v59 }
 0x11f   : > { %v1305_v51 = vpop.f32.mrf.mxu0  ;;  %v1322_v42 = vadd.f32 %v1302_v23, %v1229_v19 }
 0x121   : > { %2778 = vmatmul.msk.f32.gmra.mxu3 %vm529_vm1, %v4392_v3  ;;  %v1414_v13 = vpop.f32.mrf.mxu2 }
 0x122   : > { %2787 = vmatmul.msk.f32.gmra.mxu0 %vm529_vm1, %v3632_v7  ;;  %v1358_v23 = vpop.f32.mrf.mxu1 }
 0x123   : > { %v1378_v53 = vadd.f32 %v1358_v23, %v1322_v42 }
 0x124   : > { %v1212_v17 = vpop.f32.mrf.mxu3 }
 0x125   : > { %v1230_v22 = vadd.f32 %v1212_v17, %v3783_v24  ;;  %v3901_v59 = vadd.f32 %v1414_v13, %v1378_v53  ;;  %2795 = vmatmul.msk.f32.gmra.mxu1 %vm529_vm1, %v3611_v30 }
 0x126   : > { %2805 = vmatmul.msk.f32.gmra.mxu2 %vm529_vm1, %v3299_v18  ;;  %v2137_v18 = vld [vmem:[%s4319_s3 + $0x2e] sm:$0x3] }
 0x127   : > { %v1308_v6 = vpop.f32.mrf.mxu0  ;;  %v1323_v48 = vadd.f32 %v1305_v51, %v1230_v22  ;;  %2846 = vmatpush.msk.msra.mxu3 %vm554_vm0, %v2137_v18  ;;  %v4394_v22 = vld [vmem:[#allocation21_spill] sm:$0xff]  ;;  %v1732_v18 = vrot.slane %v3846_v54, 2 }
 0x129   : > { %2779 = vmatmul.msk.f32.gmra.mxu3 %vm529_vm1, %v4393_v40  ;;  %v1417_v19 = vpop.f32.mrf.mxu2 }
 0x12a   : > { %2788 = vmatmul.msk.f32.gmra.mxu0 %vm529_vm1, %v3652_v12  ;;  %v1361_v51 = vpop.f32.mrf.mxu1 }
 0x12b   : > { %v1379_v42 = vadd.f32 %v1361_v51, %v1323_v48  ;;  %v2195_v51 = vld [vmem:[%s4319_s3 + $0x30] sm:$0x3] }
 0x12c   : > { %v1215_v29 = vpop.f32.mrf.mxu3  ;;  %2855 = vmatpush.msk.msra.mxu0 %vm554_vm0, %v2195_v51 }
 0x12d   : > { %v1231_v62 = vadd.f32 %v1215_v29, %v3807_v26  ;;  %v3916_v13 = vadd.f32 %v1417_v19, %v1379_v42  ;;  %2796 = vmatmul.msk.f32.gmra.mxu1 %vm529_vm1, %v4394_v22  ;;  %v4395_v26 = vld [vmem:[#allocation15_spill] sm:$0xff]  ;;  %v1731_v42 = vrot.slane %v3721_v60, 2 }
 0x12e   : > { %2806 = vmatmul.msk.f32.gmra.mxu2 %vm529_vm1, %v3160_v20 }
 0x12f   : > { %v1311_v24 = vpop.f32.mrf.mxu0  ;;  %v1324_v17 = vadd.f32 %v1308_v6, %v1231_v62  ;;  %v2311_v6 = vld [vmem:[%s4319_s3 + $0x34] sm:$0x3] }
 0x130   : > { %2873 = vmatpush.msk.msra.mxu2 %vm554_vm0, %v2311_v6  ;;  %v1673_v6 = vrot.slane %v3733_v11, 2 }
 0x131   : > { %2780 = vmatmul.msk.f32.gmra.mxu3 %vm529_vm1, %v4395_v26  ;;  %v1420_v23 = vpop.f32.mrf.mxu2 }
 0x132   : > { %2789 = vmatmul.msk.f32.gmra.mxu0 %vm529_vm1, %v3680_v4  ;;  %v1364_v29 = vpop.f32.mrf.mxu1 }
 0x133   : > { %v1380_v19 = vadd.f32 %v1364_v29, %v1324_v17  ;;  %v2253_v17 = vld [vmem:[%s4319_s3 + $0x32] sm:$0x3] }
 0x134   : > { %v1218_v53 = vpop.f32.mrf.mxu3  ;;  %2864 = vmatpush.msk.msra.mxu1 %vm554_vm0, %v2253_v17 }
 0x135   : > { %v1232_v20 = vadd.f32 %v1218_v53, %v3833_v50  ;;  %v3937_v50 = vadd.f32 %v1420_v23, %v1380_v19  ;;  %2797 = vmatmul.msk.f32.gmra.mxu1 %vm529_vm1, %v3649_v35 }
 0x136   : > { %2807 = vmatmul.msk.f32.gmra.mxu2 %vm529_vm1, %v3187_v28  ;;  %v1674_v28 = vrot.slane %v3795_v39, 2 }
 0x137   : > { %v1314_v48 = vpop.f32.mrf.mxu0  ;;  %v1325_v62 = vadd.f32 %v1311_v24, %v1232_v20  ;;  %v4396_v24 = vld [vmem:[#allocation18_spill] sm:$0xff]  ;;  %v3950_v20 = vsel %vm1048_vm3, %v1731_v42, %v1732_v18 }
 0x138   : > { %v3954_v51 = vsel %vm1048_vm3, %v1673_v6, %v1674_v28 }
 0x139   : > { %2781 = vmatmul.msk.f32.gmra.mxu3 %vm529_vm1, %v4396_v24  ;;  %v1423_v54 = vpop.f32.mrf.mxu2 }
 0x13a   : > { %2790 = vmatmul.msk.f32.gmra.mxu0 %vm529_vm1, %v3708_v33  ;;  %v1367_v19 = vpop.f32.mrf.mxu1 }
 0x13b   : > { %v1381_v33 = vadd.f32 %v1367_v19, %v1325_v62 }
 0x13c   : > { %v1221_v23 = vpop.f32.mrf.mxu3 }
 0x13d   : > { %v1233_v29 = vadd.f32 %v1221_v23, %v3852_v32  ;;  %v3960_v39 = vadd.f32 %v1423_v54, %v1381_v33  ;;  %2798 = vmatmul.msk.f32.gmra.mxu1 %vm529_vm1, %v3677_v27  ;;  %v443_v32 = vld [vmem:[%s3152_s12 + $0x90] sm:$0xff]  ;;  %v2934_v54 = vld [vmem:[%s3096_s8 + $0x20] sm:$0xff] }
 0x13e   : > { %2808 = vmatmul.msk.f32.gmra.mxu2 %vm529_vm1, %v3733_v11 }
 0x13f   : > { %v1317_v53 = vpop.f32.mrf.mxu0  ;;  %v1326_v4 = vadd.f32 %v1314_v48, %v1233_v29  ;;  %v3968_v48 = vmul.f32 %v3141_v14, %v443_v32 }
 0x141   : > { %2782 = vmatmul.msk.f32.gmra.mxu3 %vm529_vm1, %v3954_v51  ;;  %v1426_v42 = vpop.f32.mrf.mxu2 }
 0x142   : > { %2791 = vmatmul.msk.f32.gmra.mxu0 %vm529_vm1, %v3950_v20  ;;  %v1370_v6 = vpop.f32.mrf.mxu1 }
 0x143   : > { %v1382_v11 = vadd.f32 %v1370_v6, %v1326_v4  ;;  %v1790_v4 = vrot.slane %v3827_v56, 2  ;;  %v2935_v56 = vld [vmem:[%s3096_s8 + $0x30] sm:$0xff] }
 0x144   : > { %v1224_v18 = vpop.f32.mrf.mxu3 }
 0x145   : > { %v1234_v17 = vadd.f32 %v1224_v18, %v3868_v5  ;;  %v3975_v28 = vadd.f32 %v1426_v42, %v1382_v11  ;;  %2799 = vmatmul.msk.f32.gmra.mxu1 %vm529_vm1, %v3703_v55  ;;  %v1789_v5 = vrot.slane %v3824_v45, 2 }
 0x146   : > { %2809 = vmatmul.msk.f32.gmra.mxu2 %vm529_vm1, %v3968_v48 }
 0x147   : > { %v1523_v62 = vpop.f32.mrf.mxu0  ;;  %v1327_v33 = vadd.f32 %v1317_v53, %v1234_v17  ;;  %v3985_v32 = vsel %vm1048_vm3, %v1789_v5, %v1790_v4  ;;  %v2936_v5 = vld [vmem:[%s3096_s8 + $0x40] sm:$0xff] }
 0x149   : > { %2811 = vmatmul.msk.f32.vlgmr.msrb.gmra.mxu3 %vm529_vm1, %v2934_v54  ;;  %v1429_v23 = vpop.f32.mrf.mxu2 }
 0x14a   : > { %2820 = vmatmul.msk.f32.vlgmr.msrb.gmra.mxu0 %vm529_vm1, %v3178_v25  ;;  %v1373_v19 = vpop.f32.mrf.mxu1 }
 0x14b   : > { %v1383_v42 = vadd.f32 %v1373_v19, %v1327_v33 }
 0x14c   : > { %v1464_v53 = vpop.f32.mrf.mxu3 }
 0x14d   : > { %v1488_v25 = vadd.f32 %v1464_v53, %v3879_v36  ;;  %v3991_v17 = vadd.f32 %v1429_v23, %v1383_v42  ;;  %2800 = vmatmul.msk.f32.gmra.mxu1 %vm529_vm1, %v3985_v32 }
 0x14e   : > { %2838 = vmatmul.msk.f32.vlgmr.msrb.gmra.mxu2 %vm529_vm1, %v3328_v43 }
 0x14f   : > { %v1526_v29 = vpop.f32.mrf.mxu0  ;;  %v1547_v18 = vadd.f32 %v1523_v62, %v1488_v25 }
 0x151   : > { %2812 = vmatmul.msk.f32.gmra.mxu3 %vm529_vm1, %v2935_v56  ;;  %v1641_v36 = vpop.f32.mrf.mxu2 }
 0x152   : > { %2821 = vmatmul.msk.f32.gmra.mxu0 %vm529_vm1, %v3208_v34  ;;  %v1582_v33 = vpop.f32.mrf.mxu1 }
 0x153   : > { %v1606_v54 = vadd.f32 %v1582_v33, %v1547_v18 }
 0x154   : > { %v1467_v6 = vpop.f32.mrf.mxu3 }
 0x155   : > { %v1489_v62 = vadd.f32 %v1467_v6, %v3890_v46  ;;  %v4002_v43 = vadd.f32 %v1641_v36, %v1606_v54  ;;  %2829 = vmatmul.msk.f32.vlgmr.msrb.gmra.mxu1 %vm529_vm1, %v3338_v52  ;;  %v2937_v52 = vld [vmem:[%s3096_s8 + $0x50] sm:$0xff] }
 0x156   : > { %2839 = vmatmul.msk.f32.gmra.mxu2 %vm529_vm1, %v4383_v0 }
 0x157   : > { %v1529_v11 = vpop.f32.mrf.mxu0  ;;  %v1548_v34 = vadd.f32 %v1526_v29, %v1489_v62 }
 0x159   : > { %2813 = vmatmul.msk.f32.gmra.mxu3 %vm529_vm1, %v2936_v5  ;;  %v1644_v4 = vpop.f32.mrf.mxu2 }
 0x15a   : > { %2822 = vmatmul.msk.f32.gmra.mxu0 %vm529_vm1, %v3241_v44  ;;  %v1585_v29 = vpop.f32.mrf.mxu1 }
 0x15b   : > { %v1607_v25 = vadd.f32 %v1585_v29, %v1548_v34 }
 0x15c   : > { %v1470_v46 = vpop.f32.mrf.mxu3 }
 0x15d   : > { %v1490_v53 = vadd.f32 %v1470_v46, %v3901_v59  ;;  %v4013_v0 = vadd.f32 %v1644_v4, %v1607_v25  ;;  %2830 = vmatmul.msk.f32.gmra.mxu1 %vm529_vm1, %v3372_v21  ;;  %v2938_v21 = vld [vmem:[%s3096_s8 + $0x60] sm:$0xff] }
 0x15e   : > { %2840 = vmatmul.msk.f32.gmra.mxu2 %vm529_vm1, %v4385_v38 }
 0x15f   : > { %v1532_v23 = vpop.f32.mrf.mxu0  ;;  %v1549_v44 = vadd.f32 %v1529_v11, %v1490_v53  ;;  %v4397_v53 = vld [vmem:[#allocation14_spill] sm:$0xff] }
 0x161   : > { %2814 = vmatmul.msk.f32.gmra.mxu3 %vm529_vm1, %v2937_v52  ;;  %v1647_v19 = vpop.f32.mrf.mxu2 }
 0x162   : > { %2823 = vmatmul.msk.f32.gmra.mxu0 %vm529_vm1, %v3271_v57  ;;  %v1588_v56 = vpop.f32.mrf.mxu1 }
 0x163   : > { %v1608_v36 = vadd.f32 %v1588_v56, %v1549_v44 }
 0x164   : > { %v1473_v59 = vpop.f32.mrf.mxu3 }
 0x165   : > { %v1491_v18 = vadd.f32 %v1473_v59, %v3916_v13  ;;  %v4024_v38 = vadd.f32 %v1647_v19, %v1608_v36  ;;  %2831 = vmatmul.msk.f32.gmra.mxu1 %vm529_vm1, %v3409_v63  ;;  %v2939_v63 = vld [vmem:[%s3096_s8 + $0x70] sm:$0xff]  ;;  %v4061_v19 = vld [vmem:[%s3096_s8 + $0x98] sm:$0x3] }
 0x166   : > { %2841 = vmatmul.msk.f32.gmra.mxu2 %vm529_vm1, %v4386_v61  ;;  %v2076_v56 = vrot.slane %v4061_v19, 1 }
 0x167   : > { %v1535_v42 = vpop.f32.mrf.mxu0  ;;  %v1550_v57 = vadd.f32 %v1532_v23, %v1491_v18  ;;  %v4398_v18 = vld [vmem:[#allocation17_spill] sm:$0xff] }
 0x169   : > { %2815 = vmatmul.msk.f32.gmra.mxu3 %vm529_vm1, %v2938_v21  ;;  %v1650_v6 = vpop.f32.mrf.mxu2 }
 0x16a   : > { %2824 = vmatmul.msk.f32.gmra.mxu0 %vm529_vm1, %v3218_v37  ;;  %v1591_v33 = vpop.f32.mrf.mxu1 }
 0x16b   : > { %v1609_v54 = vadd.f32 %v1591_v33, %v1550_v57  ;;  %v444_v57 = vld [vmem:[%s3152_s12 + $0x98] sm:$0x3] }
 0x16c   : > { %v1476_v13 = vpop.f32.mrf.mxu3 }
 0x16d   : > { %v1492_v62 = vadd.f32 %v1476_v13, %v3937_v50  ;;  %v4035_v61 = vadd.f32 %v1650_v6, %v1609_v54  ;;  %2832 = vmatmul.msk.f32.gmra.mxu1 %vm529_vm1, %v3451_v58  ;;  %v504_v58 = vld [vmem:[%s3121_s20 + $0x90] sm:$0xff] }
 0x16e   : > { %2842 = vmatmul.msk.f32.gmra.mxu2 %vm529_vm1, %v4387_v9  ;;  %v4054_v29 = vmul.f32 %v3116_v8, %v504_v58  ;;  %v4400_v58 = vld [vmem:[#allocation10_spill] sm:$0xff] }
 0x16f   : > { %v1538_v11 = vpop.f32.mrf.mxu0  ;;  %v1551_v37 = vadd.f32 %v1535_v42, %v1492_v62  ;;  %v4079_v62 = vmul.f32 %v3141_v14, %v444_v57 }
 0x171   : > { %2816 = vmatmul.msk.f32.gmra.mxu3 %vm529_vm1, %v2939_v63  ;;  %v1653_v34 = vpop.f32.mrf.mxu2  ;;  %v4399_v63 = vld [vmem:[#allocation7_spill] sm:$0xff]  ;;  %v2017_v14 = vrot.slane %v4079_v62, 1 }
 0x172   : > { %2825 = vmatmul.msk.f32.gmra.mxu0 %vm529_vm1, %v3250_v47  ;;  %v1594_v46 = vpop.f32.mrf.mxu1 }
 0x173   : > { %v1610_v47 = vadd.f32 %v1594_v46, %v1551_v37 }
 0x174   : > { %v1479_v50 = vpop.f32.mrf.mxu3 }
 0x175   : > { %v1493_v4 = vadd.f32 %v1479_v50, %v3960_v39  ;;  %v4047_v9 = vadd.f32 %v1653_v34, %v1610_v47  ;;  %2833 = vmatmul.msk.f32.gmra.mxu1 %vm529_vm1, %v4397_v53 }
 0x176   : > { %2843 = vmatmul.msk.f32.gmra.mxu2 %vm529_vm1, %v3520_v49  ;;  %v4058_v49 = vld [vmem:[%s3096_s8 + $0x90] sm:$0xff]  ;;  %s2634_s8 = sshll.u32 %s3073_s15, 3 }
 0x177   : > { %v1541_v5 = vpop.f32.mrf.mxu0  ;;  %v1552_v23 = vadd.f32 %v1538_v11, %v1493_v4 }
 0x179   : > { %2817 = vmatmul.msk.f32.gmra.mxu3 %vm529_vm1, %v3721_v60  ;;  %v1656_v39 = vpop.f32.mrf.mxu2 }
 0x17a   : > { %2826 = vmatmul.msk.f32.gmra.mxu0 %vm529_vm1, %v3824_v45  ;;  %v1597_v52 = vpop.f32.mrf.mxu1 }
 0x17b   : > { %v1611_v59 = vadd.f32 %v1597_v52, %v1552_v23 }
 0x17c   : > { %v1482_v25 = vpop.f32.mrf.mxu3 }
 0x17d   : > { %v1494_v45 = vadd.f32 %v1482_v25, %v3975_v28  ;;  %v4067_v60 = vadd.f32 %v1656_v39, %v1611_v59  ;;  %2834 = vmatmul.msk.f32.gmra.mxu1 %vm529_vm1, %v4398_v18  ;;  %v2075_v28 = vrot.slane %v4058_v49, 1 }
 0x17e   : > { %2844 = vmatmul.msk.f32.gmra.mxu2 %vm529_vm1, %v3862_v31 }
 0x17f   : > { %v1544_v44 = vpop.f32.mrf.mxu0  ;;  %v1553_v42 = vadd.f32 %v1541_v5, %v1494_v45  ;;  %v2077_v31 = vsel %vm752_vm2, %v2075_v28, %v2076_v56 }
 0x181   : > { %2818 = vmatmul.msk.f32.gmra.mxu3 %vm529_vm1, %v4058_v49  ;;  %v1659_v36 = vpop.f32.mrf.mxu2 }
 0x182   : > { %2827 = vmatmul.msk.f32.gmra.mxu0 %vm529_vm1, %v4054_v29  ;;  %v1600_v11 = vpop.f32.mrf.mxu1 }
 0x183   : > { %v1612_v33 = vadd.f32 %v1600_v11, %v1553_v42 }
 0x184   : > { %v1485_v21 = vpop.f32.mrf.mxu3 }
 0x185   : > { %v1495_v13 = vadd.f32 %v1485_v21, %v3991_v17  ;;  %v4084_v37 = vadd.f32 %v1659_v36, %v1612_v33  ;;  %2835 = vmatmul.msk.f32.gmra.mxu1 %vm529_vm1, %v3820_v1  ;;  %v2016_v17 = vrot.slane %v3968_v48, 1 }
 0x186   : > { %2845 = vmatmul.msk.f32.gmra.mxu2 %vm529_vm1, %v2077_v31 }
 0x187   : > { %v1757_v6 = vpop.f32.mrf.mxu0  ;;  %v1554_v54 = vadd.f32 %v1544_v44, %v1495_v13  ;;  %v2018_v46 = vsel %vm752_vm2, %v2016_v17, %v2017_v14  ;;  %v505_v14 = vld [vmem:[%s3121_s20 + $0x98] sm:$0x3]  ;;  %s2635_s20 = sshll.u32 %s4419_s22, 6 }
 0x188   : > { %s408_s12 = sadd.s32 %s2635_s20, %s2634_s8 }
 0x189   : > { %2847 = vmatmul.msk.f32.vlgmr.msra.gmra.mxu3 %vm529_vm1, %v4399_v63  ;;  %v1662_v34 = vpop.f32.mrf.mxu2  ;;  %s2636_s18 = sshll.u32 %s408_s12, 3 }
 0x18a   : > { %2856 = vmatmul.msk.f32.vlgmr.msra.gmra.mxu0 %vm529_vm1, %v4390_v2  ;;  %v1603_v2 = vpop.f32.mrf.mxu1  ;;  %s4234_s17 = scalar_lea.vmem %s4321_s5, %s2636_s18 }
 0x18b   : > { %v1613_v47 = vadd.f32 %v1603_v2, %v1554_v54 }
 0x18c   : > { %v1699_v50 = vpop.f32.mrf.mxu3 }
 0x18d   : > { %v1723_v4 = vadd.f32 %v1699_v50, %v4002_v43  ;;  %v4098_v1 = vadd.f32 %v1662_v34, %v1613_v47  ;;  %2836 = vmatmul.msk.f32.gmra.mxu1 %vm529_vm1, %v2018_v46  ;;  %v4405_v47 = vld [vmem:[#allocation22_spill] sm:$0xff] }
 0x18e   : > { %2874 = vmatmul.msk.f32.vlgmr.msra.gmra.mxu2 %vm529_vm1, %v3593_v41 }
 0x18f   : > { %v1760_v5 = vpop.f32.mrf.mxu0  ;;  %v1781_v23 = vadd.f32 %v1757_v6, %v1723_v4 }
 0x191   : > { %2848 = vmatmul.msk.f32.gmra.mxu3 %vm529_vm1, %v4400_v58  ;;  %v1871_v53 = vpop.f32.mrf.mxu2 }
 0x192   : > { %2857 = vmatmul.msk.f32.gmra.mxu0 %vm529_vm1, %v4391_v15  ;;  %v1815_v44 = vpop.f32.mrf.mxu1  ;;  %v4401_v15 = vld [vmem:[#allocation13_spill] sm:$0xff] }
 0x193   : > { %v1839_v45 = vadd.f32 %v1815_v44, %v1781_v23 }
 0x194   : > { %v1702_v43 = vpop.f32.mrf.mxu3 }
 0x195   : > { %v1724_v25 = vadd.f32 %v1702_v43, %v4013_v0  ;;  %v4108_v41 = vadd.f32 %v1871_v53, %v1839_v45  ;;  %2865 = vmatmul.msk.f32.vlgmr.msra.gmra.mxu1 %vm529_vm1, %v3596_v10  ;;  %v4402_v10 = vld [vmem:[#allocation16_spill] sm:$0xff]  ;;  %v4407_v45 = vld [vmem:[#allocation23_spill] sm:$0xff] }
 0x196   : > { %2875 = vmatmul.msk.f32.gmra.mxu2 %vm529_vm1, %v3611_v30 }
 0x197   : > { %v1763_v39 = vpop.f32.mrf.mxu0  ;;  %v1782_v52 = vadd.f32 %v1760_v5, %v1724_v25 }
 0x199   : > { %2849 = vmatmul.msk.f32.gmra.mxu3 %vm529_vm1, %v4401_v15  ;;  %v1874_v59 = vpop.f32.mrf.mxu2 }
 0x19a   : > { %2858 = vmatmul.msk.f32.gmra.mxu0 %vm529_vm1, %v4392_v3  ;;  %v1818_v28 = vpop.f32.mrf.mxu1 }
 0x19b   : > { %v1840_v56 = vadd.f32 %v1818_v28, %v1782_v52  ;;  %v2308_v52 = vrot.slane %v4054_v29, 2 }
 0x19c   : > { %v1705_v42 = vpop.f32.mrf.mxu3 }
 0x19d   : > { %v1725_v18 = vadd.f32 %v1705_v42, %v4024_v38  ;;  %v4119_v30 = vadd.f32 %v1874_v59, %v1840_v56  ;;  %2866 = vmatmul.msk.f32.gmra.mxu1 %vm529_vm1, %v3614_v16  ;;  %v4403_v16 = vld [vmem:[#allocation19_spill] sm:$0xff] }
 0x19e   : > { %2876 = vmatmul.msk.f32.gmra.mxu2 %vm529_vm1, %v4394_v22 }
 0x19f   : > { %v1766_v0 = vpop.f32.mrf.mxu0  ;;  %v1783_v36 = vadd.f32 %v1763_v39, %v1725_v18 }
 0x1a1   : > { %2850 = vmatmul.msk.f32.gmra.mxu3 %vm529_vm1, %v4402_v10  ;;  %v1877_v3 = vpop.f32.mrf.mxu2  ;;  %v2251_v10 = vrot.slane %v4061_v19, 2 }
 0x1a2   : > { %2859 = vmatmul.msk.f32.gmra.mxu0 %vm529_vm1, %v4393_v40  ;;  %v1821_v6 = vpop.f32.mrf.mxu1 }
 0x1a3   : > { %v1841_v13 = vadd.f32 %v1821_v6, %v1783_v36 }
 0x1a4   : > { %v1708_v57 = vpop.f32.mrf.mxu3 }
 0x1a5   : > { %v1726_v21 = vadd.f32 %v1708_v57, %v4035_v61  ;;  %v4130_v40 = vadd.f32 %v1877_v3, %v1841_v13  ;;  %2867 = vmatmul.msk.f32.gmra.mxu1 %vm529_vm1, %v3632_v7  ;;  %v4404_v7 = vld [vmem:[#allocation20_spill] sm:$0xff] }
 0x1a6   : > { %2877 = vmatmul.msk.f32.gmra.mxu2 %vm529_vm1, %v3649_v35 }
 0x1a7   : > { %v1769_v38 = vpop.f32.mrf.mxu0  ;;  %v1784_v31 = vadd.f32 %v1766_v0, %v1726_v21 }
 0x1a9   : > { %2851 = vmatmul.msk.f32.gmra.mxu3 %vm529_vm1, %v4403_v16  ;;  %v1880_v22 = vpop.f32.mrf.mxu2 }
 0x1aa   : > { %2860 = vmatmul.msk.f32.gmra.mxu0 %vm529_vm1, %v4395_v26  ;;  %v1824_v54 = vpop.f32.mrf.mxu1 }
 0x1ab   : > { %v1842_v63 = vadd.f32 %v1824_v54, %v1784_v31 }
 0x1ac   : > { %v1711_v61 = vpop.f32.mrf.mxu3 }
 0x1ad   : > { %v1727_v33 = vadd.f32 %v1711_v61, %v4047_v9  ;;  %v4141_v35 = vadd.f32 %v1880_v22, %v1842_v63  ;;  %2868 = vmatmul.msk.f32.gmra.mxu1 %vm529_vm1, %v3652_v12  ;;  %v2192_v12 = vrot.slane %v3968_v48, 2 }
 0x1ae   : > { %2878 = vmatmul.msk.f32.gmra.mxu2 %vm529_vm1, %v3677_v27  ;;  %v2193_v27 = vrot.slane %v4079_v62, 2 }
 0x1af   : > { %v1772_v11 = vpop.f32.mrf.mxu0  ;;  %v1785_v26 = vadd.f32 %v1769_v38, %v1727_v33 }
 0x1b1   : > { %2852 = vmatmul.msk.f32.gmra.mxu3 %vm529_vm1, %v4404_v7  ;;  %v1883_v17 = vpop.f32.mrf.mxu2 }
 0x1b2   : > { %2861 = vmatmul.msk.f32.gmra.mxu0 %vm529_vm1, %v4396_v24  ;;  %v1827_v5 = vpop.f32.mrf.mxu1  ;;  %v526_v24 = vmul.f32 %v3116_v8, %v505_v14  ;;  %v2134_v8 = vrot.slane %v4054_v29, 1  ;;  %v2250_v29 = vrot.slane %v4058_v49, 2 }
 0x1b3   : > { %v1843_v4 = vadd.f32 %v1827_v5, %v1785_v26 }
 0x1b4   : > { %v1714_v9 = vpop.f32.mrf.mxu3  ;;  %v2135_v23 = vrot.slane %v526_v24, 1  ;;  %v2252_v21 = vsel %vm1048_vm3, %v2250_v29, %v2251_v10 }
 0x1b5   : > { %v1728_v50 = vadd.f32 %v1714_v9, %v4067_v60  ;;  %v4156_v46 = vadd.f32 %v1883_v17, %v1843_v4  ;;  %2869 = vmatmul.msk.f32.gmra.mxu1 %vm529_vm1, %v4405_v47  ;;  %v4406_v60 = vld [vmem:[#allocation3_spill] sm:$0xff] }
 0x1b6   : > { %2879 = vmatmul.msk.f32.gmra.mxu2 %vm529_vm1, %v3703_v55  ;;  %v2194_v55 = vsel %vm1048_vm3, %v2192_v12, %v2193_v27  ;;  %v2136_v62 = vsel %vm752_vm2, %v2134_v8, %v2135_v23 }
 0x1b7   : > { %v1775_v34 = vpop.f32.mrf.mxu0  ;;  %v1786_v2 = vadd.f32 %v1772_v11, %v1728_v50 }
 0x1b9   : > { %2853 = vmatmul.msk.f32.gmra.mxu3 %vm529_vm1, %v4406_v60  ;;  %v1886_v58 = vpop.f32.mrf.mxu2 }
 0x1ba   : > { %2862 = vmatmul.msk.f32.gmra.mxu0 %vm529_vm1, %v3954_v51  ;;  %v1830_v43 = vpop.f32.mrf.mxu1 }
 0x1bb   : > { %v1844_v39 = vadd.f32 %v1830_v43, %v1786_v2 }
 0x1bc   : > { %v1717_v51 = vpop.f32.mrf.mxu3 }
 0x1bd   : > { %v1729_v48 = vadd.f32 %v1717_v51, %v4084_v37  ;;  %v4169_v44 = vadd.f32 %v1886_v58, %v1844_v39  ;;  %2870 = vmatmul.msk.f32.gmra.mxu1 %vm529_vm1, %v4407_v45  ;;  %v2309_v37 = vrot.slane %v526_v24, 2 }
 0x1be   : > { %2880 = vmatmul.msk.f32.gmra.mxu2 %vm529_vm1, %v3985_v32 }
 0x1bf   : > { %v1778_v53 = vpop.f32.mrf.mxu0  ;;  %v1787_v25 = vadd.f32 %v1775_v34, %v1729_v48  ;;  %v2310_v18 = vsel %vm1048_vm3, %v2308_v52, %v2309_v37 }
 0x1c1   : > { %2854 = vmatmul.msk.f32.gmra.mxu3 %vm529_vm1, %v2136_v62  ;;  %v1889_v15 = vpop.f32.mrf.mxu2 }
 0x1c2   : > { %2863 = vmatmul.msk.f32.gmra.mxu0 %vm529_vm1, %v2194_v55  ;;  %v1833_v28 = vpop.f32.mrf.mxu1 }
 0x1c3   : > { %v1845_v56 = vadd.f32 %v1833_v28, %v1787_v25 }
 0x1c4   : > { %v1720_v59 = vpop.f32.mrf.mxu3 }
 0x1c5   : > { %v1730_v0 = vadd.f32 %v1720_v59, %v4098_v1  ;;  %v4178_v36 = vadd.f32 %v1889_v15, %v1845_v56  ;;  %2871 = vmatmul.msk.f32.gmra.mxu1 %vm529_vm1, %v3950_v20 }
 0x1c6   : > { %2881 = vmatmul.msk.f32.gmra.mxu2 %vm529_vm1, %v2310_v18 }
 0x1c7   : > { %v1983_v42 = vpop.f32.mrf.mxu0  ;;  %v1788_v32 = vadd.f32 %v1778_v53, %v1730_v0 }
 0x1c9   : > { %v1892_v3 = vpop.f32.mrf.mxu2 }
 0x1ca   : > { %v1836_v1 = vpop.f32.mrf.mxu1 }
 0x1cb   : > { %v1846_v6 = vadd.f32 %v1836_v1, %v1788_v32  ;;  %v4228_v32 = vld [vmem:[%s4320_s4] ss:$0 sm:$0xff] }
 0x1cc   : > { %v1927_v57 = vpop.f32.mrf.mxu3 }
 0x1cd   : > { %v4185_v13 = vadd.f32 %v1892_v3, %v1846_v6  ;;  %2872 = vmatmul.msk.f32.gmra.mxu1 %vm529_vm1, %v2252_v21  ;;  %v1951_v47 = vadd.f32 %v1927_v57, %v4108_v41 }
 0x1cf   : > { %v1986_v38 = vpop.f32.mrf.mxu0  ;;  %v2007_v58 = vadd.f32 %v1983_v42, %v1951_v47 }
 0x1d1   : > { %v2101_v31 = vpop.f32.mrf.mxu2 }
 0x1d2   : > { %v2042_v61 = vpop.f32.mrf.mxu1 }
 0x1d3   : > { %v2066_v53 = vadd.f32 %v2042_v61, %v2007_v58 }
 0x1d4   : > { %v1930_v16 = vpop.f32.mrf.mxu3 }
 0x1d5   : > { %v1952_v55 = vadd.f32 %v1930_v16, %v4119_v30  ;;  %v2125_v39 = vadd.f32 %v2101_v31, %v2066_v53 }
 0x1d7   : > { %v1989_v22 = vpop.f32.mrf.mxu0  ;;  %v2008_v25 = vadd.f32 %v1986_v38, %v1952_v55 }
 0x1d9   : > { %v2104_v20 = vpop.f32.mrf.mxu2 }
 0x1da   : > { %v2045_v33 = vpop.f32.mrf.mxu1 }
 0x1db   : > { %v2067_v52 = vadd.f32 %v2045_v33, %v2008_v25 }
 0x1dc   : > { %v1933_v11 = vpop.f32.mrf.mxu3 }
 0x1dd   : > { %v1953_v37 = vadd.f32 %v1933_v11, %v4130_v40  ;;  %v2126_v0 = vadd.f32 %v2104_v20, %v2067_v52 }
 0x1df   : > { %v1992_v49 = vpop.f32.mrf.mxu0  ;;  %v2009_v30 = vadd.f32 %v1989_v22, %v1953_v37 }
 0x1e1   : > { %v2107_v19 = vpop.f32.mrf.mxu2 }
 0x1e2   : > { %v2048_v26 = vpop.f32.mrf.mxu1 }
 0x1e3   : > { %v2068_v10 = vadd.f32 %v2048_v26, %v2009_v30 }
 0x1e4   : > { %v1936_v54 = vpop.f32.mrf.mxu3 }
 0x1e5   : > { %v1954_v40 = vadd.f32 %v1936_v54, %v4141_v35  ;;  %v2127_v6 = vadd.f32 %v2107_v19, %v2068_v10 }
 0x1e7   : > { %v4188_v63 = vpop.f32.mrf.mxu0  ;;  %v2010_v31 = vadd.f32 %v1992_v49, %v1954_v40 }
 0x1e9   : > { %v4190_v7 = vpop.f32.mrf.mxu2 }
 0x1ea   : > { %v2051_v9 = vpop.f32.mrf.mxu1 }
 0x1eb   : > { %v2069_v20 = vadd.f32 %v2051_v9, %v2010_v31 }
 0x1ec   : > { %v1939_v17 = vpop.f32.mrf.mxu3 }
 0x1ed   : > { %v1955_v11 = vadd.f32 %v1939_v17, %v4156_v46  ;;  %v2128_v19 = vadd.f32 %v4190_v7, %v2069_v20 }
 0x1ef   : > { %v4192_v14 = vpop.f32.mrf.mxu0  ;;  %v2011_v49 = vadd.f32 %v4188_v63, %v1955_v11 }
 0x1f1   : > { %v4194_v34 = vpop.f32.mrf.mxu2 }
 0x1f2   : > { %v4200_v24 = vpop.f32.mrf.mxu1 }
 0x1f3   : > { %v2070_v9 = vadd.f32 %v4200_v24, %v2011_v49 }
 0x1f4   : > { %v4196_v50 = vpop.f32.mrf.mxu3 }
 0x1f5   : > { %v1956_v46 = vadd.f32 %v4196_v50, %v4169_v44 }
 0x1f7   : > { %v4198_v5 = vpop.f32.mrf.mxu0  ;;  %v2012_v52 = vadd.f32 %v4192_v14, %v1956_v46 }
 0x1f9   : > { %v4202_v4 = vpop.f32.mrf.mxu2 }
 0x1fa   : > { %v4208_v27 = vpop.f32.mrf.mxu1 }
 0x1fc   : > { %v4204_v2 = vpop.f32.mrf.mxu3 }
 0x1ff   : > { %v4206_v12 = vpop.f32.mrf.mxu0 }
 0x201   : > { %v4211_v60 = vpop.f32.mrf.mxu2 }
 0x202   : > { %v4215_v51 = vpop.f32.mrf.mxu1 }
 0x204   : > { %v4213_v8 = vpop.f32.mrf.mxu3 }
 0x205   : > { %v1958_v40 = vadd.f32 %v4213_v8, %v4185_v13 }
 0x207   : > { %v2218_v23 = vpop.f32.mrf.mxu0 }
 0x209   : > { %v4218_v48 = vpop.f32.mrf.mxu2 }
 0x20a   : > { %v4220_v41 = vpop.f32.mrf.mxu1 }
 0x20c   : > { %v2160_v43 = vpop.f32.mrf.mxu3 }
 0x20d   : > { %v2184_v45 = vadd.f32 %v2160_v43, %v2125_v39 }
 0x20f   : > { %v2221_v62 = vpop.f32.mrf.mxu0  ;;  %v2242_v15 = vadd.f32 %v2218_v23, %v2184_v45  ;;  %v2129_v45 = vadd.f32 %v4194_v34, %v2070_v9 }
 0x211   : > { %v2334_v59 = vpop.f32.mrf.mxu2 }
 0x212   : > { %v2276_v18 = vpop.f32.mrf.mxu1 }
 0x213   : > { %v2300_v56 = vadd.f32 %v2276_v18, %v2242_v15  ;;  %v2071_v15 = vadd.f32 %v4208_v27, %v2012_v52 }
 0x214   : > { %v2163_v42 = vpop.f32.mrf.mxu3 }
 0x215   : > { %v2185_v29 = vadd.f32 %v2163_v42, %v2126_v0  ;;  %v2358_v3 = vadd.f32 %v2334_v59, %v2300_v56  ;;  %v1957_v59 = vadd.f32 %v4204_v2, %v4178_v36 }
 0x217   : > { %v2224_v28 = vpop.f32.mrf.mxu0  ;;  %v4237_v57 = vadd.f32 %v4228_v32, %v2358_v3  ;;  %v2243_v38 = vadd.f32 %v2221_v62, %v2185_v29  ;;  %v2013_v56 = vadd.f32 %v4198_v5, %v1957_v59 }
 0x219   : > { %v2337_v1 = vpop.f32.mrf.mxu2  ;;  %2378 = vst [vmem:[%s4234_s17] sm:$0xff] %v4237_v57  ;;  %v2072_v2 = vadd.f32 %v4215_v51, %v2013_v56 }
 0x21a   : > { %v2279_v16 = vpop.f32.mrf.mxu1 }
 0x21b   : > { %v2301_v35 = vadd.f32 %v2279_v16, %v2243_v38  ;;  %v2131_v5 = vadd.f32 %v4211_v60, %v2072_v2 }
 0x21c   : > { %v2166_v21 = vpop.f32.mrf.mxu3 }
 0x21d   : > { %v2186_v22 = vadd.f32 %v2166_v21, %v2127_v6  ;;  %v2359_v33 = vadd.f32 %v2337_v1, %v2301_v35  ;;  %v2014_v6 = vadd.f32 %v4206_v12, %v1958_v40 }
 0x21f   : > { %v2227_v61 = vpop.f32.mrf.mxu0  ;;  %v4243_v54 = vadd.f32 %v4228_v32, %v2359_v33  ;;  %v2244_v26 = vadd.f32 %v2224_v28, %v2186_v22  ;;  %v2130_v28 = vadd.f32 %v4202_v4, %v2071_v15 }
 0x221   : > { %v2340_v47 = vpop.f32.mrf.mxu2  ;;  %2379 = vst [vmem:[%s4234_s17 + $0x8] sm:$0xff] %v4243_v54  ;;  %v2386_v62 = vadd.f32 %v4243_v54, %v4237_v57 }
 0x222   : > { %v2282_v58 = vpop.f32.mrf.mxu1 }
 0x223   : > { %v2302_v53 = vadd.f32 %v2282_v58, %v2244_v26 }
 0x224   : > { %v2169_v23 = vpop.f32.mrf.mxu3 }
 0x225   : > { %v2187_v55 = vadd.f32 %v2169_v23, %v2128_v19  ;;  %v2360_v17 = vadd.f32 %v2340_v47, %v2302_v53 }
 0x227   : > { %v2230_v43 = vpop.f32.mrf.mxu0  ;;  %v4255_v7 = vadd.f32 %v4228_v32, %v2360_v17  ;;  %v2245_v63 = vadd.f32 %v2227_v61, %v2187_v55  ;;  %v2073_v61 = vadd.f32 %v4220_v41, %v2014_v6 }
 0x229   : > { %v2343_v39 = vpop.f32.mrf.mxu2  ;;  %2380 = vst [vmem:[%s4234_s17 + $0x10] sm:$0xff] %v4255_v7  ;;  %v2387_v44 = vadd.f32 %v2386_v62, %v4255_v7  ;;  %v2132_v26 = vadd.f32 %v4218_v48, %v2073_v61 }
 0x22a   : > { %v2285_v50 = vpop.f32.mrf.mxu1 }
 0x22b   : > { %v2303_v24 = vadd.f32 %v2285_v50, %v2245_v63 }
 0x22c   : > { %v2172_v25 = vpop.f32.mrf.mxu3 }
 0x22d   : > { %v2188_v37 = vadd.f32 %v2172_v25, %v2129_v45  ;;  %v2361_v42 = vadd.f32 %v2343_v39, %v2303_v24 }
 0x22f   : > { %v4266_v0 = vadd.f32 %v4228_v32, %v2361_v42  ;;  %v2246_v34 = vadd.f32 %v2230_v43, %v2188_v37  ;;  %v2233_v18 = vpop.f32.mrf.mxu0 }
 0x231   : > { %v2346_v30 = vpop.f32.mrf.mxu2  ;;  %2381 = vst [vmem:[%s4234_s17 + $0x18] sm:$0xff] %v4266_v0  ;;  %v2388_v27 = vadd.f32 %v2387_v44, %v4266_v0 }
 0x232   : > { %v2288_v29 = vpop.f32.mrf.mxu1 }
 0x233   : > { %v2304_v10 = vadd.f32 %v2288_v29, %v2246_v34 }
 0x234   : > { %v2175_v14 = vpop.f32.mrf.mxu3 }
 0x235   : > { %v2189_v36 = vadd.f32 %v2175_v14, %v2130_v28  ;;  %v2362_v3 = vadd.f32 %v2346_v30, %v2304_v10 }
 0x237   : > { %v2374_v38 = vadd.f32 %v4228_v32, %v2362_v3  ;;  %v2247_v1 = vadd.f32 %v2233_v18, %v2189_v36  ;;  %v2236_v35 = vpop.f32.mrf.mxu0 }
 0x239   : > { %v2349_v4 = vpop.f32.mrf.mxu2  ;;  %2382 = vst [vmem:[%s4234_s17 + $0x20] sm:$0xff] %v2374_v38  ;;  %v2389_v31 = vadd.f32 %v2388_v27, %v2374_v38 }
 0x23a   : > { %v2291_v16 = vpop.f32.mrf.mxu1 }
 0x23b   : > { %v2305_v22 = vadd.f32 %v2291_v16, %v2247_v1 }
 0x23c   : > { %v2178_v21 = vpop.f32.mrf.mxu3 }
 0x23d   : > { %v2190_v51 = vadd.f32 %v2178_v21, %v2131_v5  ;;  %v2363_v13 = vadd.f32 %v2349_v4, %v2305_v22 }
 0x23f   : > { %v2375_v8 = vadd.f32 %v4228_v32, %v2363_v13  ;;  %v2248_v20 = vadd.f32 %v2236_v35, %v2190_v51  ;;  %v2239_v19 = vpop.f32.mrf.mxu0 }
 0x241   : > { %v2352_v11 = vpop.f32.mrf.mxu2  ;;  %2383 = vst [vmem:[%s4234_s17 + $0x28] sm:$0xff] %v2375_v8  ;;  %v2390_v12 = vadd.f32 %v2389_v31, %v2375_v8 }
 0x242   : > { %v2294_v60 = vpop.f32.mrf.mxu1 }
 0x243   : > { %v2306_v47 = vadd.f32 %v2294_v60, %v2248_v20 }
 0x244   : > { %v2181_v33 = vpop.f32.mrf.mxu3 }
 0x245   : > { %v2191_v23 = vadd.f32 %v2181_v33, %v2132_v26  ;;  %v2364_v49 = vadd.f32 %v2352_v11, %v2306_v47 }
 0x247   : > { %v2376_v41 = vadd.f32 %v4228_v32, %v2364_v49  ;;  %v2249_v58 = vadd.f32 %v2239_v19, %v2191_v23 }
 0x249   : > { %2384 = vst [vmem:[%s4234_s17 + $0x30] sm:$0xff] %v2376_v41  ;;  %v2391_v53 = vadd.f32 %v2390_v12, %v2376_v41  ;;  %v2355_v9 = vpop.f32.mrf.mxu2 }
 0x24a   : > { %v2297_v55 = vpop.f32.mrf.mxu1 }
 0x24b   : > { %v2307_v46 = vadd.f32 %v2297_v55, %v2249_v58 }
 0x24d   : > { %v2365_v17 = vadd.f32 %v2355_v9, %v2307_v46 }
 0x24f   : > { %v2377_v48 = vadd.f32 %v4228_v32, %v2365_v17 }
 0x251   : > { %2385 = vst [vmem:[%s4234_s17 + $0x38] sm:$0xff] %v2377_v48  ;;  %v2392_v43 = vadd.f32 %v2391_v53, %v2377_v48 }
 0x253   : > { %v2393_v62 = vrot.slane %v2392_v43, 4 }
 0x255   : > { %v2394_v63 = vadd.f32 %v2393_v62, %v2392_v43 }
 0x257   : > { %v2395_v39 = vrot.slane %v2394_v63, 2 }
 0x259   : > { %v2396_v25 = vadd.f32 %v2395_v39, %v2394_v63 }
 0x25b   : > { %v2397_v45 = vrot.slane %v2396_v25, 1 }
 0x25d   : > { %v2398_v52 = vadd.f32 %v2397_v45, %v2396_v25 }
 0x25f   : > { %v2399_v44 = vmul.f32 0.015625, %v2398_v52  ;;  %2408 = vst [vmem:[%s4293_s30] sm:$0x1] %v2398_v52 }
 0x261   : > { %v2400_v32 = vsub.f32 %v4237_v57, %v2399_v44  ;;  %v2401_v50 = vsub.f32 %v4243_v54, %v2399_v44  ;;  %v2402_v24 = vsub.f32 %v4255_v7, %v2399_v44  ;;  %v2403_v37 = vsub.f32 %v4266_v0, %v2399_v44 }
 0x262   : > { %v2404_v15 = vsub.f32 %v2374_v38, %v2399_v44  ;;  %v2405_v59 = vsub.f32 %v2375_v8, %v2399_v44  ;;  %v2406_v42 = vsub.f32 %v2376_v41, %v2399_v44  ;;  %v2407_v34 = vsub.f32 %v2377_v48, %v2399_v44 }
 0x263   : > { %v2409_v30 = vmul.f32 %v2400_v32, %v2400_v32  ;;  %v2410_v14 = vmul.f32 %v2401_v50, %v2401_v50  ;;  %v2411_v18 = vmul.f32 %v2402_v24, %v2402_v24  ;;  %v2412_v56 = vmul.f32 %v2403_v37, %v2403_v37 }
 0x264   : > { %v2413_v29 = vmul.f32 %v2404_v15, %v2404_v15  ;;  %v2414_v57 = vmul.f32 %v2405_v59, %v2405_v59  ;;  %v2415_v54 = vmul.f32 %v2406_v42, %v2406_v42  ;;  %v2416_v7 = vmul.f32 %v2407_v34, %v2407_v34 }
 0x265   : > { %v2417_v28 = vadd.f32 %v2410_v14, %v2409_v30 }
 0x267   : > { %v2418_v27 = vadd.f32 %v2417_v28, %v2411_v18 }
 0x269   : > { %v2419_v10 = vadd.f32 %v2418_v27, %v2412_v56 }
 0x26b   : > { %v2420_v36 = vadd.f32 %v2419_v10, %v2413_v29 }
 0x26d   : > { %v2421_v2 = vadd.f32 %v2420_v36, %v2414_v57 }
 0x26f   : > { %v2422_v40 = vadd.f32 %v2421_v2, %v2415_v54 }
 0x271   : > { %v2423_v0 = vadd.f32 %v2422_v40, %v2416_v7 }
 0x273   : > { %v2424_v3 = vrot.slane %v2423_v0, 4 }
 0x275   : > { %v2425_v38 = vadd.f32 %v2424_v3, %v2423_v0 }
 0x277   : > { %v2426_v1 = vrot.slane %v2425_v38, 2 }
 0x279   : > { %v2427_v4 = vadd.f32 %v2426_v1, %v2425_v38 }
 0x27b   : > { %v2428_v21 = vrot.slane %v2427_v4, 1 }
 0x27d   : > { %v2429_v5 = vadd.f32 %v2428_v21, %v2427_v4 }
 0x27f   : > { %2430 = vst [vmem:[%s4293_s30 + $0x1] sm:$0x1] %v2429_v5 }
 0x280 PF: > { %s17_s25 = sadd.s32 1, %s2978_s25   ;;  %s4408_s21 = smov %s2970_s23 }
 0x281   : > { %p14_p11 = scmp.ge.s32.totalorder %s17_s25, 18   ;;  %s4409_s22 = smov %s2974_s24 }
 0x282   : > { %s4410_s23 = smov %s4413_s26  ;;  %s4411_s24 = smov %s4417_s27 }
 0x283   :  { %16 = sbr.rel (!%p14_p11) target bundleno = 3 (0x3), region = 88 }

// kernel: encoder_block.6
= control target key start
LH: loop header
LB: loop body
LE: loop exit
PB: predicated region body
PF: predicated region fallthrough
CT: control target
= control target key end

     0   :  { %s2879_s21 = smov 0   ;;  %s2881_s22 = smov 0   ;;  %s5398_s0 = inlined_call_operand.vmem [shape: f32[2,8,10,10,128], index: 0, kind: input, shape index: {}, may-alias: {0,1,2}]   ;;  %s5399_s1 = inlined_call_operand.vmem [shape: f32[2,8,10,10,128], index: 1, kind: input, shape index: {}, may-alias: {0,1,2}]   ;;  %s5400_s2 = inlined_call_operand.vmem [shape: f32[2,8,10,10,128], index: 2, kind: input, shape index: {}, may-alias: {0,1,2}]   ;;  %s5401_s3 = inlined_call_operand.vmem [shape: f32[3456,128], index: 3, kind: input, shape index: {}]   ;;  %s5402_s4 = inlined_call_operand.vmem [shape: f32[1,128], index: 4, kind: input, shape index: {}]   ;;  %s5403_s5 = inlined_call_operand.vmem [shape: f32[2,8,64,128], index: 5, kind: output, shape index: {0}]   ;;  %s5404_s6 = inlined_call_operand.vmem [shape: f32[2,8,2,128], index: 6, kind: output, shape index: {1}]  }
   0x1   :  { %s2883_s23 = smov 0   ;;  %s2885_s24 = smov 0  }
   0x2   :  { %s2887_s25 = smov 0  }
   0x3 LB: > { %s26_s26 = sadd.s32 1, %s2834_s23  ;;  %s29_s27 = sadd.s32 1, %s2838_s24  ;;  %s2842_s25 = sphi %s2887_s25, %s17_s25   ;;  %s2838_s24 = sphi %s2885_s24, %s5541_s24   ;;  %s2834_s23 = sphi %s2883_s23, %s5540_s23   ;;  %s2830_s22 = sphi %s2881_s22, %s5539_s22   ;;  %s2826_s21 = sphi %s2879_s21, %s5538_s21  }
   0x4   : > { %p27_p0 = scmp.ge.s32.totalorder %s26_s26, 8  ;;  %p2679_p1 = scmp.ge.s32.totalorder %s2842_s25, 1 }
   0x5   : > { %p293_p2 = scmp.lt.s32.totalorder %s2842_s25, 17 }
   0x6   : > { %s5543_s26 = smov (%p27_p0, %s26_s26), 0  ;;  %s5545_s27 = smov (!%p27_p0, %s29_s27), %s2838_s24 }
   0x7   : > { %p294_p3 = pnand %p2679_p1, %p293_p2  ;;  %p31_p4 = scmp.ge.s32.totalorder %s5545_s27, 2 }
   0x9   : > { %s5547_s27 = smov (%p31_p4, %s5545_s27), 0  ;;  %297 = sbr.rel (%p294_p3) target bundleno = 671 (0x29f), region = 40 }
   0xe   : > { %v735_v0 = vld [vmem:[%s5401_s3 + $0x1f8] sm:$0xff]  ;;  %s2680_s10 = sadd.s32 4294967295, %s2826_s21  ;;  %p366_p5 = scmp.lt.s32.totalorder %s2830_s22, 1  ;;  %v734_v3 = vld [vmem:[%s5401_s3 + $0x1f0] sm:$0xff]  ;;  %v733_v6 = vld [vmem:[%s5401_s3 + $0x1e8] sm:$0xff]  ;;  %vm591_vm0 = vcmask 1046528  }
   0xf   : > { %v751_v1 = vld [vmem:[%s5401_s3 + $0x278] sm:$0xff]  ;;  %768 = vmatpush.msra.mxu0 %v735_v0  ;;  %2701 = vmatpush.msra.mxu3 %v735_v0  ;;  %v750_v4 = vld [vmem:[%s5401_s3 + $0x270] sm:$0xff]  ;;  %p364_p6 = scmp.gt.s32.totalorder %s2680_s10, 0  ;;  %p2681_p7 = scmp.lt.s32.totalorder %s2680_s10, 7  ;;  %v749_v7 = vld [vmem:[%s5401_s3 + $0x268] sm:$0xff]  ;;  %vm1014_vm1 = vcmask 1045504  }
  0x10   : > { %v767_v2 = vld [vmem:[%s5401_s3 + $0x2f8] sm:$0xff]  ;;  %v766_v5 = vld [vmem:[%s5401_s3 + $0x2f0] sm:$0xff]  ;;  %809 = vmatpush.msra.mxu1 %v751_v1  ;;  %s5549_s22 = smov (!%p366_p5, %s2830_s22), 1  ;;  %v765_v8 = vld [vmem:[%s5401_s3 + $0x2e8] sm:$0xff]  ;;  %p419_p8 = scmp.gt.s32.totalorder %s2826_s21, 0 }
  0x11   : > { %850 = vmatpush.msra.mxu2 %v767_v2  ;;  %769 = vmatpush.msra.mxu0 %v734_v3  ;;  %s365_s30 = scalar_select %p364_p6, %s2680_s10, 0  ;;  %v732_v9 = vld [vmem:[%s5401_s3 + $0x1e0] sm:$0xff]  ;;  %v731_v12 = vld [vmem:[%s5401_s3 + $0x1d8] sm:$0xff]  ;;  %v730_v15 = vld [vmem:[%s5401_s3 + $0x1d0] sm:$0xff] }
  0x12   : > { %2702 = vmatpush.msra.mxu3 %v734_v3  ;;  %810 = vmatpush.msra.mxu1 %v750_v4  ;;  %s2949_s9 = smul.u32 160, %s5549_s22  ;;  %v748_v10 = vld [vmem:[%s5401_s3 + $0x260] sm:$0xff]  ;;  %v747_v13 = vld [vmem:[%s5401_s3 + $0x258] sm:$0xff]  ;;  %p380_p9 = scmp.lt.s32.totalorder %s2826_s21, 7  ;;  %v746_v16 = vld [vmem:[%s5401_s3 + $0x250] sm:$0xff] }
  0x13   : > { %851 = vmatpush.msra.mxu2 %v766_v5  ;;  %770 = vmatpush.msra.mxu0 %v733_v6  ;;  %v764_v11 = vld [vmem:[%s5401_s3 + $0x2e0] sm:$0xff]  ;;  %s5551_s30 = smov (!%p2681_p7, %s365_s30), 7  ;;  %v763_v14 = vld [vmem:[%s5401_s3 + $0x2d8] sm:$0xff]  ;;  %s387_s8 = sadd.s32 1, %s2826_s21  ;;  %v762_v17 = vld [vmem:[%s5401_s3 + $0x2d0] sm:$0xff] }
  0x14   : > { %2703 = vmatpush.msra.mxu3 %v733_v6  ;;  %811 = vmatpush.msra.mxu1 %v749_v7  ;;  %s2962_s17 = scalar_select %p419_p8, 1, 0  ;;  %v729_v18 = vld [vmem:[%s5401_s3 + $0x1c8] sm:$0xff]  ;;  %v728_v21 = vld [vmem:[%s5401_s3 + $0x1c0] sm:$0xff]  ;;  %v727_v24 = vld [vmem:[%s5401_s3 + $0x1b8] sm:$0xff] }
  0x15   : > { %852 = vmatpush.msra.mxu2 %v765_v8  ;;  %771 = vmatpush.msra.mxu0 %v732_v9  ;;  %s2749_s10 = smul.u32 20, %s5551_s30  ;;  %p2982_p10 = scmp.lt.s32.totalorder %s387_s8, 7  ;;  %v745_v19 = vld [vmem:[%s5401_s3 + $0x248] sm:$0xff]  ;;  %v744_v22 = vld [vmem:[%s5401_s3 + $0x240] sm:$0xff]  ;;  %v743_v25 = vld [vmem:[%s5401_s3 + $0x238] sm:$0xff] }
  0x16   : > { %2704 = vmatpush.msra.mxu3 %v732_v9  ;;  %812 = vmatpush.msra.mxu1 %v748_v10  ;;  %v761_v20 = vld [vmem:[%s5401_s3 + $0x2c8] sm:$0xff]  ;;  %s421_s7 = scvt.s32.f32 %s2962_s17  ;;  %v760_v23 = vld [vmem:[%s5401_s3 + $0x2c0] sm:$0xff]  ;;  %v759_v26 = vld [vmem:[%s5401_s3 + $0x2b8] sm:$0xff] }
  0x17   : > { %853 = vmatpush.msra.mxu2 %v764_v11  ;;  %772 = vmatpush.msra.mxu0 %v731_v12  ;;  %s372_s30 = sadd.s32 %s2949_s9, %s2749_s10  ;;  %s5553_s8 = smov (!%p2982_p10, %s387_s8), 7  ;;  %v726_v27 = vld [vmem:[%s5401_s3 + $0x1b0] sm:$0xff]  ;;  %v725_v30 = vld [vmem:[%s5401_s3 + $0x1a8] sm:$0xff]  ;;  %v724_v38 = vld [vmem:[%s5401_s3 + $0x1a0] sm:$0xff] }
  0x18   : > { %2705 = vmatpush.msra.mxu3 %v731_v12  ;;  %813 = vmatpush.msra.mxu1 %v747_v13  ;;  %s2686_s10 = sshll.u32 %s372_s30, 3  ;;  %s5555_s8 = smov (!%p2982_p10, %s5553_s8), 7  ;;  %v742_v28 = vld [vmem:[%s5401_s3 + $0x230] sm:$0xff]  ;;  %v3045_v32 = vstv %s421_s7  ;;  %v741_v36 = vld [vmem:[%s5401_s3 + $0x228] sm:$0xff]  ;;  %v740_v40 = vld [vmem:[%s5401_s3 + $0x220] sm:$0xff] }
  0x19   : > { %854 = vmatpush.msra.mxu2 %v763_v14  ;;  %773 = vmatpush.msra.mxu0 %v730_v15  ;;  %s3002_s13 = scalar_select %p380_p9, %s2826_s21, 7  ;;  %v758_v29 = vld [vmem:[%s5401_s3 + $0x2b0] sm:$0xff]  ;;  %5458 = vst [vmem:[#allocation2_spill] sm:$0xff] %v3045_v32  ;;  %v757_v37 = vld [vmem:[%s5401_s3 + $0x2a8] sm:$0xff]  ;;  %v756_v41 = vld [vmem:[%s5401_s3 + $0x2a0] sm:$0xff] }
  0x1a   : > { %2706 = vmatpush.msra.mxu3 %v730_v15  ;;  %814 = vmatpush.msra.mxu1 %v746_v16  ;;  %s3018_s11 = scalar_lea.vmem %s5398_s0, %s2686_s10  ;;  %s2752_s10 = smul.u32 20, %s5555_s8  ;;  %v723_v45 = vld [vmem:[%s5401_s3 + $0x198] sm:$0xff]  ;;  %v722_v50 = vld [vmem:[%s5401_s3 + $0x190] sm:$0xff]  ;;  %v721_v59 = vld [vmem:[%s5401_s3 + $0x188] sm:$0xff] }
  0x1b   : > { %855 = vmatpush.msra.mxu2 %v762_v17  ;;  %774 = vmatpush.msra.mxu0 %v729_v18  ;;  %s2751_s12 = smul.u32 20, %s3002_s13  ;;  %v425_v31 = vld [vmem:[%s3018_s11] sm:$0xff]  ;;  %v426_v33 = vld [vmem:[%s3018_s11 + $0x8] sm:$0x3]  ;;  %v739_v46 = vld [vmem:[%s5401_s3 + $0x218] sm:$0xff]  ;;  %s2695_s7 = sshll.u32 %s5549_s22, 3 }
  0x1c   : > { %2707 = vmatpush.msra.mxu3 %v729_v18  ;;  %815 = vmatpush.msra.mxu1 %v745_v19  ;;  %v433_v34 = vld [vmem:[%s3018_s11 + $0x40] sm:$0xff]  ;;  %v434_v35 = vld [vmem:[%s3018_s11 + $0x48] sm:$0x3]  ;;  %s396_s17 = sadd.s32 %s2752_s10, %s2949_s9  ;;  %v3061_v39 = vmul.f32 %v3045_v32, %v425_v31  ;;  %v3075_v42 = vmul.f32 %v3045_v32, %v426_v33  ;;  %v755_v47 = vld [vmem:[%s5401_s3 + $0x298] sm:$0xff]  ;;  %s416_s8 = sadd.s32 %s2695_s7, %s3002_s13 }
  0x1d   : > { %856 = vmatpush.msra.mxu2 %v761_v20  ;;  %775 = vmatpush.msra.mxu0 %v728_v21  ;;  %s384_s29 = sadd.s32 %s2751_s12, %s2949_s9  ;;  %s2691_s15 = sshll.u32 %s396_s17, 3  ;;  %v3078_v43 = vmul.f32 %v3045_v32, %v433_v34  ;;  %v3081_v44 = vmul.f32 %v3045_v32, %v434_v35  ;;  %v738_v53 = vld [vmem:[%s5401_s3 + $0x210] sm:$0xff]  ;;  %v737_v60 = vld [vmem:[%s5401_s3 + $0x208] sm:$0xff]  ;;  %v720_v1 = vld [vmem:[%s5401_s3 + $0x180] sm:$0xff] }
  0x1e   : > { %2708 = vmatpush.msra.mxu3 %v728_v21  ;;  %816 = vmatpush.msra.mxu1 %v744_v22  ;;  %s2687_s30 = sshll.u32 %s384_s29, 3  ;;  %s3086_s20 = scalar_lea.vmem %s5400_s2, %s2691_s15  ;;  %v754_v54 = vld [vmem:[%s5401_s3 + $0x290] sm:$0xff]  ;;  %v592_v55 = vrot.slane %v3061_v39, 1  ;;  %v593_v56 = vrot.slane %v3075_v42, 1  ;;  %v753_v61 = vld [vmem:[%s5401_s3 + $0x288] sm:$0xff]  ;;  %v736_v6 = vld [vmem:[%s5401_s3 + $0x200] sm:$0xff] }
  0x1f   : > { %857 = vmatpush.msra.mxu2 %v760_v23  ;;  %776 = vmatpush.msra.mxu0 %v727_v24  ;;  %s3066_s16 = scalar_lea.vmem %s5399_s1, %s2687_s30  ;;  %v486_v51 = vld [vmem:[%s3086_s20] sm:$0xff]  ;;  %v487_v52 = vld [vmem:[%s3086_s20 + $0x8] sm:$0x3]  ;;  %v604_v57 = vrot.slane %v3078_v43, 1  ;;  %v605_v58 = vrot.slane %v3081_v44, 1  ;;  %v427_v4 = vld [vmem:[%s3018_s11 + $0x10] sm:$0xff] }
  0x20   : > { %2709 = vmatpush.msra.mxu3 %v727_v24  ;;  %817 = vmatpush.msra.mxu1 %v743_v25  ;;  %s423_s29 = scalar_select %p380_p9, 1, 0  ;;  %v3100_v48 = vld [vmem:[%s3066_s16] sm:$0xff]  ;;  %v3103_v49 = vld [vmem:[%s3066_s16 + $0x8] sm:$0x3]  ;;  %v435_v7 = vld [vmem:[%s3018_s11 + $0x50] sm:$0xff]  ;;  %v594_v10 = vsel %vm591_vm0, %v592_v55, %v593_v56  ;;  %v3162_v17 = vmul.f32 %v3045_v32, %v427_v4 }
  0x21   : > { %858 = vmatpush.msra.mxu2 %v759_v26  ;;  %777 = vmatpush.msra.mxu0 %v726_v27  ;;  %v640_v62 = vrot.slane %v3100_v48, 1  ;;  %v641_v63 = vrot.slane %v3103_v49, 1  ;;  %v428_v5 = vld [vmem:[%s3018_s11 + $0x18] sm:$0x3]  ;;  %v752_v9 = vld [vmem:[%s5401_s3 + $0x280] sm:$0xff]  ;;  %v3154_v11 = vsel %vm591_vm0, %v604_v57, %v605_v58  ;;  %v488_v14 = vld [vmem:[%s3086_s20 + $0x10] sm:$0xff]  ;;  %v3169_v20 = vmul.f32 %v3045_v32, %v435_v7 }
  0x22   : > { %2710 = vmatpush.msra.mxu3 %v726_v27  ;;  %818 = vmatpush.msra.mxu1 %v742_v28  ;;  %s424_s10 = scvt.s32.f32 %s423_s29  ;;  %v436_v8 = vld [vmem:[%s3018_s11 + $0x58] sm:$0x3]  ;;  %5459 = vst [vmem:[#allocation3_spill] sm:$0xff] %v3154_v11  ;;  %v3165_v18 = vmul.f32 %v3045_v32, %v428_v5  ;;  %v3175_v22 = vld [vmem:[%s3066_s16 + $0x10] sm:$0xff]  ;;  %v556_v33 = vld [vmem:[%s5401_s3 + $0xe8] sm:$0xff]  ;;  %v595_v34 = vrot.slane %v3162_v17, 1 }
  0x23   : > { %859 = vmatpush.msra.mxu2 %v758_v29  ;;  %778 = vmatpush.msra.mxu0 %v725_v30  ;;  %v489_v15 = vld [vmem:[%s3086_s20 + $0x18] sm:$0x3]  ;;  %v642_v16 = vsel %vm591_vm0, %v640_v62, %v641_v63  ;;  %5460 = vst [vmem:[#allocation4_spill] sm:$0xff] %v3169_v20  ;;  %v3172_v21 = vmul.f32 %v3045_v32, %v436_v8  ;;  %v557_v28 = vld [vmem:[%s5401_s3 + $0xf0] sm:$0xff]  ;;  %v437_v55 = vld [vmem:[%s3018_s11 + $0x60] sm:$0xff]  ;;  %s2696_s29 = sshll.u32 %s416_s8, 1 }
  0x24   : > { %2711 = vmatpush.msra.mxu3 %v725_v30  ;;  %819 = vmatpush.msra.mxu1 %v741_v36  ;;  %v3131_v0 = vstv %s424_s10  ;;  %v3178_v23 = vld [vmem:[%s3066_s16 + $0x18] sm:$0x3]  ;;  %v541_v31 = vld [vmem:[%s5401_s3 + $0x70] sm:$0xff]  ;;  %v596_v35 = vrot.slane %v3165_v18, 1  ;;  %v643_v36 = vrot.slane %v3175_v22, 1  ;;  %v572_v57 = vld [vmem:[%s5401_s3 + $0x168] sm:$0xff]  ;;  %s5377_s15 = scalar_lea.vmem %s5404_s6, %s2696_s29 }
  0x25   : > { %860 = vmatpush.msra.mxu2 %v757_v37  ;;  %779 = vmatpush.msra.mxu0 %v724_v38  ;;  %v3137_v2 = vmul.f32 %v3131_v0, %v486_v51  ;;  %v3140_v3 = vmul.f32 %v3131_v0, %v487_v52  ;;  %v558_v24 = vld [vmem:[%s5401_s3 + $0xf8] sm:$0xff]  ;;  %v3187_v26 = vmul.f32 %v3131_v0, %v488_v14  ;;  %v644_v37 = vrot.slane %v3178_v23, 1  ;;  %v1124_v52 = vld [vmem:[%s5401_s3 + $0x368] sm:$0xff]  ;;  %v539_v58 = vld [vmem:[%s5401_s3 + $0x60] sm:$0xff] }
  0x26   : > { %2712 = vmatpush.msra.mxu3 %v724_v38  ;;  %820 = vmatpush.msra.mxu1 %v740_v40  ;;  %v542_v25 = vld [vmem:[%s5401_s3 + $0x78] sm:$0xff]  ;;  %v3190_v27 = vmul.f32 %v3131_v0, %v489_v15  ;;  %v540_v38 = vld [vmem:[%s5401_s3 + $0x68] sm:$0xff]  ;;  %v607_v40 = vrot.slane %v3169_v20, 1  ;;  %v3268_v8 = vld [vmem:[%s3066_s16 + $0x20] sm:$0xff] }
  0x27   : > { %861 = vmatpush.msra.mxu2 %v756_v41  ;;  %780 = vmatpush.msra.mxu0 %v723_v45  ;;  %v688_v12 = vrot.slane %v3137_v2, 1  ;;  %v689_v13 = vrot.slane %v3140_v3, 1  ;;  %v1126_v29 = vld [vmem:[%s5401_s3 + $0x378] sm:$0xff]  ;;  %v608_v41 = vrot.slane %v3172_v21, 1  ;;  %v438_v56 = vld [vmem:[%s3018_s11 + $0x68] sm:$0x3] }
  0x28   : > { %2713 = vmatpush.msra.mxu3 %v723_v45  ;;  %821 = vmatpush.msra.mxu1 %v739_v46  ;;  %v574_v30 = vld [vmem:[%s5401_s3 + $0x178] sm:$0xff]  ;;  %v1125_v45 = vld [vmem:[%s5401_s3 + $0x370] sm:$0xff]  ;;  %v692_v51 = vrot.slane %v3190_v27, 1  ;;  %v491_v62 = vld [vmem:[%s3086_s20 + $0x28] sm:$0x3]  ;;  %v3265_v7 = vmul.f32 %v3045_v32, %v438_v56 }
  0x29   : > { %862 = vmatpush.msra.mxu2 %v755_v47  ;;  %781 = vmatpush.msra.mxu0 %v722_v50  ;;  %v690_v19 = vsel %vm591_vm0, %v688_v12, %v689_v13  ;;  %v573_v46 = vld [vmem:[%s5401_s3 + $0x170] sm:$0xff]  ;;  %v555_v47 = vld [vmem:[%s5401_s3 + $0xe0] sm:$0xff]  ;;  %v3250_v63 = vsel %vm591_vm0, %v607_v40, %v608_v41  ;;  %v538_v12 = vld [vmem:[%s5401_s3 + $0x58] sm:$0xff]  ;;  %v3283_v14 = vmul.f32 %v3131_v0, %v491_v62 }
  0x2a   : > { %2714 = vmatpush.msra.mxu3 %v722_v50  ;;  %822 = vmatpush.msra.mxu1 %v738_v53  ;;  %v691_v50 = vrot.slane %v3187_v26, 1  ;;  %v429_v53 = vld [vmem:[%s3018_s11 + $0x20] sm:$0xff]  ;;  %5462 = vst [vmem:[#allocation6_spill] sm:$0xff] %v3250_v63  ;;  %v553_v15 = vld [vmem:[%s5401_s3 + $0xd0] sm:$0xff] }
  0x2b   : > { %863 = vmatpush.msra.mxu2 %v754_v54  ;;  %782 = vmatpush.msra.mxu0 %v721_v59  ;;  %v430_v54 = vld [vmem:[%s3018_s11 + $0x28] sm:$0x3]  ;;  %v695_v41 = vrot.slane %v3283_v14, 1  ;;  %v492_v56 = vld [vmem:[%s3086_s20 + $0x30] sm:$0xff] }
  0x2c   : > { %2715 = vmatpush.msra.mxu3 %v721_v59  ;;  %823 = vmatpush.msra.mxu1 %v737_v60  ;;  %v3242_v59 = vsel %vm591_vm0, %v595_v34, %v596_v35  ;;  %v3245_v60 = vsel %vm591_vm0, %v643_v36, %v644_v37  ;;  %v3256_v4 = vmul.f32 %v3045_v32, %v430_v54  ;;  %v611_v35 = vrot.slane %v3265_v7, 1  ;;  %v1122_v36 = vld [vmem:[%s5401_s3 + $0x358] sm:$0xff] }
  0x2d   : > { %864 = vmatpush.msra.mxu2 %v753_v61  ;;  %783 = vmatpush.msra.mxu0 %v720_v1  ;;  %5461 = vst [vmem:[#allocation5_spill] sm:$0xff] %v3245_v60  ;;  %v490_v61 = vld [vmem:[%s3086_s20 + $0x20] sm:$0xff]  ;;  %v3259_v5 = vsel %vm591_vm0, %v691_v50, %v692_v51  ;;  %v570_v37 = vld [vmem:[%s5401_s3 + $0x158] sm:$0xff]  ;;  %v1121_v51 = vld [vmem:[%s5401_s3 + $0x350] sm:$0xff] }
  0x2e   : > { %2716 = vmatpush.msra.mxu3 %v720_v1  ;;  %824 = vmatpush.msra.mxu1 %v736_v6  ;;  %v3253_v1 = vmul.f32 %v3045_v32, %v429_v53  ;;  %5463 = vst [vmem:[#allocation7_spill] sm:$0xff] %v3259_v5  ;;  %v3262_v6 = vmul.f32 %v3045_v32, %v437_v55  ;;  %v440_v50 = vld [vmem:[%s3018_s11 + $0x78] sm:$0x3]  ;;  %v535_v53 = vld [vmem:[%s5401_s3 + $0x40] sm:$0xff] }
  0x2f   : > { %865 = vmatpush.msra.mxu2 %v752_v9  ;;  %784 = vmatmul.f32.vlgmr.msra.gmra.mxu0 %v594_v10  ;;  %v3271_v9 = vld [vmem:[%s3066_s16 + $0x28] sm:$0x3]  ;;  %v554_v10 = vld [vmem:[%s5401_s3 + $0xd8] sm:$0xff]  ;;  %v3280_v13 = vmul.f32 %v3131_v0, %v490_v61 }
  0x30   : > { %796 = vmatmul.f32.vlgmr.msra.gmra.mxu3 %v3154_v11  ;;  %825 = vmatmul.f32.vlgmr.msra.gmra.mxu1 %v642_v16  ;;  %v1123_v16 = vld [vmem:[%s5401_s3 + $0x360] sm:$0xff]  ;;  %v610_v34 = vrot.slane %v3262_v6, 1  ;;  %v1137_v11 = vld [vmem:[%s5401_s3 + $0x3d0] sm:$0xff] }
  0x31   : > { %866 = vmatmul.f32.vlgmr.msra.gmra.mxu2 %v690_v19  ;;  %932 = vmatpush.msrb.mxu0 %v558_v24  ;;  %v571_v19 = vld [vmem:[%s5401_s3 + $0x160] sm:$0xff]  ;;  %v537_v24 = vld [vmem:[%s5401_s3 + $0x50] sm:$0xff]  ;;  %v694_v40 = vrot.slane %v3280_v13, 1 }
  0x32   : > { %891 = vmatpush.msrb.mxu3 %v542_v25  ;;  %1159 = vmatpush.msrb.mxu2 %v1126_v29  ;;  %v552_v25 = vld [vmem:[%s5401_s3 + $0xc8] sm:$0xff]  ;;  %v599_v29 = vrot.slane %v3256_v4, 1 }
  0x33   : > { %973 = vmatpush.msrb.mxu1 %v574_v30  ;;  %933 = vmatpush.msrb.mxu0 %v557_v28  ;;  %v598_v28 = vrot.slane %v3253_v1, 1  ;;  %v646_v30 = vrot.slane %v3268_v8, 1 }
  0x34   : > { %892 = vmatpush.msrb.mxu3 %v541_v31  ;;  %1160 = vmatpush.msrb.mxu2 %v1125_v45  ;;  %v647_v31 = vrot.slane %v3271_v9, 1  ;;  %v431_v45 = vld [vmem:[%s3018_s11 + $0x30] sm:$0xff] }
  0x35   : > { %974 = vmatpush.msrb.mxu1 %v573_v46  ;;  %934 = vmatpush.msrb.mxu0 %v556_v33  ;;  %v536_v33 = vld [vmem:[%s5401_s3 + $0x48] sm:$0xff]  ;;  %v432_v46 = vld [vmem:[%s3018_s11 + $0x38] sm:$0x3]  ;;  %v3338_v54 = vsel %vm591_vm0, %v598_v28, %v599_v29  ;;  %v3349_v61 = vmul.f32 %v3045_v32, %v431_v45  ;;  %v3376_v28 = vmul.f32 %v3131_v0, %v492_v56  ;;  %v1119_v45 = vld [vmem:[%s5401_s3 + $0x340] sm:$0xff] }
  0x36   : > { %893 = vmatpush.msrb.mxu3 %v540_v38  ;;  %1161 = vmatpush.msrb.mxu2 %v1124_v52  ;;  %v551_v38 = vld [vmem:[%s5401_s3 + $0xc0] sm:$0xff]  ;;  %v569_v52 = vld [vmem:[%s5401_s3 + $0x150] sm:$0xff]  ;;  %5464 = vst [vmem:[#allocation8_spill] sm:$0xff] %v3338_v54  ;;  %v3341_v55 = vsel %vm591_vm0, %v646_v30, %v647_v31  ;;  %v3352_v62 = vmul.f32 %v3045_v32, %v432_v46  ;;  %v1120_v30 = vld [vmem:[%s5401_s3 + $0x348] sm:$0xff] }
  0x37   : > { %975 = vmatpush.msrb.mxu1 %v572_v57  ;;  %935 = vmatpush.msrb.mxu0 %v555_v47  ;;  %v439_v47 = vld [vmem:[%s3018_s11 + $0x70] sm:$0xff]  ;;  %5465 = vst [vmem:[#allocation9_spill] sm:$0xff] %v3341_v55  ;;  %v493_v57 = vld [vmem:[%s3086_s20 + $0x38] sm:$0x3]  ;;  %v568_v31 = vld [vmem:[%s5401_s3 + $0x148] sm:$0xff] }
  0x38   : > { %894 = vmatpush.msrb.mxu3 %v539_v58  ;;  %787 = vmatmul.f32.gmra.mxu0 %v3242_v59  ;;  %v3346_v58 = vsel %vm591_vm0, %v610_v34, %v611_v35  ;;  %v3379_v29 = vmul.f32 %v3131_v0, %v493_v57  ;;  %v533_v34 = vld [vmem:[%s5401_s3 + $0x30] sm:$0xff]  ;;  %v601_v35 = vrot.slane %v3349_v61, 1  ;;  %v567_v46 = vld [vmem:[%s5401_s3 + $0x140] sm:$0xff]  ;;  %v495_v56 = vld [vmem:[%s3086_s20 + $0x48] sm:$0x3] }
  0x39   : > { %799 = vmatmul.f32.gmra.mxu3 %v3250_v63  ;;  %828 = vmatmul.f32.gmra.mxu1 %v3245_v60  ;;  %5466 = vst [vmem:[#allocation10_spill] sm:$0xff] %v3346_v58  ;;  %v1118_v57 = vld [vmem:[%s5401_s3 + $0x338] sm:$0xff]  ;;  %v3583_v60 = vld [vmem:[%s3066_s16 + $0x60] sm:$0xff] }
  0x3a   : > { %869 = vmatmul.f32.gmra.mxu2 %v3259_v5  ;;  %936 = vmatpush.msrb.mxu0 %v554_v10  ;;  %v3355_v10 = vsel %vm591_vm0, %v694_v40, %v695_v41 }
  0x3b   : > { %895 = vmatpush.msrb.mxu3 %v538_v12  ;;  %1162 = vmatpush.msrb.mxu2 %v1123_v16  ;;  %5467 = vst [vmem:[#allocation11_spill] sm:$0xff] %v3355_v10  ;;  %v3358_v12 = vmul.f32 %v3045_v32, %v439_v47  ;;  %v3364_v16 = vld [vmem:[%s3066_s16 + $0x30] sm:$0xff]  ;;  %v548_v47 = vld [vmem:[%s5401_s3 + $0xa8] sm:$0xff] }
  0x3c   : > { %976 = vmatpush.msrb.mxu1 %v571_v19  ;;  %937 = vmatpush.msrb.mxu0 %v553_v15  ;;  %v3361_v15 = vmul.f32 %v3045_v32, %v440_v50  ;;  %v550_v19 = vld [vmem:[%s5401_s3 + $0xb8] sm:$0xff]  ;;  %v532_v50 = vld [vmem:[%s5401_s3 + $0x28] sm:$0xff] }
  0x3d   : > { %896 = vmatpush.msrb.mxu3 %v537_v24  ;;  %1163 = vmatpush.msrb.mxu2 %v1122_v36  ;;  %v534_v24 = vld [vmem:[%s5401_s3 + $0x38] sm:$0xff]  ;;  %v649_v36 = vrot.slane %v3364_v16, 1 }
  0x3e   : > { %977 = vmatpush.msrb.mxu1 %v570_v37  ;;  %938 = vmatpush.msrb.mxu0 %v552_v25  ;;  %v3373_v25 = vld [vmem:[%s3066_s16 + $0x38] sm:$0x3]  ;;  %v602_v37 = vrot.slane %v3352_v62, 1  ;;  %v614_v40 = vrot.slane %v3361_v15, 1 }
  0x3f   : > { %897 = vmatpush.msrb.mxu3 %v536_v33  ;;  %1164 = vmatpush.msrb.mxu2 %v1121_v51  ;;  %v549_v33 = vld [vmem:[%s5401_s3 + $0xb0] sm:$0xff]  ;;  %v650_v41 = vrot.slane %v3373_v25, 1  ;;  %v697_v51 = vrot.slane %v3376_v28, 1 }
  0x40   : > { %978 = vmatpush.msrb.mxu1 %v569_v52  ;;  %939 = vmatpush.msrb.mxu0 %v551_v38  ;;  %v613_v38 = vrot.slane %v3358_v12, 1  ;;  %v698_v52 = vrot.slane %v3379_v29, 1 }
  0x41   : > { %898 = vmatpush.msrb.mxu3 %v535_v53  ;;  %790 = vmatmul.f32.gmra.mxu0 %v3338_v54  ;;  %v494_v53 = vld [vmem:[%s3086_s20 + $0x40] sm:$0xff] }
  0x42   : > { %802 = vmatmul.f32.gmra.mxu3 %v3346_v58  ;;  %831 = vmatmul.f32.gmra.mxu1 %v3341_v55  ;;  %v3441_v58 = vsel %vm591_vm0, %v697_v51, %v698_v52  ;;  %v3447_v55 = vld [vmem:[%s3066_s16 + $0x48] sm:$0x3] }
  0x43   : > { %872 = vmatmul.f32.gmra.mxu2 %v3355_v10  ;;  %940 = vmatpush.msrb.mxu0 %v550_v19  ;;  %v566_v19 = vld [vmem:[%s5401_s3 + $0x138] sm:$0xff]  ;;  %5471 = vst [vmem:[#allocation15_spill] sm:$0xff] %v3441_v58  ;;  %v3444_v10 = vld [vmem:[%s3066_s16 + $0x40] sm:$0xff]  ;;  %v544_v51 = vld [vmem:[%s5401_s3 + $0x88] sm:$0xff] }
  0x44   : > { %899 = vmatpush.msrb.mxu3 %v534_v24  ;;  %1165 = vmatpush.msrb.mxu2 %v1120_v30  ;;  %v547_v24 = vld [vmem:[%s5401_s3 + $0xa0] sm:$0xff] }
  0x45   : > { %979 = vmatpush.msrb.mxu1 %v568_v31  ;;  %941 = vmatpush.msrb.mxu0 %v549_v33  ;;  %v531_v30 = vld [vmem:[%s5401_s3 + $0x20] sm:$0xff]  ;;  %v3432_v31 = vsel %vm591_vm0, %v601_v35, %v602_v37  ;;  %v3435_v33 = vsel %vm591_vm0, %v613_v38, %v614_v40  ;;  %v546_v35 = vld [vmem:[%s5401_s3 + $0x98] sm:$0xff]  ;;  %v1117_v37 = vld [vmem:[%s5401_s3 + $0x330] sm:$0xff] }
  0x46   : > { %900 = vmatpush.msrb.mxu3 %v533_v34  ;;  %1166 = vmatpush.msrb.mxu2 %v1119_v45  ;;  %5468 = vst [vmem:[#allocation12_spill] sm:$0xff] %v3432_v31  ;;  %v3438_v34 = vsel %vm591_vm0, %v649_v36, %v650_v41  ;;  %v3450_v45 = vmul.f32 %v3131_v0, %v494_v53  ;;  %v530_v36 = vld [vmem:[%s5401_s3 + $0x18] sm:$0xff]  ;;  %v565_v38 = vld [vmem:[%s5401_s3 + $0x130] sm:$0xff] }
  0x47   : > { %980 = vmatpush.msrb.mxu1 %v567_v46  ;;  %942 = vmatpush.msrb.mxu0 %v548_v47  ;;  %5469 = vst [vmem:[#allocation13_spill] sm:$0xff] %v3435_v33  ;;  %v3453_v46 = vmul.f32 %v3131_v0, %v495_v56  ;;  %v545_v40 = vld [vmem:[%s5401_s3 + $0x90] sm:$0xff]  ;;  %v652_v47 = vrot.slane %v3444_v10, 1  ;;  %v1116_v56 = vld [vmem:[%s5401_s3 + $0x328] sm:$0xff] }
  0x48   : > { %901 = vmatpush.msrb.mxu3 %v532_v50  ;;  %5470 = vst [vmem:[#allocation14_spill] sm:$0xff] %v3438_v34  ;;  %1167 = vmatpush.msrb.mxu2 %v1118_v57  ;;  %v529_v41 = vld [vmem:[%s5401_s3 + $0x10] sm:$0xff]  ;;  %v653_v50 = vrot.slane %v3447_v55, 1  ;;  %v700_v52 = vrot.slane %v3450_v45, 1  ;;  %v564_v57 = vld [vmem:[%s5401_s3 + $0x128] sm:$0xff] }
  0x49   : > { %981 = vmatpush.msrb.mxu1 %v566_v19  ;;  %943 = vmatpush.msrb.mxu0 %v547_v24  ;;  %v701_v53 = vrot.slane %v3453_v46, 1  ;;  %v528_v19 = vld [vmem:[%s5401_s3 + $0x8] sm:$0xff]  ;;  %v496_v24 = vld [vmem:[%s3086_s20 + $0x50] sm:$0xff] }
  0x4a   : > { %902 = vmatpush.msrb.mxu3 %v531_v30  ;;  %793 = vmatmul.f32.gmra.mxu0 %v3432_v31  ;;  %v497_v30 = vld [vmem:[%s3086_s20 + $0x58] sm:$0x3]  ;;  %v3644_v31 = vld [vmem:[%s3066_s16 + $0x70] sm:$0xff] }
  0x4b   : > { %805 = vmatmul.f32.gmra.mxu3 %v3435_v33  ;;  %834 = vmatmul.f32.gmra.mxu1 %v3438_v34  ;;  %v543_v33 = vld [vmem:[%s5401_s3 + $0x80] sm:$0xff]  ;;  %v3520_v34 = vmul.f32 %v3131_v0, %v496_v24  ;;  %v3523_v63 = vmul.f32 %v3131_v0, %v497_v30  ;;  %v1141_v30 = vld [vmem:[%s5401_s3 + $0x3f0] sm:$0xff] }
  0x4c   : > { %875 = vmatmul.f32.gmra.mxu2 %v3441_v58  ;;  %944 = vmatpush.msrb.mxu0 %v546_v35  ;;  %v1115_v35 = vld [vmem:[%s5401_s3 + $0x320] sm:$0xff] }
  0x4d   : > { %903 = vmatpush.msrb.mxu3 %v530_v36  ;;  %1168 = vmatpush.msrb.mxu2 %v1117_v37  ;;  %v563_v36 = vld [vmem:[%s5401_s3 + $0x120] sm:$0xff]  ;;  %v3508_v37 = vsel %vm591_vm0, %v652_v47, %v653_v50  ;;  %v1015_v47 = vrot.slane %v3061_v39, 2  ;;  %v1016_v50 = vrot.slane %v3075_v42, 2  ;;  %v704_v24 = vrot.slane %v3523_v63, 1 }
  0x4e   : > { %982 = vmatpush.msrb.mxu1 %v565_v38  ;;  %945 = vmatpush.msrb.mxu0 %v545_v40  ;;  %v527_v58 = vld [vmem:[%s5401_s3] sm:$0xff]  ;;  %5472 = vst [vmem:[#allocation16_spill] sm:$0xff] %v3508_v37  ;;  %v3511_v38 = vsel %vm591_vm0, %v700_v52, %v701_v53  ;;  %v3514_v40 = vld [vmem:[%s3066_s16 + $0x50] sm:$0xff]  ;;  %v1142_v52 = vld [vmem:[%s5401_s3 + $0x3f8] sm:$0xff] }
  0x4f   : > { %904 = vmatpush.msrb.mxu3 %v529_v41  ;;  %1169 = vmatpush.msrb.mxu2 %v1116_v56  ;;  %5473 = vst [vmem:[#allocation17_spill] sm:$0xff] %v3511_v38  ;;  %v3517_v41 = vld [vmem:[%s3066_s16 + $0x58] sm:$0x3]  ;;  %v655_v53 = vrot.slane %v3514_v40, 1  ;;  %v3544_v56 = vsel %vm1014_vm1, %v1015_v47, %v1016_v50  ;;  %v561_v47 = vld [vmem:[%s5401_s3 + $0x110] sm:$0xff]  ;;  %v1156_v50 = vld [vmem:[%s5401_s3 + $0x468] sm:$0xff] }
  0x50   : > { %983 = vmatpush.msrb.mxu1 %v564_v57  ;;  %946 = vmatpush.msrb.mxu0 %v544_v51  ;;  %v1158_v51 = vld [vmem:[%s5401_s3 + $0x478] sm:$0xff]  ;;  %v656_v42 = vrot.slane %v3517_v41, 1  ;;  %v1157_v57 = vld [vmem:[%s5401_s3 + $0x470] sm:$0xff] }
  0x51   : > { %905 = vmatpush.msrb.mxu3 %v528_v19  ;;  %1170 = vmatpush.msrb.mxu2 %v1115_v35  ;;  %v703_v19 = vrot.slane %v3520_v34, 1  ;;  %v498_v35 = vld [vmem:[%s3086_s20 + $0x60] sm:$0xff] }
  0x52   : > { %984 = vmatpush.msrb.mxu1 %v563_v36  ;;  %947 = vmatpush.msrb.mxu0 %v543_v33  ;;  %v562_v33 = vld [vmem:[%s5401_s3 + $0x118] sm:$0xff]  ;;  %v1113_v36 = vld [vmem:[%s5401_s3 + $0x310] sm:$0xff] }
  0x53   : > { %906 = vmatpush.msrb.mxu3 %v527_v58  ;;  %837 = vmatmul.f32.gmra.mxu1 %v3508_v37  ;;  %v1114_v58 = vld [vmem:[%s5401_s3 + $0x318] sm:$0xff]  ;;  %v560_v37 = vld [vmem:[%s5401_s3 + $0x108] sm:$0xff]  ;;  %v3580_v5 = vsel %vm591_vm0, %v703_v19, %v704_v24  ;;  %v658_v19 = vrot.slane %v3583_v60, 1  ;;  %v559_v24 = vld [vmem:[%s5401_s3 + $0x100] sm:$0xff] }
  0x54   : > { %878 = vmatmul.f32.gmra.mxu2 %v3511_v38  ;;  %907 = vmatmul.f32.vlgmr.msrb.gmra.mxu3 %v3061_v39  ;;  %v499_v39 = vld [vmem:[%s3086_s20 + $0x68] sm:$0x3]  ;;  %5475 = vst [vmem:[#allocation19_spill] sm:$0xff] %v3580_v5 }
  0x55   : > { %948 = vmatmul.f32.vlgmr.msrb.gmra.mxu0 %v3100_v48  ;;  %1200 = vmatpush.msra.mxu3 %v1142_v52  ;;  %v1140_v38 = vld [vmem:[%s5401_s3 + $0x3e8] sm:$0xff] }
  0x56   : > { %1241 = vmatpush.msra.mxu0 %v1158_v51  ;;  %1171 = vmatpush.msrb.mxu2 %v1114_v58  ;;  %v3571_v51 = vsel %vm591_vm0, %v655_v53, %v656_v42  ;;  %v1112_v52 = vld [vmem:[%s5401_s3 + $0x308] sm:$0xff]  ;;  %v3592_v53 = vmul.f32 %v3131_v0, %v499_v39  ;;  %v1155_v42 = vld [vmem:[%s5401_s3 + $0x460] sm:$0xff]  ;;  %v1154_v39 = vld [vmem:[%s5401_s3 + $0x458] sm:$0xff] }
  0x57   : > { %985 = vmatpush.msrb.mxu1 %v562_v33  ;;  %5474 = vst [vmem:[#allocation18_spill] sm:$0xff] %v3571_v51  ;;  %1201 = vmatpush.msra.mxu3 %v1141_v30  ;;  %v3586_v58 = vld [vmem:[%s3066_s16 + $0x68] sm:$0x3]  ;;  %v3589_v33 = vmul.f32 %v3131_v0, %v498_v35  ;;  %v1111_v30 = vld [vmem:[%s5401_s3 + $0x300] sm:$0xff] }
  0x58   : > { %1242 = vmatpush.msra.mxu0 %v1157_v57  ;;  %1172 = vmatpush.msrb.mxu2 %v1113_v36  ;;  %v1139_v57 = vld [vmem:[%s5401_s3 + $0x3e0] sm:$0xff]  ;;  %v707_v35 = vrot.slane %v3592_v53, 1  ;;  %v500_v36 = vld [vmem:[%s3086_s20 + $0x70] sm:$0xff] }
  0x59   : > { %5476 = vst [vmem:[#allocation20_spill] sm:$0xff] %v3589_v33  ;;  %986 = vmatpush.msrb.mxu1 %v561_v47  ;;  %1202 = vmatpush.msra.mxu3 %v1140_v38  ;;  %v659_v38 = vrot.slane %v3586_v58, 1  ;;  %v1138_v47 = vld [vmem:[%s5401_s3 + $0x3d8] sm:$0xff]  ;;  %v3647_v54 = vmul.f32 %v3131_v0, %v500_v36  ;;  %v1135_v36 = vld [vmem:[%s5401_s3 + $0x3c0] sm:$0xff] }
  0x5a   : > { %1243 = vmatpush.msra.mxu0 %v1156_v50  ;;  %1173 = vmatpush.msrb.mxu2 %v1112_v52  ;;  %v501_v50 = vld [vmem:[%s3086_s20 + $0x78] sm:$0x3] }
  0x5b   : > { %987 = vmatpush.msrb.mxu1 %v560_v37  ;;  %v706_v37 = vrot.slane %v3589_v33, 1  ;;  %1203 = vmatpush.msra.mxu3 %v1139_v57  ;;  %v1321_v52 = vld [vmem:[%s5401_s3 + $0x578] sm:$0xff]  ;;  %v1320_v57 = vld [vmem:[%s5401_s3 + $0x570] sm:$0xff]  ;;  %5479 = vst [vmem:[#allocation23_spill] sm:$0xff] %v3647_v54 }
  0x5c   : > { %840 = vmatmul.f32.gmra.mxu1 %v3571_v51  ;;  %881 = vmatmul.f32.gmra.mxu2 %v3580_v5  ;;  %v1305_v5 = vld [vmem:[%s5401_s3 + $0x4f8] sm:$0xff]  ;;  %v1153_v51 = vld [vmem:[%s5401_s3 + $0x450] sm:$0xff] }
  0x5d   : > { %910 = vmatmul.f32.gmra.mxu3 %v3162_v17  ;;  %951 = vmatmul.f32.gmra.mxu0 %v3175_v22  ;;  %v3641_v32 = vsel %vm591_vm0, %v706_v37, %v707_v35  ;;  %v661_v37 = vrot.slane %v3644_v31, 1 }
  0x5e   : > { %1244 = vmatpush.msra.mxu0 %v1155_v42  ;;  %988 = vmatpush.msrb.mxu1 %v559_v24  ;;  %v3635_v42 = vsel %vm591_vm0, %v658_v19, %v659_v38  ;;  %5478 = vst [vmem:[#allocation22_spill] sm:$0xff] %v3641_v32  ;;  %v3650_v24 = vmul.f32 %v3131_v0, %v501_v50  ;;  %v3653_v19 = vld [vmem:[%s3066_s16 + $0x78] sm:$0x3]  ;;  %v1152_v38 = vld [vmem:[%s5401_s3 + $0x448] sm:$0xff]  ;;  %v1318_v50 = vld [vmem:[%s5401_s3 + $0x560] sm:$0xff] }
  0x5f   : > { %1174 = vmatpush.msrb.mxu2 %v1111_v30  ;;  %5477 = vst [vmem:[#allocation21_spill] sm:$0xff] %v3635_v42  ;;  %1204 = vmatpush.msra.mxu3 %v1138_v47  ;;  %v1136_v30 = vld [vmem:[%s5401_s3 + $0x3c8] sm:$0xff]  ;;  %v1304_v47 = vld [vmem:[%s5401_s3 + $0x4f0] sm:$0xff] }
  0x60   : > { %1245 = vmatpush.msra.mxu0 %v1154_v39  ;;  %1338 = vmatpush.msra.mxu1 %v1305_v5  ;;  %v1319_v5 = vld [vmem:[%s5401_s3 + $0x568] sm:$0xff]  ;;  %v710_v35 = vrot.slane %v3650_v24, 1  ;;  %v1151_v39 = vld [vmem:[%s5401_s3 + $0x440] sm:$0xff] }
  0x61   : > { %1379 = vmatpush.msra.mxu2 %v1321_v52  ;;  %1205 = vmatpush.msra.mxu3 %v1137_v11  ;;  %v662_v11 = vrot.slane %v3653_v19, 1  ;;  %v1150_v52 = vld [vmem:[%s5401_s3 + $0x438] sm:$0xff] }
  0x62   : > { %1246 = vmatpush.msra.mxu0 %v1153_v51  ;;  %v709_v51 = vrot.slane %v3647_v54, 1  ;;  %1339 = vmatpush.msra.mxu1 %v1304_v47  ;;  %v1301_v47 = vld [vmem:[%s5401_s3 + $0x4d8] sm:$0xff] }
  0x63   : > { %1380 = vmatpush.msra.mxu2 %v1320_v57  ;;  %1206 = vmatpush.msra.mxu3 %v1136_v30  ;;  %v1134_v57 = vld [vmem:[%s5401_s3 + $0x3b8] sm:$0xff]  ;;  %v3697_v30 = vsel %vm591_vm0, %v661_v37, %v662_v11  ;;  %v1132_v37 = vld [vmem:[%s5401_s3 + $0x3a8] sm:$0xff]  ;;  %v1302_v11 = vld [vmem:[%s5401_s3 + $0x4e0] sm:$0xff] }
  0x64   : > { %843 = vmatmul.f32.gmra.mxu1 %v3635_v42  ;;  %884 = vmatmul.f32.gmra.mxu2 %v3641_v32  ;;  %v1303_v32 = vld [vmem:[%s5401_s3 + $0x4e8] sm:$0xff]  ;;  %5480 = vst [vmem:[#allocation24_spill] sm:$0xff] %v3697_v30  ;;  %v3700_v42 = vsel %vm591_vm0, %v709_v51, %v710_v35  ;;  %v1147_v51 = vld [vmem:[%s5401_s3 + $0x420] sm:$0xff]  ;;  %v1316_v35 = vld [vmem:[%s5401_s3 + $0x550] sm:$0xff] }
  0x65   : > { %913 = vmatmul.f32.gmra.mxu3 %v3253_v1  ;;  %954 = vmatmul.f32.gmra.mxu0 %v3268_v8  ;;  %5481 = vst [vmem:[#allocation25_spill] sm:$0xff] %v3700_v42 }
  0x66   : > { %1247 = vmatpush.msra.mxu0 %v1152_v38  ;;  %1381 = vmatpush.msra.mxu2 %v1319_v5  ;;  %v1317_v38 = vld [vmem:[%s5401_s3 + $0x558] sm:$0xff]  ;;  %v1149_v5 = vld [vmem:[%s5401_s3 + $0x430] sm:$0xff] }
  0x67   : > { %1207 = vmatpush.msra.mxu3 %v1135_v36  ;;  %1340 = vmatpush.msra.mxu1 %v1303_v32  ;;  %v1148_v32 = vld [vmem:[%s5401_s3 + $0x428] sm:$0xff]  ;;  %v1131_v36 = vld [vmem:[%s5401_s3 + $0x3a0] sm:$0xff] }
  0x68   : > { %1248 = vmatpush.msra.mxu0 %v1151_v39  ;;  %1382 = vmatpush.msra.mxu2 %v1318_v50  ;;  %v1133_v39 = vld [vmem:[%s5401_s3 + $0x3b0] sm:$0xff]  ;;  %v1315_v50 = vld [vmem:[%s5401_s3 + $0x548] sm:$0xff] }
  0x69   : > { %1208 = vmatpush.msra.mxu3 %v1134_v57  ;;  %1341 = vmatpush.msra.mxu1 %v1302_v11  ;;  %v1130_v57 = vld [vmem:[%s5401_s3 + $0x398] sm:$0xff]  ;;  %v1299_v11 = vld [vmem:[%s5401_s3 + $0x4c8] sm:$0xff] }
  0x6a   : > { %1249 = vmatpush.msra.mxu0 %v1150_v52  ;;  %1383 = vmatpush.msra.mxu2 %v1317_v38  ;;  %v1146_v52 = vld [vmem:[%s5401_s3 + $0x418] sm:$0xff]  ;;  %v1145_v38 = vld [vmem:[%s5401_s3 + $0x410] sm:$0xff] }
  0x6b   : > { %1209 = vmatpush.msra.mxu3 %v1133_v39  ;;  %1342 = vmatpush.msra.mxu1 %v1301_v47  ;;  %v1019_v39 = vrot.slane %v3165_v18, 2  ;;  %v1313_v18 = vld [vmem:[%s5401_s3 + $0x538] sm:$0xff]  ;;  %v1143_v47 = vld [vmem:[%s5401_s3 + $0x400] sm:$0xff] }
  0x6c   : > { %846 = vmatmul.f32.gmra.mxu1 %v3697_v30  ;;  %887 = vmatmul.f32.gmra.mxu2 %v3700_v42 }
  0x6d   : > { %916 = vmatmul.f32.gmra.mxu3 %v3349_v61  ;;  %957 = vmatmul.f32.gmra.mxu0 %v3364_v16 }
  0x6e   : > { %1250 = vmatpush.msra.mxu0 %v1149_v5  ;;  %1384 = vmatpush.msra.mxu2 %v1316_v35  ;;  %v1018_v5 = vrot.slane %v3162_v17, 2  ;;  %v1128_v35 = vld [vmem:[%s5401_s3 + $0x388] sm:$0xff] }
  0x6f   : > { %1210 = vmatpush.msra.mxu3 %v1132_v37  ;;  %v1314_v37 = vld [vmem:[%s5401_s3 + $0x540] sm:$0xff] }
  0x70   : > { %1251 = vmatpush.msra.mxu0 %v1148_v32  ;;  %1385 = vmatpush.msra.mxu2 %v1315_v50  ;;  %v1129_v32 = vld [vmem:[%s5401_s3 + $0x390] sm:$0xff]  ;;  %v1127_v50 = vld [vmem:[%s5401_s3 + $0x380] sm:$0xff] }
  0x71   : > { %1211 = vmatpush.msra.mxu3 %v1131_v36  ;;  %v3773_v36 = vsel %vm1014_vm1, %v1018_v5, %v1019_v39  ;;  %v1298_v5 = vld [vmem:[%s5401_s3 + $0x4c0] sm:$0xff]  ;;  %v1312_v39 = vld [vmem:[%s5401_s3 + $0x530] sm:$0xff] }
  0x72   : > { %1252 = vmatpush.msra.mxu0 %v1147_v51  ;;  %v1144_v51 = vld [vmem:[%s5401_s3 + $0x408] sm:$0xff]  ;;  %1386 = vmatpush.msra.mxu2 %v1314_v37 }
  0x73   : > { %1212 = vmatpush.msra.mxu3 %v1130_v57  ;;  %v1021_v57 = vrot.slane %v3253_v1, 2  ;;  %v1311_v37 = vld [vmem:[%s5401_s3 + $0x528] sm:$0xff] }
  0x74   : > { %989 = vmatmul.f32.vlgmr.msrb.gmra.mxu1 %v3137_v2  ;;  %1175 = vmatmul.f32.vlgmr.msrb.gmra.mxu2 %v3544_v56  ;;  %v1300_v56 = vld [vmem:[%s5401_s3 + $0x4d0] sm:$0xff] }
  0x75   : > { %919 = vmatmul.f32.gmra.mxu3 %v3078_v43  ;;  %960 = vmatmul.f32.gmra.mxu0 %v3444_v10 }
  0x76   : > { %1253 = vmatpush.msra.mxu0 %v1146_v52  ;;  %1343 = vmatpush.msra.mxu1 %v1300_v56  ;;  %v1502_v52 = vld [vmem:[%s5401_s3 + $0x678] sm:$0xff]  ;;  %v1501_v56 = vld [vmem:[%s5401_s3 + $0x670] sm:$0xff] }
  0x77   : > { %1213 = vmatpush.msra.mxu3 %v1129_v32  ;;  %1387 = vmatpush.msra.mxu2 %v1313_v18  ;;  %v1337_v32 = vld [vmem:[%s5401_s3 + $0x5f8] sm:$0xff]  ;;  %v1500_v18 = vld [vmem:[%s5401_s3 + $0x668] sm:$0xff] }
  0x78   : > { %1254 = vmatpush.msra.mxu0 %v1145_v38  ;;  %1344 = vmatpush.msra.mxu1 %v1299_v11  ;;  %v1022_v38 = vrot.slane %v3256_v4, 2  ;;  %v1297_v4 = vld [vmem:[%s5401_s3 + $0x4b8] sm:$0xff]  ;;  %v1336_v11 = vld [vmem:[%s5401_s3 + $0x5f0] sm:$0xff] }
  0x79   : > { %1214 = vmatpush.msra.mxu3 %v1128_v35  ;;  %1388 = vmatpush.msra.mxu2 %v1312_v39  ;;  %v1499_v35 = vld [vmem:[%s5401_s3 + $0x660] sm:$0xff]  ;;  %v1309_v39 = vld [vmem:[%s5401_s3 + $0x518] sm:$0xff] }
  0x7a   : > { %1255 = vmatpush.msra.mxu0 %v1144_v51  ;;  %1345 = vmatpush.msra.mxu1 %v1298_v5  ;;  %v3815_v51 = vsel %vm1014_vm1, %v1021_v57, %v1022_v38  ;;  %v1310_v57 = vld [vmem:[%s5401_s3 + $0x520] sm:$0xff]  ;;  %v1335_v38 = vld [vmem:[%s5401_s3 + $0x5e8] sm:$0xff]  ;;  %v1498_v5 = vld [vmem:[%s5401_s3 + $0x658] sm:$0xff] }
  0x7b   : > { %1215 = vmatpush.msra.mxu3 %v1127_v50  ;;  %5482 = vst [vmem:[#allocation26_spill] sm:$0xff] %v3815_v51  ;;  %1389 = vmatpush.msra.mxu2 %v1311_v37  ;;  %v1025_v50 = vrot.slane %v3352_v62, 2  ;;  %v1295_v62 = vld [vmem:[%s5401_s3 + $0x4a8] sm:$0xff] }
  0x7c   : > { %992 = vmatmul.f32.gmra.mxu1 %v3187_v26  ;;  %1178 = vmatmul.f32.gmra.mxu2 %v3773_v36 }
  0x7d   : > { %922 = vmatmul.f32.gmra.mxu3 %v3169_v20  ;;  %963 = vmatmul.f32.gmra.mxu0 %v3514_v40 }
  0x7e   : > { %1256 = vmatpush.msra.mxu0 %v1143_v47  ;;  %1420 = vmatpush.msrb.mxu3 %v1337_v32  ;;  %v1024_v47 = vrot.slane %v3349_v61, 2  ;;  %v1334_v32 = vld [vmem:[%s5401_s3 + $0x5e0] sm:$0xff] }
  0x7f   : > { %1346 = vmatpush.msra.mxu1 %v1297_v4  ;;  %1390 = vmatpush.msra.mxu2 %v1310_v57  ;;  %v1294_v4 = vld [vmem:[%s5401_s3 + $0x4a0] sm:$0xff]  ;;  %v1079_v57 = vrot.slane %v3137_v2, 2 }
  0x80   : > { %1535 = vmatpush.msrb.mxu0 %v1502_v52  ;;  %1421 = vmatpush.msrb.mxu3 %v1336_v11  ;;  %v1296_v52 = vld [vmem:[%s5401_s3 + $0x4b0] sm:$0xff]  ;;  %v3854_v37 = vsel %vm1014_vm1, %v1024_v47, %v1025_v50  ;;  %v1048_v11 = vrot.slane %v3103_v49, 2  ;;  %v1333_v50 = vld [vmem:[%s5401_s3 + $0x5d8] sm:$0xff]  ;;  %v1496_v49 = vld [vmem:[%s5401_s3 + $0x648] sm:$0xff] }
  0x81   : > { %1347 = vmatpush.msra.mxu1 %v1296_v52  ;;  %5483 = vst [vmem:[#allocation27_spill] sm:$0xff] %v3854_v37  ;;  %1391 = vmatpush.msra.mxu2 %v1309_v39  ;;  %v1308_v47 = vld [vmem:[%s5401_s3 + $0x510] sm:$0xff]  ;;  %v1047_v52 = vrot.slane %v3100_v48, 2  ;;  %v1495_v2 = vld [vmem:[%s5401_s3 + $0x640] sm:$0xff] }
  0x82   : > { %1536 = vmatpush.msrb.mxu0 %v1501_v56  ;;  %1422 = vmatpush.msrb.mxu3 %v1335_v38  ;;  %v1497_v56 = vld [vmem:[%s5401_s3 + $0x650] sm:$0xff]  ;;  %v1080_v38 = vrot.slane %v3140_v3, 2  ;;  %v1291_v3 = vld [vmem:[%s5401_s3 + $0x488] sm:$0xff]  ;;  %v1306_v39 = vld [vmem:[%s5401_s3 + $0x500] sm:$0xff] }
  0x83   : > { %1348 = vmatpush.msra.mxu1 %v1295_v62  ;;  %1392 = vmatpush.msra.mxu2 %v1308_v47  ;;  %v1307_v62 = vld [vmem:[%s5401_s3 + $0x508] sm:$0xff]  ;;  %v1332_v48 = vld [vmem:[%s5401_s3 + $0x5d0] sm:$0xff]  ;;  %v1290_v47 = vld [vmem:[%s5401_s3 + $0x480] sm:$0xff] }
  0x84   : > { %1537 = vmatpush.msrb.mxu0 %v1500_v18  ;;  %995 = vmatmul.f32.gmra.mxu1 %v3280_v13  ;;  %v1027_v18 = vrot.slane %v3078_v43, 2 }
  0x85   : > { %1181 = vmatmul.f32.gmra.mxu2 %v3815_v51  ;;  %925 = vmatmul.f32.gmra.mxu3 %v3262_v6 }
  0x86   : > { %966 = vmatmul.f32.gmra.mxu0 %v3583_v60  ;;  %1423 = vmatpush.msrb.mxu3 %v1334_v32 }
  0x87   : > { %1538 = vmatpush.msrb.mxu0 %v1499_v35  ;;  %1349 = vmatpush.msra.mxu1 %v1294_v4  ;;  %v1028_v35 = vrot.slane %v3081_v44, 2  ;;  %v1293_v44 = vld [vmem:[%s5401_s3 + $0x498] sm:$0xff]  ;;  %v1081_v4 = vsel %vm1014_vm1, %v1079_v57, %v1080_v38  ;;  %v1051_v57 = vrot.slane %v3178_v23, 2  ;;  %v1082_v38 = vrot.slane %v3187_v26, 2 }
  0x88   : > { %1424 = vmatpush.msrb.mxu3 %v1333_v50  ;;  %1393 = vmatpush.msra.mxu2 %v1307_v62  ;;  %v1494_v50 = vld [vmem:[%s5401_s3 + $0x638] sm:$0xff]  ;;  %v1033_v62 = vrot.slane %v3262_v6, 2 }
  0x89   : > { %1539 = vmatpush.msrb.mxu0 %v1498_v5  ;;  %v1292_v5 = vld [vmem:[%s5401_s3 + $0x490] sm:$0xff]  ;;  %1350 = vmatpush.msra.mxu1 %v1293_v44  ;;  %v3897_v32 = vsel %vm1014_vm1, %v1027_v18, %v1028_v35  ;;  %v1030_v18 = vrot.slane %v3169_v20, 2  ;;  %v1031_v35 = vrot.slane %v3172_v21, 2  ;;  %v1083_v21 = vrot.slane %v3190_v27, 2 }
  0x8a   : > { %1425 = vmatpush.msrb.mxu3 %v1332_v48  ;;  %1394 = vmatpush.msra.mxu2 %v1306_v39  ;;  %v1493_v44 = vld [vmem:[%s5401_s3 + $0x630] sm:$0xff]  ;;  %v1034_v48 = vrot.slane %v3265_v7, 2  ;;  %v1492_v39 = vld [vmem:[%s5401_s3 + $0x628] sm:$0xff]  ;;  %v1086_v7 = vrot.slane %v3283_v14, 2 }
  0x8b   : > { %1540 = vmatpush.msrb.mxu0 %v1497_v56  ;;  %1351 = vmatpush.msra.mxu1 %v1292_v5  ;;  %v1049_v56 = vsel %vm1014_vm1, %v1047_v52, %v1048_v11  ;;  %v1331_v11 = vld [vmem:[%s5401_s3 + $0x5c8] sm:$0xff]  ;;  %v1050_v52 = vrot.slane %v3175_v22, 2  ;;  %v1534_v5 = vld [vmem:[%s5401_s3 + $0x778] sm:$0xff]  ;;  %v3928_v22 = vsel %vm1014_vm1, %v1030_v18, %v1031_v35  ;;  %v3934_v27 = vsel %vm1014_vm1, %v1082_v38, %v1083_v21  ;;  %v1491_v18 = vld [vmem:[%s5401_s3 + $0x620] sm:$0xff] }
  0x8c   : > { %998 = vmatmul.f32.gmra.mxu1 %v3376_v28  ;;  %1426 = vmatpush.msrb.mxu3 %v1331_v11  ;;  %v1518_v35 = vld [vmem:[%s5401_s3 + $0x6f8] sm:$0xff]  ;;  %v3968_v14 = vsel %vm1014_vm1, %v1033_v62, %v1034_v48  ;;  %v1517_v21 = vld [vmem:[%s5401_s3 + $0x6f0] sm:$0xff]  ;;  %v1088_v62 = vrot.slane %v3376_v28, 2  ;;  %v1531_v48 = vld [vmem:[%s5401_s3 + $0x760] sm:$0xff] }
  0x8d   : > { %1184 = vmatmul.f32.gmra.mxu2 %v3854_v37  ;;  %928 = vmatmul.f32.gmra.mxu3 %v3358_v12  ;;  %v3931_v23 = vsel %vm1014_vm1, %v1050_v52, %v1051_v57  ;;  %v1037_v52 = vrot.slane %v3361_v15, 2  ;;  %v1327_v57 = vld [vmem:[%s5401_s3 + $0x5a8] sm:$0xff]  ;;  %v1490_v38 = vld [vmem:[%s5401_s3 + $0x618] sm:$0xff]  ;;  %v1089_v15 = vrot.slane %v3379_v29, 2 }
  0x8e   : > { %969 = vmatmul.f32.gmra.mxu0 %v3644_v31  ;;  %1352 = vmatpush.msra.mxu1 %v1291_v3  ;;  %v1329_v3 = vld [vmem:[%s5401_s3 + $0x5b8] sm:$0xff] }
  0x8f   : > { %1541 = vmatpush.msrb.mxu0 %v1496_v49  ;;  %v1330_v49 = vld [vmem:[%s5401_s3 + $0x5c0] sm:$0xff]  ;;  %1617 = vmatpush.msrb.mxu2 %v1534_v5  ;;  %v1057_v5 = vrot.slane %v3373_v25, 2  ;;  %v1516_v25 = vld [vmem:[%s5401_s3 + $0x6e8] sm:$0xff]  ;;  %v1530_v29 = vld [vmem:[%s5401_s3 + $0x758] sm:$0xff] }
  0x90   : > { %1353 = vmatpush.msra.mxu1 %v1290_v47  ;;  %1427 = vmatpush.msrb.mxu3 %v1330_v49  ;;  %v1085_v47 = vrot.slane %v3280_v13, 2  ;;  %v1036_v49 = vrot.slane %v3358_v12, 2 }
  0x91   : > { %1542 = vmatpush.msrb.mxu0 %v1495_v2  ;;  %v1053_v2 = vrot.slane %v3268_v8, 2  ;;  %v1328_v8 = vld [vmem:[%s5401_s3 + $0x5b0] sm:$0xff] }
  0x92   : > { %1428 = vmatpush.msrb.mxu3 %v1329_v3  ;;  %1576 = vmatpush.msrb.mxu1 %v1518_v35  ;;  %v4011_v3 = vsel %vm1014_vm1, %v1036_v49, %v1037_v52  ;;  %v1059_v35 = vrot.slane %v3444_v10, 2  ;;  %v1091_v49 = vrot.slane %v3450_v45, 2  ;;  %v1092_v52 = vrot.slane %v3453_v46, 2  ;;  %v1514_v46 = vld [vmem:[%s5401_s3 + $0x6d8] sm:$0xff] }
  0x93   : > { %1543 = vmatpush.msrb.mxu0 %v1494_v50  ;;  %v3974_v50 = vsel %vm1014_vm1, %v1085_v47, %v1086_v7  ;;  %v1325_v47 = vld [vmem:[%s5401_s3 + $0x598] sm:$0xff]  ;;  %v1488_v7 = vld [vmem:[%s5401_s3 + $0x608] sm:$0xff] }
  0x94   : > { %1001 = vmatmul.f32.gmra.mxu1 %v3450_v45  ;;  %1429 = vmatpush.msrb.mxu3 %v1328_v8  ;;  %v1515_v8 = vld [vmem:[%s5401_s3 + $0x6e0] sm:$0xff] }
  0x95   : > { %1187 = vmatmul.f32.gmra.mxu2 %v3897_v32  ;;  %1216 = vmatmul.f32.vlgmr.msra.gmra.mxu3 %v1049_v56  ;;  %v1533_v56 = vld [vmem:[%s5401_s3 + $0x770] sm:$0xff] }
  0x96   : > { %1257 = vmatmul.f32.vlgmr.msra.gmra.mxu0 %v1081_v4  ;;  %v1054_v4 = vrot.slane %v3271_v9, 2  ;;  %1618 = vmatpush.msrb.mxu2 %v1533_v56  ;;  %v1532_v9 = vld [vmem:[%s5401_s3 + $0x768] sm:$0xff]  ;;  %v4017_v56 = vsel %vm1014_vm1, %v1088_v62, %v1089_v15  ;;  %v4062_v62 = vsel %vm1014_vm1, %v1091_v49, %v1092_v52 }
  0x97   : > { %1544 = vmatpush.msrb.mxu0 %v1493_v44  ;;  %v1056_v44 = vrot.slane %v3364_v16, 2  ;;  %1430 = vmatpush.msrb.mxu3 %v1327_v57  ;;  %v1489_v16 = vld [vmem:[%s5401_s3 + $0x610] sm:$0xff]  ;;  %v1512_v52 = vld [vmem:[%s5401_s3 + $0x6c8] sm:$0xff] }
  0x98   : > { %1619 = vmatpush.msrb.mxu2 %v1532_v9  ;;  %v3971_v11 = vsel %vm1014_vm1, %v1053_v2, %v1054_v4  ;;  %1577 = vmatpush.msrb.mxu1 %v1517_v21  ;;  %v1326_v2 = vld [vmem:[%s5401_s3 + $0x5a0] sm:$0xff]  ;;  %v1060_v9 = vrot.slane %v3447_v55, 2  ;;  %v1529_v57 = vld [vmem:[%s5401_s3 + $0x750] sm:$0xff]  ;;  %v1528_v21 = vld [vmem:[%s5401_s3 + $0x748] sm:$0xff] }
  0x99   : > { %1545 = vmatpush.msrb.mxu0 %v1492_v39  ;;  %5484 = vst [vmem:[#allocation28_spill] sm:$0xff] %v3971_v11  ;;  %1431 = vmatpush.msrb.mxu3 %v1326_v2  ;;  %v4014_v39 = vsel %vm1014_vm1, %v1056_v44, %v1057_v5  ;;  %v1487_v55 = vld [vmem:[%s5401_s3 + $0x600] sm:$0xff]  ;;  %v1323_v44 = vld [vmem:[%s5401_s3 + $0x588] sm:$0xff]  ;;  %v2794_v2 = vld [vmem:[%s3066_s16 + $0x10] sm:$0xff] }
  0x9a   : > { %1620 = vmatpush.msrb.mxu2 %v1531_v48  ;;  %1578 = vmatpush.msrb.mxu1 %v1516_v25  ;;  %5485 = vst [vmem:[#allocation29_spill] sm:$0xff] %v4014_v39  ;;  %v4059_v5 = vsel %vm1014_vm1, %v1059_v35, %v1060_v9  ;;  %v1322_v48 = vld [vmem:[%s5401_s3 + $0x580] sm:$0xff]  ;;  %v1513_v25 = vld [vmem:[%s5401_s3 + $0x6d0] sm:$0xff]  ;;  %v1094_v35 = vrot.slane %v3520_v34, 2  ;;  %v1095_v9 = vrot.slane %v3523_v63, 2 }
  0x9b   : > { %1546 = vmatpush.msrb.mxu0 %v1491_v18  ;;  %1432 = vmatpush.msrb.mxu3 %v1325_v47 }
  0x9c   : > { %1004 = vmatmul.f32.gmra.mxu1 %v3520_v34  ;;  %1621 = vmatpush.msrb.mxu2 %v1530_v29  ;;  %v1527_v29 = vld [vmem:[%s5401_s3 + $0x740] sm:$0xff] }
  0x9d   : > { %1190 = vmatmul.f32.gmra.mxu2 %v3928_v22  ;;  %1219 = vmatmul.f32.gmra.mxu3 %v3931_v23 }
  0x9e   : > { %1260 = vmatmul.f32.gmra.mxu0 %v3934_v27  ;;  %1579 = vmatpush.msrb.mxu1 %v1515_v8  ;;  %v1063_v8 = vrot.slane %v3517_v41, 2  ;;  %v1708_v41 = vld [vmem:[%s5401_s3 + $0x870] sm:$0xff] }
  0x9f   : > { %1547 = vmatpush.msrb.mxu0 %v1490_v38  ;;  %1622 = vmatpush.msrb.mxu2 %v1529_v57  ;;  %v1324_v38 = vld [vmem:[%s5401_s3 + $0x590] sm:$0xff]  ;;  %v1526_v57 = vld [vmem:[%s5401_s3 + $0x738] sm:$0xff] }
  0xa0   : > { %1433 = vmatpush.msrb.mxu3 %v1324_v38  ;;  %1580 = vmatpush.msrb.mxu1 %v1514_v46  ;;  %v4105_v38 = vsel %vm1014_vm1, %v1094_v35, %v1095_v9 }
  0xa1   : > { %1548 = vmatpush.msrb.mxu0 %v1489_v16  ;;  %1623 = vmatpush.msrb.mxu2 %v1528_v21  ;;  %5486 = vst [vmem:[#allocation30_spill] sm:$0xff] %v4105_v38 }
  0xa2   : > { %1434 = vmatpush.msrb.mxu3 %v1323_v44  ;;  %1581 = vmatpush.msrb.mxu1 %v1513_v25  ;;  %v1511_v44 = vld [vmem:[%s5401_s3 + $0x6c0] sm:$0xff]  ;;  %v1065_v25 = vrot.slane %v3583_v60, 2 }
  0xa3   : > { %1549 = vmatpush.msrb.mxu0 %v1488_v7  ;;  %v1062_v7 = vrot.slane %v3514_v40, 2  ;;  %1624 = vmatpush.msrb.mxu2 %v1527_v29  ;;  %v1066_v29 = vrot.slane %v3586_v58, 2  ;;  %v1510_v58 = vld [vmem:[%s5401_s3 + $0x6b8] sm:$0xff] }
  0xa4   : > { %1007 = vmatmul.f32.gmra.mxu1 %v3589_v33  ;;  %1435 = vmatpush.msrb.mxu3 %v1322_v48  ;;  %v1525_v48 = vld [vmem:[%s5401_s3 + $0x730] sm:$0xff] }
  0xa5   : > { %1193 = vmatmul.f32.gmra.mxu2 %v3968_v14  ;;  %1222 = vmatmul.f32.gmra.mxu3 %v3971_v11  ;;  %v4102_v63 = vsel %vm1014_vm1, %v1062_v7, %v1063_v8  ;;  %v1098_v7 = vrot.slane %v3592_v53, 2  ;;  %v1707_v8 = vld [vmem:[%s5401_s3 + $0x868] sm:$0xff] }
  0xa6   : > { %1263 = vmatmul.f32.gmra.mxu0 %v3974_v50  ;;  %1582 = vmatpush.msrb.mxu1 %v1512_v52  ;;  %v1524_v53 = vld [vmem:[%s5401_s3 + $0x728] sm:$0xff]  ;;  %v1692_v52 = vld [vmem:[%s5401_s3 + $0x7f0] sm:$0xff] }
  0xa7   : > { %1550 = vmatpush.msrb.mxu0 %v1487_v55  ;;  %1625 = vmatpush.msrb.mxu2 %v1526_v57  ;;  %v2795_v55 = vld [vmem:[%s3066_s16 + $0x20] sm:$0xff]  ;;  %v4145_v57 = vsel %vm1014_vm1, %v1065_v25, %v1066_v29  ;;  %v1691_v29 = vld [vmem:[%s5401_s3 + $0x7e8] sm:$0xff] }
  0xa8   : > { %1583 = vmatpush.msrb.mxu1 %v1511_v44  ;;  %v2796_v44 = vld [vmem:[%s3066_s16 + $0x30] sm:$0xff]  ;;  %v1523_v25 = vld [vmem:[%s5401_s3 + $0x720] sm:$0xff] }
  0xa9   : > { %1626 = vmatpush.msrb.mxu2 %v1525_v48 }
  0xaa   : > { %1584 = vmatpush.msrb.mxu1 %v1510_v58  ;;  %v1100_v58 = vrot.slane %v3647_v54, 2 }
  0xab   : > { %1627 = vmatpush.msrb.mxu2 %v1524_v53  ;;  %v1101_v53 = vrot.slane %v3650_v24, 2  ;;  %v1522_v24 = vld [vmem:[%s5401_s3 + $0x718] sm:$0xff] }
  0xac   : > { %1010 = vmatmul.f32.gmra.mxu1 %v3647_v54  ;;  %v4023_v4 = vpop.f32.mrf.mxu0 }
  0xad   : > { %1196 = vmatmul.f32.gmra.mxu2 %v4011_v3  ;;  %1225 = vmatmul.f32.gmra.mxu3 %v4014_v39  ;;  %v4034_v18 = vpop.f32.mrf.mxu1 }
  0xae   : > { %1266 = vmatmul.f32.gmra.mxu0 %v4017_v56  ;;  %1628 = vmatpush.msrb.mxu2 %v1523_v25 }
  0xb0   : > { %1629 = vmatpush.msrb.mxu2 %v1522_v24  ;;  %v1505_v24 = vld [vmem:[%s5401_s3 + $0x690] sm:$0xff] }
  0xb3   : > { %v4064_v15 = vpop.f32.mrf.mxu3 }
  0xb4   : > { %1354 = vmatmul.f32.vlgmr.msra.gmra.mxu1 %v3162_v17  ;;  %v4071_v16 = vpop.f32.mrf.mxu2  ;;  %v1709_v17 = vld [vmem:[%s5401_s3 + $0x878] sm:$0xff] }
  0xb5   : > { %1395 = vmatmul.f32.vlgmr.msra.gmra.mxu2 %v2794_v2  ;;  %1228 = vmatmul.f32.gmra.mxu3 %v4059_v5  ;;  %v4084_v47 = vpop.f32.mrf.mxu0  ;;  %v1693_v2 = vld [vmem:[%s5401_s3 + $0x7f8] sm:$0xff] }
  0xb6   : > { %1269 = vmatmul.f32.gmra.mxu0 %v4062_v62  ;;  %v4090_v49 = vpop.f32.mrf.mxu1  ;;  %1726 = vmatpush.msra.mxu3 %v1693_v2  ;;  %v1509_v2 = vld [vmem:[%s5401_s3 + $0x6b0] sm:$0xff] }
  0xb7   : > { %1767 = vmatpush.msra.mxu0 %v1709_v17  ;;  %v1097_v17 = vrot.slane %v3589_v33, 2  ;;  %1585 = vmatpush.msrb.mxu1 %v1509_v2  ;;  %v1690_v2 = vld [vmem:[%s5401_s3 + $0x7e0] sm:$0xff] }
  0xb8   : > { %1727 = vmatpush.msra.mxu3 %v1692_v52  ;;  %v1705_v52 = vld [vmem:[%s5401_s3 + $0x858] sm:$0xff] }
  0xb9   : > { %1768 = vmatpush.msra.mxu0 %v1708_v41  ;;  %v4148_v41 = vsel %vm1014_vm1, %v1097_v17, %v1098_v7  ;;  %v1068_v7 = vrot.slane %v3644_v31, 2 }
  0xba   : > { %5487 = vst [vmem:[#allocation31_spill] sm:$0xff] %v4148_v41  ;;  %1728 = vmatpush.msra.mxu3 %v1691_v29  ;;  %v4194_v29 = vsel %vm1014_vm1, %v1100_v58, %v1101_v53  ;;  %v1703_v58 = vld [vmem:[%s5401_s3 + $0x848] sm:$0xff] }
  0xbb   : > { %1769 = vmatpush.msra.mxu0 %v1707_v8  ;;  %v1069_v8 = vrot.slane %v3653_v19, 2  ;;  %v1508_v19 = vld [vmem:[%s5401_s3 + $0x6a8] sm:$0xff]  ;;  %5488 = vst [vmem:[#allocation32_spill] sm:$0xff] %v4194_v29 }
  0xbc   : > { %1357 = vmatmul.f32.gmra.mxu1 %v3253_v1  ;;  %v4109_v46 = vpop.f32.mrf.mxu3  ;;  %1729 = vmatpush.msra.mxu3 %v1690_v2 }
  0xbd   : > { %1398 = vmatmul.f32.gmra.mxu2 %v2795_v55  ;;  %1231 = vmatmul.f32.gmra.mxu3 %v4102_v63  ;;  %v4113_v21 = vpop.f32.mrf.mxu2  ;;  %v1706_v55 = vld [vmem:[%s5401_s3 + $0x860] sm:$0xff]  ;;  %v4191_v25 = vsel %vm1014_vm1, %v1068_v7, %v1069_v8  ;;  %v1521_v7 = vld [vmem:[%s5401_s3 + $0x710] sm:$0xff]  ;;  %v1689_v8 = vld [vmem:[%s5401_s3 + $0x7d8] sm:$0xff] }
  0xbe   : > { %1272 = vmatmul.f32.gmra.mxu0 %v4105_v38  ;;  %v4131_v35 = vpop.f32.mrf.mxu0  ;;  %1586 = vmatpush.msrb.mxu1 %v1508_v19 }
  0xbf   : > { %v4133_v9 = vpop.f32.mrf.mxu1  ;;  %1770 = vmatpush.msra.mxu0 %v1706_v55  ;;  %1630 = vmatpush.msrb.mxu2 %v1521_v7  ;;  %v1702_v7 = vld [vmem:[%s5401_s3 + $0x840] sm:$0xff] }
  0xc0   : > { %1730 = vmatpush.msra.mxu3 %v1689_v8 }
  0xc1   : > { %1771 = vmatpush.msra.mxu0 %v1705_v52  ;;  %v1704_v52 = vld [vmem:[%s5401_s3 + $0x850] sm:$0xff] }
  0xc3   : > { %1772 = vmatpush.msra.mxu0 %v1704_v52  ;;  %v1520_v52 = vld [vmem:[%s5401_s3 + $0x708] sm:$0xff] }
  0xc4   : > { %1360 = vmatmul.f32.gmra.mxu1 %v3349_v61  ;;  %1631 = vmatpush.msrb.mxu2 %v1520_v52  ;;  %v1687_v52 = vld [vmem:[%s5401_s3 + $0x7c8] sm:$0xff] }
  0xc5   : > { %1401 = vmatmul.f32.gmra.mxu2 %v2796_v44  ;;  %1234 = vmatmul.f32.gmra.mxu3 %v4145_v57  ;;  %v4157_v48 = vpop.f32.mrf.mxu3 }
  0xc6   : > { %1275 = vmatmul.f32.gmra.mxu0 %v4148_v41  ;;  %v4168_v17 = vpop.f32.mrf.mxu2  ;;  %v1507_v41 = vld [vmem:[%s5401_s3 + $0x6a0] sm:$0xff] }
  0xc7   : > { %v4177_v55 = vpop.f32.mrf.mxu0  ;;  %1587 = vmatpush.msrb.mxu1 %v1507_v41  ;;  %1773 = vmatpush.msra.mxu0 %v1703_v58  ;;  %v1688_v41 = vld [vmem:[%s5401_s3 + $0x7d0] sm:$0xff]  ;;  %v1504_v58 = vld [vmem:[%s5401_s3 + $0x688] sm:$0xff] }
  0xc8   : > { %v4179_v44 = vpop.f32.mrf.mxu1  ;;  %1731 = vmatpush.msra.mxu3 %v1688_v41  ;;  %v1701_v41 = vld [vmem:[%s5401_s3 + $0x838] sm:$0xff] }
  0xc9   : > { %1774 = vmatpush.msra.mxu0 %v1702_v7 }
  0xca   : > { %1732 = vmatpush.msra.mxu3 %v1687_v52 }
  0xcb   : > { %1775 = vmatpush.msra.mxu0 %v1701_v41 }
  0xcc   : > { %1363 = vmatmul.f32.gmra.mxu1 %v3078_v43 }
  0xcd   : > { %1404 = vmatmul.f32.gmra.mxu2 %v3444_v10  ;;  %1237 = vmatmul.f32.gmra.mxu3 %v4191_v25  ;;  %v1506_v10 = vld [vmem:[%s5401_s3 + $0x698] sm:$0xff] }
  0xce   : > { %1278 = vmatmul.f32.gmra.mxu0 %v4194_v29  ;;  %v4215_v53 = vpop.f32.mrf.mxu3  ;;  %1588 = vmatpush.msrb.mxu1 %v1506_v10  ;;  %v1519_v10 = vld [vmem:[%s5401_s3 + $0x700] sm:$0xff]  ;;  %v827_v29 = vadd.f32 %v4034_v18, %v4023_v4 }
  0xcf   : > { %v4220_v19 = vpop.f32.mrf.mxu2  ;;  %1632 = vmatpush.msrb.mxu2 %v1519_v10  ;;  %v5489_v10 = vld [vmem:[#allocation8_spill] sm:$0xff] }
  0xd0   : > { %v838_v2 = vpop.f32.mrf.mxu1  ;;  %1589 = vmatpush.msrb.mxu1 %v1505_v24  ;;  %v1503_v24 = vld [vmem:[%s5401_s3 + $0x680] sm:$0xff] }
  0xd2   : > { %v949_v8 = vpop.f32.mrf.mxu0  ;;  %1590 = vmatpush.msrb.mxu1 %v1504_v58  ;;  %v830_v58 = vadd.f32 %v4090_v49, %v4084_v47 }
  0xd4   : > { %1366 = vmatmul.f32.gmra.mxu1 %v3169_v20  ;;  %v1686_v20 = vld [vmem:[%s5401_s3 + $0x7c0] sm:$0xff]  ;;  %v871_v47 = vadd.f32 %v4113_v21, %v830_v58  ;;  %v5490_v58 = vld [vmem:[#allocation12_spill] sm:$0xff] }
  0xd5   : > { %1407 = vmatmul.f32.gmra.mxu2 %v3514_v40  ;;  %1436 = vmatmul.f32.vlgmr.msrb.gmra.mxu3 %v3187_v26  ;;  %v839_v40 = vadd.f32 %v838_v2, %v4064_v15  ;;  %v868_v26 = vadd.f32 %v4071_v16, %v827_v29  ;;  %v1700_v15 = vld [vmem:[%s5401_s3 + $0x830] sm:$0xff]  ;;  %v1872_v16 = vld [vmem:[%s5401_s3 + $0x978] sm:$0xff] }
  0xd6   : > { %1551 = vmatmul.f32.vlgmr.msrb.gmra.mxu0 %v3242_v59  ;;  %1591 = vmatpush.msrb.mxu1 %v1503_v24  ;;  %v1685_v24 = vld [vmem:[%s5401_s3 + $0x7b8] sm:$0xff] }
  0xd7   : > { %v879_v4 = vpop.f32.mrf.mxu2  ;;  %v908_v18 = vpop.f32.mrf.mxu3  ;;  %1733 = vmatpush.msra.mxu3 %v1686_v20  ;;  %1776 = vmatpush.msra.mxu0 %v1700_v15  ;;  %v1699_v20 = vld [vmem:[%s5401_s3 + $0x828] sm:$0xff]  ;;  %v441_v15 = vld [vmem:[%s3018_s11 + $0x80] sm:$0xff] }
  0xd8   : > { %v4257_v59 = vadd.f32 %v879_v4, %v839_v40  ;;  %v909_v7 = vadd.f32 %v908_v18, %v868_v26  ;;  %1905 = vmatpush.msra.mxu2 %v1872_v16  ;;  %v1684_v4 = vld [vmem:[%s5401_s3 + $0x7b0] sm:$0xff]  ;;  %v1870_v18 = vld [vmem:[%s5401_s3 + $0x968] sm:$0xff]  ;;  %v833_v16 = vadd.f32 %v4133_v9, %v4131_v35  ;;  %v1869_v35 = vld [vmem:[%s5401_s3 + $0x960] sm:$0xff] }
  0xd9   : > { %v841_v38 = vpop.f32.mrf.mxu1  ;;  %1734 = vmatpush.msra.mxu3 %v1685_v24  ;;  %1777 = vmatpush.msra.mxu0 %v1699_v20  ;;  %v1697_v24 = vld [vmem:[%s5401_s3 + $0x818] sm:$0xff] }
  0xda   : > { %v952_v29 = vpop.f32.mrf.mxu0  ;;  %v4268_v2 = vadd.f32 %v949_v8, %v909_v7  ;;  %v1871_v8 = vld [vmem:[%s5401_s3 + $0x970] sm:$0xff]  ;;  %v874_v9 = vadd.f32 %v4168_v17, %v833_v16  ;;  %v836_v16 = vadd.f32 %v4179_v44, %v4177_v55 }
  0xdb   : > { %1906 = vmatpush.msra.mxu2 %v1871_v8  ;;  %1735 = vmatpush.msra.mxu3 %v1684_v4  ;;  %v1682_v4 = vld [vmem:[%s5401_s3 + $0x7a0] sm:$0xff]  ;;  %v1696_v17 = vld [vmem:[%s5401_s3 + $0x810] sm:$0xff] }
  0xdc   : > { %1369 = vmatmul.f32.gmra.mxu1 %v3262_v6  ;;  %v1867_v55 = vld [vmem:[%s5401_s3 + $0x950] sm:$0xff]  ;;  %v877_v44 = vadd.f32 %v4220_v19, %v836_v16  ;;  %v1721_v19 = vld [vmem:[%s5401_s3 + $0x8d8] sm:$0xff]  ;;  %v1678_v16 = vld [vmem:[%s5401_s3 + $0x780] sm:$0xff] }
  0xdd   : > { %1410 = vmatmul.f32.gmra.mxu2 %v3583_v60  ;;  %1439 = vmatmul.f32.gmra.mxu3 %v3280_v13  ;;  %v842_v60 = vadd.f32 %v841_v38, %v4109_v46  ;;  %v1698_v38 = vld [vmem:[%s5401_s3 + $0x820] sm:$0xff]  ;;  %v1725_v46 = vld [vmem:[%s5401_s3 + $0x8f8] sm:$0xff] }
  0xde   : > { %1554 = vmatmul.f32.gmra.mxu0 %v5489_v10  ;;  %1808 = vmatpush.msra.mxu1 %v1725_v46 }
  0xdf   : > { %v882_v49 = vpop.f32.mrf.mxu2  ;;  %1778 = vmatpush.msra.mxu0 %v1698_v38  ;;  %1907 = vmatpush.msra.mxu2 %v1870_v18  ;;  %v1723_v38 = vld [vmem:[%s5401_s3 + $0x8e8] sm:$0xff]  ;;  %v1868_v18 = vld [vmem:[%s5401_s3 + $0x958] sm:$0xff] }
  0xe0   : > { %v4287_v52 = vadd.f32 %v882_v49, %v842_v60  ;;  %v911_v41 = vpop.f32.mrf.mxu3  ;;  %v5491_v49 = vld [vmem:[#allocation2_spill] sm:$0xff] }
  0xe1   : > { %v912_v40 = vadd.f32 %v911_v41, %v871_v47  ;;  %v844_v26 = vpop.f32.mrf.mxu1  ;;  %1779 = vmatpush.msra.mxu0 %v1697_v24  ;;  %1908 = vmatpush.msra.mxu2 %v1869_v35  ;;  %v4327_v41 = vmul.f32 %v5491_v49, %v441_v15  ;;  %v1681_v24 = vld [vmem:[%s5401_s3 + $0x798] sm:$0xff] }
  0xe2   : > { %v955_v21 = vpop.f32.mrf.mxu0  ;;  %v845_v20 = vadd.f32 %v844_v26, %v4157_v48 }
  0xe3   : > { %v4301_v7 = vadd.f32 %v952_v29, %v912_v40  ;;  %v1683_v29 = vld [vmem:[%s5401_s3 + $0x7a8] sm:$0xff]  ;;  %v4330_v40 = vld [vmem:[%s3066_s16 + $0x80] sm:$0xff]  ;;  %1780 = vmatpush.msra.mxu0 %v1696_v17  ;;  %1909 = vmatpush.msra.mxu2 %v1868_v18 }
  0xe4   : > { %1372 = vmatmul.f32.gmra.mxu1 %v3358_v12  ;;  %1736 = vmatpush.msra.mxu3 %v1683_v29  ;;  %v5492_v29 = vld [vmem:[#allocation3_spill] sm:$0xff] }
  0xe5   : > { %1413 = vmatmul.f32.gmra.mxu2 %v3644_v31  ;;  %1442 = vmatmul.f32.gmra.mxu3 %v3376_v28  ;;  %v1724_v31 = vld [vmem:[%s5401_s3 + $0x8f0] sm:$0xff] }
  0xe6   : > { %1557 = vmatmul.f32.gmra.mxu0 %v5490_v58  ;;  %1809 = vmatpush.msra.mxu1 %v1724_v31  ;;  %v1722_v31 = vld [vmem:[%s5401_s3 + $0x8e0] sm:$0xff] }
  0xe7   : > { %v885_v8 = vpop.f32.mrf.mxu2  ;;  %1737 = vmatpush.msra.mxu3 %v1682_v4  ;;  %1910 = vmatpush.msra.mxu2 %v1867_v55  ;;  %v1866_v4 = vld [vmem:[%s5401_s3 + $0x948] sm:$0xff]  ;;  %v1904_v55 = vld [vmem:[%s5401_s3 + $0xa78] sm:$0xff] }
  0xe8   : > { %v4324_v60 = vadd.f32 %v885_v8, %v845_v20  ;;  %v914_v47 = vpop.f32.mrf.mxu3  ;;  %1810 = vmatpush.msra.mxu1 %v1723_v38  ;;  %v1679_v38 = vld [vmem:[%s5401_s3 + $0x788] sm:$0xff] }
  0xe9   : > { %v915_v48 = vadd.f32 %v914_v47, %v874_v9  ;;  %v847_v26 = vpop.f32.mrf.mxu1  ;;  %1738 = vmatpush.msra.mxu3 %v1681_v24  ;;  %v1680_v9 = vld [vmem:[%s5401_s3 + $0x790] sm:$0xff]  ;;  %1911 = vmatpush.msra.mxu2 %v1866_v4  ;;  %v5493_v24 = vld [vmem:[#allocation5_spill] sm:$0xff] }
  0xea   : > { %v958_v46 = vpop.f32.mrf.mxu0  ;;  %v848_v20 = vadd.f32 %v847_v26, %v4215_v53  ;;  %1811 = vmatpush.msra.mxu1 %v1722_v31  ;;  %v1694_v26 = vld [vmem:[%s5401_s3 + $0x800] sm:$0xff]  ;;  %v1864_v4 = vld [vmem:[%s5401_s3 + $0x938] sm:$0xff] }
  0xeb   : > { %v4344_v15 = vadd.f32 %v955_v21, %v915_v48  ;;  %v1695_v21 = vld [vmem:[%s5401_s3 + $0x808] sm:$0xff]  ;;  %1739 = vmatpush.msra.mxu3 %v1680_v9  ;;  %v5495_v31 = vld [vmem:[#allocation6_spill] sm:$0xff] }
  0xec   : > { %1375 = vmatmul.f32.gmra.mxu1 %v4327_v41  ;;  %1781 = vmatpush.msra.mxu0 %v1695_v21  ;;  %v5494_v21 = vld [vmem:[#allocation7_spill] sm:$0xff] }
  0xed   : > { %1416 = vmatmul.f32.gmra.mxu2 %v4330_v40  ;;  %1445 = vmatmul.f32.gmra.mxu3 %v3450_v45 }
  0xee   : > { %1560 = vmatmul.f32.gmra.mxu0 %v5492_v29  ;;  %1812 = vmatpush.msra.mxu1 %v1721_v19  ;;  %v1719_v19 = vld [vmem:[%s5401_s3 + $0x8c8] sm:$0xff] }
  0xef   : > { %v888_v35 = vpop.f32.mrf.mxu2  ;;  %1782 = vmatpush.msra.mxu0 %v1694_v26  ;;  %1740 = vmatpush.msra.mxu3 %v1679_v38  ;;  %v5496_v38 = vld [vmem:[#allocation9_spill] sm:$0xff] }
  0xf0   : > { %v4369_v8 = vadd.f32 %v888_v35, %v848_v20  ;;  %v917_v47 = vpop.f32.mrf.mxu3  ;;  %v1720_v20 = vld [vmem:[%s5401_s3 + $0x8d0] sm:$0xff] }
  0xf1   : > { %v918_v53 = vadd.f32 %v917_v47, %v877_v44  ;;  %v4371_v48 = vpop.f32.mrf.mxu1  ;;  %1741 = vmatpush.msra.mxu3 %v1678_v16  ;;  %1813 = vmatpush.msra.mxu1 %v1720_v20  ;;  %v5497_v16 = vld [vmem:[#allocation11_spill] sm:$0xff]  ;;  %v1888_v20 = vld [vmem:[%s5401_s3 + $0x9f8] sm:$0xff] }
  0xf2   : > { %v961_v17 = vpop.f32.mrf.mxu0  ;;  %1987 = vmatpush.msrb.mxu0 %v1904_v55 }
  0xf3   : > { %v4385_v18 = vadd.f32 %v958_v46, %v918_v53  ;;  %v1865_v46 = vld [vmem:[%s5401_s3 + $0x940] sm:$0xff]  ;;  %1814 = vmatpush.msra.mxu1 %v1719_v19  ;;  %1946 = vmatpush.msrb.mxu3 %v1888_v20  ;;  %v1887_v20 = vld [vmem:[%s5401_s3 + $0x9f0] sm:$0xff] }
  0xf4   : > { %1592 = vmatmul.f32.vlgmr.msrb.gmra.mxu1 %v5493_v24  ;;  %1912 = vmatpush.msra.mxu2 %v1865_v46  ;;  %v1718_v24 = vld [vmem:[%s5401_s3 + $0x8c0] sm:$0xff]  ;;  %v1902_v46 = vld [vmem:[%s5401_s3 + $0xa68] sm:$0xff] }
  0xf5   : > { %1633 = vmatmul.f32.vlgmr.msrb.gmra.mxu2 %v5494_v21  ;;  %1448 = vmatmul.f32.gmra.mxu3 %v3520_v34  ;;  %v1863_v21 = vld [vmem:[%s5401_s3 + $0x930] sm:$0xff] }
  0xf6   : > { %1563 = vmatmul.f32.gmra.mxu0 %v5495_v31  ;;  %1913 = vmatpush.msra.mxu2 %v1864_v4 }
  0xf7   : > { %v4403_v44 = vpop.f32.mrf.mxu2  ;;  %1815 = vmatpush.msra.mxu1 %v1718_v24  ;;  %v1862_v24 = vld [vmem:[%s5401_s3 + $0x928] sm:$0xff]  ;;  %1947 = vmatpush.msrb.mxu3 %v1887_v20 }
  0xf8   : > { %v920_v35 = vpop.f32.mrf.mxu3  ;;  %1914 = vmatpush.msra.mxu2 %v1863_v21  ;;  %v5499_v21 = vld [vmem:[#allocation14_spill] sm:$0xff] }
  0xf9   : > { %v921_v9 = vadd.f32 %v920_v35, %v4257_v59  ;;  %v4406_v47 = vpop.f32.mrf.mxu1  ;;  %v1903_v59 = vld [vmem:[%s5401_s3 + $0xa70] sm:$0xff]  ;;  %v442_v35 = vld [vmem:[%s3018_s11 + $0x88] sm:$0x3] }
  0xfa   : > { %v964_v53 = vpop.f32.mrf.mxu0  ;;  %1988 = vmatpush.msrb.mxu0 %v1903_v59  ;;  %v4442_v4 = vmul.f32 %v5491_v49, %v442_v35  ;;  %v1717_v59 = vld [vmem:[%s5401_s3 + $0x8b8] sm:$0xff]  ;;  %v1861_v35 = vld [vmem:[%s5401_s3 + $0x920] sm:$0xff]  ;;  %1915 = vmatpush.msra.mxu2 %v1862_v24  ;;  %v1715_v24 = vld [vmem:[%s5401_s3 + $0x8a8] sm:$0xff] }
  0xfb   : > { %v4408_v26 = vadd.f32 %v961_v17, %v921_v9  ;;  %v5498_v17 = vld [vmem:[#allocation10_spill] sm:$0xff]  ;;  %1816 = vmatpush.msra.mxu1 %v1717_v59 }
  0xfc   : > { %1595 = vmatmul.f32.gmra.mxu1 %v5496_v38  ;;  %1989 = vmatpush.msrb.mxu0 %v1902_v46  ;;  %v1716_v46 = vld [vmem:[%s5401_s3 + $0x8b0] sm:$0xff]  ;;  %v1472_v29 = vrot.slane %v4442_v4, 1 }
  0xfd   : > { %1636 = vmatmul.f32.gmra.mxu2 %v5497_v16  ;;  %1451 = vmatmul.f32.gmra.mxu3 %v3589_v33 }
  0xfe   : > { %1566 = vmatmul.f32.gmra.mxu0 %v5498_v17  ;;  %1817 = vmatpush.msra.mxu1 %v1716_v46  ;;  %v1898_v46 = vld [vmem:[%s5401_s3 + $0xa48] sm:$0xff] }
  0xff   : > { %v4435_v55 = vpop.f32.mrf.mxu2  ;;  %1916 = vmatpush.msra.mxu2 %v1861_v35  ;;  %v1713_v35 = vld [vmem:[%s5401_s3 + $0x898] sm:$0xff] }
 0x100   : > { %v923_v9 = vpop.f32.mrf.mxu3  ;;  %1818 = vmatpush.msra.mxu1 %v1715_v24 }
 0x101   : > { %v924_v16 = vadd.f32 %v923_v9, %v4287_v52  ;;  %v4439_v17 = vpop.f32.mrf.mxu1  ;;  %v5500_v52 = vld [vmem:[#allocation15_spill] sm:$0xff]  ;;  %v502_v9 = vld [vmem:[%s3086_s20 + $0x80] sm:$0xff] }
 0x102   : > { %v4483_v59 = vmul.f32 %v3131_v0, %v502_v9 }
 0x103   : > { %v967_v19 = vpop.f32.mrf.mxu0  ;;  %v4444_v31 = vadd.f32 %v964_v53, %v924_v16  ;;  %v1901_v53 = vld [vmem:[%s5401_s3 + $0xa60] sm:$0xff]  ;;  %v5501_v16 = vld [vmem:[#allocation13_spill] sm:$0xff] }
 0x104   : > { %1598 = vmatmul.f32.gmra.mxu1 %v5499_v21  ;;  %1990 = vmatpush.msrb.mxu0 %v1901_v53 }
 0x105   : > { %1639 = vmatmul.f32.gmra.mxu2 %v5500_v52  ;;  %1454 = vmatmul.f32.gmra.mxu3 %v3647_v54  ;;  %v1471_v52 = vrot.slane %v4327_v41, 1  ;;  %v1886_v54 = vld [vmem:[%s5401_s3 + $0x9e8] sm:$0xff] }
 0x106   : > { %1569 = vmatmul.f32.gmra.mxu0 %v5501_v16  ;;  %v1900_v16 = vld [vmem:[%s5401_s3 + $0xa58] sm:$0xff]  ;;  %1948 = vmatpush.msrb.mxu3 %v1886_v54  ;;  %v1885_v54 = vld [vmem:[%s5401_s3 + $0x9e0] sm:$0xff] }
 0x107   : > { %1991 = vmatpush.msrb.mxu0 %v1900_v16  ;;  %v4489_v20 = vsel %vm591_vm0, %v1471_v52, %v1472_v29  ;;  %v5504_v16 = vld [vmem:[#allocation17_spill] sm:$0xff]  ;;  %v1899_v29 = vld [vmem:[%s5401_s3 + $0xa50] sm:$0xff] }
 0x108   : > { %v4477_v21 = vpop.f32.mrf.mxu2  ;;  %v926_v58 = vpop.f32.mrf.mxu3  ;;  %5502 = vst [vmem:[#allocation2_spill] sm:$0xff] %v4489_v20  ;;  %v1884_v52 = vld [vmem:[%s5401_s3 + $0x9d8] sm:$0xff]  ;;  %1949 = vmatpush.msrb.mxu3 %v1885_v54 }
 0x109   : > { %v927_v33 = vadd.f32 %v926_v58, %v4324_v60  ;;  %v4480_v38 = vpop.f32.mrf.mxu1  ;;  %v1860_v58 = vld [vmem:[%s5401_s3 + $0x918] sm:$0xff]  ;;  %v5503_v60 = vld [vmem:[#allocation16_spill] sm:$0xff]  ;;  %1992 = vmatpush.msrb.mxu0 %v1899_v29 }
 0x10a   : > { %1917 = vmatpush.msra.mxu2 %v1860_v58  ;;  %1950 = vmatpush.msrb.mxu3 %v1884_v52  ;;  %v1712_v58 = vld [vmem:[%s5401_s3 + $0x890] sm:$0xff]  ;;  %v5506_v52 = vld [vmem:[#allocation19_spill] sm:$0xff] }
 0x10b   : > { %v970_v10 = vpop.f32.mrf.mxu0  ;;  %v4491_v53 = vadd.f32 %v967_v19, %v927_v33  ;;  %v1714_v33 = vld [vmem:[%s5401_s3 + $0x8a0] sm:$0xff]  ;;  %v1859_v19 = vld [vmem:[%s5401_s3 + $0x910] sm:$0xff]  ;;  %1993 = vmatpush.msrb.mxu0 %v1898_v46  ;;  %v1711_v46 = vld [vmem:[%s5401_s3 + $0x888] sm:$0xff] }
 0x10c   : > { %1601 = vmatmul.f32.gmra.mxu1 %v5503_v60  ;;  %1918 = vmatpush.msra.mxu2 %v1859_v19  ;;  %v5505_v19 = vld [vmem:[#allocation18_spill] sm:$0xff] }
 0x10d   : > { %1642 = vmatmul.f32.gmra.mxu2 %v5504_v16  ;;  %1457 = vmatmul.f32.gmra.mxu3 %v4483_v59 }
 0x10e   : > { %1572 = vmatmul.f32.gmra.mxu0 %v4489_v20  ;;  %1819 = vmatpush.msra.mxu1 %v1714_v33  ;;  %v1858_v20 = vld [vmem:[%s5401_s3 + $0x908] sm:$0xff]  ;;  %v1883_v33 = vld [vmem:[%s5401_s3 + $0x9d0] sm:$0xff] }
 0x10f   : > { %1919 = vmatpush.msra.mxu2 %v1858_v20  ;;  %v1882_v20 = vld [vmem:[%s5401_s3 + $0x9c8] sm:$0xff]  ;;  %1951 = vmatpush.msrb.mxu3 %v1883_v33  ;;  %v991_v33 = vadd.f32 %v4371_v48, %v4268_v2  ;;  %v1880_v2 = vld [vmem:[%s5401_s3 + $0x9b8] sm:$0xff] }
 0x110   : > { %v4521_v9 = vpop.f32.mrf.mxu2  ;;  %v929_v24 = vpop.f32.mrf.mxu3  ;;  %1820 = vmatpush.msra.mxu1 %v1713_v35  ;;  %v1896_v35 = vld [vmem:[%s5401_s3 + $0xa38] sm:$0xff]  ;;  %v1894_v48 = vld [vmem:[%s5401_s3 + $0xa28] sm:$0xff] }
 0x111   : > { %v930_v54 = vadd.f32 %v929_v24, %v4369_v8  ;;  %v4527_v16 = vpop.f32.mrf.mxu1  ;;  %v1897_v8 = vld [vmem:[%s5401_s3 + $0xa40] sm:$0xff]  ;;  %1952 = vmatpush.msrb.mxu3 %v1882_v20  ;;  %v2085_v20 = vld [vmem:[%s5401_s3 + $0xb78] sm:$0xff] }
 0x112   : > { %1821 = vmatpush.msra.mxu1 %v1712_v58  ;;  %1994 = vmatpush.msrb.mxu0 %v1897_v8  ;;  %v1710_v24 = vld [vmem:[%s5401_s3 + $0x880] sm:$0xff] }
 0x113   : > { %v1258_v60 = vpop.f32.mrf.mxu0  ;;  %v4532_v29 = vadd.f32 %v970_v10, %v930_v54  ;;  %v1857_v10 = vld [vmem:[%s5401_s3 + $0x900] sm:$0xff] }
 0x114   : > { %1604 = vmatmul.f32.gmra.mxu1 %v5505_v19  ;;  %1920 = vmatpush.msra.mxu2 %v1857_v10  ;;  %v1881_v19 = vld [vmem:[%s5401_s3 + $0x9c0] sm:$0xff]  ;;  %v5507_v10 = vld [vmem:[#allocation21_spill] sm:$0xff] }
 0x115   : > { %1645 = vmatmul.f32.gmra.mxu2 %v5506_v52  ;;  %1742 = vmatmul.f32.vlgmr.msra.gmra.mxu3 %v3773_v36 }
 0x116   : > { %1783 = vmatmul.f32.vlgmr.msra.gmra.mxu0 %v3931_v23  ;;  %1822 = vmatpush.msra.mxu1 %v1711_v46  ;;  %v1895_v46 = vld [vmem:[%s5401_s3 + $0xa30] sm:$0xff] }
 0x117   : > { %1995 = vmatpush.msrb.mxu0 %v1896_v35  ;;  %v503_v35 = vld [vmem:[%s3086_s20 + $0x88] sm:$0x3]  ;;  %1953 = vmatpush.msrb.mxu3 %v1881_v19 }
 0x118   : > { %v4559_v58 = vpop.f32.mrf.mxu2  ;;  %v1217_v36 = vpop.f32.mrf.mxu3  ;;  %1823 = vmatpush.msra.mxu1 %v1710_v24  ;;  %v2084_v24 = vld [vmem:[%s5401_s3 + $0xb70] sm:$0xff]  ;;  %2143 = vmatpush.msrb.mxu2 %v2085_v20 }
 0x119   : > { %v1218_v23 = vadd.f32 %v1217_v36, %v4403_v44  ;;  %v4562_v54 = vpop.f32.mrf.mxu1  ;;  %v5508_v44 = vld [vmem:[#allocation22_spill] sm:$0xff]  ;;  %1996 = vmatpush.msrb.mxu0 %v1895_v46  ;;  %1954 = vmatpush.msrb.mxu3 %v1880_v2  ;;  %v994_v46 = vadd.f32 %v4406_v47, %v4301_v7  ;;  %v1879_v20 = vld [vmem:[%s5401_s3 + $0x9b0] sm:$0xff]  ;;  %v1477_v2 = vrot.slane %v4330_v40, 1  ;;  %v1483_v47 = vrot.slane %v4483_v59, 1 }
 0x11a   : > { %2144 = vmatpush.msrb.mxu2 %v2084_v24  ;;  %v1892_v24 = vld [vmem:[%s5401_s3 + $0xa18] sm:$0xff] }
 0x11b   : > { %v1261_v52 = vpop.f32.mrf.mxu0  ;;  %v1259_v8 = vadd.f32 %v1258_v60, %v1218_v23  ;;  %1997 = vmatpush.msrb.mxu0 %v1894_v48  ;;  %v2069_v48 = vld [vmem:[%s5401_s3 + $0xaf8] sm:$0xff]  ;;  %1955 = vmatpush.msrb.mxu3 %v1879_v20 }
 0x11c   : > { %1607 = vmatmul.f32.gmra.mxu1 %v5507_v10 }
 0x11d   : > { %1648 = vmatmul.f32.gmra.mxu2 %v5508_v44  ;;  %1745 = vmatmul.f32.gmra.mxu3 %v3815_v51  ;;  %v4585_v60 = vadd.f32 %v1259_v8, %v991_v33  ;;  %v4597_v33 = vmul.f32 %v3131_v0, %v503_v35  ;;  %v4600_v8 = vld [vmem:[%s3066_s16 + $0x88] sm:$0x3] }
 0x11e   : > { %1786 = vmatmul.f32.gmra.mxu0 %v3971_v11  ;;  %v1478_v7 = vrot.slane %v4600_v8, 1  ;;  %v1878_v35 = vld [vmem:[%s5401_s3 + $0x9a8] sm:$0xff]  ;;  %2102 = vmatpush.msrb.mxu1 %v2069_v48  ;;  %v997_v48 = vadd.f32 %v4439_v17, %v4344_v15  ;;  %v1876_v15 = vld [vmem:[%s5401_s3 + $0x998] sm:$0xff] }
 0x11f   : > { %1956 = vmatpush.msrb.mxu3 %v1878_v35  ;;  %v1877_v35 = vld [vmem:[%s5401_s3 + $0x9a0] sm:$0xff]  ;;  %v1890_v17 = vld [vmem:[%s5401_s3 + $0xa08] sm:$0xff] }
 0x120   : > { %v4591_v36 = vpop.f32.mrf.mxu2  ;;  %v1220_v23 = vpop.f32.mrf.mxu3  ;;  %v4644_v20 = vsel %vm591_vm0, %v1477_v2, %v1478_v7  ;;  %v2080_v2 = vld [vmem:[%s5401_s3 + $0xb50] sm:$0xff] }
 0x121   : > { %v1221_v11 = vadd.f32 %v1220_v23, %v4435_v55  ;;  %v4594_v44 = vpop.f32.mrf.mxu1  ;;  %v1893_v55 = vld [vmem:[%s5401_s3 + $0xa20] sm:$0xff]  ;;  %1957 = vmatpush.msrb.mxu3 %v1877_v35 }
 0x122   : > { %1998 = vmatpush.msrb.mxu0 %v1893_v55 }
 0x123   : > { %v1264_v19 = vpop.f32.mrf.mxu0  ;;  %v1262_v51 = vadd.f32 %v1261_v52, %v1221_v11  ;;  %v2083_v11 = vld [vmem:[%s5401_s3 + $0xb68] sm:$0xff]  ;;  %v1484_v52 = vrot.slane %v4597_v33, 1  ;;  %1958 = vmatpush.msrb.mxu3 %v1876_v15 }
 0x124   : > { %1610 = vmatmul.f32.gmra.mxu1 %v3697_v30  ;;  %2145 = vmatpush.msrb.mxu2 %v2083_v11 }
 0x125   : > { %1651 = vmatmul.f32.gmra.mxu2 %v3700_v42  ;;  %1748 = vmatmul.f32.gmra.mxu3 %v3854_v37  ;;  %v4630_v23 = vadd.f32 %v1262_v51, %v994_v46  ;;  %v2082_v42 = vld [vmem:[%s5401_s3 + $0xb60] sm:$0xff]  ;;  %v4647_v55 = vsel %vm591_vm0, %v1483_v47, %v1484_v52  ;;  %v1875_v47 = vld [vmem:[%s5401_s3 + $0x990] sm:$0xff] }
 0x126   : > { %1789 = vmatmul.f32.gmra.mxu0 %v4014_v39  ;;  %v2068_v39 = vld [vmem:[%s5401_s3 + $0xaf0] sm:$0xff]  ;;  %2146 = vmatpush.msrb.mxu2 %v2082_v42  ;;  %v2067_v42 = vld [vmem:[%s5401_s3 + $0xae8] sm:$0xff] }
 0x127   : > { %1999 = vmatpush.msrb.mxu0 %v1892_v24  ;;  %2103 = vmatpush.msrb.mxu1 %v2068_v39  ;;  %v2081_v39 = vld [vmem:[%s5401_s3 + $0xb58] sm:$0xff] }
 0x128   : > { %v4638_v37 = vpop.f32.mrf.mxu2  ;;  %v1223_v30 = vpop.f32.mrf.mxu3  ;;  %2147 = vmatpush.msrb.mxu2 %v2081_v39  ;;  %1959 = vmatpush.msrb.mxu3 %v1875_v47  ;;  %v2078_v39 = vld [vmem:[%s5401_s3 + $0xb40] sm:$0xff] }
 0x129   : > { %v1224_v51 = vadd.f32 %v1223_v30, %v4477_v21  ;;  %v4641_v46 = vpop.f32.mrf.mxu1  ;;  %v1891_v30 = vld [vmem:[%s5401_s3 + $0xa10] sm:$0xff]  ;;  %2104 = vmatpush.msrb.mxu1 %v2067_v42  ;;  %v2065_v42 = vld [vmem:[%s5401_s3 + $0xad8] sm:$0xff] }
 0x12a   : > { %2000 = vmatpush.msrb.mxu0 %v1891_v30  ;;  %2148 = vmatpush.msrb.mxu2 %v2080_v2  ;;  %v1889_v30 = vld [vmem:[%s5401_s3 + $0xa00] sm:$0xff] }
 0x12b   : > { %v1267_v10 = vpop.f32.mrf.mxu0  ;;  %v1265_v11 = vadd.f32 %v1264_v19, %v1224_v51  ;;  %v2066_v19 = vld [vmem:[%s5401_s3 + $0xae0] sm:$0xff] }
 0x12c   : > { %1613 = vmatmul.f32.gmra.mxu1 %v4644_v20  ;;  %2001 = vmatpush.msrb.mxu0 %v1890_v17 }
 0x12d   : > { %1654 = vmatmul.f32.gmra.mxu2 %v4647_v55  ;;  %1751 = vmatmul.f32.gmra.mxu3 %v3897_v32  ;;  %v4673_v21 = vadd.f32 %v1265_v11, %v997_v48  ;;  %v1000_v11 = vadd.f32 %v4480_v38, %v4385_v18  ;;  %v1874_v18 = vld [vmem:[%s5401_s3 + $0x988] sm:$0xff]  ;;  %v2064_v38 = vld [vmem:[%s5401_s3 + $0xad0] sm:$0xff] }
 0x12e   : > { %1792 = vmatmul.f32.gmra.mxu0 %v4059_v5  ;;  %2105 = vmatpush.msrb.mxu1 %v2066_v19 }
 0x12f   : > { %2002 = vmatpush.msrb.mxu0 %v1889_v30  ;;  %1960 = vmatpush.msrb.mxu3 %v1874_v18  ;;  %v2258_v30 = vld [vmem:[%s5401_s3 + $0xc68] sm:$0xff] }
 0x130   : > { %v4681_v7 = vpop.f32.mrf.mxu2  ;;  %v1226_v52 = vpop.f32.mrf.mxu3  ;;  %2106 = vmatpush.msrb.mxu1 %v2065_v42 }
 0x131   : > { %v1227_v24 = vadd.f32 %v1226_v52, %v4521_v9  ;;  %v1355_v51 = vpop.f32.mrf.mxu1  ;;  %v2079_v9 = vld [vmem:[%s5401_s3 + $0xb48] sm:$0xff] }
 0x132   : > { %2149 = vmatpush.msrb.mxu2 %v2079_v9  ;;  %2107 = vmatpush.msrb.mxu1 %v2064_v38 }
 0x133   : > { %v1270_v48 = vpop.f32.mrf.mxu0  ;;  %v1268_v35 = vadd.f32 %v1267_v10, %v1227_v24  ;;  %v1873_v10 = vld [vmem:[%s5401_s3 + $0x980] sm:$0xff]  ;;  %v1003_v24 = vadd.f32 %v4527_v16, %v4408_v26  ;;  %v2076_v16 = vld [vmem:[%s5401_s3 + $0xb30] sm:$0xff] }
 0x134   : > { %1824 = vmatmul.f32.vlgmr.msra.gmra.mxu1 %v3934_v27  ;;  %1961 = vmatpush.msrb.mxu3 %v1873_v10  ;;  %v2062_v26 = vld [vmem:[%s5401_s3 + $0xac0] sm:$0xff] }
 0x135   : > { %1921 = vmatmul.f32.vlgmr.msra.gmra.mxu2 %v3253_v1  ;;  %1754 = vmatmul.f32.gmra.mxu3 %v3928_v22  ;;  %v2260_v1 = vld [vmem:[%s5401_s3 + $0xc78] sm:$0xff]  ;;  %v4711_v27 = vadd.f32 %v1268_v35, %v1000_v11  ;;  %v2063_v35 = vld [vmem:[%s5401_s3 + $0xac8] sm:$0xff] }
 0x136   : > { %1795 = vmatmul.f32.gmra.mxu0 %v4102_v63  ;;  %2150 = vmatpush.msrb.mxu2 %v2078_v39  ;;  %v1006_v39 = vadd.f32 %v4562_v54, %v4444_v31  ;;  %v2257_v31 = vld [vmem:[%s5401_s3 + $0xc60] sm:$0xff]  ;;  %v2060_v54 = vld [vmem:[%s5401_s3 + $0xab0] sm:$0xff] }
 0x137   : > { %2293 = vmatpush.msra.mxu0 %v2260_v1  ;;  %2108 = vmatpush.msrb.mxu1 %v2063_v35  ;;  %v1671_v35 = vrot.slane %v4600_v8, 2  ;;  %v2059_v8 = vld [vmem:[%s5401_s3 + $0xaa8] sm:$0xff] }
 0x138   : > { %v1396_v15 = vpop.f32.mrf.mxu2  ;;  %v1229_v17 = vpop.f32.mrf.mxu3 }
 0x139   : > { %v4719_v19 = vadd.f32 %v1396_v15, %v1355_v51  ;;  %v1230_v2 = vadd.f32 %v1229_v17, %v4559_v58  ;;  %v1358_v47 = vpop.f32.mrf.mxu1  ;;  %v2077_v51 = vld [vmem:[%s5401_s3 + $0xb38] sm:$0xff]  ;;  %v2259_v58 = vld [vmem:[%s5401_s3 + $0xc70] sm:$0xff]  ;;  %2109 = vmatpush.msrb.mxu1 %v2062_v26 }
 0x13a   : > { %2151 = vmatpush.msrb.mxu2 %v2077_v51  ;;  %2294 = vmatpush.msra.mxu0 %v2259_v58  ;;  %v2061_v17 = vld [vmem:[%s5401_s3 + $0xab8] sm:$0xff]  ;;  %v2099_v51 = vld [vmem:[%s5401_s3 + $0xbe8] sm:$0xff] }
 0x13b   : > { %v1273_v52 = vpop.f32.mrf.mxu0  ;;  %v1271_v11 = vadd.f32 %v1270_v48, %v1230_v2  ;;  %v2075_v2 = vld [vmem:[%s5401_s3 + $0xb28] sm:$0xff]  ;;  %2110 = vmatpush.msrb.mxu1 %v2061_v17  ;;  %v2256_v58 = vld [vmem:[%s5401_s3 + $0xc58] sm:$0xff]  ;;  %v2255_v17 = vld [vmem:[%s5401_s3 + $0xc50] sm:$0xff] }
 0x13c   : > { %1827 = vmatmul.f32.gmra.mxu1 %v3974_v50  ;;  %2152 = vmatpush.msrb.mxu2 %v2076_v16 }
 0x13d   : > { %1924 = vmatmul.f32.gmra.mxu2 %v3349_v61  ;;  %1757 = vmatmul.f32.gmra.mxu3 %v3968_v14  ;;  %v2101_v61 = vld [vmem:[%s5401_s3 + $0xbf8] sm:$0xff]  ;;  %v4746_v48 = vadd.f32 %v1271_v11, %v1003_v24  ;;  %v1667_v24 = vrot.slane %v4442_v4, 2  ;;  %v1670_v11 = vrot.slane %v4330_v40, 2 }
 0x13e   : > { %1798 = vmatmul.f32.gmra.mxu0 %v4145_v57  ;;  %2184 = vmatpush.msra.mxu3 %v2101_v61 }
 0x13f   : > { %2295 = vmatpush.msra.mxu0 %v2258_v30  ;;  %2153 = vmatpush.msrb.mxu2 %v2075_v2 }
 0x140   : > { %v1399_v42 = vpop.f32.mrf.mxu2  ;;  %v1232_v9 = vpop.f32.mrf.mxu3  ;;  %2111 = vmatpush.msrb.mxu1 %v2060_v54 }
 0x141   : > { %v4751_v18 = vadd.f32 %v1399_v42, %v1358_v47  ;;  %v1233_v38 = vadd.f32 %v1232_v9, %v4591_v36  ;;  %v1361_v1 = vpop.f32.mrf.mxu1  ;;  %v2100_v36 = vld [vmem:[%s5401_s3 + $0xbf0] sm:$0xff]  ;;  %2296 = vmatpush.msra.mxu0 %v2257_v31  ;;  %v4800_v9 = vsel %vm1014_vm1, %v1670_v11, %v1671_v35  ;;  %v2057_v31 = vld [vmem:[%s5401_s3 + $0xa98] sm:$0xff] }
 0x142   : > { %2185 = vmatpush.msra.mxu3 %v2100_v36  ;;  %2112 = vmatpush.msrb.mxu1 %v2059_v8  ;;  %v2254_v36 = vld [vmem:[%s5401_s3 + $0xc48] sm:$0xff] }
 0x143   : > { %v1276_v10 = vpop.f32.mrf.mxu0  ;;  %v1274_v15 = vadd.f32 %v1273_v52, %v1233_v38  ;;  %v1666_v52 = vrot.slane %v4327_v41, 2  ;;  %2297 = vmatpush.msra.mxu0 %v2256_v58  ;;  %v1009_v38 = vadd.f32 %v4594_v44, %v4491_v53  ;;  %v2058_v53 = vld [vmem:[%s5401_s3 + $0xaa0] sm:$0xff]  ;;  %v2072_v44 = vld [vmem:[%s5401_s3 + $0xb10] sm:$0xff]  ;;  %v2055_v8 = vld [vmem:[%s5401_s3 + $0xa88] sm:$0xff] }
 0x144   : > { %1830 = vmatmul.f32.gmra.mxu1 %v4017_v56  ;;  %2186 = vmatpush.msra.mxu3 %v2099_v51  ;;  %v2071_v51 = vld [vmem:[%s5401_s3 + $0xb08] sm:$0xff] }
 0x145   : > { %1927 = vmatmul.f32.gmra.mxu2 %v3078_v43  ;;  %1760 = vmatmul.f32.gmra.mxu3 %v4011_v3  ;;  %v2074_v43 = vld [vmem:[%s5401_s3 + $0xb20] sm:$0xff]  ;;  %v4778_v47 = vadd.f32 %v1274_v15, %v1006_v39  ;;  %v4797_v42 = vsel %vm1014_vm1, %v1666_v52, %v1667_v24  ;;  %v5509_v15 = vld [vmem:[#allocation4_spill] sm:$0xff] }
 0x146   : > { %1801 = vmatmul.f32.gmra.mxu0 %v4191_v25  ;;  %2154 = vmatpush.msrb.mxu2 %v2074_v43  ;;  %v2098_v39 = vld [vmem:[%s5401_s3 + $0xbe0] sm:$0xff]  ;;  %v2056_v24 = vld [vmem:[%s5401_s3 + $0xa90] sm:$0xff] }
 0x147   : > { %2187 = vmatpush.msra.mxu3 %v2098_v39  ;;  %2298 = vmatpush.msra.mxu0 %v2255_v17 }
 0x148   : > { %v1402_v26 = vpop.f32.mrf.mxu2  ;;  %v1235_v16 = vpop.f32.mrf.mxu3  ;;  %2113 = vmatpush.msrb.mxu1 %v2058_v53 }
 0x149   : > { %v4790_v61 = vadd.f32 %v1402_v26, %v1361_v1  ;;  %v1236_v40 = vadd.f32 %v1235_v16, %v4638_v37  ;;  %v1364_v4 = vpop.f32.mrf.mxu1  ;;  %v2073_v37 = vld [vmem:[%s5401_s3 + $0xb18] sm:$0xff]  ;;  %2299 = vmatpush.msra.mxu0 %v2254_v36  ;;  %v1012_v26 = vadd.f32 %v4641_v46, %v4532_v29  ;;  %v2070_v29 = vld [vmem:[%s5401_s3 + $0xb00] sm:$0xff]  ;;  %v2251_v36 = vld [vmem:[%s5401_s3 + $0xc30] sm:$0xff] }
 0x14a   : > { %2155 = vmatpush.msrb.mxu2 %v2073_v37  ;;  %2114 = vmatpush.msrb.mxu1 %v2057_v31  ;;  %v2797_v46 = vld [vmem:[%s3066_s16 + $0x20] sm:$0xff]  ;;  %v5511_v31 = vld [vmem:[#allocation31_spill] sm:$0xff] }
 0x14b   : > { %v1279_v30 = vpop.f32.mrf.mxu0  ;;  %v1277_v1 = vadd.f32 %v1276_v10, %v1236_v40  ;;  %v2097_v10 = vld [vmem:[%s5401_s3 + $0xbd8] sm:$0xff]  ;;  %v2253_v40 = vld [vmem:[%s5401_s3 + $0xc40] sm:$0xff] }
 0x14c   : > { %1833 = vmatmul.f32.gmra.mxu1 %v4062_v62  ;;  %2156 = vmatpush.msrb.mxu2 %v2072_v44 }
 0x14d   : > { %1930 = vmatmul.f32.gmra.mxu2 %v5509_v15  ;;  %1763 = vmatmul.f32.gmra.mxu3 %v4797_v42  ;;  %v4826_v2 = vadd.f32 %v1277_v1, %v1009_v38  ;;  %v2054_v1 = vld [vmem:[%s5401_s3 + $0xa80] sm:$0xff] }
 0x14e   : > { %1804 = vmatmul.f32.gmra.mxu0 %v4800_v9  ;;  %2188 = vmatpush.msra.mxu3 %v2097_v10  ;;  %v2094_v10 = vld [vmem:[%s5401_s3 + $0xbc0] sm:$0xff] }
 0x14f   : > { %2157 = vmatpush.msrb.mxu2 %v2071_v51  ;;  %2115 = vmatpush.msrb.mxu1 %v2056_v24 }
 0x150   : > { %v1405_v54 = vpop.f32.mrf.mxu2  ;;  %v1238_v43 = vpop.f32.mrf.mxu3  ;;  %2300 = vmatpush.msra.mxu0 %v2253_v40  ;;  %v2249_v40 = vld [vmem:[%s5401_s3 + $0xc20] sm:$0xff] }
 0x151   : > { %v4834_v52 = vadd.f32 %v1405_v54, %v1364_v4  ;;  %v1239_v11 = vadd.f32 %v1238_v43, %v4681_v7  ;;  %v1367_v35 = vpop.f32.mrf.mxu1  ;;  %v2096_v7 = vld [vmem:[%s5401_s3 + $0xbd0] sm:$0xff]  ;;  %v5510_v4 = vld [vmem:[#allocation30_spill] sm:$0xff]  ;;  %2116 = vmatpush.msrb.mxu1 %v2055_v8  ;;  %2158 = vmatpush.msrb.mxu2 %v2070_v29  ;;  %v2250_v43 = vld [vmem:[%s5401_s3 + $0xc28] sm:$0xff] }
 0x152   : > { %2189 = vmatpush.msra.mxu3 %v2096_v7  ;;  %v2798_v54 = vld [vmem:[%s3066_s16 + $0x30] sm:$0xff]  ;;  %v2799_v29 = vld [vmem:[%s3066_s16 + $0x40] sm:$0xff] }
 0x153   : > { %v4843_v58 = vpop.f32.mrf.mxu0  ;;  %v1280_v16 = vadd.f32 %v1279_v30, %v1239_v11  ;;  %v2095_v30 = vld [vmem:[%s5401_s3 + $0xbc8] sm:$0xff]  ;;  %2117 = vmatpush.msrb.mxu1 %v2054_v1  ;;  %v2092_v7 = vld [vmem:[%s5401_s3 + $0xbb0] sm:$0xff]  ;;  %v2248_v1 = vld [vmem:[%s5401_s3 + $0xc18] sm:$0xff] }
 0x154   : > { %1836 = vmatmul.f32.gmra.mxu1 %v5510_v4  ;;  %2190 = vmatpush.msra.mxu3 %v2095_v30  ;;  %v5512_v8 = vld [vmem:[#allocation32_spill] sm:$0xff]  ;;  %v1675_v30 = vrot.slane %v4597_v33, 2 }
 0x155   : > { %1933 = vmatmul.f32.gmra.mxu2 %v3262_v6  ;;  %1962 = vmatmul.f32.vlgmr.msrb.gmra.mxu3 %v2797_v46  ;;  %v2252_v6 = vld [vmem:[%s5401_s3 + $0xc38] sm:$0xff]  ;;  %v4869_v38 = vadd.f32 %v1280_v16, %v1012_v26  ;;  %v1674_v46 = vrot.slane %v4483_v59, 2 }
 0x156   : > { %2003 = vmatmul.f32.vlgmr.msrb.gmra.mxu0 %v3280_v13  ;;  %2191 = vmatpush.msra.mxu3 %v2094_v10 }
 0x157   : > { %2301 = vmatpush.msra.mxu0 %v2252_v6  ;;  %v443_v6 = vld [vmem:[%s3018_s11 + $0x90] sm:$0xff] }
 0x158   : > { %v1408_v37 = vpop.f32.mrf.mxu2  ;;  %v1437_v39 = vpop.f32.mrf.mxu3 }
 0x159   : > { %v4874_v13 = vadd.f32 %v1408_v37, %v1367_v35  ;;  %v1438_v15 = vadd.f32 %v1437_v39, %v4719_v19  ;;  %v1370_v17 = vpop.f32.mrf.mxu1  ;;  %v4893_v19 = vld [vmem:[%s5401_s3 + $0xd78] sm:$0xff]  ;;  %2302 = vmatpush.msra.mxu0 %v2251_v36  ;;  %v4950_v37 = vld [vmem:[%s5401_s3 + $0xcf0] sm:$0xff] }
 0x15a   : > { %2375 = vmatpush.msra.mxu2 %v4893_v19 }
 0x15b   : > { %v4877_v53 = vpop.f32.mrf.mxu0  ;;  %v4880_v44 = vadd.f32 %v1438_v15, %v4585_v60  ;;  %v2093_v60 = vld [vmem:[%s5401_s3 + $0xbb8] sm:$0xff]  ;;  %2303 = vmatpush.msra.mxu0 %v2250_v43 }
 0x15c   : > { %1839 = vmatmul.f32.gmra.mxu1 %v5511_v31  ;;  %2192 = vmatpush.msra.mxu3 %v2093_v60 }
 0x15d   : > { %1936 = vmatmul.f32.gmra.mxu2 %v3358_v12  ;;  %1965 = vmatmul.f32.gmra.mxu3 %v2798_v54  ;;  %v4906_v12 = vld [vmem:[%s5401_s3 + $0xd70] sm:$0xff]  ;;  %v4966_v54 = vsel %vm1014_vm1, %v1674_v46, %v1675_v30 }
 0x15e   : > { %2006 = vmatmul.f32.gmra.mxu0 %v3376_v28  ;;  %2376 = vmatpush.msra.mxu2 %v4906_v12  ;;  %v2088_v46 = vld [vmem:[%s5401_s3 + $0xb90] sm:$0xff] }
 0x15f   : > { %2193 = vmatpush.msra.mxu3 %v2092_v7  ;;  %2304 = vmatpush.msra.mxu0 %v2249_v40  ;;  %v2246_v7 = vld [vmem:[%s5401_s3 + $0xc08] sm:$0xff]  ;;  %v5004_v40 = vld [vmem:[%s5401_s3 + $0xce0] sm:$0xff] }
 0x160   : > { %v1411_v24 = vpop.f32.mrf.mxu2  ;;  %v1440_v11 = vpop.f32.mrf.mxu3 }
 0x161   : > { %v4909_v28 = vadd.f32 %v1411_v24, %v1370_v17  ;;  %v1441_v35 = vadd.f32 %v1440_v11, %v4751_v18  ;;  %v1373_v51 = vpop.f32.mrf.mxu1  ;;  %v4929_v18 = vld [vmem:[%s5401_s3 + $0xcf8] sm:$0xff]  ;;  %v4962_v17 = vmul.f32 %v5491_v49, %v443_v6  ;;  %2305 = vmatpush.msra.mxu0 %v2248_v1  ;;  %v2090_v24 = vld [vmem:[%s5401_s3 + $0xba0] sm:$0xff]  ;;  %v4986_v11 = vld [vmem:[%s5401_s3 + $0xce8] sm:$0xff] }
 0x162   : > { %2717 = vmatpush.msra.mxu1 %v4929_v18 }
 0x163   : > { %v4913_v26 = vpop.f32.mrf.mxu0  ;;  %v4916_v16 = vadd.f32 %v1441_v35, %v4630_v23  ;;  %v4934_v23 = vld [vmem:[%s5401_s3 + $0xd68] sm:$0xff]  ;;  %v2800_v35 = vld [vmem:[%s3066_s16 + $0x50] sm:$0xff] }
 0x164   : > { %1842 = vmatmul.f32.gmra.mxu1 %v5512_v8  ;;  %2377 = vmatpush.msra.mxu2 %v4934_v23 }
 0x165   : > { %1939 = vmatmul.f32.gmra.mxu2 %v4327_v41  ;;  %1968 = vmatmul.f32.gmra.mxu3 %v2799_v29  ;;  %v2091_v41 = vld [vmem:[%s5401_s3 + $0xba8] sm:$0xff]  ;;  %v5009_v29 = vld [vmem:[%s5401_s3 + $0xd50] sm:$0xff] }
 0x166   : > { %2009 = vmatmul.f32.gmra.mxu0 %v3450_v45  ;;  %v4955_v45 = vld [vmem:[%s5401_s3 + $0xd60] sm:$0xff]  ;;  %2194 = vmatpush.msra.mxu3 %v2091_v41 }
 0x167   : > { %2718 = vmatpush.msra.mxu1 %v4950_v37  ;;  %2378 = vmatpush.msra.mxu2 %v4955_v45 }
 0x168   : > { %v1414_v33 = vpop.f32.mrf.mxu2  ;;  %v1443_v15 = vpop.f32.mrf.mxu3  ;;  %2195 = vmatpush.msra.mxu3 %v2090_v24  ;;  %v5514_v24 = vld [vmem:[#allocation9_spill] sm:$0xff] }
 0x169   : > { %v4959_v39 = vadd.f32 %v1414_v33, %v1373_v51  ;;  %v1444_v10 = vadd.f32 %v1443_v15, %v4790_v61  ;;  %v1376_v36 = vpop.f32.mrf.mxu1  ;;  %v2247_v61 = vld [vmem:[%s5401_s3 + $0xc10] sm:$0xff]  ;;  %v2089_v51 = vld [vmem:[%s5401_s3 + $0xb98] sm:$0xff]  ;;  %2719 = vmatpush.msra.mxu1 %v4986_v11 }
 0x16a   : > { %2306 = vmatpush.msra.mxu0 %v2247_v61  ;;  %2196 = vmatpush.msra.mxu3 %v2089_v51  ;;  %v5037_v61 = vld [vmem:[%s5401_s3 + $0xd48] sm:$0xff]  ;;  %v5515_v51 = vld [vmem:[#allocation20_spill] sm:$0xff] }
 0x16b   : > { %v4970_v60 = vpop.f32.mrf.mxu0  ;;  %v4973_v43 = vadd.f32 %v1444_v10, %v4673_v21  ;;  %v4991_v21 = vld [vmem:[%s5401_s3 + $0xd58] sm:$0xff]  ;;  %2720 = vmatpush.msra.mxu1 %v5004_v40  ;;  %v2245_v10 = vld [vmem:[%s5401_s3 + $0xc00] sm:$0xff] }
 0x16c   : > { %1845 = vmatmul.f32.gmra.mxu1 %v4966_v54  ;;  %2379 = vmatpush.msra.mxu2 %v4991_v21 }
 0x16d   : > { %1942 = vmatmul.f32.gmra.mxu2 %v4962_v17  ;;  %1971 = vmatmul.f32.gmra.mxu3 %v2800_v35  ;;  %v2801_v35 = vld [vmem:[%s3066_s16 + $0x60] sm:$0xff] }
 0x16e   : > { %2012 = vmatmul.f32.gmra.mxu0 %v3520_v34  ;;  %2380 = vmatpush.msra.mxu2 %v5009_v29 }
 0x16f   : > { %2307 = vmatpush.msra.mxu0 %v2246_v7  ;;  %2197 = vmatpush.msra.mxu3 %v2088_v46  ;;  %v5047_v7 = vld [vmem:[%s5401_s3 + $0xcd0] sm:$0xff]  ;;  %v2086_v46 = vld [vmem:[%s5401_s3 + $0xb80] sm:$0xff] }
 0x170   : > { %v1417_v34 = vpop.f32.mrf.mxu2  ;;  %v1446_v6 = vpop.f32.mrf.mxu3  ;;  %2381 = vmatpush.msra.mxu2 %v5037_v61 }
 0x171   : > { %v5016_v30 = vadd.f32 %v1417_v34, %v1376_v36  ;;  %v1447_v41 = vadd.f32 %v1446_v6, %v4834_v52  ;;  %v1593_v1 = vpop.f32.mrf.mxu1  ;;  %v2272_v36 = vld [vmem:[%s5401_s3 + $0xcd8] sm:$0xff]  ;;  %v5513_v52 = vld [vmem:[#allocation8_spill] sm:$0xff]  ;;  %2308 = vmatpush.msra.mxu0 %v2245_v10  ;;  %v5056_v6 = vld [vmem:[%s5401_s3 + $0xd40] sm:$0xff] }
 0x172   : > { %v1594_v34 = vadd.f32 %v1593_v1, %v4843_v58  ;;  %2721 = vmatpush.msra.mxu1 %v2272_v36  ;;  %2382 = vmatpush.msra.mxu2 %v5056_v6 }
 0x173   : > { %v5021_v33 = vpop.f32.mrf.mxu0  ;;  %v5024_v15 = vadd.f32 %v1447_v41, %v4711_v27  ;;  %v2087_v27 = vld [vmem:[%s5401_s3 + $0xb88] sm:$0xff]  ;;  %2334 = vmatpush.msrb.mxu0 %v4929_v18 }
 0x174   : > { %2118 = vmatmul.f32.vlgmr.msrb.gmra.mxu1 %v5513_v52  ;;  %2198 = vmatpush.msra.mxu3 %v2087_v27  ;;  %v2270_v18 = vld [vmem:[%s5401_s3 + $0xcc8] sm:$0xff]  ;;  %v5075_v27 = vld [vmem:[%s5401_s3 + $0xd38] sm:$0xff] }
 0x175   : > { %2159 = vmatmul.f32.vlgmr.msrb.gmra.mxu2 %v5514_v24  ;;  %1974 = vmatmul.f32.gmra.mxu3 %v2801_v35 }
 0x176   : > { %2015 = vmatmul.f32.gmra.mxu0 %v5515_v51  ;;  %2722 = vmatpush.msra.mxu1 %v5047_v7  ;;  %v2802_v51 = vld [vmem:[%s3066_s16 + $0x70] sm:$0xff] }
 0x177   : > { %2199 = vmatpush.msra.mxu3 %v2086_v46  ;;  %2335 = vmatpush.msrb.mxu0 %v4950_v37  ;;  %v5517_v37 = vld [vmem:[#allocation14_spill] sm:$0xff] }
 0x178   : > { %v1634_v41 = vpop.f32.mrf.mxu2  ;;  %v1449_v52 = vpop.f32.mrf.mxu3  ;;  %2723 = vmatpush.msra.mxu1 %v2270_v18  ;;  %2383 = vmatpush.msra.mxu2 %v5075_v27  ;;  %v2269_v46 = vld [vmem:[%s5401_s3 + $0xcc0] sm:$0xff] }
 0x179   : > { %v1635_v24 = vadd.f32 %v1634_v41, %v1594_v34  ;;  %v1450_v58 = vadd.f32 %v1449_v52, %v4874_v13  ;;  %v1596_v1 = vpop.f32.mrf.mxu1  ;;  %2733 = vmatpush.msrb.mxu3 %v4893_v19  ;;  %v5518_v34 = vld [vmem:[#allocation23_spill] sm:$0xff]  ;;  %2336 = vmatpush.msrb.mxu0 %v4986_v11 }
 0x17a   : > { %v1597_v19 = vadd.f32 %v1596_v1, %v4877_v53  ;;  %2724 = vmatpush.msra.mxu1 %v2269_v46  ;;  %v5112_v1 = vld [vmem:[%s5401_s3 + $0xd28] sm:$0xff] }
 0x17b   : > { %v5064_v10 = vadd.f32 %v1635_v24, %v4880_v44  ;;  %v5066_v35 = vpop.f32.mrf.mxu0  ;;  %v5079_v13 = vadd.f32 %v1450_v58, %v4746_v48  ;;  %v5516_v44 = vld [vmem:[#allocation12_spill] sm:$0xff]  ;;  %2734 = vmatpush.msrb.mxu3 %v4906_v12  ;;  %2337 = vmatpush.msrb.mxu0 %v5004_v40  ;;  %v2268_v12 = vld [vmem:[%s5401_s3 + $0xcb8] sm:$0xff]  ;;  %v2803_v40 = vld [vmem:[%s3066_s16 + $0x80] sm:$0xff] }
 0x17c   : > { %2121 = vmatmul.f32.gmra.mxu1 %v5516_v44  ;;  %v5092_v48 = vld [vmem:[%s5401_s3 + $0xd30] sm:$0xff] }
 0x17d   : > { %2162 = vmatmul.f32.gmra.mxu2 %v5517_v37  ;;  %1977 = vmatmul.f32.gmra.mxu3 %v2802_v51  ;;  %v2267_v37 = vld [vmem:[%s5401_s3 + $0xcb0] sm:$0xff] }
 0x17e   : > { %2018 = vmatmul.f32.gmra.mxu0 %v5518_v34  ;;  %2384 = vmatpush.msra.mxu2 %v5092_v48  ;;  %v504_v51 = vld [vmem:[%s3086_s20 + $0x90] sm:$0xff] }
 0x17f   : > { %2735 = vmatpush.msrb.mxu3 %v4934_v23  ;;  %2338 = vmatpush.msrb.mxu0 %v2272_v36  ;;  %v5520_v23 = vld [vmem:[#allocation16_spill] sm:$0xff] }
 0x180   : > { %v1637_v41 = vpop.f32.mrf.mxu2  ;;  %v1452_v52 = vpop.f32.mrf.mxu3  ;;  %2725 = vmatpush.msra.mxu1 %v2268_v12  ;;  %2385 = vmatpush.msra.mxu2 %v5112_v1 }
 0x181   : > { %v1638_v24 = vadd.f32 %v1637_v41, %v1597_v19  ;;  %v1453_v58 = vadd.f32 %v1452_v52, %v4909_v28  ;;  %v1599_v44 = vpop.f32.mrf.mxu1  ;;  %2339 = vmatpush.msrb.mxu0 %v5047_v7  ;;  %2736 = vmatpush.msrb.mxu3 %v4955_v45  ;;  %v5149_v45 = vld [vmem:[%s3066_s16 + $0x90] sm:$0xff] }
 0x182   : > { %v1600_v36 = vadd.f32 %v1599_v44, %v4913_v26  ;;  %2726 = vmatpush.msra.mxu1 %v2267_v37  ;;  %v2266_v26 = vld [vmem:[%s5401_s3 + $0xca8] sm:$0xff] }
 0x183   : > { %v5102_v53 = vadd.f32 %v1638_v24, %v4916_v16  ;;  %v5104_v11 = vpop.f32.mrf.mxu0  ;;  %v5115_v28 = vadd.f32 %v1453_v58, %v4778_v47  ;;  %v5519_v16 = vld [vmem:[#allocation3_spill] sm:$0xff]  ;;  %v5128_v47 = vld [vmem:[%s5401_s3 + $0xd20] sm:$0xff]  ;;  %v5137_v24 = vmul.f32 %v3131_v0, %v504_v51  ;;  %2340 = vmatpush.msrb.mxu0 %v2270_v18  ;;  %2737 = vmatpush.msrb.mxu3 %v4991_v21 }
 0x184   : > { %2124 = vmatmul.f32.gmra.mxu1 %v5519_v16  ;;  %2386 = vmatpush.msra.mxu2 %v5128_v47  ;;  %v5521_v21 = vld [vmem:[#allocation6_spill] sm:$0xff]  ;;  %v2264_v16 = vld [vmem:[%s5401_s3 + $0xc98] sm:$0xff] }
 0x185   : > { %2165 = vmatmul.f32.gmra.mxu2 %v5520_v23  ;;  %1980 = vmatmul.f32.gmra.mxu3 %v2803_v40  ;;  %v5522_v18 = vld [vmem:[#allocation18_spill] sm:$0xff]  ;;  %v2263_v40 = vld [vmem:[%s5401_s3 + $0xc90] sm:$0xff] }
 0x186   : > { %2021 = vmatmul.f32.gmra.mxu0 %v4483_v59  ;;  %2727 = vmatpush.msra.mxu1 %v2266_v26 }
 0x187   : > { %2341 = vmatpush.msrb.mxu0 %v2269_v46  ;;  %2738 = vmatpush.msrb.mxu3 %v5009_v29 }
 0x188   : > { %v1640_v34 = vpop.f32.mrf.mxu2  ;;  %v1455_v59 = vpop.f32.mrf.mxu3 }
 0x189   : > { %v1641_v19 = vadd.f32 %v1640_v34, %v1600_v36  ;;  %v1456_v41 = vadd.f32 %v1455_v59, %v4959_v39  ;;  %v1602_v52 = vpop.f32.mrf.mxu1  ;;  %v5154_v39 = vld [vmem:[%s5401_s3 + $0xd18] sm:$0xff]  ;;  %2342 = vmatpush.msrb.mxu0 %v2268_v12  ;;  %2739 = vmatpush.msrb.mxu3 %v5037_v61  ;;  %v2277_v12 = vld [vmem:[%s5401_s3 + $0xd00] sm:$0xff] }
 0x18a   : > { %2387 = vmatpush.msra.mxu2 %v5154_v39  ;;  %v1603_v23 = vadd.f32 %v1602_v52, %v4970_v60  ;;  %v2278_v60 = vld [vmem:[%s5401_s3 + $0xd08] sm:$0xff]  ;;  %v5523_v61 = vld [vmem:[#allocation10_spill] sm:$0xff] }
 0x18b   : > { %v5144_v58 = vadd.f32 %v1641_v19, %v4973_v43  ;;  %v5146_v7 = vpop.f32.mrf.mxu0  ;;  %v5157_v44 = vadd.f32 %v1456_v41, %v4826_v2  ;;  %v2265_v43 = vld [vmem:[%s5401_s3 + $0xca0] sm:$0xff]  ;;  %v5170_v2 = vld [vmem:[%s5401_s3 + $0xd10] sm:$0xff]  ;;  %2343 = vmatpush.msrb.mxu0 %v2267_v37  ;;  %2740 = vmatpush.msrb.mxu3 %v5056_v6  ;;  %v5525_v37 = vld [vmem:[#allocation11_spill] sm:$0xff] }
 0x18c   : > { %2127 = vmatmul.f32.gmra.mxu1 %v5521_v21  ;;  %2388 = vmatpush.msra.mxu2 %v5170_v2  ;;  %v5526_v52 = vld [vmem:[#allocation26_spill] sm:$0xff] }
 0x18d   : > { %2168 = vmatmul.f32.gmra.mxu2 %v5522_v18  ;;  %1983 = vmatmul.f32.gmra.mxu3 %v5149_v45 }
 0x18e   : > { %2024 = vmatmul.f32.gmra.mxu0 %v5137_v24  ;;  %2728 = vmatpush.msra.mxu1 %v2265_v43 }
 0x18f   : > { %2389 = vmatpush.msra.mxu2 %v2278_v60  ;;  %2344 = vmatpush.msrb.mxu0 %v2266_v26 }
 0x190   : > { %v1643_v46 = vpop.f32.mrf.mxu2  ;;  %v1458_v36 = vpop.f32.mrf.mxu3  ;;  %2729 = vmatpush.msra.mxu1 %v2264_v16  ;;  %2741 = vmatpush.msrb.mxu3 %v5075_v27  ;;  %v5528_v27 = vld [vmem:[#allocation24_spill] sm:$0xff] }
 0x191   : > { %v1644_v51 = vadd.f32 %v1643_v46, %v1603_v23  ;;  %v1459_v34 = vadd.f32 %v1458_v36, %v5016_v30  ;;  %v1605_v59 = vpop.f32.mrf.mxu1  ;;  %v2262_v30 = vld [vmem:[%s5401_s3 + $0xc88] sm:$0xff]  ;;  %2390 = vmatpush.msra.mxu2 %v2277_v12  ;;  %2345 = vmatpush.msrb.mxu0 %v2265_v43 }
 0x192   : > { %2730 = vmatpush.msra.mxu1 %v2263_v40  ;;  %v1606_v21 = vadd.f32 %v1605_v59, %v5021_v33  ;;  %2742 = vmatpush.msrb.mxu3 %v5092_v48  ;;  %v5527_v33 = vld [vmem:[#allocation13_spill] sm:$0xff]  ;;  %v5529_v43 = vld [vmem:[#allocation15_spill] sm:$0xff] }
 0x193   : > { %v5187_v19 = vadd.f32 %v1644_v51, %v5024_v15  ;;  %v1784_v41 = vpop.f32.mrf.mxu0  ;;  %v5190_v29 = vadd.f32 %v1459_v34, %v4869_v38  ;;  %v5524_v15 = vld [vmem:[#allocation21_spill] sm:$0xff]  ;;  %v2261_v38 = vld [vmem:[%s5401_s3 + $0xc80] sm:$0xff]  ;;  %2346 = vmatpush.msrb.mxu0 %v2264_v16  ;;  %v5530_v34 = vld [vmem:[#allocation27_spill] sm:$0xff] }
 0x194   : > { %2130 = vmatmul.f32.gmra.mxu1 %v5523_v61  ;;  %2743 = vmatpush.msrb.mxu3 %v5112_v1  ;;  %v444_v48 = vld [vmem:[%s3018_s11 + $0x98] sm:$0x3]  ;;  %s2692_s11 = sshll.u32 %s3002_s13, 3 }
 0x195   : > { %2171 = vmatmul.f32.gmra.mxu2 %v5524_v15  ;;  %2200 = vmatmul.f32.vlgmr.msra.gmra.mxu3 %v5525_v37  ;;  %v5222_v61 = vmul.f32 %v5491_v49, %v444_v48  ;;  %v2038_v49 = vrot.slane %v4962_v17, 1 }
 0x196   : > { %2309 = vmatmul.f32.vlgmr.msra.gmra.mxu0 %v5526_v52  ;;  %2731 = vmatpush.msra.mxu1 %v2262_v30  ;;  %v5229_v52 = vld [vmem:[%s3066_s16 + $0x98] sm:$0x3]  ;;  %s2693_s16 = sshll.u32 %s5549_s22, 6 }
 0x197   : > { %2347 = vmatpush.msrb.mxu0 %v2263_v40  ;;  %2744 = vmatpush.msrb.mxu3 %v5128_v47  ;;  %v5531_v47 = vld [vmem:[#allocation2_spill] sm:$0xff] }
 0x198   : > { %v1646_v18 = vpop.f32.mrf.mxu2  ;;  %v1743_v26 = vpop.f32.mrf.mxu3  ;;  %2732 = vmatpush.msra.mxu1 %v2261_v38 }
 0x199   : > { %v1647_v6 = vadd.f32 %v1646_v18, %v1606_v21  ;;  %v1785_v23 = vadd.f32 %v1784_v41, %v1743_v26  ;;  %v1608_v46 = vpop.f32.mrf.mxu1  ;;  %2348 = vmatpush.msrb.mxu0 %v2262_v30  ;;  %2745 = vmatpush.msrb.mxu3 %v5154_v39  ;;  %v2044_v39 = vrot.slane %v5149_v45, 1  ;;  %v5532_v30 = vld [vmem:[#allocation17_spill] sm:$0xff] }
 0x19a   : > { %v1609_v59 = vadd.f32 %v1608_v46, %v5066_v35 }
 0x19b   : > { %v5210_v36 = vadd.f32 %v1647_v6, %v5079_v13  ;;  %v1787_v51 = vpop.f32.mrf.mxu0  ;;  %2349 = vmatpush.msrb.mxu0 %v2261_v38  ;;  %2746 = vmatpush.msrb.mxu3 %v5170_v2 }
 0x19c   : > { %2133 = vmatmul.f32.gmra.mxu1 %v5527_v33  ;;  %v5533_v33 = vld [vmem:[#allocation19_spill] sm:$0xff] }
 0x19d   : > { %2174 = vmatmul.f32.gmra.mxu2 %v5528_v27  ;;  %2203 = vmatmul.f32.gmra.mxu3 %v5529_v43 }
 0x19e   : > { %2312 = vmatmul.f32.gmra.mxu0 %v5530_v34  ;;  %2747 = vmatpush.msrb.mxu3 %v2278_v60 }
 0x1a0   : > { %v1649_v13 = vpop.f32.mrf.mxu2  ;;  %v1746_v41 = vpop.f32.mrf.mxu3  ;;  %2748 = vmatpush.msrb.mxu3 %v2277_v12 }
 0x1a1   : > { %v1650_v16 = vadd.f32 %v1649_v13, %v1609_v59  ;;  %v1788_v1 = vadd.f32 %v1787_v51, %v1746_v41  ;;  %v1611_v40 = vpop.f32.mrf.mxu1 }
 0x1a2   : > { %v1612_v35 = vadd.f32 %v1611_v40, %v5104_v11  ;;  %v2045_v11 = vrot.slane %v5229_v52, 1 }
 0x1a3   : > { %v5225_v15 = vadd.f32 %v1650_v16, %v5115_v28  ;;  %v1790_v37 = vpop.f32.mrf.mxu0  ;;  %v2039_v28 = vrot.slane %v5222_v61, 1 }
 0x1a4   : > { %2136 = vmatmul.f32.gmra.mxu1 %v5531_v47  ;;  %v2046_v26 = vsel %vm591_vm0, %v2044_v39, %v2045_v11 }
 0x1a5   : > { %2177 = vmatmul.f32.gmra.mxu2 %v4644_v20  ;;  %2206 = vmatmul.f32.gmra.mxu3 %v5532_v30  ;;  %v2040_v20 = vsel %vm591_vm0, %v2038_v49, %v2039_v28  ;;  %v2234_v49 = vrot.slane %v5222_v61, 2 }
 0x1a6   : > { %2315 = vmatmul.f32.gmra.mxu0 %v3897_v32 }
 0x1a8   : > { %v1652_v38 = vpop.f32.mrf.mxu2  ;;  %v1749_v2 = vpop.f32.mrf.mxu3 }
 0x1a9   : > { %v1653_v21 = vadd.f32 %v1652_v38, %v1612_v35  ;;  %v1791_v18 = vadd.f32 %v1790_v37, %v1749_v2  ;;  %v1614_v6 = vpop.f32.mrf.mxu1 }
 0x1aa   : > { %v1615_v32 = vadd.f32 %v1614_v6, %v5146_v7  ;;  %v5534_v7 = vld [vmem:[#allocation22_spill] sm:$0xff] }
 0x1ab   : > { %v5243_v46 = vadd.f32 %v1653_v21, %v5157_v44  ;;  %v1793_v51 = vpop.f32.mrf.mxu0 }
 0x1ac   : > { %2139 = vmatmul.f32.gmra.mxu1 %v2040_v20 }
 0x1ad   : > { %2180 = vmatmul.f32.gmra.mxu2 %v2046_v26  ;;  %2209 = vmatmul.f32.gmra.mxu3 %v5533_v33  ;;  %v5536_v26 = vld [vmem:[#allocation28_spill] sm:$0xff] }
 0x1ae   : > { %2318 = vmatmul.f32.gmra.mxu0 %v3928_v22 }
 0x1b0   : > { %v1655_v60 = vpop.f32.mrf.mxu2  ;;  %v1752_v27 = vpop.f32.mrf.mxu3 }
 0x1b1   : > { %v1656_v12 = vadd.f32 %v1655_v60, %v1615_v32  ;;  %v1794_v43 = vadd.f32 %v1793_v51, %v1752_v27  ;;  %v1825_v34 = vpop.f32.mrf.mxu1 }
 0x1b2   : > { %v1826_v44 = vadd.f32 %v1825_v34, %v1785_v23 }
 0x1b3   : > { %v5249_v59 = vadd.f32 %v1656_v12, %v5190_v29  ;;  %v1796_v48 = vpop.f32.mrf.mxu0 }
 0x1b4   : > { %v5252_v13 = vadd.f32 %v1826_v44, %v5064_v10  ;;  %2356 = vmatmul.f32.vlgmr.msra.gmra.mxu1 %v4059_v5  ;;  %v5535_v5 = vld [vmem:[#allocation25_spill] sm:$0xff] }
 0x1b5   : > { %2391 = vmatmul.f32.vlgmr.msra.gmra.mxu2 %v3974_v50  ;;  %2212 = vmatmul.f32.gmra.mxu3 %v5534_v7  ;;  %v505_v10 = vld [vmem:[%s3086_s20 + $0x98] sm:$0x3]  ;;  %s408_s20 = sadd.s32 %s2693_s16, %s2692_s11 }
 0x1b6   : > { %2321 = vmatmul.f32.gmra.mxu0 %v3968_v14  ;;  %s2694_s21 = sshll.u32 %s408_s20, 3 }
 0x1b7   : > { %s5335_s17 = scalar_lea.vmem %s5403_s5, %s2694_s21 }
 0x1b8   : > { %v1922_v22 = vpop.f32.mrf.mxu2  ;;  %v1755_v16 = vpop.f32.mrf.mxu3 }
 0x1b9   : > { %v1797_v41 = vadd.f32 %v1796_v48, %v1755_v16  ;;  %v1828_v40 = vpop.f32.mrf.mxu1 }
 0x1ba   : > { %v1829_v35 = vadd.f32 %v1828_v40, %v1788_v1  ;;  %v526_v1 = vmul.f32 %v3131_v0, %v505_v10 }
 0x1bb   : > { %v1799_v29 = vpop.f32.mrf.mxu0 }
 0x1bc   : > { %v5259_v23 = vadd.f32 %v1829_v35, %v5102_v53  ;;  %2359 = vmatmul.f32.gmra.mxu1 %v4102_v63  ;;  %v2233_v63 = vrot.slane %v4962_v17, 2  ;;  %v2242_v32 = vrot.slane %v526_v1, 2 }
 0x1bd   : > { %2394 = vmatmul.f32.gmra.mxu2 %v4017_v56  ;;  %2215 = vmatmul.f32.gmra.mxu3 %v5535_v5  ;;  %v2051_v56 = vrot.slane %v526_v1, 1 }
 0x1be   : > { %2324 = vmatmul.f32.gmra.mxu0 %v4011_v3  ;;  %v2050_v3 = vrot.slane %v5137_v24, 1 }
 0x1c0   : > { %v1925_v50 = vpop.f32.mrf.mxu2  ;;  %v1758_v14 = vpop.f32.mrf.mxu3 }
 0x1c1   : > { %v1800_v37 = vadd.f32 %v1799_v29, %v1758_v14  ;;  %v1831_v47 = vpop.f32.mrf.mxu1 }
 0x1c2   : > { %v1832_v30 = vadd.f32 %v1831_v47, %v1791_v18 }
 0x1c3   : > { %v1802_v39 = vpop.f32.mrf.mxu0 }
 0x1c4   : > { %v5268_v53 = vadd.f32 %v1832_v30, %v5144_v58  ;;  %2362 = vmatmul.f32.gmra.mxu1 %v4145_v57  ;;  %v2052_v57 = vsel %vm591_vm0, %v2050_v3, %v2051_v56 }
 0x1c5   : > { %2397 = vmatmul.f32.gmra.mxu2 %v4062_v62  ;;  %2218 = vmatmul.f32.gmra.mxu3 %v4647_v55  ;;  %v2235_v62 = vsel %vm1014_vm1, %v2233_v63, %v2234_v49 }
 0x1c6   : > { %2327 = vmatmul.f32.gmra.mxu0 %v4797_v42 }
 0x1c8   : > { %v1928_v28 = vpop.f32.mrf.mxu2  ;;  %v1761_v0 = vpop.f32.mrf.mxu3 }
 0x1c9   : > { %v1803_v11 = vadd.f32 %v1802_v39, %v1761_v0  ;;  %v1834_v58 = vpop.f32.mrf.mxu1 }
 0x1ca   : > { %v1835_v21 = vadd.f32 %v1834_v58, %v1794_v43 }
 0x1cb   : > { %v1805_v38 = vpop.f32.mrf.mxu0 }
 0x1cc   : > { %v1852_v55 = vadd.f32 %v1835_v21, %v5187_v19  ;;  %2365 = vmatmul.f32.gmra.mxu1 %v4191_v25  ;;  %v2237_v19 = vrot.slane %v5149_v45, 2  ;;  %v2238_v25 = vrot.slane %v5229_v52, 2 }
 0x1cd   : > { %2400 = vmatmul.f32.gmra.mxu2 %v5510_v4  ;;  %2221 = vmatmul.f32.gmra.mxu3 %v2052_v57  ;;  %v2241_v4 = vrot.slane %v5137_v24, 2 }
 0x1ce   : > { %2330 = vmatmul.f32.gmra.mxu0 %v2235_v62 }
 0x1d0   : > { %v1931_v42 = vpop.f32.mrf.mxu2  ;;  %v1764_v17 = vpop.f32.mrf.mxu3 }
 0x1d1   : > { %v1806_v61 = vadd.f32 %v1805_v38, %v1764_v17  ;;  %v1837_v2 = vpop.f32.mrf.mxu1 }
 0x1d2   : > { %v1838_v18 = vadd.f32 %v1837_v2, %v1797_v41 }
 0x1d3   : > { %v2004_v6 = vpop.f32.mrf.mxu0 }
 0x1d4   : > { %v1853_v20 = vadd.f32 %v1838_v18, %v5210_v36  ;;  %2368 = vmatmul.f32.gmra.mxu1 %v4800_v9  ;;  %v2239_v36 = vsel %vm1014_vm1, %v2237_v19, %v2238_v25 }
 0x1d5   : > { %2403 = vmatmul.f32.gmra.mxu2 %v5511_v31  ;;  %2409 = vmatmul.f32.vlgmr.msrb.gmra.mxu3 %v4966_v54  ;;  %v2243_v31 = vsel %vm1014_vm1, %v2241_v4, %v2242_v32  ;;  %v5537_v54 = vld [vmem:[#allocation29_spill] sm:$0xff] }
 0x1d6   : > { %2350 = vmatmul.f32.vlgmr.msrb.gmra.mxu0 %v5536_v26 }
 0x1d8   : > { %v1934_v51 = vpop.f32.mrf.mxu2  ;;  %v1963_v33 = vpop.f32.mrf.mxu3 }
 0x1d9   : > { %v1964_v60 = vadd.f32 %v1963_v33, %v1922_v22  ;;  %v1840_v12 = vpop.f32.mrf.mxu1 }
 0x1da   : > { %v1841_v9 = vadd.f32 %v1840_v12, %v1800_v37 }
 0x1db   : > { %v2007_v27 = vpop.f32.mrf.mxu0  ;;  %v2005_v45 = vadd.f32 %v2004_v6, %v1964_v60 }
 0x1dc   : > { %v1854_v43 = vadd.f32 %v1841_v9, %v5225_v15  ;;  %2371 = vmatmul.f32.gmra.mxu1 %v2239_v36 }
 0x1dd   : > { %2406 = vmatmul.f32.gmra.mxu2 %v5512_v8  ;;  %2412 = vmatmul.f32.gmra.mxu3 %v2243_v31  ;;  %v2028_v24 = vadd.f32 %v2005_v45, %v5252_v13 }
 0x1de   : > { %2353 = vmatmul.f32.gmra.mxu0 %v5537_v54 }
 0x1e0   : > { %v1937_v52 = vpop.f32.mrf.mxu2  ;;  %v1966_v34 = vpop.f32.mrf.mxu3 }
 0x1e1   : > { %v1967_v48 = vadd.f32 %v1966_v34, %v1925_v50  ;;  %v1843_v44 = vpop.f32.mrf.mxu1 }
 0x1e2   : > { %v1844_v7 = vadd.f32 %v1843_v44, %v1803_v11 }
 0x1e3   : > { %v2010_v22 = vpop.f32.mrf.mxu0  ;;  %v2008_v16 = vadd.f32 %v2007_v27, %v1967_v48 }
 0x1e4   : > { %v1855_v41 = vadd.f32 %v1844_v7, %v5243_v46 }
 0x1e5   : > { %v2029_v40 = vadd.f32 %v2008_v16, %v5259_v23 }
 0x1e8   : > { %v1940_v15 = vpop.f32.mrf.mxu2  ;;  %v1969_v29 = vpop.f32.mrf.mxu3 }
 0x1e9   : > { %v1970_v35 = vadd.f32 %v1969_v29, %v1928_v28  ;;  %v1846_v8 = vpop.f32.mrf.mxu1 }
 0x1ea   : > { %v1847_v5 = vadd.f32 %v1846_v8, %v1806_v61 }
 0x1eb   : > { %v2013_v10 = vpop.f32.mrf.mxu0  ;;  %v2011_v14 = vadd.f32 %v2010_v22, %v1970_v35 }
 0x1ec   : > { %v1856_v13 = vadd.f32 %v1847_v5, %v5249_v59 }
 0x1ed   : > { %v5300_v37 = vadd.f32 %v2011_v14, %v5268_v53 }
 0x1f0   : > { %v1943_v50 = vpop.f32.mrf.mxu2  ;;  %v1972_v47 = vpop.f32.mrf.mxu3 }
 0x1f1   : > { %v1973_v39 = vadd.f32 %v1972_v47, %v1931_v42  ;;  %v2119_v30 = vpop.f32.mrf.mxu1 }
 0x1f3   : > { %v2016_v1 = vpop.f32.mrf.mxu0  ;;  %v2014_v46 = vadd.f32 %v2013_v10, %v1973_v39 }
 0x1f5   : > { %v5302_v3 = vadd.f32 %v2014_v46, %v1852_v55 }
 0x1f8   : > { %v2160_v23 = vpop.f32.mrf.mxu2  ;;  %v1975_v56 = vpop.f32.mrf.mxu3 }
 0x1f9   : > { %v2161_v63 = vadd.f32 %v2160_v23, %v2119_v30  ;;  %v1976_v49 = vadd.f32 %v1975_v56, %v1934_v51  ;;  %v2122_v28 = vpop.f32.mrf.mxu1 }
 0x1fb   : > { %v2019_v0 = vpop.f32.mrf.mxu0  ;;  %v2017_v11 = vadd.f32 %v2016_v1, %v1976_v49  ;;  %v5330_v49 = vld [vmem:[%s5402_s4] ss:$0 sm:$0xff] }
 0x1fd   : > { %v5304_v58 = vadd.f32 %v2017_v11, %v1853_v20 }
 0x200   : > { %v2163_v59 = vpop.f32.mrf.mxu2  ;;  %v1978_v53 = vpop.f32.mrf.mxu3 }
 0x201   : > { %v2164_v38 = vadd.f32 %v2163_v59, %v2122_v28  ;;  %v1979_v21 = vadd.f32 %v1978_v53, %v1937_v52  ;;  %v2125_v57 = vpop.f32.mrf.mxu1 }
 0x203   : > { %v2022_v62 = vpop.f32.mrf.mxu0  ;;  %v2020_v42 = vadd.f32 %v2019_v0, %v1979_v21 }
 0x205   : > { %v5306_v17 = vadd.f32 %v2020_v42, %v1854_v43 }
 0x208   : > { %v2166_v55 = vpop.f32.mrf.mxu2  ;;  %v1981_v61 = vpop.f32.mrf.mxu3 }
 0x209   : > { %v1982_v2 = vadd.f32 %v1981_v61, %v1940_v15  ;;  %v2128_v18 = vpop.f32.mrf.mxu1  ;;  %v2167_v47 = vadd.f32 %v2166_v55, %v2125_v57 }
 0x20b   : > { %v2025_v6 = vpop.f32.mrf.mxu0  ;;  %v2023_v19 = vadd.f32 %v2022_v62, %v1982_v2 }
 0x20d   : > { %v5308_v26 = vadd.f32 %v2023_v19, %v1855_v41 }
 0x210   : > { %v2169_v25 = vpop.f32.mrf.mxu2  ;;  %v1984_v20 = vpop.f32.mrf.mxu3 }
 0x211   : > { %v1985_v4 = vadd.f32 %v1984_v20, %v1943_v50  ;;  %v2131_v32 = vpop.f32.mrf.mxu1  ;;  %v2170_v0 = vadd.f32 %v2169_v25, %v2128_v18 }
 0x213   : > { %v2310_v51 = vpop.f32.mrf.mxu0  ;;  %v2026_v33 = vadd.f32 %v2025_v6, %v1985_v4 }
 0x215   : > { %v5310_v60 = vadd.f32 %v2026_v33, %v1856_v13 }
 0x218   : > { %v2172_v12 = vpop.f32.mrf.mxu2  ;;  %v2201_v36 = vpop.f32.mrf.mxu3 }
 0x219   : > { %v2202_v9 = vadd.f32 %v2201_v36, %v2161_v63  ;;  %v5312_v27 = vpop.f32.mrf.mxu1  ;;  %v2173_v55 = vadd.f32 %v2172_v12, %v2131_v32 }
 0x21b   : > { %v5314_v31 = vpop.f32.mrf.mxu0  ;;  %v2225_v45 = vadd.f32 %v2202_v9, %v2028_v24 }
 0x220   : > { %v5316_v43 = vpop.f32.mrf.mxu2  ;;  %v2204_v54 = vpop.f32.mrf.mxu3 }
 0x221   : > { %v2205_v52 = vadd.f32 %v2204_v54, %v2164_v38  ;;  %v2137_v34 = vpop.f32.mrf.mxu1 }
 0x223   : > { %v2316_v48 = vpop.f32.mrf.mxu0  ;;  %v5318_v44 = vadd.f32 %v2205_v52, %v2029_v40 }
 0x228   : > { %v2178_v7 = vpop.f32.mrf.mxu2  ;;  %v2207_v22 = vpop.f32.mrf.mxu3 }
 0x229   : > { %v5320_v16 = vpop.f32.mrf.mxu1  ;;  %v2208_v30 = vadd.f32 %v2207_v22, %v2167_v47  ;;  %v2179_v6 = vadd.f32 %v2178_v7, %v2137_v34  ;;  %v2176_v7 = vadd.f32 %v5316_v43, %v5312_v27 }
 0x22b   : > { %v2319_v41 = vpop.f32.mrf.mxu0  ;;  %v2227_v23 = vadd.f32 %v2208_v30, %v5300_v37 }
 0x230   : > { %v2181_v15 = vpop.f32.mrf.mxu2  ;;  %v2210_v29 = vpop.f32.mrf.mxu3 }
 0x231   : > { %v2357_v35 = vpop.f32.mrf.mxu1  ;;  %v2211_v53 = vadd.f32 %v2210_v29, %v2170_v0 }
 0x232   : > { %v2358_v1 = vadd.f32 %v2357_v35, %v2316_v48 }
 0x233   : > { %v2322_v8 = vpop.f32.mrf.mxu0  ;;  %v2228_v57 = vadd.f32 %v2211_v53, %v5302_v3 }
 0x238   : > { %v2392_v24 = vpop.f32.mrf.mxu2  ;;  %v2213_v5 = vpop.f32.mrf.mxu3 }
 0x239   : > { %v2360_v10 = vpop.f32.mrf.mxu1  ;;  %v2214_v25 = vadd.f32 %v2213_v5, %v2173_v55 }
 0x23a   : > { %v2361_v38 = vadd.f32 %v2360_v10, %v2319_v41 }
 0x23b   : > { %v5322_v14 = vpop.f32.mrf.mxu0  ;;  %v2229_v32 = vadd.f32 %v2214_v25, %v5304_v58 }
 0x240   : > { %v2395_v13 = vpop.f32.mrf.mxu2  ;;  %v2216_v50 = vpop.f32.mrf.mxu3 }
 0x241   : > { %v2363_v40 = vpop.f32.mrf.mxu1  ;;  %v2217_v35 = vadd.f32 %v2216_v50, %v2176_v7 }
 0x242   : > { %v2364_v36 = vadd.f32 %v2363_v40, %v2322_v8 }
 0x243   : > { %v2328_v39 = vpop.f32.mrf.mxu0 }
 0x248   : > { %v2398_v46 = vpop.f32.mrf.mxu2  ;;  %v2219_v56 = vpop.f32.mrf.mxu3 }
 0x249   : > { %v2399_v63 = vadd.f32 %v2398_v46, %v2358_v1  ;;  %v2366_v28 = vpop.f32.mrf.mxu1  ;;  %v2220_v4 = vadd.f32 %v2219_v56, %v2179_v6 }
 0x24a   : > { %v2367_v40 = vadd.f32 %v2366_v28, %v5322_v14 }
 0x24b   : > { %v2418_v11 = vadd.f32 %v2399_v63, %v2227_v23  ;;  %v2331_v59 = vpop.f32.mrf.mxu0  ;;  %v2231_v34 = vadd.f32 %v2220_v4, %v5308_v26 }
 0x24d   : > { %v5338_v37 = vadd.f32 %v5330_v49, %v2418_v11 }
 0x24f   : > { %2438 = vst [vmem:[%s5335_s17 + $0x10] sm:$0xff] %v5338_v37 }
 0x250   : > { %v2401_v21 = vpop.f32.mrf.mxu2  ;;  %v2222_v62 = vpop.f32.mrf.mxu3 }
 0x251   : > { %v2402_v42 = vadd.f32 %v2401_v21, %v2361_v38  ;;  %v2369_v18 = vpop.f32.mrf.mxu1 }
 0x252   : > { %v2370_v3 = vadd.f32 %v2369_v18, %v2328_v39 }
 0x253   : > { %v2419_v61 = vadd.f32 %v2402_v42, %v2228_v57  ;;  %v2351_v2 = vpop.f32.mrf.mxu0 }
 0x254   : > { %v2352_v19 = vadd.f32 %v2351_v2, %v2310_v51 }
 0x255   : > { %v5344_v20 = vadd.f32 %v5330_v49, %v2419_v61 }
 0x256   : > { %v2393_v33 = vadd.f32 %v2392_v24, %v2352_v19 }
 0x257   : > { %2439 = vst [vmem:[%s5335_s17 + $0x18] sm:$0xff] %v5344_v20 }
 0x258   : > { %v2416_v9 = vadd.f32 %v2393_v33, %v2225_v45  ;;  %v2404_v54 = vpop.f32.mrf.mxu2  ;;  %v2410_v52 = vpop.f32.mrf.mxu3  ;;  %v2182_v45 = vadd.f32 %v2181_v15, %v5320_v16 }
 0x259   : > { %v2405_v12 = vadd.f32 %v2404_v54, %v2364_v36  ;;  %v2411_v48 = vadd.f32 %v2410_v52, %v2370_v3  ;;  %v2372_v26 = vpop.f32.mrf.mxu1 }
 0x25a   : > { %v2428_v51 = vadd.f32 %v5330_v49, %v2416_v9  ;;  %v2223_v24 = vadd.f32 %v2222_v62, %v2182_v45  ;;  %v2373_v43 = vadd.f32 %v2372_v26, %v2331_v59 }
 0x25b   : > { %v2420_v22 = vadd.f32 %v2405_v12, %v2229_v32  ;;  %v2354_v41 = vpop.f32.mrf.mxu0  ;;  %v2422_v29 = vadd.f32 %v2411_v48, %v2231_v34 }
 0x25c   : > { %2436 = vst [vmem:[%s5335_s17] sm:$0xff] %v2428_v51  ;;  %v2355_v58 = vadd.f32 %v2354_v41, %v5314_v31  ;;  %v2230_v31 = vadd.f32 %v2217_v35, %v5306_v17  ;;  %v2232_v47 = vadd.f32 %v2223_v24, %v5310_v60 }
 0x25d   : > { %v2432_v8 = vadd.f32 %v5330_v49, %v2420_v22  ;;  %v2434_v5 = vadd.f32 %v5330_v49, %v2422_v29 }
 0x25e   : > { %v2396_v10 = vadd.f32 %v2395_v13, %v2355_v58 }
 0x25f   : > { %2440 = vst [vmem:[%s5335_s17 + $0x20] sm:$0xff] %v2432_v8 }
 0x260   : > { %2442 = vst [vmem:[%s5335_s17 + $0x30] sm:$0xff] %v2434_v5  ;;  %v2417_v27 = vadd.f32 %v2396_v10, %v5318_v44  ;;  %v2407_v16 = vpop.f32.mrf.mxu2  ;;  %v2413_v50 = vpop.f32.mrf.mxu3 }
 0x261   : > { %v2408_v15 = vadd.f32 %v2407_v16, %v2367_v40  ;;  %v2414_v13 = vadd.f32 %v2413_v50, %v2373_v43 }
 0x262   : > { %v2429_v39 = vadd.f32 %v5330_v49, %v2417_v27 }
 0x263   : > { %v2421_v30 = vadd.f32 %v2408_v15, %v2230_v31  ;;  %v2423_v1 = vadd.f32 %v2414_v13, %v2232_v47 }
 0x264   : > { %2437 = vst [vmem:[%s5335_s17 + $0x8] sm:$0xff] %v2429_v39  ;;  %v2444_v14 = vadd.f32 %v2429_v39, %v2428_v51 }
 0x265   : > { %v2433_v44 = vadd.f32 %v5330_v49, %v2421_v30  ;;  %v2435_v23 = vadd.f32 %v5330_v49, %v2423_v1 }
 0x266   : > { %v2445_v46 = vadd.f32 %v2444_v14, %v5338_v37 }
 0x267   : > { %2441 = vst [vmem:[%s5335_s17 + $0x28] sm:$0xff] %v2433_v44 }
 0x268   : > { %v2446_v17 = vadd.f32 %v2445_v46, %v5344_v20  ;;  %2443 = vst [vmem:[%s5335_s17 + $0x38] sm:$0xff] %v2435_v23 }
 0x26a   : > { %v2447_v60 = vadd.f32 %v2446_v17, %v2432_v8 }
 0x26c   : > { %v2448_v56 = vadd.f32 %v2447_v60, %v2433_v44 }
 0x26e   : > { %v2449_v63 = vadd.f32 %v2448_v56, %v2434_v5 }
 0x270   : > { %v2450_v28 = vadd.f32 %v2449_v63, %v2435_v23 }
 0x272   : > { %v2451_v0 = vrot.slane %v2450_v28, 4 }
 0x274   : > { %v2452_v11 = vadd.f32 %v2451_v0, %v2450_v28 }
 0x276   : > { %v2453_v59 = vrot.slane %v2452_v11, 2 }
 0x278   : > { %v2454_v53 = vadd.f32 %v2453_v59, %v2452_v11 }
 0x27a   : > { %v2455_v38 = vrot.slane %v2454_v53, 1 }
 0x27c   : > { %v2456_v49 = vadd.f32 %v2455_v38, %v2454_v53 }
 0x27e   : > { %v2457_v21 = vmul.f32 0.015625, %v2456_v49  ;;  %2466 = vst [vmem:[%s5377_s15] sm:$0x1] %v2456_v49 }
 0x280   : > { %v2458_v57 = vsub.f32 %v2428_v51, %v2457_v21  ;;  %v2459_v62 = vsub.f32 %v2429_v39, %v2457_v21  ;;  %v2460_v42 = vsub.f32 %v5338_v37, %v2457_v21  ;;  %v2461_v55 = vsub.f32 %v5344_v20, %v2457_v21 }
 0x281   : > { %v2462_v61 = vsub.f32 %v2432_v8, %v2457_v21  ;;  %v2463_v2 = vsub.f32 %v2433_v44, %v2457_v21  ;;  %v2464_v18 = vsub.f32 %v2434_v5, %v2457_v21  ;;  %v2465_v6 = vsub.f32 %v2435_v23, %v2457_v21 }
 0x282   : > { %v2467_v19 = vmul.f32 %v2458_v57, %v2458_v57  ;;  %v2468_v25 = vmul.f32 %v2459_v62, %v2459_v62  ;;  %v2469_v4 = vmul.f32 %v2460_v42, %v2460_v42  ;;  %v2470_v36 = vmul.f32 %v2461_v55, %v2461_v55 }
 0x283   : > { %v2471_v3 = vmul.f32 %v2462_v61, %v2462_v61  ;;  %v2472_v32 = vmul.f32 %v2463_v2, %v2463_v2  ;;  %v2473_v52 = vmul.f32 %v2464_v18, %v2464_v18  ;;  %v2474_v37 = vmul.f32 %v2465_v6, %v2465_v6 }
 0x284   : > { %v2475_v33 = vadd.f32 %v2468_v25, %v2467_v19 }
 0x286   : > { %v2476_v9 = vadd.f32 %v2475_v33, %v2469_v4 }
 0x288   : > { %v2477_v54 = vadd.f32 %v2476_v9, %v2470_v36 }
 0x28a   : > { %v2478_v12 = vadd.f32 %v2477_v54, %v2471_v3 }
 0x28c   : > { %v2479_v34 = vadd.f32 %v2478_v12, %v2472_v32 }
 0x28e   : > { %v2480_v51 = vadd.f32 %v2479_v34, %v2473_v52 }
 0x290   : > { %v2481_v20 = vadd.f32 %v2480_v51, %v2474_v37 }
 0x292   : > { %v2482_v48 = vrot.slane %v2481_v20, 4 }
 0x294   : > { %v2483_v7 = vadd.f32 %v2482_v48, %v2481_v20 }
 0x296   : > { %v2484_v22 = vrot.slane %v2483_v7, 2 }
 0x298   : > { %v2485_v41 = vadd.f32 %v2484_v22, %v2483_v7 }
 0x29a   : > { %v2486_v45 = vrot.slane %v2485_v41, 1 }
 0x29c   : > { %v2487_v29 = vadd.f32 %v2486_v45, %v2485_v41 }
 0x29e   : > { %2488 = vst [vmem:[%s5377_s15 + $0x1] sm:$0x1] %v2487_v29 }
 0x29f PF: > { %s17_s25 = sadd.s32 1, %s2842_s25   ;;  %s5538_s21 = smov %s2834_s23 }
 0x2a0   : > { %p14_p11 = scmp.ge.s32.totalorder %s17_s25, 18   ;;  %s5539_s22 = smov %s2838_s24 }
 0x2a1   : > { %s5540_s23 = smov %s5543_s26  ;;  %s5541_s24 = smov %s5547_s27 }
 0x2a2   :  { %16 = sbr.rel (!%p14_p11) target bundleno = 3 (0x3), region = 88 }

</bundles_post_ra>
